<compile_context>
chip_gen: v7x
topology: tpu7x:2x2x1
jax: 0.10.0
libtpu: 0.0.40
codegen_flags: <defaults>
</compile_context>

<pallas_src>
import functools

import jax
import jax.numpy as jnp
from jax.experimental import pallas as pl
from jax.experimental.pallas import tpu as pltpu

D_IN = 784
D_OUT = 10
D_OUT_PAD = 128  # lane-dense padded output width (unmasked vst, MXU-aligned N)


def _mlp_kernel(x_ref, w1_ref, b1_ref, w2_ref, b2_ref, w3_ref, b3_ref,
                w4_ref, b4_ref, o_ref):
    """One batch tile of the fused MLP.

    Matmuls run on the MXU in bf16 with f32 accumulation; bias-add / ReLU stay
    in f32 on the VPU (also correct on v5e, which has no bf16 VPU path).  The
    input cast f32->bf16 happens here (VPU, hidden under MXU work) rather than
    in the wrapper, saving a separate XLA pass over x in HBM.
    """
    x = x_ref[...].astype(jnp.bfloat16)
    h = jnp.dot(x, w1_ref[...], preferred_element_type=jnp.float32)
    h = jnp.maximum(h + b1_ref[...], 0.0).astype(jnp.bfloat16)
    h = jnp.dot(h, w2_ref[...], preferred_element_type=jnp.float32)
    h = jnp.maximum(h + b2_ref[...], 0.0).astype(jnp.bfloat16)
    h = jnp.dot(h, w3_ref[...], preferred_element_type=jnp.float32)
    h = jnp.maximum(h + b3_ref[...], 0.0).astype(jnp.bfloat16)
    h = jnp.dot(h, w4_ref[...], preferred_element_type=jnp.float32)
    o_ref[...] = (h + b4_ref[...]).astype(o_ref.dtype)


def prepare_params(params):
    """One-time re-layout OUTSIDE the per-call hot path.

    - Transpose PyTorch-style (out_features, in_features) weights to (in, out).
    - Cast weights to bf16 (MXU-native); keep biases in f32.
    - Zero-pad the last layer (W4, b4) from 10 -> 128 output columns so the
      kernel's output tile is lane-dense.

    # NOTE: D_IN=784 is not lane-aligned (6*128+16); padding W1/x to 896 would
    # make layer-1 K-loads unmasked but re-introduces a wrapper pad pass over
    # x, so it is intentionally skipped (the kernel is MXU-bound anyway).
    # TODO(synk): on v7x, W1/W2 could be stored in fp8 for ~2x MXU throughput
    # on ~80% of the FLOPs, at the cost of extra quantization error.
    """
    def w_t(name):
        return jnp.asarray(params[name]).T.astype(jnp.bfloat16)

    def b_row(name):
        return jnp.asarray(params[name]).astype(jnp.float32)[None, :]

    w1, w2, w3, w4 = (w_t("fc1.weight"), w_t("fc2.weight"),
                      w_t("fc3.weight"), w_t("fc4.weight"))
    b1, b2, b3, b4 = (b_row("fc1.bias"), b_row("fc2.bias"),
                      b_row("fc3.bias"), b_row("fc4.bias"))
    w4 = jnp.pad(w4, ((0, 0), (0, D_OUT_PAD - D_OUT)))
    b4 = jnp.pad(b4, ((0, 0), (0, D_OUT_PAD - D_OUT)))
    return (w1, b1, w2, b2, w3, b3, w4, b4)


def _choose_tile_b(B, tile_b):
    """Static batch-tile choice (trace-time Python on static shapes).

    - Multiple of 16 (bf16 LHS packs two rows per sublane after the in-kernel
      cast), capped at tile_b and at the 16-rounded batch.
    - Prefer the largest tile whose zero-padding waste (Bp - B)/B stays under
      ~10%; otherwise pick the tile with least waste (larger wins ties).
    """
    b16 = ((B + 15) // 16) * 16
    cap = max(16, (min(tile_b, b16) // 16) * 16)

    def waste(t):
        bp = ((B + t - 1) // t) * t
        return (bp - B) / B

    cands = list(range(cap, 15, -16))
    for t in cands:  # descending: prefer the biggest acceptable tile
        if waste(t) <= 0.10:
            return t
    return min(cands, key=lambda t: (waste(t), -t))


@functools.partial(jax.jit, static_argnames=("tile_b",))
def mlp_forward(x, prepared, tile_b=512):
    """x: [B, 784] float32.  prepared: output of prepare_params()."""
    w1, b1, w2, b2, w3, b3, w4, b4 = prepared
    B, d_in = x.shape
    assert d_in == D_IN

    # The grid tile is NOT the MXU M dimension (the compiler sub-tiles to
    # 128/256 internally), so we do not cap it per-generation; a bigger tile
    # simply amortizes the ~0.35us per-grid-step overhead and the 4 per-layer
    # MXU drain/refill bubbles.
    tb = _choose_tile_b(B, tile_b)
    Bp = ((B + tb - 1) // tb) * tb
    xp = x if Bp == B else jnp.pad(x, ((0, Bp - B), (0, 0)))

    grid = (Bp // tb,)

    # Weights/biases are grid-invariant (index_map always (0, 0)) so they are
    # DMA'd into VMEM once and stay resident across all batch tiles.
    # Buffered(1) drops the dead second copy of ~5.8 MiB of bf16 weights —
    # matters most on v7x's 64 MiB VMEM.
    def resident(arr):
        return pl.BlockSpec(arr.shape, lambda i: (0, 0),
                            pipeline_mode=pl.Buffered(1))

    # Size the VMEM request from actual use (weights single-buffered, x/out
    # double-buffered, activation scratch for the widest layers) plus headroom,
    # clamped to [32 MiB, 56 MiB] so it stays safe on v7x (64 MiB physical).
    weight_bytes = sum(int(a.size) * a.dtype.itemsize
                       for a in (w1, b1, w2, b2, w3, b3, w4, b4))
    act_bytes = tb * (2048 + 512 + 512) * 6      # f32 accum + bf16 copy per hidden
    io_bytes = 2 * tb * (D_IN * 4 + D_OUT_PAD * 4)
    vmem_bytes = int(1.5 * (weight_bytes + act_bytes + io_bytes))
    vmem_bytes = min(56 << 20, max(32 << 20, vmem_bytes))

    out = pl.pallas_call(
        _mlp_kernel,
        out_shape=jax.ShapeDtypeStruct((Bp, D_OUT_PAD), jnp.float32),
        grid_spec=pltpu.PrefetchScalarGridSpec(
            num_scalar_prefetch=0,
            grid=grid,
            in_specs=[
                pl.BlockSpec((tb, D_IN), lambda i: (i, 0)),  # x batch tile (f32)
                resident(w1), resident(b1),
                resident(w2), resident(b2),
                resident(w3), resident(b3),
                resident(w4), resident(b4),
            ],
            out_specs=pl.BlockSpec((tb, D_OUT_PAD), lambda i: (i, 0)),
        ),
        compiler_params=pltpu.CompilerParams(
            # Batch axis is embarrassingly parallel -> megacore / v7x 2-TC
            # sharding whenever the grid has >= 2 steps.
            dimension_semantics=("parallel",),
            vmem_limit_bytes=vmem_bytes,
        ),
    )(xp, w1, b1, w2, b2, w3, b3, w4, b4)

    # Drop batch padding and the lane-padding of the final layer.
    return out[:B, :D_OUT]


def init_params(key):
    """Deterministic PyTorch-style init: U(-1/sqrt(fan_in), 1/sqrt(fan_in))."""
    # TODO(synk): the original load_param() reads .npy files from disk; this
    # script uses deterministic random params of the same shapes instead.
    dims = [(2048, 784), (512, 2048), (512, 512), (10, 512)]
    names = ["fc1", "fc2", "fc3", "fc4"]
    params = {}
    for name, (out_f, in_f) in zip(names, dims):
        key, kw, kb = jax.random.split(key, 3)
        bound = 1.0 / jnp.sqrt(in_f)
        params[f"{name}.weight"] = jax.random.uniform(
            kw, (out_f, in_f), jnp.float32, -bound, bound)
        params[f"{name}.bias"] = jax.random.uniform(
            kb, (out_f,), jnp.float32, -bound, bound)
    return params


def reference_forward(x, params):
    """Pure-f32 reference matching the PyTorch module semantics."""
    h = jax.nn.relu(x @ params["fc1.weight"].T + params["fc1.bias"])
    h = jax.nn.relu(h @ params["fc2.weight"].T + params["fc2.bias"])
    h = jax.nn.relu(h @ params["fc3.weight"].T + params["fc3.bias"])
    return h @ params["fc4.weight"].T + params["fc4.bias"]


def reference_forward_bf16(x, params):
    """Precision-matched reference: bf16 matmul operands, f32 accumulation."""
    def lin(h, name):
        w = params[f"{name}.weight"].T.astype(jnp.bfloat16)
        return jnp.dot(h.astype(jnp.bfloat16), w,
                       preferred_element_type=jnp.float32) + params[f"{name}.bias"]
    h = jax.nn.relu(lin(x, "fc1"))
    h = jax.nn.relu(lin(h, "fc2"))
    h = jax.nn.relu(lin(h, "fc3"))
    return lin(h, "fc4")


if __name__ == "__main__":
    key = jax.random.PRNGKey(0)
    key, kx = jax.random.split(key)
    batch = 2
    x = jax.random.normal(kx, (batch, D_IN), jnp.float32)
    params = init_params(key)
    prepared = prepare_params(params)  # one-time re-layout, outside hot path

    out = mlp_forward(x, prepared)
    out = jax.block_until_ready(out)
    assert out.shape == (batch, D_OUT)

    # Tight check vs. a precision-matched (bf16 operands, f32 accum) reference.
    ref_matched = reference_forward_bf16(x, params)
    assert jnp.allclose(out, ref_matched, atol=2e-3, rtol=2e-3)
    # Loose check vs. the pure-f32 PyTorch-equivalent reference
    # (difference is bf16 weight/activation quantization only).
    ref_f32 = reference_forward(x, params)
    assert jnp.allclose(out, ref_f32, atol=5e-2, rtol=5e-2)

    print("KERNEL_OK")
</pallas_src>

<mosaic_0001>
module attributes {stable_mosaic.version = 11 : i64} {
  func.func @_mlp_kernel(%arg0: i32, %arg1: memref<16x784xf32, #tpu.memory_space<vmem>>, %arg2: memref<784x2048xbf16, #tpu.memory_space<vmem>>, %arg3: memref<1x2048xf32, #tpu.memory_space<vmem>>, %arg4: memref<2048x512xbf16, #tpu.memory_space<vmem>>, %arg5: memref<1x512xf32, #tpu.memory_space<vmem>>, %arg6: memref<512x512xbf16, #tpu.memory_space<vmem>>, %arg7: memref<1x512xf32, #tpu.memory_space<vmem>>, %arg8: memref<512x128xbf16, #tpu.memory_space<vmem>>, %arg9: memref<1x128xf32, #tpu.memory_space<vmem>>, %arg10: memref<16x128xf32, #tpu.memory_space<vmem>>) attributes {dimension_semantics = [#tpu.dimension_semantics<parallel>], iteration_bounds = array<i64: 1>, scalar_prefetch = 0 : i64, scratch_operands = 0 : i64, tpu.core_type = #tpu.core_type<tc>, window_params = [{transform_indices = @transform_0, window_bounds = array<i64: 16, 784>}, {pipeline_mode = #tpu.pipeline_mode<synchronous>, transform_indices = @transform_1, window_bounds = array<i64: 784, 2048>}, {pipeline_mode = #tpu.pipeline_mode<synchronous>, transform_indices = @transform_2, window_bounds = array<i64: 1, 2048>}, {pipeline_mode = #tpu.pipeline_mode<synchronous>, transform_indices = @transform_3, window_bounds = array<i64: 2048, 512>}, {pipeline_mode = #tpu.pipeline_mode<synchronous>, transform_indices = @transform_4, window_bounds = array<i64: 1, 512>}, {pipeline_mode = #tpu.pipeline_mode<synchronous>, transform_indices = @transform_5, window_bounds = array<i64: 512, 512>}, {pipeline_mode = #tpu.pipeline_mode<synchronous>, transform_indices = @transform_6, window_bounds = array<i64: 1, 512>}, {pipeline_mode = #tpu.pipeline_mode<synchronous>, transform_indices = @transform_7, window_bounds = array<i64: 512, 128>}, {pipeline_mode = #tpu.pipeline_mode<synchronous>, transform_indices = @transform_8, window_bounds = array<i64: 1, 128>}, {transform_indices = @transform_9, window_bounds = array<i64: 16, 128>}]} {
    %c0 = arith.constant 0 : index
    %c0_0 = arith.constant 0 : index
    %0 = vector.load %arg1[%c0, %c0_0] : memref<16x784xf32, #tpu.memory_space<vmem>>, vector<16x784xf32>
    %1 = arith.truncf %0 : vector<16x784xf32> to vector<16x784xbf16>
    %c0_1 = arith.constant 0 : index
    %c0_2 = arith.constant 0 : index
    %2 = vector.load %arg2[%c0_1, %c0_2] : memref<784x2048xbf16, #tpu.memory_space<vmem>>, vector<784x2048xbf16>
    %cst = arith.constant dense<0.000000e+00> : vector<16x2048xf32>
    %3 = tpu.matmul %1, %2, %cst {dimension_numbers = #tpu.dot_dimension_numbers<[1], [0], [0], [1], [0, 0, 1, 1], [], []>} : vector<16x784xbf16>, vector<784x2048xbf16>, vector<16x2048xf32> -> vector<16x2048xf32>
    %c0_3 = arith.constant 0 : index
    %c0_4 = arith.constant 0 : index
    %4 = vector.load %arg3[%c0_3, %c0_4] : memref<1x2048xf32, #tpu.memory_space<vmem>>, vector<1x2048xf32>
    %5 = vector.broadcast %4 : vector<1x2048xf32> to vector<16x2048xf32>
    %6 = arith.addf %3, %5 : vector<16x2048xf32>
    %cst_5 = arith.constant 0.000000e+00 : f32
    %7 = vector.broadcast %cst_5 : f32 to vector<16x2048xf32>
    %8 = arith.maximumf %6, %7 : vector<16x2048xf32>
    %9 = arith.truncf %8 : vector<16x2048xf32> to vector<16x2048xbf16>
    %c0_6 = arith.constant 0 : index
    %c0_7 = arith.constant 0 : index
    %10 = vector.load %arg4[%c0_6, %c0_7] : memref<2048x512xbf16, #tpu.memory_space<vmem>>, vector<2048x512xbf16>
    %cst_8 = arith.constant dense<0.000000e+00> : vector<16x512xf32>
    %11 = tpu.matmul %9, %10, %cst_8 {dimension_numbers = #tpu.dot_dimension_numbers<[1], [0], [0], [1], [0, 0, 1, 1], [], []>} : vector<16x2048xbf16>, vector<2048x512xbf16>, vector<16x512xf32> -> vector<16x512xf32>
    %c0_9 = arith.constant 0 : index
    %c0_10 = arith.constant 0 : index
    %12 = vector.load %arg5[%c0_9, %c0_10] : memref<1x512xf32, #tpu.memory_space<vmem>>, vector<1x512xf32>
    %13 = vector.broadcast %12 : vector<1x512xf32> to vector<16x512xf32>
    %14 = arith.addf %11, %13 : vector<16x512xf32>
    %cst_11 = arith.constant 0.000000e+00 : f32
    %15 = vector.broadcast %cst_11 : f32 to vector<16x512xf32>
    %16 = arith.maximumf %14, %15 : vector<16x512xf32>
    %17 = arith.truncf %16 : vector<16x512xf32> to vector<16x512xbf16>
    %c0_12 = arith.constant 0 : index
    %c0_13 = arith.constant 0 : index
    %18 = vector.load %arg6[%c0_12, %c0_13] : memref<512x512xbf16, #tpu.memory_space<vmem>>, vector<512x512xbf16>
    %cst_14 = arith.constant dense<0.000000e+00> : vector<16x512xf32>
    %19 = tpu.matmul %17, %18, %cst_14 {dimension_numbers = #tpu.dot_dimension_numbers<[1], [0], [0], [1], [0, 0, 1, 1], [], []>} : vector<16x512xbf16>, vector<512x512xbf16>, vector<16x512xf32> -> vector<16x512xf32>
    %c0_15 = arith.constant 0 : index
    %c0_16 = arith.constant 0 : index
    %20 = vector.load %arg7[%c0_15, %c0_16] : memref<1x512xf32, #tpu.memory_space<vmem>>, vector<1x512xf32>
    %21 = vector.broadcast %20 : vector<1x512xf32> to vector<16x512xf32>
    %22 = arith.addf %19, %21 : vector<16x512xf32>
    %cst_17 = arith.constant 0.000000e+00 : f32
    %23 = vector.broadcast %cst_17 : f32 to vector<16x512xf32>
    %24 = arith.maximumf %22, %23 : vector<16x512xf32>
    %25 = arith.truncf %24 : vector<16x512xf32> to vector<16x512xbf16>
    %c0_18 = arith.constant 0 : index
    %c0_19 = arith.constant 0 : index
    %26 = vector.load %arg8[%c0_18, %c0_19] : memref<512x128xbf16, #tpu.memory_space<vmem>>, vector<512x128xbf16>
    %cst_20 = arith.constant dense<0.000000e+00> : vector<16x128xf32>
    %27 = tpu.matmul %25, %26, %cst_20 {dimension_numbers = #tpu.dot_dimension_numbers<[1], [0], [0], [1], [0, 0, 1, 1], [], []>} : vector<16x512xbf16>, vector<512x128xbf16>, vector<16x128xf32> -> vector<16x128xf32>
    %c0_21 = arith.constant 0 : index
    %c0_22 = arith.constant 0 : index
    %28 = vector.load %arg9[%c0_21, %c0_22] : memref<1x128xf32, #tpu.memory_space<vmem>>, vector<1x128xf32>
    %29 = vector.broadcast %28 : vector<1x128xf32> to vector<16x128xf32>
    %30 = arith.addf %27, %29 : vector<16x128xf32>
    %c0_23 = arith.constant 0 : index
    %c0_24 = arith.constant 0 : index
    %31 = vector.load %arg10[%c0_23, %c0_24] : memref<16x128xf32, #tpu.memory_space<vmem>>, vector<16x128xf32>
    tpu.vector_store %arg10[%c0_23, %c0_24], %30 {strides = array<i32>} : memref<16x128xf32, #tpu.memory_space<vmem>>, vector<16x128xf32>,
    return
  }
  func.func @transform_0(%arg0: i32) -> (i32, i32) {
    %c0_i32 = arith.constant 0 : i32
    %c0_i32_0 = arith.constant 0 : i32
    return %arg0, %c0_i32 : i32, i32
  }
  func.func @transform_1(%arg0: i32) -> (i32, i32) {
    %c0_i32 = arith.constant 0 : i32
    %c0_i32_0 = arith.constant 0 : i32
    %c0_i32_1 = arith.constant 0 : i32
    return %c0_i32, %c0_i32_0 : i32, i32
  }
  func.func @transform_2(%arg0: i32) -> (i32, i32) {
    %c0_i32 = arith.constant 0 : i32
    %c0_i32_0 = arith.constant 0 : i32
    %c0_i32_1 = arith.constant 0 : i32
    return %c0_i32, %c0_i32_0 : i32, i32
  }
  func.func @transform_3(%arg0: i32) -> (i32, i32) {
    %c0_i32 = arith.constant 0 : i32
    %c0_i32_0 = arith.constant 0 : i32
    %c0_i32_1 = arith.constant 0 : i32
    return %c0_i32, %c0_i32_0 : i32, i32
  }
  func.func @transform_4(%arg0: i32) -> (i32, i32) {
    %c0_i32 = arith.constant 0 : i32
    %c0_i32_0 = arith.constant 0 : i32
    %c0_i32_1 = arith.constant 0 : i32
    return %c0_i32, %c0_i32_0 : i32, i32
  }
  func.func @transform_5(%arg0: i32) -> (i32, i32) {
    %c0_i32 = arith.constant 0 : i32
    %c0_i32_0 = arith.constant 0 : i32
    %c0_i32_1 = arith.constant 0 : i32
    return %c0_i32, %c0_i32_0 : i32, i32
  }
  func.func @transform_6(%arg0: i32) -> (i32, i32) {
    %c0_i32 = arith.constant 0 : i32
    %c0_i32_0 = arith.constant 0 : i32
    %c0_i32_1 = arith.constant 0 : i32
    return %c0_i32, %c0_i32_0 : i32, i32
  }
  func.func @transform_7(%arg0: i32) -> (i32, i32) {
    %c0_i32 = arith.constant 0 : i32
    %c0_i32_0 = arith.constant 0 : i32
    %c0_i32_1 = arith.constant 0 : i32
    return %c0_i32, %c0_i32_0 : i32, i32
  }
  func.func @transform_8(%arg0: i32) -> (i32, i32) {
    %c0_i32 = arith.constant 0 : i32
    %c0_i32_0 = arith.constant 0 : i32
    %c0_i32_1 = arith.constant 0 : i32
    return %c0_i32, %c0_i32_0 : i32, i32
  }
  func.func @transform_9(%arg0: i32) -> (i32, i32) {
    %c0_i32 = arith.constant 0 : i32
    %c0_i32_0 = arith.constant 0 : i32
    return %arg0, %c0_i32 : i32, i32
  }
}

</mosaic_0001>

<bundles_post_ra>
// kernel: mlp_forward.1
= control target key start
LH: loop header
LB: loop body
LE: loop exit
PB: predicated region body
PF: predicated region fallthrough
CT: control target
= control target key end

     0   :  { %14 = vsyncpa [#allocation3], 0  ;;  %s14837_s0 = inlined_call_operand.vmem [shape: f32[16,784], index: 0, kind: input, shape index: {}]   ;;  %s14838_s1 = inlined_call_operand.hbm [shape: bf16[784,2048], index: 1, kind: input, shape index: {}]   ;;  %s14839_s2 = inlined_call_operand.hbm [shape: f32[1,2048], index: 2, kind: input, shape index: {}]   ;;  %s14840_s3 = inlined_call_operand.hbm [shape: bf16[2048,512], index: 3, kind: input, shape index: {}]   ;;  %s14841_s4 = inlined_call_operand.hbm [shape: f32[1,512], index: 4, kind: input, shape index: {}]   ;;  %s14842_s5 = inlined_call_operand.hbm [shape: bf16[512,512], index: 5, kind: input, shape index: {}]   ;;  %s14843_s6 = inlined_call_operand.hbm [shape: f32[1,512], index: 6, kind: input, shape index: {}]   ;;  %s14844_s7 = inlined_call_operand.hbm [shape: bf16[512,128], index: 7, kind: input, shape index: {}]   ;;  %s14845_s8 = inlined_call_operand.hbm [shape: f32[1,128], index: 8, kind: input, shape index: {}]   ;;  %s14846_s9 = inlined_call_operand.vmem [shape: f32[16,128], index: 9, kind: output, shape index: {}]  }
   0x1   :  { %15 = vsyncpa [#allocation5], 0 }
   0x2   :  { %16 = vsyncpa [#allocation8], 0 }
   0x3   :  { %17 = vsyncpa [#allocation11], 0 }
   0x4   :  { %18 = vsyncpa [#allocation14], 0  ;;  %s14405_s30 = smov [#allocation4]   ;;  %s14406_s11 = smov [#allocation7]  }
   0x5   :  { %s39_s10 = sshll.u32 %s14405_s30, 4  ;;  %s61_s12 = sshll.u32 %s14406_s11, 4  ;;  %s40_s10 = int_to_ptr.vmem [resolvable:$true] %s39_s10  ;;  %s62_s12 = int_to_ptr.vmem [resolvable:$true] %s61_s12 }
   0x6   :  { %s14219_s15 = scalar_lea.hbm %s14839_s2, 256 }
   0x7   :  { %p14220_p0 = scmp.ne.s32.totalorder %s14839_s2, %s14219_s15  ;;  %p14223_p1 = scmp.lt.u32.totalorder %s14219_s15, %s14839_s2 }
   0x9   :  { %p14225_p2 = pnand %p14223_p1, %p14220_p0 }
   0xb   :  { %14228 = shalt.err (!%p14225_p2)
}
   0xc   :  { %s14229_s20 = scalar_lea.vmem %s40_s10, 256  ;;  %p14234_p4 = scmp.lt.s32.totalorder %s40_s10, %s40_s10 }
   0xd   :  { %p14230_p3 = scmp.ne.s32.totalorder %s40_s10, %s14229_s20  ;;  %p14235_p5 = scmp.lt.s32.totalorder %s14229_s20, %s14229_s20 }
   0xf   :  { %p14236_p6 = por %p14235_p5, %p14234_p4 }
  0x11   :  { %p14237_p7 = pnand %p14236_p6, %p14230_p3 }
  0x13   :  { %14240 = shalt.err (!%p14237_p7)
}
  0x14   :  { %42 = dma.hbm_to_vmem [thread:$0]  %s14839_s2, 256, %s40_s10, [#allocation5]  }
  0x15   :  { %s14241_s25 = scalar_lea.hbm %s14841_s4, 64 }
  0x16   :  { %p14242_p8 = scmp.ne.s32.totalorder %s14841_s4, %s14241_s25  ;;  %p14245_p9 = scmp.lt.u32.totalorder %s14241_s25, %s14841_s4 }
  0x18   :  { %p14247_p10 = pnand %p14245_p9, %p14242_p8 }
  0x1a   :  { %14250 = shalt.err (!%p14247_p10)
}
  0x1b   :  { %s14251_s30 = scalar_lea.vmem %s62_s12, 64  ;;  %p14256_p12 = scmp.lt.s32.totalorder %s62_s12, %s62_s12 }
  0x1c   :  { %p14252_p11 = scmp.ne.s32.totalorder %s62_s12, %s14251_s30  ;;  %p14257_p13 = scmp.lt.s32.totalorder %s14251_s30, %s14251_s30 }
  0x1e   :  { %p14258_p0 = por %p14257_p13, %p14256_p12 }
  0x20   :  { %p14259_p1 = pnand %p14258_p0, %p14252_p11 }
  0x22   :  { %14262 = shalt.err (!%p14259_p1)
}
  0x23   :  { %64 = dma.hbm_to_vmem [thread:$0]  %s14841_s4, 64, %s62_s12, [#allocation8]  }
  0x24   :  { %s14407_s11 = smov [#allocation10]   ;;  %s14408_s14 = smov [#allocation2]  }
  0x25   :  { %s83_s13 = sshll.u32 %s14407_s11, 4  ;;  %s26_s15 = sshll.u32 %s14408_s14, 4  ;;  %s84_s13 = int_to_ptr.vmem [resolvable:$true] %s83_s13  ;;  %s14493_s15 = int_to_ptr.vmem [resolvable:$true] %s26_s15 }
  0x26   :  { %s14263_s18 = scalar_lea.hbm %s14843_s6, 64 }
  0x27   :  { %p14264_p2 = scmp.ne.s32.totalorder %s14843_s6, %s14263_s18  ;;  %p14267_p3 = scmp.lt.u32.totalorder %s14263_s18, %s14843_s6 }
  0x29   :  { %p14269_p4 = pnand %p14267_p3, %p14264_p2 }
  0x2b   :  { %14272 = shalt.err (!%p14269_p4)
}
  0x2c   :  { %s14273_s4 = scalar_lea.vmem %s84_s13, 64  ;;  %p14278_p6 = scmp.lt.s32.totalorder %s84_s13, %s84_s13 }
  0x2d   :  { %p14274_p5 = scmp.ne.s32.totalorder %s84_s13, %s14273_s4  ;;  %p14279_p7 = scmp.lt.s32.totalorder %s14273_s4, %s14273_s4 }
  0x2f   :  { %p14280_p8 = por %p14279_p7, %p14278_p6 }
  0x31   :  { %p14281_p9 = pnand %p14280_p8, %p14274_p5 }
  0x33   :  { %14284 = shalt.err (!%p14281_p9)
}
  0x34   :  { %86 = dma.hbm_to_vmem [thread:$0]  %s14843_s6, 64, %s84_s13, [#allocation11]  }
  0x35   :  { %s14285_s26 = scalar_lea.hbm %s14838_s1, 100352 }
  0x36   :  { %p14286_p10 = scmp.ne.s32.totalorder %s14838_s1, %s14285_s26  ;;  %p14289_p11 = scmp.lt.u32.totalorder %s14285_s26, %s14838_s1 }
  0x38   :  { %p14291_p12 = pnand %p14289_p11, %p14286_p10 }
  0x3a   :  { %14294 = shalt.err (!%p14291_p12)
}
  0x3b   :  { %s14295_s2 = scalar_lea.vmem %s14493_s15, 100352  ;;  %p14300_p0 = scmp.lt.s32.totalorder %s14493_s15, %s14493_s15 }
  0x3c   :  { %p14296_p13 = scmp.ne.s32.totalorder %s14493_s15, %s14295_s2  ;;  %p14301_p1 = scmp.lt.s32.totalorder %s14295_s2, %s14295_s2 }
  0x3e   :  { %p14302_p2 = por %p14301_p1, %p14300_p0 }
  0x40   :  { %p14303_p3 = pnand %p14302_p2, %p14296_p13 }
  0x42   :  { %14306 = shalt.err (!%p14303_p3)
}
  0x43   :  { %s14409_s6 = smov 1024   ;;  %s14410_s10 = smov 64  }
  0x44   :  { %32 = dma.hbm_to_vmem [thread:$0]  %s14838_s1, 100352, %s14493_s15, [#allocation3], %s14409_s6, %s14409_s6, %s14410_s10  }
  0x45   :  { %s14411_s14 = smov [#allocation6]   ;;  %s14307_s19 = scalar_lea.hbm %s14840_s3, 65536 }
  0x46   :  { %s48_s16 = sshll.u32 %s14411_s14, 4  ;;  %p14308_p4 = scmp.ne.s32.totalorder %s14840_s3, %s14307_s19  ;;  %s49_s16 = int_to_ptr.vmem [resolvable:$true] %s48_s16 }
  0x47   :  { %p14311_p5 = scmp.lt.u32.totalorder %s14307_s19, %s14840_s3 }
  0x49   :  { %p14313_p6 = pnand %p14311_p5, %p14308_p4 }
  0x4b   :  { %14316 = shalt.err (!%p14313_p6)
}
  0x4c   :  { %s14317_s12 = scalar_lea.vmem %s49_s16, 65536  ;;  %p14322_p8 = scmp.lt.s32.totalorder %s49_s16, %s49_s16 }
  0x4d   :  { %p14318_p7 = scmp.ne.s32.totalorder %s49_s16, %s14317_s12  ;;  %p14323_p9 = scmp.lt.s32.totalorder %s14317_s12, %s14317_s12 }
  0x4f   :  { %p14324_p10 = por %p14323_p9, %p14322_p8 }
  0x51   :  { %p14325_p11 = pnand %p14324_p10, %p14318_p7 }
  0x53   :  { %14328 = shalt.err (!%p14325_p11)
}
  0x54   :  { %s14412_s1 = smov 256   ;;  %s14413_s15 = smov 16  }
  0x55   :  { %54 = dma.hbm_to_vmem [thread:$0]  %s14840_s3, 65536, %s49_s16, [#allocation5], %s14412_s1, %s14412_s1, %s14413_s15  }
  0x56   :  { %s14414_s25 = smov [#allocation9]   ;;  %s14415_s27 = smov [#allocation12]  }
  0x57   :  { %s70_s26 = sshll.u32 %s14414_s25, 4  ;;  %s92_s28 = sshll.u32 %s14415_s27, 4  ;;  %s71_s26 = int_to_ptr.vmem [resolvable:$true] %s70_s26  ;;  %s93_s28 = int_to_ptr.vmem [resolvable:$true] %s92_s28 }
  0x58   :  { %s14329_s2 = scalar_lea.hbm %s14842_s5, 16384 }
  0x59   :  { %p14330_p12 = scmp.ne.s32.totalorder %s14842_s5, %s14329_s2  ;;  %p14333_p13 = scmp.lt.u32.totalorder %s14329_s2, %s14842_s5 }
  0x5b   :  { %p14335_p0 = pnand %p14333_p13, %p14330_p12 }
  0x5d   :  { %14338 = shalt.err (!%p14335_p0)
}
  0x5e   :  { %s14339_s3 = scalar_lea.vmem %s71_s26, 16384  ;;  %p14344_p2 = scmp.lt.s32.totalorder %s71_s26, %s71_s26 }
  0x5f   :  { %p14340_p1 = scmp.ne.s32.totalorder %s71_s26, %s14339_s3  ;;  %p14345_p3 = scmp.lt.s32.totalorder %s14339_s3, %s14339_s3 }
  0x61   :  { %p14346_p4 = por %p14345_p3, %p14344_p2 }
  0x63   :  { %p14347_p5 = pnand %p14346_p4, %p14340_p1 }
  0x65   :  { %14350 = shalt.err (!%p14347_p5)
}
  0x66   :  { %76 = dma.hbm_to_vmem [thread:$0]  %s14842_s5, 16384, %s71_s26, [#allocation8], %s14412_s1, %s14412_s1, %s14413_s15  }
  0x67   :  { %s14351_s20 = scalar_lea.hbm %s14844_s7, 4096 }
  0x68   :  { %p14352_p6 = scmp.ne.s32.totalorder %s14844_s7, %s14351_s20  ;;  %p14355_p7 = scmp.lt.u32.totalorder %s14351_s20, %s14844_s7 }
  0x6a   :  { %p14357_p8 = pnand %p14355_p7, %p14352_p6 }
  0x6c   :  { %14360 = shalt.err (!%p14357_p8)
}
  0x6d   :  { %s14361_s23 = scalar_lea.vmem %s93_s28, 4096  ;;  %p14366_p10 = scmp.lt.s32.totalorder %s93_s28, %s93_s28 }
  0x6e   :  { %p14362_p9 = scmp.ne.s32.totalorder %s93_s28, %s14361_s23  ;;  %p14367_p11 = scmp.lt.s32.totalorder %s14361_s23, %s14361_s23 }
  0x70   :  { %p14368_p12 = por %p14367_p11, %p14366_p10 }
  0x72   :  { %p14369_p13 = pnand %p14368_p12, %p14362_p9 }
  0x74   :  { %14372 = shalt.err (!%p14369_p13)
}
  0x75   :  { %s14416_s5 = smov 4   ;;  %s14417_s24 = smov [#allocation13]  }
  0x76   :  { %98 = dma.hbm_to_vmem [thread:$0]  %s14844_s7, 4096, %s93_s28, [#allocation11], %s14410_s10, %s14410_s10, %s14416_s5  }
  0x77   :  { %s105_s25 = sshll.u32 %s14417_s24, 4  ;;  %s14373_s29 = scalar_lea.hbm %s14845_s8, 16  ;;  %s106_s25 = int_to_ptr.vmem [resolvable:$true] %s105_s25 }
  0x78   :  { %p14374_p0 = scmp.ne.s32.totalorder %s14845_s8, %s14373_s29  ;;  %p14377_p1 = scmp.lt.u32.totalorder %s14373_s29, %s14845_s8 }
  0x7a   :  { %p14379_p2 = pnand %p14377_p1, %p14374_p0 }
  0x7c   :  { %14382 = shalt.err (!%p14379_p2)
}
  0x7d   :  { %s14383_s13 = scalar_lea.vmem %s106_s25, 16  ;;  %s14387_s7 = scalar_lea.vmem %s106_s25, 32 }
  0x7e   :  { %p14384_p3 = scmp.ne.s32.totalorder %s106_s25, %s14383_s13  ;;  %p14388_p4 = scmp.lt.s32.totalorder %s106_s25, %s106_s25 }
  0x7f   :  { %p14389_p5 = scmp.lt.s32.totalorder %s14387_s7, %s14383_s13 }
  0x81   :  { %p14390_p6 = por %p14389_p5, %p14388_p4 }
  0x83   :  { %p14391_p7 = pnand %p14390_p6, %p14384_p3 }
  0x85   :  { %14394 = shalt.err (!%p14391_p7)
}
  0x86   :  { %108 = dma.hbm_to_vmem [thread:$0]  %s14845_s8, 16, %s106_s25, [#allocation14]  }
  0x87   :  { %14395 = dma.done.wait [#allocation3], 100352  }
  0x88   :  { %14396 = vsyncadd [#allocation3], 4294866944 }
  0x89   :  { %14397 = dma.done.wait [#allocation5], 65792  }
  0x8a   :  { %14398 = vsyncadd [#allocation5], 4294901504 }
  0x8b   :  { %14399 = dma.done.wait [#allocation8], 16448  }
  0x8c   :  { %14400 = vsyncadd [#allocation8], 4294950848 }
  0x8d   :  { %14401 = dma.done.wait [#allocation11], 4160  }
  0x8e   :  { %14402 = vsyncadd [#allocation11], 4294963136 }
  0x8f   :  { %14403 = dma.done.wait [#allocation14], 16  }
  0x90   :  { %14404 = vsyncadd [#allocation14], 4294967280  ;;  %v155_v0 = vld [vmem:[#allocation2] sm:$0xff]  ;;  %v156_v2 = vld [vmem:[#allocation2 + $0x8] sm:$0xff]  ;;  %vm4943_vm0 = vcmask 130048  }
  0x91   :  { %v163_v1 = vld [vmem:[#allocation2 + $0x40] sm:$0xff]  ;;  %v164_v4 = vld [vmem:[#allocation2 + $0x48] sm:$0xff] }
  0x92   :  { %v11496_v3 = vcombine.high %v155_v0, %v163_v1  ;;  %v11495_v5 = vcombine.low %v155_v0, %v163_v1  ;;  %v171_v6 = vld [vmem:[#allocation2 + $0x80] sm:$0xff]  ;;  %v11498_v8 = vcombine.high %v156_v2, %v164_v4  ;;  %v11497_v9 = vcombine.low %v156_v2, %v164_v4  ;;  %v172_v11 = vld [vmem:[#allocation2 + $0x88] sm:$0xff] }
  0x93   :  { %v179_v7 = vld [vmem:[#allocation2 + $0xc0] sm:$0xff]  ;;  %v180_v12 = vld [vmem:[#allocation2 + $0xc8] sm:$0xff] }
  0x94   :  { %v11512_v10 = vcombine.high %v171_v6, %v179_v7  ;;  %v187_v13 = vld [vmem:[#allocation2 + $0x100] sm:$0xff]  ;;  %4947 = vmatprep.subr.bf16.mxu0 %v11496_v3  ;;  %v11514_v14 = vcombine.high %v172_v11, %v180_v12  ;;  %v188_v16 = vld [vmem:[#allocation2 + $0x108] sm:$0xff]  ;;  %5119 = vmatprep.subr.bf16.mxu1 %v11498_v8  ;;  %v11511_v18 = vcombine.low %v171_v6, %v179_v7 }
  0x95   :  { %v195_v15 = vld [vmem:[#allocation2 + $0x140] sm:$0xff]  ;;  %v196_v17 = vld [vmem:[#allocation2 + $0x148] sm:$0xff]  ;;  %4948 = vmatpush1.bf16.msra.mxu0 %v11495_v5  ;;  %5120 = vmatpush1.bf16.msra.mxu1 %v11497_v9  ;;  %v11513_v19 = vcombine.low %v172_v11, %v180_v12 }
  0x96   :  { %4949 = vmatprep.subr.bf16.mxu0 %v11512_v10  ;;  %v11528_v20 = vcombine.high %v187_v13, %v195_v15  ;;  %5121 = vmatprep.subr.bf16.mxu1 %v11514_v14  ;;  %v11530_v21 = vcombine.high %v188_v16, %v196_v17  ;;  %v203_v22 = vld [vmem:[#allocation2 + $0x180] sm:$0xff]  ;;  %v204_v24 = vld [vmem:[#allocation2 + $0x188] sm:$0xff]  ;;  %v11527_v26 = vcombine.low %v187_v13, %v195_v15 }
  0x97   :  { %v211_v23 = vld [vmem:[#allocation2 + $0x1c0] sm:$0xff]  ;;  %v212_v25 = vld [vmem:[#allocation2 + $0x1c8] sm:$0xff]  ;;  %v11529_v27 = vcombine.low %v188_v16, %v196_v17 }
  0x98   :  { %v11544_v28 = vcombine.high %v203_v22, %v211_v23  ;;  %v11546_v29 = vcombine.high %v204_v24, %v212_v25  ;;  %v219_v30 = vld [vmem:[#allocation2 + $0x200] sm:$0xff]  ;;  %v220_v32 = vld [vmem:[#allocation2 + $0x208] sm:$0xff]  ;;  %v11543_v34 = vcombine.low %v203_v22, %v211_v23  ;;  %v11545_v35 = vcombine.low %v204_v24, %v212_v25 }
  0x99   :  { %4950 = vmatpush1.bf16.msra.mxu0 %v11511_v18  ;;  %5122 = vmatpush1.bf16.msra.mxu1 %v11513_v19  ;;  %v227_v31 = vld [vmem:[#allocation2 + $0x240] sm:$0xff]  ;;  %v228_v33 = vld [vmem:[#allocation2 + $0x248] sm:$0xff] }
  0x9a   :  { %4951 = vmatprep.subr.bf16.mxu0 %v11528_v20  ;;  %5123 = vmatprep.subr.bf16.mxu1 %v11530_v21  ;;  %v11560_v36 = vcombine.high %v219_v30, %v227_v31  ;;  %v11562_v37 = vcombine.high %v220_v32, %v228_v33  ;;  %v235_v38 = vld [vmem:[#allocation2 + $0x280] sm:$0xff]  ;;  %v236_v40 = vld [vmem:[#allocation2 + $0x288] sm:$0xff]  ;;  %v11559_v42 = vcombine.low %v219_v30, %v227_v31 }
  0x9b   :  { %v243_v39 = vld [vmem:[#allocation2 + $0x2c0] sm:$0xff]  ;;  %v244_v41 = vld [vmem:[#allocation2 + $0x2c8] sm:$0xff]  ;;  %v11561_v43 = vcombine.low %v220_v32, %v228_v33 }
  0x9c   :  { %v11576_v44 = vcombine.high %v235_v38, %v243_v39  ;;  %v11578_v45 = vcombine.high %v236_v40, %v244_v41  ;;  %v251_v46 = vld [vmem:[#allocation2 + $0x300] sm:$0xff]  ;;  %v252_v48 = vld [vmem:[#allocation2 + $0x308] sm:$0xff]  ;;  %v11575_v50 = vcombine.low %v235_v38, %v243_v39  ;;  %v11577_v51 = vcombine.low %v236_v40, %v244_v41 }
  0x9d   :  { %4952 = vmatpush1.bf16.msra.mxu0 %v11527_v26  ;;  %5124 = vmatpush1.bf16.msra.mxu1 %v11529_v27  ;;  %v259_v47 = vld [vmem:[#allocation2 + $0x340] sm:$0xff]  ;;  %v260_v49 = vld [vmem:[#allocation2 + $0x348] sm:$0xff] }
  0x9e   :  { %4953 = vmatprep.subr.bf16.mxu0 %v11544_v28  ;;  %5125 = vmatprep.subr.bf16.mxu1 %v11546_v29  ;;  %v11592_v52 = vcombine.high %v251_v46, %v259_v47  ;;  %v135_v53 = vld [vmem:[%s14837_s0 + $0x8] sm:$0xff]  ;;  %v142_v54 = vld [vmem:[%s14837_s0 + $0x40] sm:$0xff]  ;;  %v11594_v55 = vcombine.high %v252_v48, %v260_v49  ;;  %v11591_v61 = vcombine.low %v251_v46, %v259_v47 }
  0x9f   :  { %v267_v56 = vld [vmem:[#allocation2 + $0x380] sm:$0xff]  ;;  %v14581_v58 = vpack.c.bf16 %v142_v54, %v135_v53  ;;  %v268_v59 = vld [vmem:[#allocation2 + $0x388] sm:$0xff]  ;;  %v11593_v62 = vcombine.low %v252_v48, %v260_v49 }
  0xa0   :  { %v275_v57 = vld [vmem:[#allocation2 + $0x3c0] sm:$0xff]  ;;  %v276_v60 = vld [vmem:[#allocation2 + $0x3c8] sm:$0xff] }
  0xa1   :  { %4954 = vmatpush1.bf16.msra.mxu0 %v11543_v34  ;;  %5126 = vmatpush1.bf16.msra.mxu1 %v11545_v35  ;;  %v11608_v63 = vcombine.high %v267_v56, %v275_v57  ;;  %v11610_v0 = vcombine.high %v268_v59, %v276_v60  ;;  %v283_v1 = vld [vmem:[#allocation2 + $0x400] sm:$0xff]  ;;  %v284_v3 = vld [vmem:[#allocation2 + $0x408] sm:$0xff]  ;;  %v11607_v5 = vcombine.low %v267_v56, %v275_v57 }
  0xa2   :  { %4955 = vmatprep.subr.bf16.mxu0 %v11560_v36  ;;  %5127 = vmatprep.subr.bf16.mxu1 %v11562_v37  ;;  %v291_v2 = vld [vmem:[#allocation2 + $0x440] sm:$0xff]  ;;  %v292_v4 = vld [vmem:[#allocation2 + $0x448] sm:$0xff]  ;;  %v11609_v6 = vcombine.low %v268_v59, %v276_v60 }
  0xa3   :  { %4979 = vmatprep.mubr.bf16.mxu0 %v14581_v58  ;;  %5151 = vmatprep.mubr.bf16.mxu1 %v14581_v58  ;;  %v11624_v7 = vcombine.high %v283_v1, %v291_v2  ;;  %v11626_v8 = vcombine.high %v284_v3, %v292_v4  ;;  %v299_v9 = vld [vmem:[#allocation2 + $0x480] sm:$0xff]  ;;  %v300_v11 = vld [vmem:[#allocation2 + $0x488] sm:$0xff]  ;;  %v11623_v13 = vcombine.low %v283_v1, %v291_v2 }
  0xa4   :  { %v307_v10 = vld [vmem:[#allocation2 + $0x4c0] sm:$0xff]  ;;  %v308_v12 = vld [vmem:[#allocation2 + $0x4c8] sm:$0xff]  ;;  %v11625_v14 = vcombine.low %v284_v3, %v292_v4 }
  0xa5   :  { %4956 = vmatpush1.bf16.msra.mxu0 %v11559_v42  ;;  %5128 = vmatpush1.bf16.msra.mxu1 %v11561_v43  ;;  %v11640_v15 = vcombine.high %v299_v9, %v307_v10  ;;  %v11642_v16 = vcombine.high %v300_v11, %v308_v12  ;;  %v315_v17 = vld [vmem:[#allocation2 + $0x500] sm:$0xff]  ;;  %v316_v19 = vld [vmem:[#allocation2 + $0x508] sm:$0xff]  ;;  %v11639_v21 = vcombine.low %v299_v9, %v307_v10 }
  0xa6   :  { %4957 = vmatprep.subr.bf16.mxu0 %v11576_v44  ;;  %5129 = vmatprep.subr.bf16.mxu1 %v11578_v45  ;;  %v323_v18 = vld [vmem:[#allocation2 + $0x540] sm:$0xff]  ;;  %v324_v20 = vld [vmem:[#allocation2 + $0x548] sm:$0xff]  ;;  %v11641_v22 = vcombine.low %v300_v11, %v308_v12 }
  0xa7   :  { %v11656_v23 = vcombine.high %v315_v17, %v323_v18  ;;  %v11658_v24 = vcombine.high %v316_v19, %v324_v20  ;;  %v331_v25 = vld [vmem:[#allocation2 + $0x580] sm:$0xff]  ;;  %v332_v27 = vld [vmem:[#allocation2 + $0x588] sm:$0xff]  ;;  %v11655_v29 = vcombine.low %v315_v17, %v323_v18  ;;  %v11657_v30 = vcombine.low %v316_v19, %v324_v20  ;;  %v137_v17 = vld [vmem:[%s14837_s0 + $0x18] sm:$0xff] }
  0xa8   :  { %v339_v26 = vld [vmem:[#allocation2 + $0x5c0] sm:$0xff]  ;;  %v340_v28 = vld [vmem:[#allocation2 + $0x5c8] sm:$0xff]  ;;  %v144_v18 = vld [vmem:[%s14837_s0 + $0x50] sm:$0xff] }
  0xa9   :  { %4958 = vmatpush1.bf16.msra.mxu0 %v11575_v50  ;;  %5130 = vmatpush1.bf16.msra.mxu1 %v11577_v51  ;;  %v11672_v31 = vcombine.high %v331_v25, %v339_v26  ;;  %v11674_v32 = vcombine.high %v332_v27, %v340_v28  ;;  %v347_v33 = vld [vmem:[#allocation2 + $0x600] sm:$0xff]  ;;  %v348_v35 = vld [vmem:[#allocation2 + $0x608] sm:$0xff]  ;;  %v11671_v37 = vcombine.low %v331_v25, %v339_v26 }
  0xaa   :  { %4959 = vmatprep.subr.bf16.mxu0 %v11592_v52  ;;  %5131 = vmatprep.subr.bf16.mxu1 %v11594_v55  ;;  %v355_v34 = vld [vmem:[#allocation2 + $0x640] sm:$0xff]  ;;  %v356_v36 = vld [vmem:[#allocation2 + $0x648] sm:$0xff]  ;;  %v11673_v38 = vcombine.low %v332_v27, %v340_v28  ;;  %v14599_v25 = vpack.c.bf16 %v144_v18, %v137_v17 }
  0xab   :  { %v11688_v39 = vcombine.high %v347_v33, %v355_v34  ;;  %v11690_v40 = vcombine.high %v348_v35, %v356_v36  ;;  %v363_v41 = vld [vmem:[#allocation2 + $0x680] sm:$0xff]  ;;  %v364_v43 = vld [vmem:[#allocation2 + $0x688] sm:$0xff]  ;;  %v11687_v45 = vcombine.low %v347_v33, %v355_v34  ;;  %v11689_v46 = vcombine.low %v348_v35, %v356_v36 }
  0xac   :  { %v371_v42 = vld [vmem:[#allocation2 + $0x6c0] sm:$0xff]  ;;  %v372_v44 = vld [vmem:[#allocation2 + $0x6c8] sm:$0xff] }
  0xad   :  { %4960 = vmatpush1.bf16.msra.mxu0 %v11591_v61  ;;  %5132 = vmatpush1.bf16.msra.mxu1 %v11593_v62  ;;  %v11704_v47 = vcombine.high %v363_v41, %v371_v42  ;;  %v11706_v48 = vcombine.high %v364_v43, %v372_v44  ;;  %v379_v49 = vld [vmem:[#allocation2 + $0x700] sm:$0xff]  ;;  %v380_v51 = vld [vmem:[#allocation2 + $0x708] sm:$0xff]  ;;  %v11703_v53 = vcombine.low %v363_v41, %v371_v42 }
  0xae   :  { %4961 = vmatprep.subr.bf16.mxu0 %v11608_v63  ;;  %5133 = vmatprep.subr.bf16.mxu1 %v11610_v0  ;;  %v387_v50 = vld [vmem:[#allocation2 + $0x740] sm:$0xff]  ;;  %v388_v52 = vld [vmem:[#allocation2 + $0x748] sm:$0xff]  ;;  %v11705_v54 = vcombine.low %v364_v43, %v372_v44 }
  0xaf   :  { %v11720_v55 = vcombine.high %v379_v49, %v387_v50  ;;  %v11722_v56 = vcombine.high %v380_v51, %v388_v52  ;;  %v395_v57 = vld [vmem:[#allocation2 + $0x780] sm:$0xff]  ;;  %v396_v60 = vld [vmem:[#allocation2 + $0x788] sm:$0xff]  ;;  %v11719_v62 = vcombine.low %v379_v49, %v387_v50  ;;  %v11721_v63 = vcombine.low %v380_v51, %v388_v52 }
  0xb0   :  { %v403_v59 = vld [vmem:[#allocation2 + $0x7c0] sm:$0xff]  ;;  %v404_v61 = vld [vmem:[#allocation2 + $0x7c8] sm:$0xff] }
  0xb1   :  { %4962 = vmatpush1.bf16.msra.mxu0 %v11607_v5  ;;  %5134 = vmatpush1.bf16.msra.mxu1 %v11609_v6  ;;  %v11736_v0 = vcombine.high %v395_v57, %v403_v59  ;;  %v11738_v1 = vcombine.high %v396_v60, %v404_v61  ;;  %v411_v2 = vld [vmem:[#allocation2 + $0x800] sm:$0xff]  ;;  %v412_v4 = vld [vmem:[#allocation2 + $0x808] sm:$0xff]  ;;  %v11735_v6 = vcombine.low %v395_v57, %v403_v59 }
  0xb2   :  { %4963 = vmatprep.subr.bf16.mxu0 %v11624_v7  ;;  %5135 = vmatprep.subr.bf16.mxu1 %v11626_v8  ;;  %v419_v3 = vld [vmem:[#allocation2 + $0x840] sm:$0xff]  ;;  %v420_v5 = vld [vmem:[#allocation2 + $0x848] sm:$0xff]  ;;  %v141_v8 = vld [vmem:[%s14837_s0 + $0x38] sm:$0xff]  ;;  %v11737_v9 = vcombine.low %v396_v60, %v404_v61 }
  0xb3   :  { %v134_v7 = vld [vmem:[%s14837_s0] sm:$0xff]  ;;  %v11752_v10 = vcombine.high %v411_v2, %v419_v3  ;;  %v11754_v11 = vcombine.high %v412_v4, %v420_v5  ;;  %v11751_v19 = vcombine.low %v411_v2, %v419_v3  ;;  %v11753_v20 = vcombine.low %v412_v4, %v420_v5  ;;  %v444_v26 = vld [vmem:[#allocation2 + $0x908] sm:$0xff] }
  0xb4   :  { %v427_v12 = vld [vmem:[#allocation2 + $0x880] sm:$0xff]  ;;  %v452_v27 = vld [vmem:[#allocation2 + $0x948] sm:$0xff] }
  0xb5   :  { %4964 = vmatpush1.bf16.msra.mxu0 %v11623_v13  ;;  %5136 = vmatpush1.bf16.msra.mxu1 %v11625_v14  ;;  %v435_v13 = vld [vmem:[#allocation2 + $0x8c0] sm:$0xff]  ;;  %v428_v14 = vld [vmem:[#allocation2 + $0x888] sm:$0xff] }
  0xb6   :  { %4965 = vmatprep.subr.bf16.mxu0 %v11640_v15  ;;  %5137 = vmatprep.subr.bf16.mxu1 %v11642_v16  ;;  %v14591_v15 = vpack.c.bf16 %v141_v8, %v134_v7  ;;  %v436_v16 = vld [vmem:[#allocation2 + $0x8c8] sm:$0xff]  ;;  %v11767_v28 = vcombine.low %v427_v12, %v435_v13  ;;  %v467_v33 = vld [vmem:[#allocation2 + $0x9c0] sm:$0xff] }
  0xb7   :  { %v460_v34 = vld [vmem:[#allocation2 + $0x988] sm:$0xff]  ;;  %v539_v8 = vld [vmem:[#allocation2 + $0xc00] sm:$0xff] }
  0xb8   :  { %v468_v35 = vld [vmem:[#allocation2 + $0x9c8] sm:$0xff]  ;;  %v555_v17 = vld [vmem:[#allocation2 + $0xc80] sm:$0xff] }
  0xb9   :  { %4966 = vmatpush1.bf16.msra.mxu0 %v11639_v21  ;;  %5138 = vmatpush1.bf16.msra.mxu1 %v11641_v22  ;;  %v11768_v21 = vcombine.high %v427_v12, %v435_v13  ;;  %v11770_v22 = vcombine.high %v428_v14, %v436_v16  ;;  %v476_v41 = vld [vmem:[#allocation2 + $0xa08] sm:$0xff]  ;;  %v11802_v43 = vcombine.high %v460_v34, %v468_v35  ;;  %v563_v18 = vld [vmem:[#allocation2 + $0xcc0] sm:$0xff] }
  0xba   :  { %4967 = vmatprep.subr.bf16.mxu0 %v11656_v23  ;;  %5139 = vmatprep.subr.bf16.mxu1 %v11658_v24  ;;  %v443_v23 = vld [vmem:[#allocation2 + $0x900] sm:$0xff]  ;;  %v484_v42 = vld [vmem:[#allocation2 + $0xa48] sm:$0xff] }
  0xbb   :  { %v451_v24 = vld [vmem:[#allocation2 + $0x940] sm:$0xff]  ;;  %v492_v49 = vld [vmem:[#allocation2 + $0xa88] sm:$0xff]  ;;  %v11818_v51 = vcombine.high %v476_v41, %v484_v42 }
  0xbc   :  { %v11783_v36 = vcombine.low %v443_v23, %v451_v24  ;;  %v500_v50 = vld [vmem:[#allocation2 + $0xac8] sm:$0xff] }
  0xbd   :  { %4968 = vmatpush1.bf16.msra.mxu0 %v11655_v29  ;;  %5140 = vmatpush1.bf16.msra.mxu1 %v11657_v30  ;;  %v11769_v29 = vcombine.low %v428_v14, %v436_v16  ;;  %v11784_v30 = vcombine.high %v443_v23, %v451_v24  ;;  %v508_v57 = vld [vmem:[#allocation2 + $0xb08] sm:$0xff]  ;;  %v11834_v59 = vcombine.high %v492_v49, %v500_v50 }
  0xbe   :  { %4969 = vmatprep.subr.bf16.mxu0 %v11672_v31  ;;  %5141 = vmatprep.subr.bf16.mxu1 %v11674_v32  ;;  %v11786_v31 = vcombine.high %v444_v26, %v452_v27  ;;  %v459_v32 = vld [vmem:[#allocation2 + $0x980] sm:$0xff]  ;;  %v516_v60 = vld [vmem:[#allocation2 + $0xb48] sm:$0xff]  ;;  %v11896_v24 = vcombine.high %v555_v17, %v563_v18 }
  0xbf   :  { %v11799_v44 = vcombine.low %v459_v32, %v467_v33  ;;  %v524_v2 = vld [vmem:[#allocation2 + $0xb88] sm:$0xff]  ;;  %v11850_v3 = vcombine.high %v508_v57, %v516_v60 }
  0xc0   :  { %v532_v4 = vld [vmem:[#allocation2 + $0xbc8] sm:$0xff] }
  0xc1   :  { %4970 = vmatpush1.bf16.msra.mxu0 %v11671_v37  ;;  %5142 = vmatpush1.bf16.msra.mxu1 %v11673_v38  ;;  %v475_v37 = vld [vmem:[#allocation2 + $0xa00] sm:$0xff]  ;;  %v548_v12 = vld [vmem:[#allocation2 + $0xc48] sm:$0xff]  ;;  %v11865_v14 = vcombine.low %v524_v2, %v532_v4 }
  0xc2   :  { %4971 = vmatprep.subr.bf16.mxu0 %v11688_v39  ;;  %5143 = vmatprep.subr.bf16.mxu1 %v11690_v40  ;;  %v483_v38 = vld [vmem:[#allocation2 + $0xa40] sm:$0xff]  ;;  %v11785_v39 = vcombine.low %v444_v26, %v452_v27  ;;  %v11800_v40 = vcombine.high %v459_v32, %v467_v33 }
  0xc3   :  { %v11815_v52 = vcombine.low %v475_v37, %v483_v38  ;;  %v571_v26 = vld [vmem:[#allocation2 + $0xd00] sm:$0xff] }
  0xc4   :  { %v579_v27 = vld [vmem:[#allocation2 + $0xd40] sm:$0xff] }
  0xc5   :  { %4972 = vmatpush1.bf16.msra.mxu0 %v11687_v45  ;;  %5144 = vmatpush1.bf16.msra.mxu1 %v11689_v46  ;;  %v491_v45 = vld [vmem:[#allocation2 + $0xa80] sm:$0xff]  ;;  %v11912_v33 = vcombine.high %v571_v26, %v579_v27 }
  0xc6   :  { %4973 = vmatprep.subr.bf16.mxu0 %v11704_v47  ;;  %5145 = vmatprep.subr.bf16.mxu1 %v11706_v48  ;;  %v499_v46 = vld [vmem:[#allocation2 + $0xac0] sm:$0xff]  ;;  %v11801_v47 = vcombine.low %v460_v34, %v468_v35  ;;  %v11816_v48 = vcombine.high %v475_v37, %v483_v38  ;;  %v596_v38 = vld [vmem:[#allocation2 + $0xdc8] sm:$0xff] }
  0xc7   :  { %v11831_v61 = vcombine.low %v491_v45, %v499_v46  ;;  %v587_v34 = vld [vmem:[#allocation2 + $0xd80] sm:$0xff] }
  0xc8   :  { %v595_v35 = vld [vmem:[#allocation2 + $0xdc0] sm:$0xff] }
  0xc9   :  { %4974 = vmatpush1.bf16.msra.mxu0 %v11703_v53  ;;  %5146 = vmatpush1.bf16.msra.mxu1 %v11705_v54  ;;  %v11817_v53 = vcombine.low %v476_v41, %v484_v42  ;;  %v11832_v54 = vcombine.high %v491_v45, %v499_v46  ;;  %v11928_v41 = vcombine.high %v587_v34, %v595_v35  ;;  %v603_v42 = vld [vmem:[#allocation2 + $0xe00] sm:$0xff]  ;;  %v612_v46 = vld [vmem:[#allocation2 + $0xe48] sm:$0xff] }
  0xca   :  { %4975 = vmatprep.subr.bf16.mxu0 %v11720_v55  ;;  %5147 = vmatprep.subr.bf16.mxu1 %v11722_v56  ;;  %v507_v55 = vld [vmem:[#allocation2 + $0xb00] sm:$0xff] }
  0xcb   :  { %v515_v56 = vld [vmem:[#allocation2 + $0xb40] sm:$0xff] }
  0xcc   :  { %v11847_v5 = vcombine.low %v507_v55, %v515_v56 }
  0xcd   :  { %4976 = vmatpush1.bf16.msra.mxu0 %v11719_v62  ;;  %5148 = vmatpush1.bf16.msra.mxu1 %v11721_v63  ;;  %v11833_v62 = vcombine.low %v492_v49, %v500_v50  ;;  %v11848_v63 = vcombine.high %v507_v55, %v515_v56  ;;  %v619_v50 = vld [vmem:[#allocation2 + $0xe80] sm:$0xff] }
  0xce   :  { %4977 = vmatprep.subr.bf16.mxu0 %v11736_v0  ;;  %5149 = vmatprep.subr.bf16.mxu1 %v11738_v1  ;;  %v523_v0 = vld [vmem:[#allocation2 + $0xb80] sm:$0xff] }
  0xcf   :  { %v531_v1 = vld [vmem:[#allocation2 + $0xbc0] sm:$0xff] }
  0xd0   :  { %v11864_v7 = vcombine.high %v523_v0, %v531_v1  ;;  %v11863_v13 = vcombine.low %v523_v0, %v531_v1 }
  0xd1   :  { %4978 = vmatpush1.bf16.msra.mxu0 %v11735_v6  ;;  %5150 = vmatpush1.bf16.msra.mxu1 %v11737_v9  ;;  %v11849_v6 = vcombine.low %v508_v57, %v516_v60  ;;  %v547_v9 = vld [vmem:[#allocation2 + $0xc40] sm:$0xff] }
  0xd2   :  { %4990 = vmatprep.subr.bf16.mxu0 %v11752_v10  ;;  %5162 = vmatprep.subr.bf16.mxu1 %v11754_v11  ;;  %v540_v10 = vld [vmem:[#allocation2 + $0xc08] sm:$0xff]  ;;  %v11866_v11 = vcombine.high %v524_v2, %v532_v4  ;;  %v11880_v16 = vcombine.high %v539_v8, %v547_v9  ;;  %v643_v60 = vld [vmem:[#allocation2 + $0xf40] sm:$0xff] }
  0xd3   :  { %v11881_v23 = vcombine.low %v540_v10, %v548_v12  ;;  %v659_v4 = vld [vmem:[#allocation2 + $0xfc0] sm:$0xff] }
  0xd4   :  { %4980 = vmatmul.mubr.bf16.vlgmr.msra.gmra.mrb[0].mxu0 %v14591_v15  ;;  %5152 = vmatmul.mubr.bf16.vlgmr.msra.gmra.mrb[0].mxu1 %v14591_v15 }
  0xd5   :  { %4991 = vmatpush1.bf16.msra.mxu0 %v11751_v19  ;;  %5163 = vmatpush1.bf16.msra.mxu1 %v11753_v20  ;;  %v556_v19 = vld [vmem:[#allocation2 + $0xc88] sm:$0xff]  ;;  %v11882_v20 = vcombine.high %v540_v10, %v548_v12  ;;  %v675_v12 = vld [vmem:[#allocation2 + $0x1040] sm:$0xff] }
  0xd6   :  { %4992 = vmatprep.subr.bf16.mxu0 %v11768_v21  ;;  %5164 = vmatprep.subr.bf16.mxu1 %v11770_v22  ;;  %v564_v21 = vld [vmem:[#allocation2 + $0xcc8] sm:$0xff]  ;;  %v11879_v22 = vcombine.low %v539_v8, %v547_v9  ;;  %v667_v9 = vld [vmem:[#allocation2 + $0x1000] sm:$0xff] }
  0xd7   :  { %5022 = vmatprep.mubr.bf16.mxu0 %v14599_v25  ;;  %5194 = vmatprep.mubr.bf16.mxu1 %v14599_v25  ;;  %v11897_v32 = vcombine.low %v556_v19, %v564_v21 }
  0xd9   :  { %4993 = vmatpush1.bf16.msra.mxu0 %v11767_v28  ;;  %5165 = vmatpush1.bf16.msra.mxu1 %v11769_v29  ;;  %v572_v28 = vld [vmem:[#allocation2 + $0xd08] sm:$0xff]  ;;  %v11898_v29 = vcombine.high %v556_v19, %v564_v21  ;;  %v691_v21 = vld [vmem:[#allocation2 + $0x10c0] sm:$0xff] }
  0xda   :  { %4994 = vmatprep.subr.bf16.mxu0 %v11784_v30  ;;  %5166 = vmatprep.subr.bf16.mxu1 %v11786_v31  ;;  %v580_v30 = vld [vmem:[#allocation2 + $0xd48] sm:$0xff]  ;;  %v11895_v31 = vcombine.low %v555_v17, %v563_v18  ;;  %v136_v17 = vld [vmem:[%s14837_s0 + $0x10] sm:$0xff] }
  0xdb   :  { %v11914_v37 = vcombine.high %v572_v28, %v580_v30  ;;  %v143_v18 = vld [vmem:[%s14837_s0 + $0x48] sm:$0xff] }
  0xdd   :  { %4995 = vmatpush1.bf16.msra.mxu0 %v11783_v36  ;;  %5167 = vmatpush1.bf16.msra.mxu1 %v11785_v39  ;;  %v588_v36 = vld [vmem:[#allocation2 + $0xd88] sm:$0xff]  ;;  %v11911_v39 = vcombine.low %v571_v26, %v579_v27 }
  0xde   :  { %4996 = vmatprep.subr.bf16.mxu0 %v11800_v40  ;;  %5168 = vmatprep.subr.bf16.mxu1 %v11802_v43  ;;  %v11913_v40 = vcombine.low %v572_v28, %v580_v30  ;;  %v611_v43 = vld [vmem:[#allocation2 + $0xe40] sm:$0xff]  ;;  %v11930_v45 = vcombine.high %v588_v36, %v596_v38  ;;  %v692_v26 = vld [vmem:[#allocation2 + $0x10c8] sm:$0xff]  ;;  %v14617_v30 = vpack.c.bf16 %v143_v18, %v136_v17 }
  0xdf   :  { %v11944_v49 = vcombine.high %v603_v42, %v611_v43  ;;  %v11943_v55 = vcombine.low %v603_v42, %v611_v43  ;;  %v139_v27 = vld [vmem:[%s14837_s0 + $0x28] sm:$0xff]  ;;  %v715_v43 = vld [vmem:[#allocation2 + $0x1180] sm:$0xff] }
  0xe0   :  { %v788_v17 = vld [vmem:[#allocation2 + $0x13c8] sm:$0xff] }
  0xe1   :  { %4997 = vmatpush1.bf16.msra.mxu0 %v11799_v44  ;;  %5169 = vmatpush1.bf16.msra.mxu1 %v11801_v47  ;;  %v604_v44 = vld [vmem:[#allocation2 + $0xe08] sm:$0xff]  ;;  %v11927_v47 = vcombine.low %v587_v34, %v595_v35  ;;  %v699_v34 = vld [vmem:[#allocation2 + $0x1100] sm:$0xff] }
  0xe2   :  { %4998 = vmatprep.subr.bf16.mxu0 %v11816_v48  ;;  %5170 = vmatprep.subr.bf16.mxu1 %v11818_v51  ;;  %v11929_v48 = vcombine.low %v588_v36, %v596_v38  ;;  %v627_v51 = vld [vmem:[#allocation2 + $0xec0] sm:$0xff]  ;;  %v11945_v56 = vcombine.low %v604_v44, %v612_v46  ;;  %v700_v36 = vld [vmem:[#allocation2 + $0x1108] sm:$0xff] }
  0xe3   :  { %v11960_v57 = vcombine.high %v619_v50, %v627_v51  ;;  %v11959_v0 = vcombine.low %v619_v50, %v627_v51  ;;  %v707_v35 = vld [vmem:[#allocation2 + $0x1140] sm:$0xff]  ;;  %v708_v38 = vld [vmem:[#allocation2 + $0x1148] sm:$0xff] }
  0xe4   :  { %v12040_v42 = vcombine.high %v699_v34, %v707_v35  ;;  %v731_v51 = vld [vmem:[#allocation2 + $0x1200] sm:$0xff] }
  0xe5   :  { %4999 = vmatpush1.bf16.msra.mxu0 %v11815_v52  ;;  %5171 = vmatpush1.bf16.msra.mxu1 %v11817_v53  ;;  %v620_v52 = vld [vmem:[#allocation2 + $0xe88] sm:$0xff]  ;;  %v11946_v53 = vcombine.high %v604_v44, %v612_v46  ;;  %v723_v44 = vld [vmem:[#allocation2 + $0x11c0] sm:$0xff]  ;;  %v12042_v46 = vcombine.high %v700_v36, %v708_v38 }
  0xe6   :  { %5000 = vmatprep.subr.bf16.mxu0 %v11832_v54  ;;  %5172 = vmatprep.subr.bf16.mxu1 %v11834_v59  ;;  %v628_v54 = vld [vmem:[#allocation2 + $0xec8] sm:$0xff]  ;;  %v635_v59 = vld [vmem:[#allocation2 + $0xf00] sm:$0xff]  ;;  %v12056_v50 = vcombine.high %v715_v43, %v723_v44 }
  0xe7   :  { %v11961_v1 = vcombine.low %v620_v52, %v628_v54  ;;  %v11976_v2 = vcombine.high %v635_v59, %v643_v60  ;;  %v11975_v8 = vcombine.low %v635_v59, %v643_v60  ;;  %v747_v60 = vld [vmem:[#allocation2 + $0x1280] sm:$0xff] }
  0xe9   :  { %5001 = vmatpush1.bf16.msra.mxu0 %v11831_v61  ;;  %5173 = vmatpush1.bf16.msra.mxu1 %v11833_v62  ;;  %v636_v61 = vld [vmem:[#allocation2 + $0xf08] sm:$0xff]  ;;  %v11962_v62 = vcombine.high %v620_v52, %v628_v54  ;;  %v739_v52 = vld [vmem:[#allocation2 + $0x1240] sm:$0xff] }
  0xea   :  { %5002 = vmatprep.subr.bf16.mxu0 %v11848_v63  ;;  %5174 = vmatprep.subr.bf16.mxu1 %v11850_v3  ;;  %v644_v63 = vld [vmem:[#allocation2 + $0xf48] sm:$0xff]  ;;  %v651_v3 = vld [vmem:[#allocation2 + $0xf80] sm:$0xff]  ;;  %v12072_v59 = vcombine.high %v731_v51, %v739_v52 }
  0xeb   :  { %v11977_v10 = vcombine.low %v636_v61, %v644_v63  ;;  %v11991_v19 = vcombine.low %v651_v3, %v659_v4 }
  0xed   :  { %5003 = vmatpush1.bf16.msra.mxu0 %v11847_v5  ;;  %5175 = vmatpush1.bf16.msra.mxu1 %v11849_v6  ;;  %v652_v5 = vld [vmem:[#allocation2 + $0xf88] sm:$0xff]  ;;  %v11978_v6 = vcombine.high %v636_v61, %v644_v63  ;;  %v755_v61 = vld [vmem:[#allocation2 + $0x12c0] sm:$0xff] }
  0xee   :  { %5004 = vmatprep.subr.bf16.mxu0 %v11864_v7  ;;  %5176 = vmatprep.subr.bf16.mxu1 %v11866_v11  ;;  %v660_v7 = vld [vmem:[#allocation2 + $0xfc8] sm:$0xff]  ;;  %v11992_v11 = vcombine.high %v651_v3, %v659_v4  ;;  %v12088_v3 = vcombine.high %v747_v60, %v755_v61  ;;  %v763_v4 = vld [vmem:[#allocation2 + $0x1300] sm:$0xff] }
  0xf1   :  { %5005 = vmatpush1.bf16.msra.mxu0 %v11863_v13  ;;  %5177 = vmatpush1.bf16.msra.mxu1 %v11865_v14  ;;  %v668_v13 = vld [vmem:[#allocation2 + $0x1008] sm:$0xff] }
  0xf2   :  { %5006 = vmatprep.subr.bf16.mxu0 %v11880_v16  ;;  %5178 = vmatprep.subr.bf16.mxu1 %v11882_v20  ;;  %v676_v14 = vld [vmem:[#allocation2 + $0x1048] sm:$0xff]  ;;  %v11994_v16 = vcombine.high %v652_v5, %v660_v7  ;;  %v683_v20 = vld [vmem:[#allocation2 + $0x1080] sm:$0xff] }
  0xf3   :  { %v12010_v28 = vcombine.high %v668_v13, %v676_v14 }
  0xf5   :  { %5007 = vmatpush1.bf16.msra.mxu0 %v11879_v22  ;;  %5179 = vmatpush1.bf16.msra.mxu1 %v11881_v23  ;;  %v11993_v22 = vcombine.low %v652_v5, %v660_v7  ;;  %v12008_v23 = vcombine.high %v667_v9, %v675_v12  ;;  %v771_v5 = vld [vmem:[#allocation2 + $0x1340] sm:$0xff] }
  0xf6   :  { %5008 = vmatprep.subr.bf16.mxu0 %v11896_v24  ;;  %5180 = vmatprep.subr.bf16.mxu1 %v11898_v29  ;;  %v684_v24 = vld [vmem:[#allocation2 + $0x1088] sm:$0xff]  ;;  %v146_v29 = vld [vmem:[%s14837_s0 + $0x60] sm:$0xff]  ;;  %v12103_v18 = vcombine.low %v763_v4, %v771_v5 }
  0xf9   :  { %5009 = vmatpush1.bf16.msra.mxu0 %v11895_v31  ;;  %5181 = vmatpush1.bf16.msra.mxu1 %v11897_v32  ;;  %v12007_v31 = vcombine.low %v667_v9, %v675_v12  ;;  %v12009_v32 = vcombine.low %v668_v13, %v676_v14  ;;  %v12087_v9 = vcombine.low %v747_v60, %v755_v61  ;;  %v779_v12 = vld [vmem:[#allocation2 + $0x1380] sm:$0xff]  ;;  %v780_v14 = vld [vmem:[#allocation2 + $0x1388] sm:$0xff] }
  0xfa   :  { %5010 = vmatprep.subr.bf16.mxu0 %v11912_v33  ;;  %5182 = vmatprep.subr.bf16.mxu1 %v11914_v37  ;;  %v12024_v33 = vcombine.high %v683_v20, %v691_v21  ;;  %v12026_v37 = vcombine.high %v684_v24, %v692_v26  ;;  %v787_v13 = vld [vmem:[#allocation2 + $0x13c0] sm:$0xff]  ;;  %v868_v61 = vld [vmem:[#allocation2 + $0x1648] sm:$0xff] }
  0xfd   :  { %5011 = vmatpush1.bf16.msra.mxu0 %v11911_v39  ;;  %5183 = vmatpush1.bf16.msra.mxu1 %v11913_v40  ;;  %v14619_v39 = vpack.c.bf16 %v146_v29, %v139_v27  ;;  %v12023_v40 = vcombine.low %v683_v20, %v691_v21  ;;  %v12120_v20 = vcombine.high %v779_v12, %v787_v13  ;;  %v795_v21 = vld [vmem:[#allocation2 + $0x1400] sm:$0xff] }
  0xfe   :  { %5012 = vmatprep.subr.bf16.mxu0 %v11928_v41  ;;  %5184 = vmatprep.subr.bf16.mxu1 %v11930_v45  ;;  %v12025_v41 = vcombine.low %v684_v24, %v692_v26  ;;  %v716_v45 = vld [vmem:[#allocation2 + $0x1188] sm:$0xff]  ;;  %v12122_v24 = vcombine.high %v780_v14, %v788_v17  ;;  %v12119_v27 = vcombine.low %v779_v12, %v787_v13 }
  0xff   :  { %v804_v26 = vld [vmem:[#allocation2 + $0x1448] sm:$0xff] }
 0x100   :  { %v900_v13 = vld [vmem:[#allocation2 + $0x1748] sm:$0xff] }
 0x101   :  { %5013 = vmatpush1.bf16.msra.mxu0 %v11927_v47  ;;  %5185 = vmatpush1.bf16.msra.mxu1 %v11929_v48  ;;  %v724_v47 = vld [vmem:[#allocation2 + $0x11c8] sm:$0xff]  ;;  %v12039_v48 = vcombine.low %v699_v34, %v707_v35 }
 0x102   :  { %5014 = vmatprep.subr.bf16.mxu0 %v11944_v49  ;;  %5186 = vmatprep.subr.bf16.mxu1 %v11946_v53  ;;  %v12041_v49 = vcombine.low %v700_v36, %v708_v38  ;;  %v732_v53 = vld [vmem:[#allocation2 + $0x1208] sm:$0xff]  ;;  %v12058_v54 = vcombine.high %v716_v45, %v724_v47 }
 0x103   :  { %v820_v35 = vld [vmem:[#allocation2 + $0x14c8] sm:$0xff] }
 0x105   :  { %5015 = vmatpush1.bf16.msra.mxu0 %v11943_v55  ;;  %5187 = vmatpush1.bf16.msra.mxu1 %v11945_v56  ;;  %v740_v55 = vld [vmem:[#allocation2 + $0x1248] sm:$0xff]  ;;  %v12055_v56 = vcombine.low %v715_v43, %v723_v44 }
 0x106   :  { %5016 = vmatprep.subr.bf16.mxu0 %v11960_v57  ;;  %5188 = vmatprep.subr.bf16.mxu1 %v11962_v62  ;;  %v12057_v57 = vcombine.low %v716_v45, %v724_v47  ;;  %v748_v62 = vld [vmem:[#allocation2 + $0x1288] sm:$0xff]  ;;  %v12074_v63 = vcombine.high %v732_v53, %v740_v55 }
 0x107   :  { %v836_v44 = vld [vmem:[#allocation2 + $0x1548] sm:$0xff] }
 0x109   :  { %5017 = vmatpush1.bf16.msra.mxu0 %v11959_v0  ;;  %5189 = vmatpush1.bf16.msra.mxu1 %v11961_v1  ;;  %v756_v0 = vld [vmem:[#allocation2 + $0x12c8] sm:$0xff]  ;;  %v12071_v1 = vcombine.low %v731_v51, %v739_v52 }
 0x10a   :  { %5018 = vmatprep.subr.bf16.mxu0 %v11976_v2  ;;  %5190 = vmatprep.subr.bf16.mxu1 %v11978_v6  ;;  %v12073_v2 = vcombine.low %v732_v53, %v740_v55  ;;  %v764_v6 = vld [vmem:[#allocation2 + $0x1308] sm:$0xff]  ;;  %v12090_v7 = vcombine.high %v748_v62, %v756_v0 }
 0x10b   :  { %v852_v52 = vld [vmem:[#allocation2 + $0x15c8] sm:$0xff] }
 0x10d   :  { %5019 = vmatpush1.bf16.msra.mxu0 %v11975_v8  ;;  %5191 = vmatpush1.bf16.msra.mxu1 %v11977_v10  ;;  %v772_v8 = vld [vmem:[#allocation2 + $0x1348] sm:$0xff]  ;;  %v12089_v10 = vcombine.low %v748_v62, %v756_v0 }
 0x10e   :  { %5020 = vmatprep.subr.bf16.mxu0 %v11992_v11  ;;  %5192 = vmatprep.subr.bf16.mxu1 %v11994_v16  ;;  %v12104_v11 = vcombine.high %v763_v4, %v771_v5  ;;  %v12106_v16 = vcombine.high %v764_v6, %v772_v8  ;;  %v884_v5 = vld [vmem:[#allocation2 + $0x16c8] sm:$0xff] }
 0x111   :  { %5021 = vmatpush1.bf16.msra.mxu0 %v11991_v19  ;;  %5193 = vmatpush1.bf16.msra.mxu1 %v11993_v22  ;;  %v12105_v19 = vcombine.low %v764_v6, %v772_v8  ;;  %v803_v22 = vld [vmem:[#allocation2 + $0x1440] sm:$0xff] }
 0x112   :  { %5033 = vmatprep.subr.bf16.mxu0 %v12008_v23  ;;  %5205 = vmatprep.subr.bf16.mxu1 %v12010_v28  ;;  %v796_v23 = vld [vmem:[#allocation2 + $0x1408] sm:$0xff]  ;;  %v12121_v28 = vcombine.low %v780_v14, %v788_v17  ;;  %v12136_v29 = vcombine.high %v795_v21, %v803_v22  ;;  %v12135_v36 = vcombine.low %v795_v21, %v803_v22 }
 0x113   :  { %v12138_v34 = vcombine.high %v796_v23, %v804_v26  ;;  %v916_v22 = vld [vmem:[#allocation2 + $0x17c8] sm:$0xff] }
 0x114   :  { %5023 = vmatmul.mubr.bf16.vlgmr.msra.gmra.mrb[0].mxu0 %v14617_v30  ;;  %5195 = vmatmul.mubr.bf16.vlgmr.msra.gmra.mrb[0].mxu1 %v14617_v30 }
 0x115   :  { %5034 = vmatpush1.bf16.msra.mxu0 %v12007_v31  ;;  %5206 = vmatpush1.bf16.msra.mxu1 %v12009_v32  ;;  %v811_v31 = vld [vmem:[#allocation2 + $0x1480] sm:$0xff] }
 0x116   :  { %5035 = vmatprep.subr.bf16.mxu0 %v12024_v33  ;;  %5207 = vmatprep.subr.bf16.mxu1 %v12026_v37  ;;  %v819_v32 = vld [vmem:[#allocation2 + $0x14c0] sm:$0xff]  ;;  %v812_v33 = vld [vmem:[#allocation2 + $0x1488] sm:$0xff]  ;;  %v12137_v37 = vcombine.low %v796_v23, %v804_v26 }
 0x117   :  { %5065 = vmatprep.mubr.bf16.mxu0 %v14619_v39  ;;  %5237 = vmatprep.mubr.bf16.mxu1 %v14619_v39  ;;  %v12152_v38 = vcombine.high %v811_v31, %v819_v32  ;;  %v12154_v43 = vcombine.high %v812_v33, %v820_v35  ;;  %v12151_v45 = vcombine.low %v811_v31, %v819_v32  ;;  %v138_v32 = vld [vmem:[%s14837_s0 + $0x20] sm:$0xff] }
 0x119   :  { %5036 = vmatpush1.bf16.msra.mxu0 %v12023_v40  ;;  %5208 = vmatpush1.bf16.msra.mxu1 %v12025_v41  ;;  %v827_v40 = vld [vmem:[#allocation2 + $0x1500] sm:$0xff] }
 0x11a   :  { %5037 = vmatprep.subr.bf16.mxu0 %v12040_v42  ;;  %5209 = vmatprep.subr.bf16.mxu1 %v12042_v46  ;;  %v835_v41 = vld [vmem:[#allocation2 + $0x1540] sm:$0xff]  ;;  %v828_v42 = vld [vmem:[#allocation2 + $0x1508] sm:$0xff]  ;;  %v12153_v46 = vcombine.low %v812_v33, %v820_v35  ;;  %v145_v33 = vld [vmem:[%s14837_s0 + $0x58] sm:$0xff] }
 0x11b   :  { %v12168_v47 = vcombine.high %v827_v40, %v835_v41  ;;  %v12170_v51 = vcombine.high %v828_v42, %v836_v44  ;;  %v12167_v53 = vcombine.low %v827_v40, %v835_v41  ;;  %v165_v40 = vld [vmem:[#allocation2 + $0x50] sm:$0xff] }
 0x11d   :  { %5038 = vmatpush1.bf16.msra.mxu0 %v12039_v48  ;;  %5210 = vmatpush1.bf16.msra.mxu1 %v12041_v49  ;;  %v843_v48 = vld [vmem:[#allocation2 + $0x1580] sm:$0xff] }
 0x11e   :  { %5039 = vmatprep.subr.bf16.mxu0 %v12056_v50  ;;  %5211 = vmatprep.subr.bf16.mxu1 %v12058_v54  ;;  %v851_v49 = vld [vmem:[#allocation2 + $0x15c0] sm:$0xff]  ;;  %v844_v50 = vld [vmem:[#allocation2 + $0x1588] sm:$0xff]  ;;  %v12169_v54 = vcombine.low %v828_v42, %v836_v44  ;;  %v158_v42 = vld [vmem:[#allocation2 + $0x18] sm:$0xff]  ;;  %v14631_v44 = vpack.c.bf16 %v145_v33, %v138_v32 }
 0x11f   :  { %v12184_v55 = vcombine.high %v843_v48, %v851_v49  ;;  %v12186_v60 = vcombine.high %v844_v50, %v852_v52  ;;  %v12183_v62 = vcombine.low %v843_v48, %v851_v49  ;;  %v14418_v49 = vmov 0   ;;  %v253_v32 = vld [vmem:[#allocation2 + $0x310] sm:$0xff] }
 0x120   :  { %v261_v33 = vld [vmem:[#allocation2 + $0x350] sm:$0xff] }
 0x121   :  { %5040 = vmatpush1.bf16.msra.mxu0 %v12055_v56  ;;  %5212 = vmatpush1.bf16.msra.mxu1 %v12057_v57  ;;  %v859_v56 = vld [vmem:[#allocation2 + $0x1600] sm:$0xff] }
 0x122   :  { %5041 = vmatprep.subr.bf16.mxu0 %v12072_v59  ;;  %5213 = vmatprep.subr.bf16.mxu1 %v12074_v63  ;;  %v867_v57 = vld [vmem:[#allocation2 + $0x1640] sm:$0xff]  ;;  %v860_v59 = vld [vmem:[#allocation2 + $0x1608] sm:$0xff]  ;;  %v12185_v63 = vcombine.low %v844_v50, %v852_v52  ;;  %v140_v50 = vld [vmem:[%s14837_s0 + $0x30] sm:$0xff] }
 0x123   :  { %v12200_v0 = vcombine.high %v859_v56, %v867_v57  ;;  %v12202_v4 = vcombine.high %v860_v59, %v868_v61  ;;  %v12199_v6 = vcombine.low %v859_v56, %v867_v57  ;;  %v173_v52 = vld [vmem:[#allocation2 + $0x90] sm:$0xff] }
 0x125   :  { %5042 = vmatpush1.bf16.msra.mxu0 %v12071_v1  ;;  %5214 = vmatpush1.bf16.msra.mxu1 %v12073_v2  ;;  %v875_v1 = vld [vmem:[#allocation2 + $0x1680] sm:$0xff] }
 0x126   :  { %5043 = vmatprep.subr.bf16.mxu0 %v12088_v3  ;;  %5215 = vmatprep.subr.bf16.mxu1 %v12090_v7  ;;  %v883_v2 = vld [vmem:[#allocation2 + $0x16c0] sm:$0xff]  ;;  %v876_v3 = vld [vmem:[#allocation2 + $0x1688] sm:$0xff]  ;;  %v12201_v7 = vcombine.low %v860_v59, %v868_v61  ;;  %v189_v61 = vld [vmem:[#allocation2 + $0x110] sm:$0xff] }
 0x127   :  { %v12216_v8 = vcombine.high %v875_v1, %v883_v2  ;;  %v12218_v12 = vcombine.high %v876_v3, %v884_v5  ;;  %v12215_v14 = vcombine.low %v875_v1, %v883_v2  ;;  %v198_v1 = vld [vmem:[#allocation2 + $0x158] sm:$0xff] }
 0x129   :  { %5044 = vmatpush1.bf16.msra.mxu0 %v12087_v9  ;;  %5216 = vmatpush1.bf16.msra.mxu1 %v12089_v10  ;;  %v891_v9 = vld [vmem:[#allocation2 + $0x1700] sm:$0xff] }
 0x12a   :  { %5045 = vmatprep.subr.bf16.mxu0 %v12104_v11  ;;  %5217 = vmatprep.subr.bf16.mxu1 %v12106_v16  ;;  %v899_v10 = vld [vmem:[#allocation2 + $0x1740] sm:$0xff]  ;;  %v892_v11 = vld [vmem:[#allocation2 + $0x1708] sm:$0xff]  ;;  %v12217_v16 = vcombine.low %v876_v3, %v884_v5  ;;  %v205_v5 = vld [vmem:[#allocation2 + $0x190] sm:$0xff] }
 0x12b   :  { %v12232_v17 = vcombine.high %v891_v9, %v899_v10  ;;  %v12234_v21 = vcombine.high %v892_v11, %v900_v13  ;;  %v12231_v23 = vcombine.low %v891_v9, %v899_v10  ;;  %v214_v9 = vld [vmem:[#allocation2 + $0x1d8] sm:$0xff] }
 0x12d   :  { %5046 = vmatpush1.bf16.msra.mxu0 %v12103_v18  ;;  %5218 = vmatpush1.bf16.msra.mxu1 %v12105_v19  ;;  %v907_v18 = vld [vmem:[#allocation2 + $0x1780] sm:$0xff] }
 0x12e   :  { %5047 = vmatprep.subr.bf16.mxu0 %v12120_v20  ;;  %5219 = vmatprep.subr.bf16.mxu1 %v12122_v24  ;;  %v915_v19 = vld [vmem:[#allocation2 + $0x17c0] sm:$0xff]  ;;  %v908_v20 = vld [vmem:[#allocation2 + $0x1788] sm:$0xff]  ;;  %v12233_v24 = vcombine.low %v892_v11, %v900_v13  ;;  %v221_v13 = vld [vmem:[#allocation2 + $0x210] sm:$0xff] }
 0x12f   :  { %v12248_v26 = vcombine.high %v907_v18, %v915_v19  ;;  %v12250_v31 = vcombine.high %v908_v20, %v916_v22  ;;  %v12247_v35 = vcombine.low %v907_v18, %v915_v19  ;;  %v230_v18 = vld [vmem:[#allocation2 + $0x258] sm:$0xff] }
 0x131   :  { %5048 = vmatpush1.bf16.msra.mxu0 %v12119_v27  ;;  %5220 = vmatpush1.bf16.msra.mxu1 %v12121_v28  ;;  %v923_v27 = vld [vmem:[#allocation2 + $0x1800] sm:$0xff] }
 0x132   :  { %5049 = vmatprep.subr.bf16.mxu0 %v12136_v29  ;;  %5221 = vmatprep.subr.bf16.mxu1 %v12138_v34  ;;  %v931_v28 = vld [vmem:[#allocation2 + $0x1840] sm:$0xff]  ;;  %v924_v29 = vld [vmem:[#allocation2 + $0x1808] sm:$0xff] }
 0x133   :  { %v932_v34 = vld [vmem:[#allocation2 + $0x1848] sm:$0xff] }
 0x134   :  { %v12266_v41 = vcombine.high %v924_v29, %v932_v34 }
 0x135   :  { %5050 = vmatpush1.bf16.msra.mxu0 %v12135_v36  ;;  %5222 = vmatpush1.bf16.msra.mxu1 %v12137_v37  ;;  %v12249_v36 = vcombine.low %v908_v20, %v916_v22  ;;  %v12264_v37 = vcombine.high %v923_v27, %v931_v28  ;;  %v237_v22 = vld [vmem:[#allocation2 + $0x290] sm:$0xff] }
 0x136   :  { %5051 = vmatprep.subr.bf16.mxu0 %v12152_v38  ;;  %5223 = vmatprep.subr.bf16.mxu1 %v12154_v43  ;;  %v157_v38 = vld [vmem:[#allocation2 + $0x10] sm:$0xff]  ;;  %v166_v43 = vld [vmem:[#allocation2 + $0x58] sm:$0xff] }
 0x137   :  { %v11502_v48 = vcombine.high %v158_v42, %v166_v43  ;;  %v11499_v57 = vcombine.low %v157_v38, %v165_v40  ;;  %v11501_v59 = vcombine.low %v158_v42, %v166_v43  ;;  %v277_v42 = vld [vmem:[#allocation2 + $0x3d0] sm:$0xff]  ;;  %v270_v43 = vld [vmem:[#allocation2 + $0x398] sm:$0xff] }
 0x139   :  { %5052 = vmatpush1.bf16.msra.mxu0 %v12151_v45  ;;  %5224 = vmatpush1.bf16.msra.mxu1 %v12153_v46  ;;  %v12263_v45 = vcombine.low %v923_v27, %v931_v28  ;;  %v12265_v46 = vcombine.low %v924_v29, %v932_v34  ;;  %v246_v27 = vld [vmem:[#allocation2 + $0x2d8] sm:$0xff] }
 0x13a   :  { %5053 = vmatprep.subr.bf16.mxu0 %v12168_v47  ;;  %5225 = vmatprep.subr.bf16.mxu1 %v12170_v51  ;;  %v11500_v47 = vcombine.high %v157_v38, %v165_v40  ;;  %v147_v51 = vld [vmem:[%s14837_s0 + $0x68] sm:$0xff]  ;;  %v254_v34 = vld [vmem:[#allocation2 + $0x318] sm:$0xff]  ;;  %v11596_v40 = vcombine.high %v253_v32, %v261_v33 }
 0x13b   :  { %v14643_v56 = vpack.c.bf16 %v147_v51, %v140_v50  ;;  %v285_v51 = vld [vmem:[#allocation2 + $0x410] sm:$0xff] }
 0x13d   :  { %5054 = vmatpush1.bf16.msra.mxu0 %v12167_v53  ;;  %5226 = vmatpush1.bf16.msra.mxu1 %v12169_v54  ;;  %v181_v53 = vld [vmem:[#allocation2 + $0xd0] sm:$0xff]  ;;  %v174_v54 = vld [vmem:[#allocation2 + $0x98] sm:$0xff] }
 0x13e   :  { %5055 = vmatprep.subr.bf16.mxu0 %v12184_v55  ;;  %5227 = vmatprep.subr.bf16.mxu1 %v12186_v60  ;;  %v182_v55 = vld [vmem:[#allocation2 + $0xd8] sm:$0xff]  ;;  %v11516_v60 = vcombine.high %v173_v52, %v181_v53  ;;  %v11515_v2 = vcombine.low %v173_v52, %v181_v53  ;;  %v293_v52 = vld [vmem:[#allocation2 + $0x450] sm:$0xff] }
 0x13f   :  { %v11517_v3 = vcombine.low %v174_v54, %v182_v55  ;;  %v286_v53 = vld [vmem:[#allocation2 + $0x418] sm:$0xff] }
 0x141   :  { %5056 = vmatpush1.bf16.msra.mxu0 %v12183_v62  ;;  %5228 = vmatpush1.bf16.msra.mxu1 %v12185_v63  ;;  %v197_v62 = vld [vmem:[#allocation2 + $0x150] sm:$0xff]  ;;  %v190_v63 = vld [vmem:[#allocation2 + $0x118] sm:$0xff] }
 0x142   :  { %5057 = vmatprep.subr.bf16.mxu0 %v12200_v0  ;;  %5229 = vmatprep.subr.bf16.mxu1 %v12202_v4  ;;  %v11518_v0 = vcombine.high %v174_v54, %v182_v55  ;;  %v11532_v4 = vcombine.high %v189_v61, %v197_v62  ;;  %v11531_v10 = vcombine.low %v189_v61, %v197_v62  ;;  %v294_v55 = vld [vmem:[#allocation2 + $0x458] sm:$0xff]  ;;  %v301_v61 = vld [vmem:[#allocation2 + $0x490] sm:$0xff] }
 0x143   :  { %v11533_v11 = vcombine.low %v190_v63, %v198_v1  ;;  %v309_v62 = vld [vmem:[#allocation2 + $0x4d0] sm:$0xff] }
 0x145   :  { %5058 = vmatpush1.bf16.msra.mxu0 %v12199_v6  ;;  %5230 = vmatpush1.bf16.msra.mxu1 %v12201_v7  ;;  %v213_v6 = vld [vmem:[#allocation2 + $0x1d0] sm:$0xff]  ;;  %v206_v7 = vld [vmem:[#allocation2 + $0x198] sm:$0xff] }
 0x146   :  { %5059 = vmatprep.subr.bf16.mxu0 %v12216_v8  ;;  %5231 = vmatprep.subr.bf16.mxu1 %v12218_v12  ;;  %v11534_v8 = vcombine.high %v190_v63, %v198_v1  ;;  %v11548_v12 = vcombine.high %v205_v5, %v213_v6  ;;  %v11547_v19 = vcombine.low %v205_v5, %v213_v6  ;;  %v302_v63 = vld [vmem:[#allocation2 + $0x498] sm:$0xff]  ;;  %v317_v5 = vld [vmem:[#allocation2 + $0x510] sm:$0xff] }
 0x147   :  { %v11549_v20 = vcombine.low %v206_v7, %v214_v9  ;;  %v310_v1 = vld [vmem:[#allocation2 + $0x4d8] sm:$0xff]  ;;  %v325_v6 = vld [vmem:[#allocation2 + $0x550] sm:$0xff] }
 0x149   :  { %5060 = vmatpush1.bf16.msra.mxu0 %v12215_v14  ;;  %5232 = vmatpush1.bf16.msra.mxu1 %v12217_v16  ;;  %v229_v14 = vld [vmem:[#allocation2 + $0x250] sm:$0xff]  ;;  %v222_v16 = vld [vmem:[#allocation2 + $0x218] sm:$0xff] }
 0x14a   :  { %5061 = vmatprep.subr.bf16.mxu0 %v12232_v17  ;;  %5233 = vmatprep.subr.bf16.mxu1 %v12234_v21  ;;  %v11550_v17 = vcombine.high %v206_v7, %v214_v9  ;;  %v11564_v21 = vcombine.high %v221_v13, %v229_v14  ;;  %v11563_v28 = vcombine.low %v221_v13, %v229_v14  ;;  %v318_v7 = vld [vmem:[#allocation2 + $0x518] sm:$0xff]  ;;  %v333_v13 = vld [vmem:[#allocation2 + $0x590] sm:$0xff] }
 0x14b   :  { %v11565_v29 = vcombine.low %v222_v16, %v230_v18  ;;  %v326_v9 = vld [vmem:[#allocation2 + $0x558] sm:$0xff]  ;;  %v341_v14 = vld [vmem:[#allocation2 + $0x5d0] sm:$0xff] }
 0x14d   :  { %5062 = vmatpush1.bf16.msra.mxu0 %v12231_v23  ;;  %5234 = vmatpush1.bf16.msra.mxu1 %v12233_v24  ;;  %v245_v23 = vld [vmem:[#allocation2 + $0x2d0] sm:$0xff]  ;;  %v238_v24 = vld [vmem:[#allocation2 + $0x298] sm:$0xff] }
 0x14e   :  { %5063 = vmatprep.subr.bf16.mxu0 %v12248_v26  ;;  %5235 = vmatprep.subr.bf16.mxu1 %v12250_v31  ;;  %v11566_v26 = vcombine.high %v222_v16, %v230_v18  ;;  %v11580_v31 = vcombine.high %v237_v22, %v245_v23  ;;  %v11581_v38 = vcombine.low %v238_v24, %v246_v27  ;;  %v334_v16 = vld [vmem:[#allocation2 + $0x598] sm:$0xff] }
 0x14f   :  { %v342_v18 = vld [vmem:[#allocation2 + $0x5d8] sm:$0xff] }
 0x151   :  { %5064 = vmatpush1.bf16.msra.mxu0 %v12247_v35  ;;  %5236 = vmatpush1.bf16.msra.mxu1 %v12249_v36  ;;  %v11582_v35 = vcombine.high %v238_v24, %v246_v27  ;;  %v262_v36 = vld [vmem:[#allocation2 + $0x358] sm:$0xff] }
 0x152   :  { %5076 = vmatprep.subr.bf16.mxu0 %v12264_v37  ;;  %5248 = vmatprep.subr.bf16.mxu1 %v12266_v41  ;;  %v11579_v37 = vcombine.low %v237_v22, %v245_v23  ;;  %v269_v41 = vld [vmem:[#allocation2 + $0x390] sm:$0xff]  ;;  %v350_v24 = vld [vmem:[#allocation2 + $0x618] sm:$0xff] }
 0x153   :  { %v11612_v50 = vcombine.high %v269_v41, %v277_v42  ;;  %v349_v22 = vld [vmem:[#allocation2 + $0x610] sm:$0xff]  ;;  %v358_v27 = vld [vmem:[#allocation2 + $0x658] sm:$0xff] }
 0x154   :  { %5066 = vmatmul.mubr.bf16.vlgmr.msra.gmra.mrb[0].mxu0 %v14631_v44  ;;  %5238 = vmatmul.mubr.bf16.vlgmr.msra.gmra.mrb[0].mxu1 %v14631_v44  ;;  %v357_v23 = vld [vmem:[#allocation2 + $0x650] sm:$0xff] }
 0x155   :  { %5077 = vmatpush1.bf16.msra.mxu0 %v12263_v45  ;;  %5249 = vmatpush1.bf16.msra.mxu1 %v12265_v46  ;;  %v11598_v45 = vcombine.high %v254_v34, %v262_v36  ;;  %v278_v46 = vld [vmem:[#allocation2 + $0x3d8] sm:$0xff] }
 0x156   :  { %5108 = vmatprep.mubr.bf16.mxu0 %v14418_v49  ;;  %5280 = vmatprep.mubr.bf16.mxu1 %v14418_v49  ;;  %v11614_v54 = vcombine.high %v270_v43, %v278_v46 }
 0x157   :  { %5291 = vmatprep.subr.bf16.mxu0 %v11500_v47  ;;  %5463 = vmatprep.subr.bf16.mxu1 %v11502_v48  ;;  %v11595_v47 = vcombine.low %v253_v32, %v261_v33  ;;  %v11597_v48 = vcombine.low %v254_v34, %v262_v36  ;;  %v365_v32 = vld [vmem:[#allocation2 + $0x690] sm:$0xff]  ;;  %v366_v34 = vld [vmem:[#allocation2 + $0x698] sm:$0xff] }
 0x158   :  { %v373_v33 = vld [vmem:[#allocation2 + $0x6d0] sm:$0xff]  ;;  %v374_v36 = vld [vmem:[#allocation2 + $0x6d8] sm:$0xff] }
 0x160   :  { %12279 = vmatmul.mubr.msk.bf16.vlgmr.msra.gmra.mrb[0].mxu0 %vm4943_vm0, %v14643_v56  ;;  %12280 = vmatmul.mubr.msk.bf16.vlgmr.msra.gmra.mrb[0].mxu1 %vm4943_vm0, %v14643_v56 }
 0x161   :  { %5292 = vmatpush1.bf16.msra.mxu0 %v11499_v57  ;;  %5464 = vmatpush1.bf16.msra.mxu1 %v11501_v59  ;;  %v11611_v57 = vcombine.low %v269_v41, %v277_v42  ;;  %v11613_v59 = vcombine.low %v270_v43, %v278_v46  ;;  %v381_v41 = vld [vmem:[#allocation2 + $0x710] sm:$0xff]  ;;  %v382_v43 = vld [vmem:[#allocation2 + $0x718] sm:$0xff] }
 0x162   :  { %5293 = vmatprep.subr.bf16.mxu0 %v11516_v60  ;;  %5465 = vmatprep.subr.bf16.mxu1 %v11518_v0  ;;  %v11628_v60 = vcombine.high %v285_v51, %v293_v52  ;;  %v11630_v0 = vcombine.high %v286_v53, %v294_v55  ;;  %v389_v42 = vld [vmem:[#allocation2 + $0x750] sm:$0xff]  ;;  %v390_v46 = vld [vmem:[#allocation2 + $0x758] sm:$0xff] }
 0x163   :  { %5323 = vmatprep.mubr.bf16.mxu0 %v14581_v58  ;;  %5495 = vmatprep.mubr.bf16.mxu1 %v14581_v58 }
 0x165   :  { %5294 = vmatpush1.bf16.msra.mxu0 %v11515_v2  ;;  %5466 = vmatpush1.bf16.msra.mxu1 %v11517_v3  ;;  %v11627_v2 = vcombine.low %v285_v51, %v293_v52  ;;  %v11629_v3 = vcombine.low %v286_v53, %v294_v55  ;;  %v397_v51 = vld [vmem:[#allocation2 + $0x790] sm:$0xff]  ;;  %v398_v53 = vld [vmem:[#allocation2 + $0x798] sm:$0xff] }
 0x166   :  { %5295 = vmatprep.subr.bf16.mxu0 %v11532_v4  ;;  %5467 = vmatprep.subr.bf16.mxu1 %v11534_v8  ;;  %v11644_v4 = vcombine.high %v301_v61, %v309_v62  ;;  %v11646_v8 = vcombine.high %v302_v63, %v310_v1  ;;  %v405_v52 = vld [vmem:[#allocation2 + $0x7d0] sm:$0xff]  ;;  %v406_v55 = vld [vmem:[#allocation2 + $0x7d8] sm:$0xff] }
 0x169   :  { %5296 = vmatpush1.bf16.msra.mxu0 %v11531_v10  ;;  %5468 = vmatpush1.bf16.msra.mxu1 %v11533_v11  ;;  %v11643_v10 = vcombine.low %v301_v61, %v309_v62  ;;  %v11645_v11 = vcombine.low %v302_v63, %v310_v1  ;;  %v413_v61 = vld [vmem:[#allocation2 + $0x810] sm:$0xff]  ;;  %v414_v63 = vld [vmem:[#allocation2 + $0x818] sm:$0xff] }
 0x16a   :  { %5297 = vmatprep.subr.bf16.mxu0 %v11548_v12  ;;  %5469 = vmatprep.subr.bf16.mxu1 %v11550_v17  ;;  %v11660_v12 = vcombine.high %v317_v5, %v325_v6  ;;  %v11662_v17 = vcombine.high %v318_v7, %v326_v9  ;;  %v421_v62 = vld [vmem:[#allocation2 + $0x850] sm:$0xff]  ;;  %v422_v1 = vld [vmem:[#allocation2 + $0x858] sm:$0xff] }
 0x16d   :  { %5298 = vmatpush1.bf16.msra.mxu0 %v11547_v19  ;;  %5470 = vmatpush1.bf16.msra.mxu1 %v11549_v20  ;;  %v11659_v19 = vcombine.low %v317_v5, %v325_v6  ;;  %v11661_v20 = vcombine.low %v318_v7, %v326_v9  ;;  %v429_v5 = vld [vmem:[#allocation2 + $0x890] sm:$0xff]  ;;  %v430_v7 = vld [vmem:[#allocation2 + $0x898] sm:$0xff] }
 0x16e   :  { %5299 = vmatprep.subr.bf16.mxu0 %v11564_v21  ;;  %5471 = vmatprep.subr.bf16.mxu1 %v11566_v26  ;;  %v11676_v21 = vcombine.high %v333_v13, %v341_v14  ;;  %v11678_v26 = vcombine.high %v334_v16, %v342_v18  ;;  %v437_v6 = vld [vmem:[#allocation2 + $0x8d0] sm:$0xff]  ;;  %v438_v9 = vld [vmem:[#allocation2 + $0x8d8] sm:$0xff] }
 0x171   :  { %5300 = vmatpush1.bf16.msra.mxu0 %v11563_v28  ;;  %5472 = vmatpush1.bf16.msra.mxu1 %v11565_v29  ;;  %v11675_v28 = vcombine.low %v333_v13, %v341_v14  ;;  %v11677_v29 = vcombine.low %v334_v16, %v342_v18  ;;  %v11757_v13 = vcombine.low %v414_v63, %v422_v1  ;;  %v454_v18 = vld [vmem:[#allocation2 + $0x958] sm:$0xff] }
 0x172   :  { %5301 = vmatprep.subr.bf16.mxu0 %v11580_v31  ;;  %5473 = vmatprep.subr.bf16.mxu1 %v11582_v35  ;;  %v11692_v31 = vcombine.high %v349_v22, %v357_v23  ;;  %v11694_v35 = vcombine.high %v350_v24, %v358_v27  ;;  %v11772_v14 = vcombine.high %v429_v5, %v437_v6 }
 0x173   :  { %v11774_v16 = vcombine.high %v430_v7, %v438_v9 }
 0x175   :  { %5302 = vmatpush1.bf16.msra.mxu0 %v11579_v37  ;;  %5474 = vmatpush1.bf16.msra.mxu1 %v11581_v38  ;;  %v11691_v37 = vcombine.low %v349_v22, %v357_v23  ;;  %v11693_v38 = vcombine.low %v350_v24, %v358_v27  ;;  %v461_v23 = vld [vmem:[#allocation2 + $0x990] sm:$0xff]  ;;  %v470_v27 = vld [vmem:[#allocation2 + $0x9d8] sm:$0xff] }
 0x176   :  { %5303 = vmatprep.subr.bf16.mxu0 %v11596_v40  ;;  %5475 = vmatprep.subr.bf16.mxu1 %v11598_v45  ;;  %v11708_v40 = vcombine.high %v365_v32, %v373_v33  ;;  %v11710_v45 = vcombine.high %v366_v34, %v374_v36  ;;  %v469_v24 = vld [vmem:[#allocation2 + $0x9d0] sm:$0xff] }
 0x179   :  { %5304 = vmatpush1.bf16.msra.mxu0 %v11595_v47  ;;  %5476 = vmatpush1.bf16.msra.mxu1 %v11597_v48  ;;  %v11707_v47 = vcombine.low %v365_v32, %v373_v33  ;;  %v11709_v48 = vcombine.low %v366_v34, %v374_v36  ;;  %v11804_v33 = vcombine.high %v461_v23, %v469_v24  ;;  %v478_v34 = vld [vmem:[#allocation2 + $0xa18] sm:$0xff] }
 0x17a   :  { %5305 = vmatprep.subr.bf16.mxu0 %v11612_v50  ;;  %5477 = vmatprep.subr.bf16.mxu1 %v11614_v54  ;;  %v11724_v50 = vcombine.high %v381_v41, %v389_v42  ;;  %v11726_v54 = vcombine.high %v382_v43, %v390_v46 }
 0x17d   :  { %5306 = vmatpush1.bf16.msra.mxu0 %v11611_v57  ;;  %5478 = vmatpush1.bf16.msra.mxu1 %v11613_v59  ;;  %v11723_v57 = vcombine.low %v381_v41, %v389_v42  ;;  %v11725_v59 = vcombine.low %v382_v43, %v390_v46  ;;  %v494_v43 = vld [vmem:[#allocation2 + $0xa98] sm:$0xff] }
 0x17e   :  { %5307 = vmatprep.subr.bf16.mxu0 %v11628_v60  ;;  %5479 = vmatprep.subr.bf16.mxu1 %v11630_v0  ;;  %v11740_v60 = vcombine.high %v397_v51, %v405_v52  ;;  %v11742_v0 = vcombine.high %v398_v53, %v406_v55 }
 0x181   :  { %5308 = vmatpush1.bf16.msra.mxu0 %v11627_v2  ;;  %5480 = vmatpush1.bf16.msra.mxu1 %v11629_v3  ;;  %v11739_v2 = vcombine.low %v397_v51, %v405_v52  ;;  %v11741_v3 = vcombine.low %v398_v53, %v406_v55  ;;  %v509_v51 = vld [vmem:[#allocation2 + $0xb10] sm:$0xff]  ;;  %v510_v53 = vld [vmem:[#allocation2 + $0xb18] sm:$0xff] }
 0x182   :  { %5309 = vmatprep.subr.bf16.mxu0 %v11644_v4  ;;  %5481 = vmatprep.subr.bf16.mxu1 %v11646_v8  ;;  %v11756_v4 = vcombine.high %v413_v61, %v421_v62  ;;  %v11758_v8 = vcombine.high %v414_v63, %v422_v1  ;;  %v517_v52 = vld [vmem:[#allocation2 + $0xb50] sm:$0xff]  ;;  %v518_v55 = vld [vmem:[#allocation2 + $0xb58] sm:$0xff] }
 0x183   :  { %v11854_v63 = vcombine.high %v510_v53, %v518_v55  ;;  %v534_v1 = vld [vmem:[#allocation2 + $0xbd8] sm:$0xff] }
 0x185   :  { %5310 = vmatpush1.bf16.msra.mxu0 %v11643_v10  ;;  %5482 = vmatpush1.bf16.msra.mxu1 %v11645_v11  ;;  %v11755_v10 = vcombine.low %v413_v61, %v421_v62  ;;  %v445_v11 = vld [vmem:[#allocation2 + $0x910] sm:$0xff] }
 0x186   :  { %5311 = vmatprep.subr.bf16.mxu0 %v11660_v12  ;;  %5483 = vmatprep.subr.bf16.mxu1 %v11662_v17  ;;  %v453_v12 = vld [vmem:[#allocation2 + $0x950] sm:$0xff]  ;;  %v446_v17 = vld [vmem:[#allocation2 + $0x918] sm:$0xff] }
 0x187   :  { %v11790_v22 = vcombine.high %v446_v17, %v454_v18  ;;  %v11789_v32 = vcombine.low %v446_v17, %v454_v18  ;;  %v525_v61 = vld [vmem:[#allocation2 + $0xb90] sm:$0xff]  ;;  %v566_v18 = vld [vmem:[#allocation2 + $0xcd8] sm:$0xff] }
 0x188   :  { %v533_v62 = vld [vmem:[#allocation2 + $0xbd0] sm:$0xff] }
 0x189   :  { %5312 = vmatpush1.bf16.msra.mxu0 %v11659_v19  ;;  %5484 = vmatpush1.bf16.msra.mxu1 %v11661_v20  ;;  %v11771_v19 = vcombine.low %v429_v5, %v437_v6  ;;  %v11773_v20 = vcombine.low %v430_v7, %v438_v9  ;;  %v541_v5 = vld [vmem:[#allocation2 + $0xc10] sm:$0xff]  ;;  %v542_v7 = vld [vmem:[#allocation2 + $0xc18] sm:$0xff] }
 0x18a   :  { %5313 = vmatprep.subr.bf16.mxu0 %v11676_v21  ;;  %5485 = vmatprep.subr.bf16.mxu1 %v11678_v26  ;;  %v11788_v21 = vcombine.high %v445_v11, %v453_v12  ;;  %v462_v26 = vld [vmem:[#allocation2 + $0x998] sm:$0xff]  ;;  %v549_v6 = vld [vmem:[#allocation2 + $0xc50] sm:$0xff] }
 0x18b   :  { %v11806_v36 = vcombine.high %v462_v26, %v470_v27  ;;  %v11805_v41 = vcombine.low %v462_v26, %v470_v27  ;;  %v550_v9 = vld [vmem:[#allocation2 + $0xc58] sm:$0xff] }
 0x18c   :  { %v11886_v17 = vcombine.high %v542_v7, %v550_v9  ;;  %v582_v27 = vld [vmem:[#allocation2 + $0xd58] sm:$0xff] }
 0x18d   :  { %5314 = vmatpush1.bf16.msra.mxu0 %v11675_v28  ;;  %5486 = vmatpush1.bf16.msra.mxu1 %v11677_v29  ;;  %v11787_v28 = vcombine.low %v445_v11, %v453_v12  ;;  %v477_v29 = vld [vmem:[#allocation2 + $0xa10] sm:$0xff]  ;;  %v11884_v12 = vcombine.high %v541_v5, %v549_v6 }
 0x18e   :  { %5315 = vmatprep.subr.bf16.mxu0 %v11692_v31  ;;  %5487 = vmatprep.subr.bf16.mxu1 %v11694_v35  ;;  %v485_v31 = vld [vmem:[#allocation2 + $0xa50] sm:$0xff]  ;;  %v486_v35 = vld [vmem:[#allocation2 + $0xa58] sm:$0xff] }
 0x18f   :  { %v11820_v42 = vcombine.high %v477_v29, %v485_v31  ;;  %v11822_v46 = vcombine.high %v478_v34, %v486_v35 }
 0x191   :  { %5316 = vmatpush1.bf16.msra.mxu0 %v11691_v37  ;;  %5488 = vmatpush1.bf16.msra.mxu1 %v11693_v38  ;;  %v11803_v37 = vcombine.low %v461_v23, %v469_v24  ;;  %v493_v38 = vld [vmem:[#allocation2 + $0xa90] sm:$0xff]  ;;  %v574_v24 = vld [vmem:[#allocation2 + $0xd18] sm:$0xff] }
 0x192   :  { %5317 = vmatprep.subr.bf16.mxu0 %v11708_v40  ;;  %5489 = vmatprep.subr.bf16.mxu1 %v11710_v45  ;;  %v501_v40 = vld [vmem:[#allocation2 + $0xad0] sm:$0xff]  ;;  %v502_v45 = vld [vmem:[#allocation2 + $0xad8] sm:$0xff] }
 0x193   :  { %v581_v23 = vld [vmem:[#allocation2 + $0xd50] sm:$0xff] }
 0x195   :  { %5318 = vmatpush1.bf16.msra.mxu0 %v11707_v47  ;;  %5490 = vmatpush1.bf16.msra.mxu1 %v11709_v48  ;;  %v11819_v47 = vcombine.low %v477_v29, %v485_v31  ;;  %v11821_v48 = vcombine.low %v478_v34, %v486_v35  ;;  %v590_v34 = vld [vmem:[#allocation2 + $0xd98] sm:$0xff]  ;;  %v11918_v35 = vcombine.high %v574_v24, %v582_v27 }
 0x196   :  { %5319 = vmatprep.subr.bf16.mxu0 %v11724_v50  ;;  %5491 = vmatprep.subr.bf16.mxu1 %v11726_v54  ;;  %v11836_v50 = vcombine.high %v493_v38, %v501_v40  ;;  %v11838_v54 = vcombine.high %v494_v43, %v502_v45 }
 0x199   :  { %5320 = vmatpush1.bf16.msra.mxu0 %v11723_v57  ;;  %5492 = vmatpush1.bf16.msra.mxu1 %v11725_v59  ;;  %v11835_v57 = vcombine.low %v493_v38, %v501_v40  ;;  %v11837_v59 = vcombine.low %v494_v43, %v502_v45  ;;  %v11917_v38 = vcombine.low %v574_v24, %v582_v27  ;;  %v606_v43 = vld [vmem:[#allocation2 + $0xe18] sm:$0xff] }
 0x19a   :  { %5321 = vmatprep.subr.bf16.mxu0 %v11740_v60  ;;  %5493 = vmatprep.subr.bf16.mxu1 %v11742_v0  ;;  %v11852_v60 = vcombine.high %v509_v51, %v517_v52  ;;  %v526_v0 = vld [vmem:[#allocation2 + $0xb98] sm:$0xff] }
 0x19b   :  { %v11869_v11 = vcombine.low %v526_v0, %v534_v1  ;;  %v686_v24 = vld [vmem:[#allocation2 + $0x1098] sm:$0xff] }
 0x19c   :  { %v694_v27 = vld [vmem:[#allocation2 + $0x10d8] sm:$0xff] }
 0x19d   :  { %5322 = vmatpush1.bf16.msra.mxu0 %v11739_v2  ;;  %5494 = vmatpush1.bf16.msra.mxu1 %v11741_v3  ;;  %v11851_v2 = vcombine.low %v509_v51, %v517_v52  ;;  %v11853_v3 = vcombine.low %v510_v53, %v518_v55  ;;  %v621_v51 = vld [vmem:[#allocation2 + $0xe90] sm:$0xff]  ;;  %v622_v53 = vld [vmem:[#allocation2 + $0xe98] sm:$0xff] }
 0x19e   :  { %5334 = vmatprep.subr.bf16.mxu0 %v11756_v4  ;;  %5506 = vmatprep.subr.bf16.mxu1 %v11758_v8  ;;  %v11868_v4 = vcombine.high %v525_v61, %v533_v62  ;;  %v11870_v8 = vcombine.high %v526_v0, %v534_v1  ;;  %v629_v52 = vld [vmem:[#allocation2 + $0xed0] sm:$0xff]  ;;  %v630_v55 = vld [vmem:[#allocation2 + $0xed8] sm:$0xff] }
 0x19f   :  { %v11966_v0 = vcombine.high %v622_v53, %v630_v55  ;;  %v646_v1 = vld [vmem:[#allocation2 + $0xf58] sm:$0xff] }
 0x1a0   :  { %5324 = vmatmul.mubr.bf16.vlgmr.msra.gmra.mrb[4].mxu0 %v14591_v15  ;;  %5496 = vmatmul.mubr.bf16.vlgmr.msra.gmra.mrb[4].mxu1 %v14591_v15 }
 0x1a1   :  { %5335 = vmatpush1.bf16.msra.mxu0 %v11755_v10  ;;  %5507 = vmatpush1.bf16.msra.mxu1 %v11757_v13  ;;  %v11867_v10 = vcombine.low %v525_v61, %v533_v62  ;;  %v557_v13 = vld [vmem:[#allocation2 + $0xc90] sm:$0xff] }
 0x1a2   :  { %5336 = vmatprep.subr.bf16.mxu0 %v11772_v14  ;;  %5508 = vmatprep.subr.bf16.mxu1 %v11774_v16  ;;  %v565_v14 = vld [vmem:[#allocation2 + $0xcd0] sm:$0xff]  ;;  %v558_v16 = vld [vmem:[#allocation2 + $0xc98] sm:$0xff] }
 0x1a3   :  { %5366 = vmatprep.mubr.bf16.mxu0 %v14599_v25  ;;  %5538 = vmatprep.mubr.bf16.mxu1 %v14599_v25  ;;  %v11902_v26 = vcombine.high %v558_v16, %v566_v18  ;;  %v11901_v29 = vcombine.low %v558_v16, %v566_v18  ;;  %v637_v61 = vld [vmem:[#allocation2 + $0xf10] sm:$0xff]  ;;  %v670_v16 = vld [vmem:[#allocation2 + $0x1018] sm:$0xff] }
 0x1a4   :  { %v645_v62 = vld [vmem:[#allocation2 + $0xf50] sm:$0xff]  ;;  %v678_v18 = vld [vmem:[#allocation2 + $0x1058] sm:$0xff] }
 0x1a5   :  { %5337 = vmatpush1.bf16.msra.mxu0 %v11771_v19  ;;  %5509 = vmatpush1.bf16.msra.mxu1 %v11773_v20  ;;  %v11883_v19 = vcombine.low %v541_v5, %v549_v6  ;;  %v11885_v20 = vcombine.low %v542_v7, %v550_v9  ;;  %v653_v5 = vld [vmem:[#allocation2 + $0xf90] sm:$0xff]  ;;  %v654_v7 = vld [vmem:[#allocation2 + $0xf98] sm:$0xff] }
 0x1a6   :  { %5338 = vmatprep.subr.bf16.mxu0 %v11788_v21  ;;  %5510 = vmatprep.subr.bf16.mxu1 %v11790_v22  ;;  %v11900_v21 = vcombine.high %v557_v13, %v565_v14  ;;  %v573_v22 = vld [vmem:[#allocation2 + $0xd10] sm:$0xff]  ;;  %v662_v9 = vld [vmem:[#allocation2 + $0xfd8] sm:$0xff] }
 0x1a7   :  { %v11916_v31 = vcombine.high %v573_v22, %v581_v23  ;;  %v661_v6 = vld [vmem:[#allocation2 + $0xfd0] sm:$0xff] }
 0x1a9   :  { %5339 = vmatpush1.bf16.msra.mxu0 %v11787_v28  ;;  %5511 = vmatpush1.bf16.msra.mxu1 %v11789_v32  ;;  %v11899_v28 = vcombine.low %v557_v13, %v565_v14  ;;  %v589_v32 = vld [vmem:[#allocation2 + $0xd90] sm:$0xff] }
 0x1aa   :  { %5340 = vmatprep.subr.bf16.mxu0 %v11804_v33  ;;  %5512 = vmatprep.subr.bf16.mxu1 %v11806_v36  ;;  %v597_v33 = vld [vmem:[#allocation2 + $0xdd0] sm:$0xff]  ;;  %v598_v36 = vld [vmem:[#allocation2 + $0xdd8] sm:$0xff] }
 0x1ab   :  { %v11932_v40 = vcombine.high %v589_v32, %v597_v33  ;;  %v11934_v45 = vcombine.high %v590_v34, %v598_v36  ;;  %v669_v13 = vld [vmem:[#allocation2 + $0x1010] sm:$0xff] }
 0x1ac   :  { %v677_v14 = vld [vmem:[#allocation2 + $0x1050] sm:$0xff] }
 0x1ad   :  { %5341 = vmatpush1.bf16.msra.mxu0 %v11803_v37  ;;  %5513 = vmatpush1.bf16.msra.mxu1 %v11805_v41  ;;  %v11915_v37 = vcombine.low %v573_v22, %v581_v23  ;;  %v605_v41 = vld [vmem:[#allocation2 + $0xe10] sm:$0xff] }
 0x1ae   :  { %5342 = vmatprep.subr.bf16.mxu0 %v11820_v42  ;;  %5514 = vmatprep.subr.bf16.mxu1 %v11822_v46  ;;  %v613_v42 = vld [vmem:[#allocation2 + $0xe50] sm:$0xff]  ;;  %v614_v46 = vld [vmem:[#allocation2 + $0xe58] sm:$0xff] }
 0x1af   :  { %v685_v22 = vld [vmem:[#allocation2 + $0x1090] sm:$0xff] }
 0x1b0   :  { %v693_v23 = vld [vmem:[#allocation2 + $0x10d0] sm:$0xff] }
 0x1b1   :  { %5343 = vmatpush1.bf16.msra.mxu0 %v11819_v47  ;;  %5515 = vmatpush1.bf16.msra.mxu1 %v11821_v48  ;;  %v11931_v47 = vcombine.low %v589_v32, %v597_v33  ;;  %v11933_v48 = vcombine.low %v590_v34, %v598_v36  ;;  %v701_v32 = vld [vmem:[#allocation2 + $0x1110] sm:$0xff]  ;;  %v702_v34 = vld [vmem:[#allocation2 + $0x1118] sm:$0xff] }
 0x1b2   :  { %5344 = vmatprep.subr.bf16.mxu0 %v11836_v50  ;;  %5516 = vmatprep.subr.bf16.mxu1 %v11838_v54  ;;  %v11948_v50 = vcombine.high %v605_v41, %v613_v42  ;;  %v11950_v54 = vcombine.high %v606_v43, %v614_v46  ;;  %v709_v33 = vld [vmem:[#allocation2 + $0x1150] sm:$0xff]  ;;  %v710_v36 = vld [vmem:[#allocation2 + $0x1158] sm:$0xff] }
 0x1b5   :  { %5345 = vmatpush1.bf16.msra.mxu0 %v11835_v57  ;;  %5517 = vmatpush1.bf16.msra.mxu1 %v11837_v59  ;;  %v11947_v57 = vcombine.low %v605_v41, %v613_v42  ;;  %v11949_v59 = vcombine.low %v606_v43, %v614_v46  ;;  %v717_v41 = vld [vmem:[#allocation2 + $0x1190] sm:$0xff]  ;;  %v718_v43 = vld [vmem:[#allocation2 + $0x1198] sm:$0xff] }
 0x1b6   :  { %5346 = vmatprep.subr.bf16.mxu0 %v11852_v60  ;;  %5518 = vmatprep.subr.bf16.mxu1 %v11854_v63  ;;  %v11964_v60 = vcombine.high %v621_v51, %v629_v52  ;;  %v638_v63 = vld [vmem:[#allocation2 + $0xf18] sm:$0xff]  ;;  %v725_v42 = vld [vmem:[#allocation2 + $0x11d0] sm:$0xff] }
 0x1b7   :  { %v726_v46 = vld [vmem:[#allocation2 + $0x11d8] sm:$0xff] }
 0x1b9   :  { %5347 = vmatpush1.bf16.msra.mxu0 %v11851_v2  ;;  %5519 = vmatpush1.bf16.msra.mxu1 %v11853_v3  ;;  %v11963_v2 = vcombine.low %v621_v51, %v629_v52  ;;  %v11965_v3 = vcombine.low %v622_v53, %v630_v55  ;;  %v733_v51 = vld [vmem:[#allocation2 + $0x1210] sm:$0xff]  ;;  %v734_v53 = vld [vmem:[#allocation2 + $0x1218] sm:$0xff] }
 0x1ba   :  { %5348 = vmatprep.subr.bf16.mxu0 %v11868_v4  ;;  %5520 = vmatprep.subr.bf16.mxu1 %v11870_v8  ;;  %v11980_v4 = vcombine.high %v637_v61, %v645_v62  ;;  %v11982_v8 = vcombine.high %v638_v63, %v646_v1  ;;  %v741_v52 = vld [vmem:[#allocation2 + $0x1250] sm:$0xff]  ;;  %v742_v55 = vld [vmem:[#allocation2 + $0x1258] sm:$0xff] }
 0x1bd   :  { %5349 = vmatpush1.bf16.msra.mxu0 %v11867_v10  ;;  %5521 = vmatpush1.bf16.msra.mxu1 %v11869_v11  ;;  %v11979_v10 = vcombine.low %v637_v61, %v645_v62  ;;  %v11981_v11 = vcombine.low %v638_v63, %v646_v1  ;;  %v749_v61 = vld [vmem:[#allocation2 + $0x1290] sm:$0xff]  ;;  %v750_v63 = vld [vmem:[#allocation2 + $0x1298] sm:$0xff] }
 0x1be   :  { %5350 = vmatprep.subr.bf16.mxu0 %v11884_v12  ;;  %5522 = vmatprep.subr.bf16.mxu1 %v11886_v17  ;;  %v11996_v12 = vcombine.high %v653_v5, %v661_v6  ;;  %v11998_v17 = vcombine.high %v654_v7, %v662_v9  ;;  %v757_v62 = vld [vmem:[#allocation2 + $0x12d0] sm:$0xff]  ;;  %v758_v1 = vld [vmem:[#allocation2 + $0x12d8] sm:$0xff] }
 0x1c1   :  { %5351 = vmatpush1.bf16.msra.mxu0 %v11883_v19  ;;  %5523 = vmatpush1.bf16.msra.mxu1 %v11885_v20  ;;  %v11995_v19 = vcombine.low %v653_v5, %v661_v6  ;;  %v11997_v20 = vcombine.low %v654_v7, %v662_v9  ;;  %v765_v5 = vld [vmem:[#allocation2 + $0x1310] sm:$0xff]  ;;  %v766_v7 = vld [vmem:[#allocation2 + $0x1318] sm:$0xff] }
 0x1c2   :  { %5352 = vmatprep.subr.bf16.mxu0 %v11900_v21  ;;  %5524 = vmatprep.subr.bf16.mxu1 %v11902_v26  ;;  %v12012_v21 = vcombine.high %v669_v13, %v677_v14  ;;  %v12014_v26 = vcombine.high %v670_v16, %v678_v18  ;;  %v773_v6 = vld [vmem:[#allocation2 + $0x1350] sm:$0xff]  ;;  %v774_v9 = vld [vmem:[#allocation2 + $0x1358] sm:$0xff] }
 0x1c5   :  { %5353 = vmatpush1.bf16.msra.mxu0 %v11899_v28  ;;  %5525 = vmatpush1.bf16.msra.mxu1 %v11901_v29  ;;  %v12011_v28 = vcombine.low %v669_v13, %v677_v14  ;;  %v12013_v29 = vcombine.low %v670_v16, %v678_v18  ;;  %v781_v13 = vld [vmem:[#allocation2 + $0x1390] sm:$0xff]  ;;  %v782_v16 = vld [vmem:[#allocation2 + $0x1398] sm:$0xff] }
 0x1c6   :  { %5354 = vmatprep.subr.bf16.mxu0 %v11916_v31  ;;  %5526 = vmatprep.subr.bf16.mxu1 %v11918_v35  ;;  %v12028_v31 = vcombine.high %v685_v22, %v693_v23  ;;  %v12030_v35 = vcombine.high %v686_v24, %v694_v27  ;;  %v789_v14 = vld [vmem:[#allocation2 + $0x13d0] sm:$0xff]  ;;  %v790_v18 = vld [vmem:[#allocation2 + $0x13d8] sm:$0xff] }
 0x1c9   :  { %5355 = vmatpush1.bf16.msra.mxu0 %v11915_v37  ;;  %5527 = vmatpush1.bf16.msra.mxu1 %v11917_v38  ;;  %v12027_v37 = vcombine.low %v685_v22, %v693_v23  ;;  %v12029_v38 = vcombine.low %v686_v24, %v694_v27  ;;  %v797_v22 = vld [vmem:[#allocation2 + $0x1410] sm:$0xff]  ;;  %v798_v24 = vld [vmem:[#allocation2 + $0x1418] sm:$0xff] }
 0x1ca   :  { %5356 = vmatprep.subr.bf16.mxu0 %v11932_v40  ;;  %5528 = vmatprep.subr.bf16.mxu1 %v11934_v45  ;;  %v12044_v40 = vcombine.high %v701_v32, %v709_v33  ;;  %v12046_v45 = vcombine.high %v702_v34, %v710_v36  ;;  %v805_v23 = vld [vmem:[#allocation2 + $0x1450] sm:$0xff]  ;;  %v806_v27 = vld [vmem:[#allocation2 + $0x1458] sm:$0xff] }
 0x1cd   :  { %5357 = vmatpush1.bf16.msra.mxu0 %v11931_v47  ;;  %5529 = vmatpush1.bf16.msra.mxu1 %v11933_v48  ;;  %v12043_v47 = vcombine.low %v701_v32, %v709_v33  ;;  %v12045_v48 = vcombine.low %v702_v34, %v710_v36  ;;  %v813_v32 = vld [vmem:[#allocation2 + $0x1490] sm:$0xff]  ;;  %v814_v34 = vld [vmem:[#allocation2 + $0x1498] sm:$0xff] }
 0x1ce   :  { %5358 = vmatprep.subr.bf16.mxu0 %v11948_v50  ;;  %5530 = vmatprep.subr.bf16.mxu1 %v11950_v54  ;;  %v12060_v50 = vcombine.high %v717_v41, %v725_v42  ;;  %v12062_v54 = vcombine.high %v718_v43, %v726_v46  ;;  %v821_v33 = vld [vmem:[#allocation2 + $0x14d0] sm:$0xff]  ;;  %v822_v36 = vld [vmem:[#allocation2 + $0x14d8] sm:$0xff] }
 0x1d1   :  { %5359 = vmatpush1.bf16.msra.mxu0 %v11947_v57  ;;  %5531 = vmatpush1.bf16.msra.mxu1 %v11949_v59  ;;  %v12059_v57 = vcombine.low %v717_v41, %v725_v42  ;;  %v12061_v59 = vcombine.low %v718_v43, %v726_v46  ;;  %v829_v41 = vld [vmem:[#allocation2 + $0x1510] sm:$0xff]  ;;  %v830_v43 = vld [vmem:[#allocation2 + $0x1518] sm:$0xff] }
 0x1d2   :  { %5360 = vmatprep.subr.bf16.mxu0 %v11964_v60  ;;  %5532 = vmatprep.subr.bf16.mxu1 %v11966_v0  ;;  %v12076_v60 = vcombine.high %v733_v51, %v741_v52  ;;  %v12078_v0 = vcombine.high %v734_v53, %v742_v55  ;;  %v837_v42 = vld [vmem:[#allocation2 + $0x1550] sm:$0xff]  ;;  %v838_v46 = vld [vmem:[#allocation2 + $0x1558] sm:$0xff] }
 0x1d5   :  { %5361 = vmatpush1.bf16.msra.mxu0 %v11963_v2  ;;  %5533 = vmatpush1.bf16.msra.mxu1 %v11965_v3  ;;  %v12075_v2 = vcombine.low %v733_v51, %v741_v52  ;;  %v12077_v3 = vcombine.low %v734_v53, %v742_v55  ;;  %v845_v51 = vld [vmem:[#allocation2 + $0x1590] sm:$0xff]  ;;  %v846_v53 = vld [vmem:[#allocation2 + $0x1598] sm:$0xff] }
 0x1d6   :  { %5362 = vmatprep.subr.bf16.mxu0 %v11980_v4  ;;  %5534 = vmatprep.subr.bf16.mxu1 %v11982_v8  ;;  %v12092_v4 = vcombine.high %v749_v61, %v757_v62  ;;  %v12094_v8 = vcombine.high %v750_v63, %v758_v1  ;;  %v853_v52 = vld [vmem:[#allocation2 + $0x15d0] sm:$0xff]  ;;  %v854_v55 = vld [vmem:[#allocation2 + $0x15d8] sm:$0xff] }
 0x1d9   :  { %5363 = vmatpush1.bf16.msra.mxu0 %v11979_v10  ;;  %5535 = vmatpush1.bf16.msra.mxu1 %v11981_v11  ;;  %v12091_v10 = vcombine.low %v749_v61, %v757_v62  ;;  %v12093_v11 = vcombine.low %v750_v63, %v758_v1  ;;  %v861_v61 = vld [vmem:[#allocation2 + $0x1610] sm:$0xff]  ;;  %v862_v63 = vld [vmem:[#allocation2 + $0x1618] sm:$0xff] }
 0x1da   :  { %5364 = vmatprep.subr.bf16.mxu0 %v11996_v12  ;;  %5536 = vmatprep.subr.bf16.mxu1 %v11998_v17  ;;  %v12108_v12 = vcombine.high %v765_v5, %v773_v6  ;;  %v12110_v17 = vcombine.high %v766_v7, %v774_v9  ;;  %v869_v62 = vld [vmem:[#allocation2 + $0x1650] sm:$0xff]  ;;  %v870_v1 = vld [vmem:[#allocation2 + $0x1658] sm:$0xff] }
 0x1dd   :  { %5365 = vmatpush1.bf16.msra.mxu0 %v11995_v19  ;;  %5537 = vmatpush1.bf16.msra.mxu1 %v11997_v20  ;;  %v12107_v19 = vcombine.low %v765_v5, %v773_v6  ;;  %v12109_v20 = vcombine.low %v766_v7, %v774_v9  ;;  %v877_v5 = vld [vmem:[#allocation2 + $0x1690] sm:$0xff]  ;;  %v878_v7 = vld [vmem:[#allocation2 + $0x1698] sm:$0xff] }
 0x1de   :  { %5377 = vmatprep.subr.bf16.mxu0 %v12012_v21  ;;  %5549 = vmatprep.subr.bf16.mxu1 %v12014_v26  ;;  %v12124_v21 = vcombine.high %v781_v13, %v789_v14  ;;  %v12126_v26 = vcombine.high %v782_v16, %v790_v18  ;;  %v885_v6 = vld [vmem:[#allocation2 + $0x16d0] sm:$0xff]  ;;  %v886_v9 = vld [vmem:[#allocation2 + $0x16d8] sm:$0xff] }
 0x1e0   :  { %5367 = vmatmul.mubr.bf16.vlgmr.msra.gmra.mrb[4].mxu0 %v14617_v30  ;;  %5539 = vmatmul.mubr.bf16.vlgmr.msra.gmra.mrb[4].mxu1 %v14617_v30 }
 0x1e1   :  { %5378 = vmatpush1.bf16.msra.mxu0 %v12011_v28  ;;  %5550 = vmatpush1.bf16.msra.mxu1 %v12013_v29  ;;  %v12123_v28 = vcombine.low %v781_v13, %v789_v14  ;;  %v12125_v29 = vcombine.low %v782_v16, %v790_v18  ;;  %v893_v13 = vld [vmem:[#allocation2 + $0x1710] sm:$0xff]  ;;  %v894_v16 = vld [vmem:[#allocation2 + $0x1718] sm:$0xff] }
 0x1e2   :  { %5379 = vmatprep.subr.bf16.mxu0 %v12028_v31  ;;  %5551 = vmatprep.subr.bf16.mxu1 %v12030_v35  ;;  %v12140_v31 = vcombine.high %v797_v22, %v805_v23  ;;  %v12142_v35 = vcombine.high %v798_v24, %v806_v27  ;;  %v901_v14 = vld [vmem:[#allocation2 + $0x1750] sm:$0xff]  ;;  %v902_v18 = vld [vmem:[#allocation2 + $0x1758] sm:$0xff] }
 0x1e3   :  { %5409 = vmatprep.mubr.bf16.mxu0 %v14619_v39  ;;  %5581 = vmatprep.mubr.bf16.mxu1 %v14619_v39 }
 0x1e5   :  { %5380 = vmatpush1.bf16.msra.mxu0 %v12027_v37  ;;  %5552 = vmatpush1.bf16.msra.mxu1 %v12029_v38  ;;  %v12139_v37 = vcombine.low %v797_v22, %v805_v23  ;;  %v12141_v38 = vcombine.low %v798_v24, %v806_v27  ;;  %v909_v22 = vld [vmem:[#allocation2 + $0x1790] sm:$0xff]  ;;  %v910_v24 = vld [vmem:[#allocation2 + $0x1798] sm:$0xff] }
 0x1e6   :  { %5381 = vmatprep.subr.bf16.mxu0 %v12044_v40  ;;  %5553 = vmatprep.subr.bf16.mxu1 %v12046_v45  ;;  %v12156_v40 = vcombine.high %v813_v32, %v821_v33  ;;  %v12158_v45 = vcombine.high %v814_v34, %v822_v36  ;;  %v917_v23 = vld [vmem:[#allocation2 + $0x17d0] sm:$0xff]  ;;  %v918_v27 = vld [vmem:[#allocation2 + $0x17d8] sm:$0xff] }
 0x1e9   :  { %5382 = vmatpush1.bf16.msra.mxu0 %v12043_v47  ;;  %5554 = vmatpush1.bf16.msra.mxu1 %v12045_v48  ;;  %v12155_v47 = vcombine.low %v813_v32, %v821_v33  ;;  %v12157_v48 = vcombine.low %v814_v34, %v822_v36  ;;  %v925_v32 = vld [vmem:[#allocation2 + $0x1810] sm:$0xff]  ;;  %v926_v34 = vld [vmem:[#allocation2 + $0x1818] sm:$0xff] }
 0x1ea   :  { %5383 = vmatprep.subr.bf16.mxu0 %v12060_v50  ;;  %5555 = vmatprep.subr.bf16.mxu1 %v12062_v54  ;;  %v12172_v50 = vcombine.high %v829_v41, %v837_v42  ;;  %v12174_v54 = vcombine.high %v830_v43, %v838_v46  ;;  %v933_v33 = vld [vmem:[#allocation2 + $0x1850] sm:$0xff]  ;;  %v934_v36 = vld [vmem:[#allocation2 + $0x1858] sm:$0xff] }
 0x1ed   :  { %5384 = vmatpush1.bf16.msra.mxu0 %v12059_v57  ;;  %5556 = vmatpush1.bf16.msra.mxu1 %v12061_v59  ;;  %v12171_v57 = vcombine.low %v829_v41, %v837_v42  ;;  %v12173_v59 = vcombine.low %v830_v43, %v838_v46  ;;  %v159_v41 = vld [vmem:[#allocation2 + $0x20] sm:$0xff]  ;;  %v12270_v43 = vcombine.high %v926_v34, %v934_v36  ;;  %v168_v46 = vld [vmem:[#allocation2 + $0x68] sm:$0xff] }
 0x1ee   :  { %5385 = vmatprep.subr.bf16.mxu0 %v12076_v60  ;;  %5557 = vmatprep.subr.bf16.mxu1 %v12078_v0  ;;  %v12188_v60 = vcombine.high %v845_v51, %v853_v52  ;;  %v12190_v0 = vcombine.high %v846_v53, %v854_v55  ;;  %v167_v42 = vld [vmem:[#allocation2 + $0x60] sm:$0xff] }
 0x1f1   :  { %5386 = vmatpush1.bf16.msra.mxu0 %v12075_v2  ;;  %5558 = vmatpush1.bf16.msra.mxu1 %v12077_v3  ;;  %v12187_v2 = vcombine.low %v845_v51, %v853_v52  ;;  %v12189_v3 = vcombine.low %v846_v53, %v854_v55  ;;  %v943_v52 = vlaneseq  ;;  %v175_v53 = vld [vmem:[#allocation2 + $0xa0] sm:$0xff]  ;;  %v176_v55 = vld [vmem:[#allocation2 + $0xa8] sm:$0xff] }
 0x1f2   :  { %5387 = vmatprep.subr.bf16.mxu0 %v12092_v4  ;;  %5559 = vmatprep.subr.bf16.mxu1 %v12094_v8  ;;  %v12204_v4 = vcombine.high %v861_v61, %v869_v62  ;;  %v12206_v8 = vcombine.high %v862_v63, %v870_v1 }
 0x1f5   :  { %5388 = vmatpush1.bf16.msra.mxu0 %v12091_v10  ;;  %5560 = vmatpush1.bf16.msra.mxu1 %v12093_v11  ;;  %v12203_v10 = vcombine.low %v861_v61, %v869_v62  ;;  %v12205_v11 = vcombine.low %v862_v63, %v870_v1  ;;  %v191_v61 = vld [vmem:[#allocation2 + $0x120] sm:$0xff]  ;;  %v192_v1 = vld [vmem:[#allocation2 + $0x128] sm:$0xff] }
 0x1f6   :  { %5389 = vmatprep.subr.bf16.mxu0 %v12108_v12  ;;  %5561 = vmatprep.subr.bf16.mxu1 %v12110_v17  ;;  %v12220_v12 = vcombine.high %v877_v5, %v885_v6  ;;  %v12222_v17 = vcombine.high %v878_v7, %v886_v9 }
 0x1f9   :  { %5390 = vmatpush1.bf16.msra.mxu0 %v12107_v19  ;;  %5562 = vmatpush1.bf16.msra.mxu1 %v12109_v20  ;;  %v12219_v19 = vcombine.low %v877_v5, %v885_v6  ;;  %v12221_v20 = vcombine.low %v878_v7, %v886_v9  ;;  %v939_v5 = vld [vmem:[#allocation4] sm:$0xff] }
 0x1fa   :  { %5391 = vmatprep.subr.bf16.mxu0 %v12124_v21  ;;  %5563 = vmatprep.subr.bf16.mxu1 %v12126_v26  ;;  %v12236_v21 = vcombine.high %v893_v13, %v901_v14  ;;  %v12238_v26 = vcombine.high %v894_v16, %v902_v18 }
 0x1fd   :  { %5392 = vmatpush1.bf16.msra.mxu0 %v12123_v28  ;;  %5564 = vmatpush1.bf16.msra.mxu1 %v12125_v29  ;;  %v12235_v28 = vcombine.low %v893_v13, %v901_v14  ;;  %v12237_v29 = vcombine.low %v894_v16, %v902_v18  ;;  %v215_v13 = vld [vmem:[#allocation2 + $0x1e0] sm:$0xff]  ;;  %v208_v16 = vld [vmem:[#allocation2 + $0x1a8] sm:$0xff] }
 0x1fe   :  { %5393 = vmatprep.subr.bf16.mxu0 %v12140_v31  ;;  %5565 = vmatprep.subr.bf16.mxu1 %v12142_v35  ;;  %v12252_v31 = vcombine.high %v909_v22, %v917_v23  ;;  %v12254_v35 = vcombine.high %v910_v24, %v918_v27  ;;  %v216_v18 = vld [vmem:[#allocation2 + $0x1e8] sm:$0xff] }
 0x201   :  { %5394 = vmatpush1.bf16.msra.mxu0 %v12139_v37  ;;  %5566 = vmatpush1.bf16.msra.mxu1 %v12141_v38  ;;  %v12251_v37 = vcombine.low %v909_v22, %v917_v23  ;;  %v12253_v38 = vcombine.low %v910_v24, %v918_v27  ;;  %v11554_v27 = vcombine.high %v208_v16, %v216_v18 }
 0x202   :  { %5395 = vmatprep.subr.bf16.mxu0 %v12156_v40  ;;  %5567 = vmatprep.subr.bf16.mxu1 %v12158_v45  ;;  %v12268_v40 = vcombine.high %v925_v32, %v933_v33  ;;  %v160_v45 = vld [vmem:[#allocation2 + $0x28] sm:$0xff] }
 0x203   :  { %v11506_v51 = vcombine.high %v160_v45, %v168_v46  ;;  %v11505_v62 = vcombine.low %v160_v45, %v168_v46 }
 0x205   :  { %5396 = vmatpush1.bf16.msra.mxu0 %v12155_v47  ;;  %5568 = vmatpush1.bf16.msra.mxu1 %v12157_v48  ;;  %v12267_v47 = vcombine.low %v925_v32, %v933_v33  ;;  %v12269_v48 = vcombine.low %v926_v34, %v934_v36  ;;  %v224_v34 = vld [vmem:[#allocation2 + $0x228] sm:$0xff] }
 0x206   :  { %5397 = vmatprep.subr.bf16.mxu0 %v12172_v50  ;;  %5569 = vmatprep.subr.bf16.mxu1 %v12174_v54  ;;  %v11504_v50 = vcombine.high %v159_v41, %v167_v42  ;;  %v183_v54 = vld [vmem:[#allocation2 + $0xe0] sm:$0xff] }
 0x207   :  { %v11520_v63 = vcombine.high %v175_v53, %v183_v54 }
 0x209   :  { %5398 = vmatpush1.bf16.msra.mxu0 %v12171_v57  ;;  %5570 = vmatpush1.bf16.msra.mxu1 %v12173_v59  ;;  %v14663_v57 = vshrl.u32 %v943_v52, 7  ;;  %v184_v59 = vld [vmem:[#allocation2 + $0xe8] sm:$0xff] }
 0x20a   :  { %5399 = vmatprep.subr.bf16.mxu0 %v12188_v60  ;;  %5571 = vmatprep.subr.bf16.mxu1 %v12190_v0  ;;  %v11503_v60 = vcombine.low %v159_v41, %v167_v42  ;;  %v199_v0 = vld [vmem:[#allocation2 + $0x160] sm:$0xff]  ;;  %v11521_v9 = vcombine.low %v176_v55, %v184_v59  ;;  %v11553_v42 = vcombine.low %v208_v16, %v216_v18 }
 0x20b   :  { %v14669_v6 = vsub.s32 2, %v14663_v57  ;;  %v14672_v7 = vsub.s32 1, %v14663_v57  ;;  %v255_v18 = vld [vmem:[#allocation2 + $0x320] sm:$0xff] }
 0x20d   :  { %5400 = vmatpush1.bf16.msra.mxu0 %v12187_v2  ;;  %5572 = vmatpush1.bf16.msra.mxu1 %v12189_v3  ;;  %v200_v2 = vld [vmem:[#allocation2 + $0x168] sm:$0xff]  ;;  %v14666_v3 = vsub.s32 0, %v14663_v57 }
 0x20e   :  { %5401 = vmatprep.subr.bf16.mxu0 %v12204_v4  ;;  %5573 = vmatprep.subr.bf16.mxu1 %v12206_v8  ;;  %v11522_v4 = vcombine.high %v176_v55, %v184_v59  ;;  %v11519_v8 = vcombine.low %v175_v53, %v183_v54  ;;  %v11538_v14 = vcombine.high %v192_v1, %v200_v2  ;;  %v239_v55 = vld [vmem:[#allocation2 + $0x2a0] sm:$0xff] }
 0x20f   :  { %v11537_v22 = vcombine.low %v192_v1, %v200_v2  ;;  %v247_v59 = vld [vmem:[#allocation2 + $0x2e0] sm:$0xff]  ;;  %v248_v1 = vld [vmem:[#allocation2 + $0x2e8] sm:$0xff] }
 0x211   :  { %5402 = vmatpush1.bf16.msra.mxu0 %v12203_v10  ;;  %5574 = vmatpush1.bf16.msra.mxu1 %v12205_v11  ;;  %v11536_v10 = vcombine.high %v191_v61, %v199_v0  ;;  %v14679_v11 = vsub.s32 3, %v14663_v57 }
 0x212   :  { %5403 = vmatprep.subr.bf16.mxu0 %v12220_v12  ;;  %5575 = vmatprep.subr.bf16.mxu1 %v12222_v17  ;;  %v207_v12 = vld [vmem:[#allocation2 + $0x1a0] sm:$0xff]  ;;  %v946_v17 = vrot.slane %v939_v5, %v14666_v3 }
 0x213   :  { %v958_v23 = vrot.slane %v939_v5, %v14679_v11  ;;  %v11552_v24 = vcombine.high %v207_v12, %v215_v13  ;;  %v11551_v41 = vcombine.low %v207_v12, %v215_v13  ;;  %v11584_v13 = vcombine.high %v239_v55, %v247_v59 }
 0x215   :  { %5404 = vmatpush1.bf16.msra.mxu0 %v12219_v19  ;;  %5576 = vmatpush1.bf16.msra.mxu1 %v12221_v20  ;;  %v11535_v19 = vcombine.low %v191_v61, %v199_v0  ;;  %v954_v20 = vrot.slane %v939_v5, %v14669_v6  ;;  %v240_v0 = vld [vmem:[#allocation2 + $0x2a8] sm:$0xff] }
 0x216   :  { %5405 = vmatprep.subr.bf16.mxu0 %v12236_v21  ;;  %5577 = vmatprep.subr.bf16.mxu1 %v12238_v26  ;;  %v950_v21 = vrot.slane %v939_v5, %v14672_v7 }
 0x219   :  { %5406 = vmatpush1.bf16.msra.mxu0 %v12235_v28  ;;  %5578 = vmatpush1.bf16.msra.mxu1 %v12237_v29  ;;  %v223_v28 = vld [vmem:[#allocation2 + $0x220] sm:$0xff] }
 0x21a   :  { %5407 = vmatprep.subr.bf16.mxu0 %v12252_v31  ;;  %5579 = vmatprep.subr.bf16.mxu1 %v12254_v35  ;;  %v231_v29 = vld [vmem:[#allocation2 + $0x260] sm:$0xff]  ;;  %v232_v35 = vld [vmem:[#allocation2 + $0x268] sm:$0xff] }
 0x21b   :  { %v11567_v53 = vcombine.low %v223_v28, %v231_v29  ;;  %v11570_v54 = vcombine.high %v224_v34, %v232_v35 }
 0x21d   :  { %5408 = vmatpush1.bf16.msra.mxu0 %v12251_v37  ;;  %5580 = vmatpush1.bf16.msra.mxu1 %v12253_v38 }
 0x21e   :  { %5420 = vmatprep.subr.bf16.mxu0 %v12268_v40  ;;  %5592 = vmatprep.subr.bf16.mxu1 %v12270_v43 }
 0x220   :  { %5410 = vmatmul.mubr.bf16.vlgmr.msra.gmra.mrb[4].mxu0 %v14631_v44  ;;  %5582 = vmatmul.mubr.bf16.vlgmr.msra.gmra.mrb[4].mxu1 %v14631_v44 }
 0x221   :  { %5421 = vmatpush1.bf16.msra.mxu0 %v12267_v47  ;;  %5593 = vmatpush1.bf16.msra.mxu1 %v12269_v48  ;;  %v11568_v48 = vcombine.high %v223_v28, %v231_v29  ;;  %v271_v28 = vld [vmem:[#allocation2 + $0x3a0] sm:$0xff] }
 0x222   :  { %5452 = vmatprep.mubr.bf16.mxu0 %v14418_v49  ;;  %5624 = vmatprep.mubr.bf16.mxu1 %v14418_v49  ;;  %v279_v29 = vld [vmem:[#allocation2 + $0x3e0] sm:$0xff] }
 0x223   :  { %5635 = vmatprep.subr.bf16.mxu0 %v11504_v50  ;;  %5807 = vmatprep.subr.bf16.mxu1 %v11506_v51 }
 0x22c   :  { %12281 = vmatmul.mubr.msk.bf16.vlgmr.msra.gmra.mrb[4].mxu0 %vm4943_vm0, %v14643_v56  ;;  %12282 = vmatmul.mubr.msk.bf16.vlgmr.msra.gmra.mrb[4].mxu1 %vm4943_vm0, %v14643_v56 }
 0x22d   :  { %5636 = vmatpush1.bf16.msra.mxu0 %v11503_v60  ;;  %5808 = vmatpush1.bf16.msra.mxu1 %v11505_v62 }
 0x22e   :  { %5637 = vmatprep.subr.bf16.mxu0 %v11520_v63  ;;  %5809 = vmatprep.subr.bf16.mxu1 %v11522_v4  ;;  %v11569_v63 = vcombine.low %v224_v34, %v232_v35  ;;  %v11616_v35 = vcombine.high %v271_v28, %v279_v29 }
 0x22f   :  { %5667 = vmatprep.mubr.bf16.mxu0 %v14581_v58  ;;  %5839 = vmatprep.mubr.bf16.mxu1 %v14581_v58 }
 0x231   :  { %5638 = vmatpush1.bf16.msra.mxu0 %v11519_v8  ;;  %5810 = vmatpush1.bf16.msra.mxu1 %v11521_v9 }
 0x232   :  { %5639 = vmatprep.subr.bf16.mxu0 %v11536_v10  ;;  %5811 = vmatprep.subr.bf16.mxu1 %v11538_v14 }
 0x233   :  { %v5110_v26 = vpop.f32.mrb[0].mxu0  ;;  %v5282_v32 = vpop.f32.mrb[0].mxu1 }
 0x234   :  { %v13004_v31 = vadd.f32 %v5110_v26, %v946_v17  ;;  %v5112_v33 = vpop.f32.mrb[1].mxu0  ;;  %v13008_v36 = vadd.f32 %v5282_v32, %v954_v20  ;;  %v5284_v38 = vpop.f32.mrb[1].mxu1  ;;  %v280_v32 = vld [vmem:[#allocation2 + $0x3e8] sm:$0xff] }
 0x235   :  { %5640 = vmatpush1.bf16.msra.mxu0 %v11535_v19  ;;  %v13005_v37 = vadd.f32 %v5112_v33, %v950_v21  ;;  %v5114_v40 = vpop.f32.mrb[2].mxu0  ;;  %5812 = vmatpush1.bf16.msra.mxu1 %v11537_v22  ;;  %v13009_v43 = vadd.f32 %v5284_v38, %v958_v23  ;;  %v5286_v46 = vpop.f32.mrb[2].mxu1  ;;  %v263_v19 = vld [vmem:[#allocation2 + $0x360] sm:$0xff]  ;;  %v264_v22 = vld [vmem:[#allocation2 + $0x368] sm:$0xff] }
 0x236   :  { %v13006_v45 = vadd.f32 %v5114_v40, %v946_v17  ;;  %v5116_v47 = vpop.f32.mrb[3].mxu0  ;;  %5641 = vmatprep.subr.bf16.mxu0 %v11552_v24  ;;  %v13010_v50 = vadd.f32 %v5286_v46, %v954_v20  ;;  %v5288_v52 = vpop.f32.mrb[3].mxu1  ;;  %5813 = vmatprep.subr.bf16.mxu1 %v11554_v27  ;;  %v6323_v60 = vmax.f32 %v13004_v31, 0.0  ;;  %v6325_v2 = vmax.f32 %v13008_v36, 0.0  ;;  %v272_v31 = vld [vmem:[#allocation2 + $0x3a8] sm:$0xff]  ;;  %v295_v38 = vld [vmem:[#allocation2 + $0x460] sm:$0xff] }
 0x237   :  { %v13007_v51 = vadd.f32 %v5116_v47, %v950_v21  ;;  %v13011_v62 = vadd.f32 %v5288_v52, %v958_v23  ;;  %v6324_v4 = vmax.f32 %v13005_v37, 0.0  ;;  %v6326_v9 = vmax.f32 %v13009_v43, 0.0  ;;  %v256_v21 = vld [vmem:[#allocation2 + $0x328] sm:$0xff]  ;;  %v287_v37 = vld [vmem:[#allocation2 + $0x420] sm:$0xff] }
 0x238   :  { %v6339_v61 = vmax.f32 %v13006_v45, 0.0  ;;  %v6341_v5 = vmax.f32 %v13010_v50, 0.0  ;;  %v11586_v17 = vcombine.high %v240_v0, %v248_v1  ;;  %v11583_v23 = vcombine.low %v239_v55, %v247_v59  ;;  %v288_v40 = vld [vmem:[#allocation2 + $0x428] sm:$0xff]  ;;  %v303_v47 = vld [vmem:[#allocation2 + $0x4a0] sm:$0xff] }
 0x239   :  { %v6340_v8 = vmax.f32 %v13007_v51, 0.0  ;;  %5642 = vmatpush1.bf16.msra.mxu0 %v11551_v41  ;;  %v6342_v12 = vmax.f32 %v13011_v62, 0.0  ;;  %5814 = vmatpush1.bf16.msra.mxu1 %v11553_v42  ;;  %v11585_v24 = vcombine.low %v240_v0, %v248_v1  ;;  %v11600_v26 = vcombine.high %v255_v18, %v263_v19  ;;  %v296_v41 = vld [vmem:[#allocation2 + $0x468] sm:$0xff]  ;;  %v319_v59 = vld [vmem:[#allocation2 + $0x520] sm:$0xff] }
 0x23a   :  { %v14687_v10 = vpack.c.bf16 %v6339_v61, %v6323_v60  ;;  %5643 = vmatprep.subr.bf16.mxu0 %v11568_v48  ;;  %v14689_v14 = vpack.c.bf16 %v6341_v5, %v6325_v2  ;;  %5815 = vmatprep.subr.bf16.mxu1 %v11570_v54  ;;  %v11602_v27 = vcombine.high %v256_v21, %v264_v22  ;;  %v311_v48 = vld [vmem:[#allocation2 + $0x4e0] sm:$0xff]  ;;  %v304_v50 = vld [vmem:[#allocation2 + $0x4a8] sm:$0xff] }
 0x23b   :  { %v14691_v16 = vpack.c.bf16 %v6340_v8, %v6324_v4  ;;  %v14693_v20 = vpack.c.bf16 %v6342_v12, %v6326_v9  ;;  %v11599_v33 = vcombine.low %v255_v18, %v263_v19  ;;  %v11601_v34 = vcombine.low %v256_v21, %v264_v22  ;;  %v312_v51 = vld [vmem:[#allocation2 + $0x4e8] sm:$0xff]  ;;  %v327_v60 = vld [vmem:[#allocation2 + $0x560] sm:$0xff] }
 0x23c   :  { %v11618_v36 = vcombine.high %v272_v31, %v280_v32  ;;  %v11615_v42 = vcombine.low %v271_v28, %v279_v29  ;;  %v11617_v43 = vcombine.low %v272_v31, %v280_v32  ;;  %v11632_v45 = vcombine.high %v287_v37, %v295_v38  ;;  %v320_v61 = vld [vmem:[#allocation2 + $0x528] sm:$0xff]  ;;  %v335_v4 = vld [vmem:[#allocation2 + $0x5a0] sm:$0xff] }
 0x23d   :  { %5644 = vmatpush1.bf16.msra.mxu0 %v11567_v53  ;;  %5816 = vmatpush1.bf16.msra.mxu1 %v11569_v63  ;;  %v11634_v46 = vcombine.high %v288_v40, %v296_v41  ;;  %v11631_v52 = vcombine.low %v287_v37, %v295_v38  ;;  %v11633_v53 = vcombine.low %v288_v40, %v296_v41  ;;  %v328_v62 = vld [vmem:[#allocation2 + $0x568] sm:$0xff]  ;;  %v343_v5 = vld [vmem:[#allocation2 + $0x5e0] sm:$0xff] }
 0x23e   :  { %5645 = vmatprep.subr.bf16.mxu0 %v11584_v13  ;;  %5817 = vmatprep.subr.bf16.mxu1 %v11586_v17  ;;  %v11648_v54 = vcombine.high %v303_v47, %v311_v48  ;;  %v11650_v55 = vcombine.high %v304_v50, %v312_v51  ;;  %v11647_v63 = vcombine.low %v303_v47, %v311_v48  ;;  %v336_v8 = vld [vmem:[#allocation2 + $0x5a8] sm:$0xff]  ;;  %v351_v19 = vld [vmem:[#allocation2 + $0x620] sm:$0xff] }
 0x23f   :  { %v11649_v0 = vcombine.low %v304_v50, %v312_v51  ;;  %v11664_v1 = vcombine.high %v319_v59, %v327_v60  ;;  %v11666_v2 = vcombine.high %v320_v61, %v328_v62  ;;  %v344_v9 = vld [vmem:[#allocation2 + $0x5e8] sm:$0xff]  ;;  %v11663_v12 = vcombine.low %v319_v59, %v327_v60  ;;  %v359_v21 = vld [vmem:[#allocation2 + $0x660] sm:$0xff] }
 0x240   :  { %v11665_v13 = vcombine.low %v320_v61, %v328_v62  ;;  %v11680_v17 = vcombine.high %v335_v4, %v343_v5  ;;  %v11682_v18 = vcombine.high %v336_v8, %v344_v9  ;;  %v352_v22 = vld [vmem:[#allocation2 + $0x628] sm:$0xff]  ;;  %v367_v29 = vld [vmem:[#allocation2 + $0x6a0] sm:$0xff] }
 0x241   :  { %5646 = vmatpush1.bf16.msra.mxu0 %v11583_v23  ;;  %5818 = vmatpush1.bf16.msra.mxu1 %v11585_v24  ;;  %v360_v23 = vld [vmem:[#allocation2 + $0x668] sm:$0xff]  ;;  %v11679_v24 = vcombine.low %v335_v4, %v343_v5  ;;  %v375_v31 = vld [vmem:[#allocation2 + $0x6e0] sm:$0xff] }
 0x242   :  { %5647 = vmatprep.subr.bf16.mxu0 %v11600_v26  ;;  %5819 = vmatprep.subr.bf16.mxu1 %v11602_v27  ;;  %v11681_v26 = vcombine.low %v336_v8, %v344_v9  ;;  %v11696_v27 = vcombine.high %v351_v19, %v359_v21  ;;  %v11698_v28 = vcombine.high %v352_v22, %v360_v23  ;;  %v368_v32 = vld [vmem:[#allocation2 + $0x6a8] sm:$0xff]  ;;  %v383_v38 = vld [vmem:[#allocation2 + $0x720] sm:$0xff] }
 0x243   :  { %v391_v40 = vld [vmem:[#allocation2 + $0x760] sm:$0xff]  ;;  %v384_v41 = vld [vmem:[#allocation2 + $0x728] sm:$0xff] }
 0x244   :  { %v399_v48 = vld [vmem:[#allocation2 + $0x7a0] sm:$0xff]  ;;  %v400_v51 = vld [vmem:[#allocation2 + $0x7a8] sm:$0xff] }
 0x245   :  { %5648 = vmatpush1.bf16.msra.mxu0 %v11599_v33  ;;  %5820 = vmatpush1.bf16.msra.mxu1 %v11601_v34  ;;  %v376_v33 = vld [vmem:[#allocation2 + $0x6e8] sm:$0xff]  ;;  %v11695_v34 = vcombine.low %v351_v19, %v359_v21  ;;  %v407_v50 = vld [vmem:[#allocation2 + $0x7e0] sm:$0xff] }
 0x246   :  { %5649 = vmatprep.subr.bf16.mxu0 %v11616_v35  ;;  %5821 = vmatprep.subr.bf16.mxu1 %v11618_v36  ;;  %v11697_v35 = vcombine.low %v352_v22, %v360_v23  ;;  %v11712_v36 = vcombine.high %v367_v29, %v375_v31  ;;  %v11714_v37 = vcombine.high %v368_v32, %v376_v33  ;;  %v415_v60 = vld [vmem:[#allocation2 + $0x820] sm:$0xff]  ;;  %v416_v62 = vld [vmem:[#allocation2 + $0x828] sm:$0xff] }
 0x247   :  { %v423_v61 = vld [vmem:[#allocation2 + $0x860] sm:$0xff]  ;;  %v432_v9 = vld [vmem:[#allocation2 + $0x8a8] sm:$0xff] }
 0x248   :  { %v431_v5 = vld [vmem:[#allocation2 + $0x8a0] sm:$0xff]  ;;  %v448_v23 = vld [vmem:[#allocation2 + $0x928] sm:$0xff] }
 0x249   :  { %5650 = vmatpush1.bf16.msra.mxu0 %v11615_v42  ;;  %5822 = vmatpush1.bf16.msra.mxu1 %v11617_v43  ;;  %v392_v42 = vld [vmem:[#allocation2 + $0x768] sm:$0xff]  ;;  %v11711_v43 = vcombine.low %v367_v29, %v375_v31  ;;  %v439_v8 = vld [vmem:[#allocation2 + $0x8e0] sm:$0xff] }
 0x24a   :  { %5651 = vmatprep.subr.bf16.mxu0 %v11632_v45  ;;  %5823 = vmatprep.subr.bf16.mxu1 %v11634_v46  ;;  %v11713_v45 = vcombine.low %v368_v32, %v376_v33  ;;  %v11728_v46 = vcombine.high %v383_v38, %v391_v40  ;;  %v11730_v47 = vcombine.high %v384_v41, %v392_v42  ;;  %v447_v21 = vld [vmem:[#allocation2 + $0x920] sm:$0xff]  ;;  %v464_v33 = vld [vmem:[#allocation2 + $0x9a8] sm:$0xff] }
 0x24b   :  { %v455_v22 = vld [vmem:[#allocation2 + $0x960] sm:$0xff] }
 0x24c   :  { %v463_v31 = vld [vmem:[#allocation2 + $0x9a0] sm:$0xff] }
 0x24d   :  { %5652 = vmatpush1.bf16.msra.mxu0 %v11631_v52  ;;  %5824 = vmatpush1.bf16.msra.mxu1 %v11633_v53  ;;  %v408_v52 = vld [vmem:[#allocation2 + $0x7e8] sm:$0xff]  ;;  %v11727_v53 = vcombine.low %v383_v38, %v391_v40  ;;  %v471_v32 = vld [vmem:[#allocation2 + $0x9e0] sm:$0xff] }
 0x24e   :  { %5653 = vmatprep.subr.bf16.mxu0 %v11648_v54  ;;  %5825 = vmatprep.subr.bf16.mxu1 %v11650_v55  ;;  %v11729_v54 = vcombine.low %v384_v41, %v392_v42  ;;  %v11744_v55 = vcombine.high %v399_v48, %v407_v50  ;;  %v11746_v59 = vcombine.high %v400_v51, %v408_v52  ;;  %v479_v40 = vld [vmem:[#allocation2 + $0xa20] sm:$0xff]  ;;  %v480_v42 = vld [vmem:[#allocation2 + $0xa28] sm:$0xff] }
 0x24f   :  { %v487_v41 = vld [vmem:[#allocation2 + $0xa60] sm:$0xff] }
 0x251   :  { %5654 = vmatpush1.bf16.msra.mxu0 %v11647_v63  ;;  %5826 = vmatpush1.bf16.msra.mxu1 %v11649_v0  ;;  %v424_v63 = vld [vmem:[#allocation2 + $0x868] sm:$0xff]  ;;  %v11743_v0 = vcombine.low %v399_v48, %v407_v50  ;;  %v495_v50 = vld [vmem:[#allocation2 + $0xaa0] sm:$0xff] }
 0x252   :  { %5655 = vmatprep.subr.bf16.mxu0 %v11664_v1  ;;  %5827 = vmatprep.subr.bf16.mxu1 %v11666_v2  ;;  %v11745_v1 = vcombine.low %v400_v51, %v408_v52  ;;  %v11760_v2 = vcombine.high %v415_v60, %v423_v61  ;;  %v11762_v4 = vcombine.high %v416_v62, %v424_v63  ;;  %v503_v51 = vld [vmem:[#allocation2 + $0xae0] sm:$0xff]  ;;  %v496_v52 = vld [vmem:[#allocation2 + $0xaa8] sm:$0xff] }
 0x255   :  { %5656 = vmatpush1.bf16.msra.mxu0 %v11663_v12  ;;  %5828 = vmatpush1.bf16.msra.mxu1 %v11665_v13  ;;  %v440_v12 = vld [vmem:[#allocation2 + $0x8e8] sm:$0xff]  ;;  %v11759_v13 = vcombine.low %v415_v60, %v423_v61  ;;  %v511_v61 = vld [vmem:[#allocation2 + $0xb20] sm:$0xff] }
 0x256   :  { %5657 = vmatprep.subr.bf16.mxu0 %v11680_v17  ;;  %5829 = vmatprep.subr.bf16.mxu1 %v11682_v18  ;;  %v11761_v17 = vcombine.low %v416_v62, %v424_v63  ;;  %v11776_v18 = vcombine.high %v431_v5, %v439_v8  ;;  %v11778_v19 = vcombine.high %v432_v9, %v440_v12  ;;  %v519_v62 = vld [vmem:[#allocation2 + $0xb60] sm:$0xff]  ;;  %v512_v63 = vld [vmem:[#allocation2 + $0xb28] sm:$0xff] }
 0x259   :  { %5658 = vmatpush1.bf16.msra.mxu0 %v11679_v24  ;;  %5830 = vmatpush1.bf16.msra.mxu1 %v11681_v26  ;;  %v456_v24 = vld [vmem:[#allocation2 + $0x968] sm:$0xff]  ;;  %v11775_v26 = vcombine.low %v431_v5, %v439_v8  ;;  %v527_v8 = vld [vmem:[#allocation2 + $0xba0] sm:$0xff] }
 0x25a   :  { %5659 = vmatprep.subr.bf16.mxu0 %v11696_v27  ;;  %5831 = vmatprep.subr.bf16.mxu1 %v11698_v28  ;;  %v11777_v27 = vcombine.low %v432_v9, %v440_v12  ;;  %v11792_v28 = vcombine.high %v447_v21, %v455_v22  ;;  %v11794_v29 = vcombine.high %v448_v23, %v456_v24  ;;  %v535_v9 = vld [vmem:[#allocation2 + $0xbe0] sm:$0xff]  ;;  %v528_v12 = vld [vmem:[#allocation2 + $0xba8] sm:$0xff] }
 0x25d   :  { %5660 = vmatpush1.bf16.msra.mxu0 %v11695_v34  ;;  %5832 = vmatpush1.bf16.msra.mxu1 %v11697_v35  ;;  %v472_v34 = vld [vmem:[#allocation2 + $0x9e8] sm:$0xff]  ;;  %v11791_v35 = vcombine.low %v447_v21, %v455_v22  ;;  %v543_v22 = vld [vmem:[#allocation2 + $0xc20] sm:$0xff] }
 0x25e   :  { %5661 = vmatprep.subr.bf16.mxu0 %v11712_v36  ;;  %5833 = vmatprep.subr.bf16.mxu1 %v11714_v37  ;;  %v11793_v36 = vcombine.low %v448_v23, %v456_v24  ;;  %v11808_v37 = vcombine.high %v463_v31, %v471_v32  ;;  %v11810_v38 = vcombine.high %v464_v33, %v472_v34  ;;  %v551_v23 = vld [vmem:[#allocation2 + $0xc60] sm:$0xff]  ;;  %v544_v24 = vld [vmem:[#allocation2 + $0xc28] sm:$0xff] }
 0x261   :  { %5662 = vmatpush1.bf16.msra.mxu0 %v11711_v43  ;;  %5834 = vmatpush1.bf16.msra.mxu1 %v11713_v45  ;;  %v488_v43 = vld [vmem:[#allocation2 + $0xa68] sm:$0xff]  ;;  %v11807_v45 = vcombine.low %v463_v31, %v471_v32  ;;  %v559_v32 = vld [vmem:[#allocation2 + $0xca0] sm:$0xff] }
 0x262   :  { %5663 = vmatprep.subr.bf16.mxu0 %v11728_v46  ;;  %5835 = vmatprep.subr.bf16.mxu1 %v11730_v47  ;;  %v11809_v46 = vcombine.low %v464_v33, %v472_v34  ;;  %v11824_v47 = vcombine.high %v479_v40, %v487_v41  ;;  %v11826_v48 = vcombine.high %v480_v42, %v488_v43  ;;  %v567_v33 = vld [vmem:[#allocation2 + $0xce0] sm:$0xff]  ;;  %v560_v34 = vld [vmem:[#allocation2 + $0xca8] sm:$0xff] }
 0x265   :  { %5664 = vmatpush1.bf16.msra.mxu0 %v11727_v53  ;;  %5836 = vmatpush1.bf16.msra.mxu1 %v11729_v54  ;;  %v504_v53 = vld [vmem:[#allocation2 + $0xae8] sm:$0xff]  ;;  %v11823_v54 = vcombine.low %v479_v40, %v487_v41  ;;  %v575_v41 = vld [vmem:[#allocation2 + $0xd20] sm:$0xff] }
 0x266   :  { %5665 = vmatprep.subr.bf16.mxu0 %v11744_v55  ;;  %5837 = vmatprep.subr.bf16.mxu1 %v11746_v59  ;;  %v11825_v55 = vcombine.low %v480_v42, %v488_v43  ;;  %v11840_v59 = vcombine.high %v495_v50, %v503_v51  ;;  %v11842_v60 = vcombine.high %v496_v52, %v504_v53  ;;  %v583_v42 = vld [vmem:[#allocation2 + $0xd60] sm:$0xff]  ;;  %v576_v43 = vld [vmem:[#allocation2 + $0xd28] sm:$0xff] }
 0x269   :  { %5666 = vmatpush1.bf16.msra.mxu0 %v11743_v0  ;;  %5838 = vmatpush1.bf16.msra.mxu1 %v11745_v1  ;;  %v520_v0 = vld [vmem:[#allocation2 + $0xb68] sm:$0xff]  ;;  %v11839_v1 = vcombine.low %v495_v50, %v503_v51  ;;  %v591_v51 = vld [vmem:[#allocation2 + $0xda0] sm:$0xff] }
 0x26a   :  { %5678 = vmatprep.subr.bf16.mxu0 %v11760_v2  ;;  %5850 = vmatprep.subr.bf16.mxu1 %v11762_v4  ;;  %v11841_v2 = vcombine.low %v496_v52, %v504_v53  ;;  %v11856_v4 = vcombine.high %v511_v61, %v519_v62  ;;  %v11858_v5 = vcombine.high %v512_v63, %v520_v0  ;;  %v599_v52 = vld [vmem:[#allocation2 + $0xde0] sm:$0xff]  ;;  %v592_v53 = vld [vmem:[#allocation2 + $0xda8] sm:$0xff] }
 0x26c   :  { %5668 = vmatmul.mubr.bf16.vlgmr.msra.gmra.mrb[8].mxu0 %v14591_v15  ;;  %5840 = vmatmul.mubr.bf16.vlgmr.msra.gmra.mrb[8].mxu1 %v14591_v15 }
 0x26d   :  { %5679 = vmatpush1.bf16.msra.mxu0 %v11759_v13  ;;  %5851 = vmatpush1.bf16.msra.mxu1 %v11761_v17  ;;  %v536_v13 = vld [vmem:[#allocation2 + $0xbe8] sm:$0xff]  ;;  %v11855_v17 = vcombine.low %v511_v61, %v519_v62  ;;  %v607_v62 = vld [vmem:[#allocation2 + $0xe20] sm:$0xff] }
 0x26e   :  { %5680 = vmatprep.subr.bf16.mxu0 %v11776_v18  ;;  %5852 = vmatprep.subr.bf16.mxu1 %v11778_v19  ;;  %v11857_v18 = vcombine.low %v512_v63, %v520_v0  ;;  %v11872_v19 = vcombine.high %v527_v8, %v535_v9  ;;  %v11874_v21 = vcombine.high %v528_v12, %v536_v13  ;;  %v615_v63 = vld [vmem:[#allocation2 + $0xe60] sm:$0xff]  ;;  %v608_v0 = vld [vmem:[#allocation2 + $0xe28] sm:$0xff] }
 0x26f   :  { %5710 = vmatprep.mubr.bf16.mxu0 %v14599_v25  ;;  %5882 = vmatprep.mubr.bf16.mxu1 %v14599_v25 }
 0x271   :  { %5681 = vmatpush1.bf16.msra.mxu0 %v11775_v26  ;;  %5853 = vmatpush1.bf16.msra.mxu1 %v11777_v27  ;;  %v552_v26 = vld [vmem:[#allocation2 + $0xc68] sm:$0xff]  ;;  %v11871_v27 = vcombine.low %v527_v8, %v535_v9  ;;  %v623_v9 = vld [vmem:[#allocation2 + $0xea0] sm:$0xff] }
 0x272   :  { %5682 = vmatprep.subr.bf16.mxu0 %v11792_v28  ;;  %5854 = vmatprep.subr.bf16.mxu1 %v11794_v29  ;;  %v11873_v28 = vcombine.low %v528_v12, %v536_v13  ;;  %v11888_v29 = vcombine.high %v543_v22, %v551_v23  ;;  %v11890_v31 = vcombine.high %v544_v24, %v552_v26  ;;  %v631_v12 = vld [vmem:[#allocation2 + $0xee0] sm:$0xff]  ;;  %v624_v13 = vld [vmem:[#allocation2 + $0xea8] sm:$0xff] }
 0x275   :  { %5683 = vmatpush1.bf16.msra.mxu0 %v11791_v35  ;;  %5855 = vmatpush1.bf16.msra.mxu1 %v11793_v36  ;;  %v568_v35 = vld [vmem:[#allocation2 + $0xce8] sm:$0xff]  ;;  %v11887_v36 = vcombine.low %v543_v22, %v551_v23  ;;  %v639_v23 = vld [vmem:[#allocation2 + $0xf20] sm:$0xff] }
 0x276   :  { %5684 = vmatprep.subr.bf16.mxu0 %v11808_v37  ;;  %5856 = vmatprep.subr.bf16.mxu1 %v11810_v38  ;;  %v11889_v37 = vcombine.low %v544_v24, %v552_v26  ;;  %v11904_v38 = vcombine.high %v559_v32, %v567_v33  ;;  %v11906_v40 = vcombine.high %v560_v34, %v568_v35  ;;  %v647_v24 = vld [vmem:[#allocation2 + $0xf60] sm:$0xff]  ;;  %v640_v26 = vld [vmem:[#allocation2 + $0xf28] sm:$0xff] }
 0x279   :  { %5685 = vmatpush1.bf16.msra.mxu0 %v11807_v45  ;;  %5857 = vmatpush1.bf16.msra.mxu1 %v11809_v46  ;;  %v584_v45 = vld [vmem:[#allocation2 + $0xd68] sm:$0xff]  ;;  %v11903_v46 = vcombine.low %v559_v32, %v567_v33  ;;  %v655_v33 = vld [vmem:[#allocation2 + $0xfa0] sm:$0xff] }
 0x27a   :  { %5686 = vmatprep.subr.bf16.mxu0 %v11824_v47  ;;  %5858 = vmatprep.subr.bf16.mxu1 %v11826_v48  ;;  %v11905_v47 = vcombine.low %v560_v34, %v568_v35  ;;  %v11920_v48 = vcombine.high %v575_v41, %v583_v42  ;;  %v11922_v50 = vcombine.high %v576_v43, %v584_v45  ;;  %v663_v34 = vld [vmem:[#allocation2 + $0xfe0] sm:$0xff]  ;;  %v656_v35 = vld [vmem:[#allocation2 + $0xfa8] sm:$0xff] }
 0x27d   :  { %5687 = vmatpush1.bf16.msra.mxu0 %v11823_v54  ;;  %5859 = vmatpush1.bf16.msra.mxu1 %v11825_v55  ;;  %v600_v54 = vld [vmem:[#allocation2 + $0xde8] sm:$0xff]  ;;  %v11919_v55 = vcombine.low %v575_v41, %v583_v42  ;;  %v671_v42 = vld [vmem:[#allocation2 + $0x1020] sm:$0xff] }
 0x27e   :  { %5688 = vmatprep.subr.bf16.mxu0 %v11840_v59  ;;  %5860 = vmatprep.subr.bf16.mxu1 %v11842_v60  ;;  %v11921_v59 = vcombine.low %v576_v43, %v584_v45  ;;  %v11936_v60 = vcombine.high %v591_v51, %v599_v52  ;;  %v11938_v61 = vcombine.high %v592_v53, %v600_v54  ;;  %v679_v43 = vld [vmem:[#allocation2 + $0x1060] sm:$0xff]  ;;  %v672_v45 = vld [vmem:[#allocation2 + $0x1028] sm:$0xff] }
 0x281   :  { %5689 = vmatpush1.bf16.msra.mxu0 %v11839_v1  ;;  %5861 = vmatpush1.bf16.msra.mxu1 %v11841_v2  ;;  %v616_v1 = vld [vmem:[#allocation2 + $0xe68] sm:$0xff]  ;;  %v11935_v2 = vcombine.low %v591_v51, %v599_v52  ;;  %v687_v52 = vld [vmem:[#allocation2 + $0x10a0] sm:$0xff] }
 0x282   :  { %5690 = vmatprep.subr.bf16.mxu0 %v11856_v4  ;;  %5862 = vmatprep.subr.bf16.mxu1 %v11858_v5  ;;  %v11937_v4 = vcombine.low %v592_v53, %v600_v54  ;;  %v11952_v5 = vcombine.high %v607_v62, %v615_v63  ;;  %v11954_v8 = vcombine.high %v608_v0, %v616_v1  ;;  %v695_v53 = vld [vmem:[#allocation2 + $0x10e0] sm:$0xff]  ;;  %v688_v54 = vld [vmem:[#allocation2 + $0x10a8] sm:$0xff] }
 0x285   :  { %5691 = vmatpush1.bf16.msra.mxu0 %v11855_v17  ;;  %5863 = vmatpush1.bf16.msra.mxu1 %v11857_v18  ;;  %v632_v17 = vld [vmem:[#allocation2 + $0xee8] sm:$0xff]  ;;  %v11951_v18 = vcombine.low %v607_v62, %v615_v63  ;;  %v703_v63 = vld [vmem:[#allocation2 + $0x1120] sm:$0xff] }
 0x286   :  { %5692 = vmatprep.subr.bf16.mxu0 %v11872_v19  ;;  %5864 = vmatprep.subr.bf16.mxu1 %v11874_v21  ;;  %v11953_v19 = vcombine.low %v608_v0, %v616_v1  ;;  %v11968_v21 = vcombine.high %v623_v9, %v631_v12  ;;  %v11970_v22 = vcombine.high %v624_v13, %v632_v17  ;;  %v711_v0 = vld [vmem:[#allocation2 + $0x1160] sm:$0xff]  ;;  %v704_v1 = vld [vmem:[#allocation2 + $0x1128] sm:$0xff] }
 0x289   :  { %5693 = vmatpush1.bf16.msra.mxu0 %v11871_v27  ;;  %5865 = vmatpush1.bf16.msra.mxu1 %v11873_v28  ;;  %v648_v27 = vld [vmem:[#allocation2 + $0xf68] sm:$0xff]  ;;  %v11967_v28 = vcombine.low %v623_v9, %v631_v12  ;;  %v719_v12 = vld [vmem:[#allocation2 + $0x11a0] sm:$0xff] }
 0x28a   :  { %5694 = vmatprep.subr.bf16.mxu0 %v11888_v29  ;;  %5866 = vmatprep.subr.bf16.mxu1 %v11890_v31  ;;  %v11969_v29 = vcombine.low %v624_v13, %v632_v17  ;;  %v11984_v31 = vcombine.high %v639_v23, %v647_v24  ;;  %v11986_v32 = vcombine.high %v640_v26, %v648_v27  ;;  %v727_v13 = vld [vmem:[#allocation2 + $0x11e0] sm:$0xff]  ;;  %v720_v17 = vld [vmem:[#allocation2 + $0x11a8] sm:$0xff] }
 0x28d   :  { %5695 = vmatpush1.bf16.msra.mxu0 %v11887_v36  ;;  %5867 = vmatpush1.bf16.msra.mxu1 %v11889_v37  ;;  %v664_v36 = vld [vmem:[#allocation2 + $0xfe8] sm:$0xff]  ;;  %v11983_v37 = vcombine.low %v639_v23, %v647_v24  ;;  %v735_v24 = vld [vmem:[#allocation2 + $0x1220] sm:$0xff] }
 0x28e   :  { %5696 = vmatprep.subr.bf16.mxu0 %v11904_v38  ;;  %5868 = vmatprep.subr.bf16.mxu1 %v11906_v40  ;;  %v11985_v38 = vcombine.low %v640_v26, %v648_v27  ;;  %v12000_v40 = vcombine.high %v655_v33, %v663_v34  ;;  %v12002_v41 = vcombine.high %v656_v35, %v664_v36  ;;  %v743_v26 = vld [vmem:[#allocation2 + $0x1260] sm:$0xff]  ;;  %v736_v27 = vld [vmem:[#allocation2 + $0x1228] sm:$0xff] }
 0x291   :  { %5697 = vmatpush1.bf16.msra.mxu0 %v11903_v46  ;;  %5869 = vmatpush1.bf16.msra.mxu1 %v11905_v47  ;;  %v680_v46 = vld [vmem:[#allocation2 + $0x1068] sm:$0xff]  ;;  %v11999_v47 = vcombine.low %v655_v33, %v663_v34  ;;  %v751_v34 = vld [vmem:[#allocation2 + $0x12a0] sm:$0xff] }
 0x292   :  { %5698 = vmatprep.subr.bf16.mxu0 %v11920_v48  ;;  %5870 = vmatprep.subr.bf16.mxu1 %v11922_v50  ;;  %v12001_v48 = vcombine.low %v656_v35, %v664_v36  ;;  %v12016_v50 = vcombine.high %v671_v42, %v679_v43  ;;  %v12018_v51 = vcombine.high %v672_v45, %v680_v46  ;;  %v759_v35 = vld [vmem:[#allocation2 + $0x12e0] sm:$0xff]  ;;  %v752_v36 = vld [vmem:[#allocation2 + $0x12a8] sm:$0xff] }
 0x295   :  { %5699 = vmatpush1.bf16.msra.mxu0 %v11919_v55  ;;  %5871 = vmatpush1.bf16.msra.mxu1 %v11921_v59  ;;  %v696_v55 = vld [vmem:[#allocation2 + $0x10e8] sm:$0xff]  ;;  %v12015_v59 = vcombine.low %v671_v42, %v679_v43  ;;  %v767_v43 = vld [vmem:[#allocation2 + $0x1320] sm:$0xff] }
 0x296   :  { %5700 = vmatprep.subr.bf16.mxu0 %v11936_v60  ;;  %5872 = vmatprep.subr.bf16.mxu1 %v11938_v61  ;;  %v12017_v60 = vcombine.low %v672_v45, %v680_v46  ;;  %v12032_v61 = vcombine.high %v687_v52, %v695_v53  ;;  %v12034_v62 = vcombine.high %v688_v54, %v696_v55  ;;  %v775_v45 = vld [vmem:[#allocation2 + $0x1360] sm:$0xff]  ;;  %v768_v46 = vld [vmem:[#allocation2 + $0x1328] sm:$0xff] }
 0x299   :  { %5701 = vmatpush1.bf16.msra.mxu0 %v11935_v2  ;;  %5873 = vmatpush1.bf16.msra.mxu1 %v11937_v4  ;;  %v712_v2 = vld [vmem:[#allocation2 + $0x1168] sm:$0xff]  ;;  %v12031_v4 = vcombine.low %v687_v52, %v695_v53  ;;  %v783_v53 = vld [vmem:[#allocation2 + $0x13a0] sm:$0xff] }
 0x29a   :  { %5702 = vmatprep.subr.bf16.mxu0 %v11952_v5  ;;  %5874 = vmatprep.subr.bf16.mxu1 %v11954_v8  ;;  %v12033_v5 = vcombine.low %v688_v54, %v696_v55  ;;  %v12048_v8 = vcombine.high %v703_v63, %v711_v0  ;;  %v12050_v9 = vcombine.high %v704_v1, %v712_v2  ;;  %v791_v54 = vld [vmem:[#allocation2 + $0x13e0] sm:$0xff]  ;;  %v784_v55 = vld [vmem:[#allocation2 + $0x13a8] sm:$0xff] }
 0x29d   :  { %5703 = vmatpush1.bf16.msra.mxu0 %v11951_v18  ;;  %5875 = vmatpush1.bf16.msra.mxu1 %v11953_v19  ;;  %v728_v18 = vld [vmem:[#allocation2 + $0x11e8] sm:$0xff]  ;;  %v12047_v19 = vcombine.low %v703_v63, %v711_v0  ;;  %v799_v0 = vld [vmem:[#allocation2 + $0x1420] sm:$0xff] }
 0x29e   :  { %5704 = vmatprep.subr.bf16.mxu0 %v11968_v21  ;;  %5876 = vmatprep.subr.bf16.mxu1 %v11970_v22  ;;  %v12049_v21 = vcombine.low %v704_v1, %v712_v2  ;;  %v12064_v22 = vcombine.high %v719_v12, %v727_v13  ;;  %v12066_v23 = vcombine.high %v720_v17, %v728_v18  ;;  %v807_v1 = vld [vmem:[#allocation2 + $0x1460] sm:$0xff]  ;;  %v800_v2 = vld [vmem:[#allocation2 + $0x1428] sm:$0xff] }
 0x2a1   :  { %5705 = vmatpush1.bf16.msra.mxu0 %v11967_v28  ;;  %5877 = vmatpush1.bf16.msra.mxu1 %v11969_v29  ;;  %v744_v28 = vld [vmem:[#allocation2 + $0x1268] sm:$0xff]  ;;  %v12063_v29 = vcombine.low %v719_v12, %v727_v13  ;;  %v815_v13 = vld [vmem:[#allocation2 + $0x14a0] sm:$0xff] }
 0x2a2   :  { %5706 = vmatprep.subr.bf16.mxu0 %v11984_v31  ;;  %5878 = vmatprep.subr.bf16.mxu1 %v11986_v32  ;;  %v12065_v31 = vcombine.low %v720_v17, %v728_v18  ;;  %v12080_v32 = vcombine.high %v735_v24, %v743_v26  ;;  %v12082_v33 = vcombine.high %v736_v27, %v744_v28  ;;  %v823_v17 = vld [vmem:[#allocation2 + $0x14e0] sm:$0xff]  ;;  %v816_v18 = vld [vmem:[#allocation2 + $0x14a8] sm:$0xff] }
 0x2a5   :  { %5707 = vmatpush1.bf16.msra.mxu0 %v11983_v37  ;;  %5879 = vmatpush1.bf16.msra.mxu1 %v11985_v38  ;;  %v760_v37 = vld [vmem:[#allocation2 + $0x12e8] sm:$0xff]  ;;  %v12079_v38 = vcombine.low %v735_v24, %v743_v26  ;;  %v831_v26 = vld [vmem:[#allocation2 + $0x1520] sm:$0xff] }
 0x2a6   :  { %5708 = vmatprep.subr.bf16.mxu0 %v12000_v40  ;;  %5880 = vmatprep.subr.bf16.mxu1 %v12002_v41  ;;  %v12081_v40 = vcombine.low %v736_v27, %v744_v28  ;;  %v12096_v41 = vcombine.high %v751_v34, %v759_v35  ;;  %v12098_v42 = vcombine.high %v752_v36, %v760_v37  ;;  %v839_v27 = vld [vmem:[#allocation2 + $0x1560] sm:$0xff]  ;;  %v832_v28 = vld [vmem:[#allocation2 + $0x1528] sm:$0xff] }
 0x2a9   :  { %5709 = vmatpush1.bf16.msra.mxu0 %v11999_v47  ;;  %5881 = vmatpush1.bf16.msra.mxu1 %v12001_v48  ;;  %v776_v47 = vld [vmem:[#allocation2 + $0x1368] sm:$0xff]  ;;  %v12095_v48 = vcombine.low %v751_v34, %v759_v35  ;;  %v847_v35 = vld [vmem:[#allocation2 + $0x15a0] sm:$0xff] }
 0x2aa   :  { %5721 = vmatprep.subr.bf16.mxu0 %v12016_v50  ;;  %5893 = vmatprep.subr.bf16.mxu1 %v12018_v51  ;;  %v12097_v50 = vcombine.low %v752_v36, %v760_v37  ;;  %v12112_v51 = vcombine.high %v767_v43, %v775_v45  ;;  %v12114_v52 = vcombine.high %v768_v46, %v776_v47  ;;  %v855_v36 = vld [vmem:[#allocation2 + $0x15e0] sm:$0xff]  ;;  %v848_v37 = vld [vmem:[#allocation2 + $0x15a8] sm:$0xff] }
 0x2ac   :  { %5711 = vmatmul.mubr.bf16.vlgmr.msra.gmra.mrb[8].mxu0 %v14617_v30  ;;  %5883 = vmatmul.mubr.bf16.vlgmr.msra.gmra.mrb[8].mxu1 %v14617_v30 }
 0x2ad   :  { %5722 = vmatpush1.bf16.msra.mxu0 %v12015_v59  ;;  %5894 = vmatpush1.bf16.msra.mxu1 %v12017_v60  ;;  %v792_v59 = vld [vmem:[#allocation2 + $0x13e8] sm:$0xff]  ;;  %v12111_v60 = vcombine.low %v767_v43, %v775_v45  ;;  %v863_v45 = vld [vmem:[#allocation2 + $0x1620] sm:$0xff] }
 0x2ae   :  { %5723 = vmatprep.subr.bf16.mxu0 %v12032_v61  ;;  %5895 = vmatprep.subr.bf16.mxu1 %v12034_v62  ;;  %v12113_v61 = vcombine.low %v768_v46, %v776_v47  ;;  %v12128_v62 = vcombine.high %v783_v53, %v791_v54  ;;  %v12130_v63 = vcombine.high %v784_v55, %v792_v59  ;;  %v871_v46 = vld [vmem:[#allocation2 + $0x1660] sm:$0xff]  ;;  %v864_v47 = vld [vmem:[#allocation2 + $0x1628] sm:$0xff] }
 0x2af   :  { %5753 = vmatprep.mubr.bf16.mxu0 %v14619_v39  ;;  %5925 = vmatprep.mubr.bf16.mxu1 %v14619_v39 }
 0x2b1   :  { %5724 = vmatpush1.bf16.msra.mxu0 %v12031_v4  ;;  %5896 = vmatpush1.bf16.msra.mxu1 %v12033_v5  ;;  %v808_v4 = vld [vmem:[#allocation2 + $0x1468] sm:$0xff]  ;;  %v12127_v5 = vcombine.low %v783_v53, %v791_v54  ;;  %v879_v54 = vld [vmem:[#allocation2 + $0x16a0] sm:$0xff] }
 0x2b2   :  { %5725 = vmatprep.subr.bf16.mxu0 %v12048_v8  ;;  %5897 = vmatprep.subr.bf16.mxu1 %v12050_v9  ;;  %v12129_v8 = vcombine.low %v784_v55, %v792_v59  ;;  %v12144_v9 = vcombine.high %v799_v0, %v807_v1  ;;  %v12146_v12 = vcombine.high %v800_v2, %v808_v4  ;;  %v887_v55 = vld [vmem:[#allocation2 + $0x16e0] sm:$0xff]  ;;  %v880_v59 = vld [vmem:[#allocation2 + $0x16a8] sm:$0xff] }
 0x2b5   :  { %5726 = vmatpush1.bf16.msra.mxu0 %v12047_v19  ;;  %5898 = vmatpush1.bf16.msra.mxu1 %v12049_v21  ;;  %v824_v19 = vld [vmem:[#allocation2 + $0x14e8] sm:$0xff]  ;;  %v12143_v21 = vcombine.low %v799_v0, %v807_v1  ;;  %v895_v1 = vld [vmem:[#allocation2 + $0x1720] sm:$0xff] }
 0x2b6   :  { %5727 = vmatprep.subr.bf16.mxu0 %v12064_v22  ;;  %5899 = vmatprep.subr.bf16.mxu1 %v12066_v23  ;;  %v12145_v22 = vcombine.low %v800_v2, %v808_v4  ;;  %v12160_v23 = vcombine.high %v815_v13, %v823_v17  ;;  %v12162_v24 = vcombine.high %v816_v18, %v824_v19  ;;  %v903_v2 = vld [vmem:[#allocation2 + $0x1760] sm:$0xff]  ;;  %v896_v4 = vld [vmem:[#allocation2 + $0x1728] sm:$0xff] }
 0x2b9   :  { %5728 = vmatpush1.bf16.msra.mxu0 %v12063_v29  ;;  %5900 = vmatpush1.bf16.msra.mxu1 %v12065_v31  ;;  %v840_v29 = vld [vmem:[#allocation2 + $0x1568] sm:$0xff]  ;;  %v12159_v31 = vcombine.low %v815_v13, %v823_v17  ;;  %v911_v17 = vld [vmem:[#allocation2 + $0x17a0] sm:$0xff] }
 0x2ba   :  { %5729 = vmatprep.subr.bf16.mxu0 %v12080_v32  ;;  %5901 = vmatprep.subr.bf16.mxu1 %v12082_v33  ;;  %v12161_v32 = vcombine.low %v816_v18, %v824_v19  ;;  %v12176_v33 = vcombine.high %v831_v26, %v839_v27  ;;  %v12178_v34 = vcombine.high %v832_v28, %v840_v29  ;;  %v919_v18 = vld [vmem:[#allocation2 + $0x17e0] sm:$0xff]  ;;  %v912_v19 = vld [vmem:[#allocation2 + $0x17a8] sm:$0xff] }
 0x2bd   :  { %5730 = vmatpush1.bf16.msra.mxu0 %v12079_v38  ;;  %5902 = vmatpush1.bf16.msra.mxu1 %v12081_v40  ;;  %v856_v38 = vld [vmem:[#allocation2 + $0x15e8] sm:$0xff]  ;;  %v12175_v40 = vcombine.low %v831_v26, %v839_v27  ;;  %v927_v27 = vld [vmem:[#allocation2 + $0x1820] sm:$0xff] }
 0x2be   :  { %5731 = vmatprep.subr.bf16.mxu0 %v12096_v41  ;;  %5903 = vmatprep.subr.bf16.mxu1 %v12098_v42  ;;  %v12177_v41 = vcombine.low %v832_v28, %v840_v29  ;;  %v12192_v42 = vcombine.high %v847_v35, %v855_v36  ;;  %v12194_v43 = vcombine.high %v848_v37, %v856_v38  ;;  %v935_v28 = vld [vmem:[#allocation2 + $0x1860] sm:$0xff]  ;;  %v928_v29 = vld [vmem:[#allocation2 + $0x1828] sm:$0xff] }
 0x2c1   :  { %5732 = vmatpush1.bf16.msra.mxu0 %v12095_v48  ;;  %5904 = vmatpush1.bf16.msra.mxu1 %v12097_v50  ;;  %v872_v48 = vld [vmem:[#allocation2 + $0x1668] sm:$0xff]  ;;  %v12191_v50 = vcombine.low %v847_v35, %v855_v36  ;;  %v161_v36 = vld [vmem:[#allocation2 + $0x30] sm:$0xff] }
 0x2c2   :  { %5733 = vmatprep.subr.bf16.mxu0 %v12112_v51  ;;  %5905 = vmatprep.subr.bf16.mxu1 %v12114_v52  ;;  %v12193_v51 = vcombine.low %v848_v37, %v856_v38  ;;  %v12208_v52 = vcombine.high %v863_v45, %v871_v46  ;;  %v12210_v53 = vcombine.high %v864_v47, %v872_v48  ;;  %v169_v37 = vld [vmem:[#allocation2 + $0x70] sm:$0xff] }
 0x2c3   :  { %v12271_v38 = vcombine.low %v927_v27, %v935_v28 }
 0x2c5   :  { %5734 = vmatpush1.bf16.msra.mxu0 %v12111_v60  ;;  %5906 = vmatpush1.bf16.msra.mxu1 %v12113_v61  ;;  %v888_v60 = vld [vmem:[#allocation2 + $0x16e8] sm:$0xff]  ;;  %v12207_v61 = vcombine.low %v863_v45, %v871_v46  ;;  %v177_v46 = vld [vmem:[#allocation2 + $0xb0] sm:$0xff] }
 0x2c6   :  { %5735 = vmatprep.subr.bf16.mxu0 %v12128_v62  ;;  %5907 = vmatprep.subr.bf16.mxu1 %v12130_v63  ;;  %v12209_v62 = vcombine.low %v864_v47, %v872_v48  ;;  %v12224_v63 = vcombine.high %v879_v54, %v887_v55  ;;  %v12226_v0 = vcombine.high %v880_v59, %v888_v60  ;;  %v185_v47 = vld [vmem:[#allocation2 + $0xf0] sm:$0xff]  ;;  %v178_v48 = vld [vmem:[#allocation2 + $0xb8] sm:$0xff] }
 0x2c9   :  { %5736 = vmatpush1.bf16.msra.mxu0 %v12127_v5  ;;  %5908 = vmatpush1.bf16.msra.mxu1 %v12129_v8  ;;  %v904_v5 = vld [vmem:[#allocation2 + $0x1768] sm:$0xff]  ;;  %v12223_v8 = vcombine.low %v879_v54, %v887_v55  ;;  %v193_v55 = vld [vmem:[#allocation2 + $0x130] sm:$0xff] }
 0x2ca   :  { %5737 = vmatprep.subr.bf16.mxu0 %v12144_v9  ;;  %5909 = vmatprep.subr.bf16.mxu1 %v12146_v12  ;;  %v12225_v9 = vcombine.low %v880_v59, %v888_v60  ;;  %v12240_v12 = vcombine.high %v895_v1, %v903_v2  ;;  %v12242_v13 = vcombine.high %v896_v4, %v904_v5  ;;  %v201_v59 = vld [vmem:[#allocation2 + $0x170] sm:$0xff]  ;;  %v194_v60 = vld [vmem:[#allocation2 + $0x138] sm:$0xff] }
 0x2cd   :  { %5738 = vmatpush1.bf16.msra.mxu0 %v12143_v21  ;;  %5910 = vmatpush1.bf16.msra.mxu1 %v12145_v22  ;;  %v920_v21 = vld [vmem:[#allocation2 + $0x17e8] sm:$0xff]  ;;  %v12239_v22 = vcombine.low %v895_v1, %v903_v2  ;;  %v965_v1 = vsub.s32 5, %v14663_v57 }
 0x2ce   :  { %5739 = vmatprep.subr.bf16.mxu0 %v12160_v23  ;;  %5911 = vmatprep.subr.bf16.mxu1 %v12162_v24  ;;  %v12241_v23 = vcombine.low %v896_v4, %v904_v5  ;;  %v12256_v24 = vcombine.high %v911_v17, %v919_v18  ;;  %v12258_v26 = vcombine.high %v912_v19, %v920_v21  ;;  %v973_v5 = vsub.s32 7, %v14663_v57 }
 0x2cf   :  { %v11540_v4 = vcombine.high %v193_v55, %v201_v59 }
 0x2d1   :  { %5740 = vmatpush1.bf16.msra.mxu0 %v12159_v31  ;;  %5912 = vmatpush1.bf16.msra.mxu1 %v12161_v32  ;;  %v936_v31 = vld [vmem:[#allocation2 + $0x1868] sm:$0xff]  ;;  %v12255_v32 = vcombine.low %v911_v17, %v919_v18  ;;  %v210_v18 = vld [vmem:[#allocation2 + $0x1b8] sm:$0xff] }
 0x2d2   :  { %5741 = vmatprep.subr.bf16.mxu0 %v12176_v33  ;;  %5913 = vmatprep.subr.bf16.mxu1 %v12178_v34  ;;  %v12257_v33 = vcombine.low %v912_v19, %v920_v21  ;;  %v12272_v34 = vcombine.high %v927_v27, %v935_v28  ;;  %v12274_v35 = vcombine.high %v928_v29, %v936_v31  ;;  %v218_v19 = vld [vmem:[#allocation2 + $0x1f8] sm:$0xff] }
 0x2d3   :  { %v11539_v21 = vcombine.low %v193_v55, %v201_v59  ;;  %v241_v59 = vld [vmem:[#allocation2 + $0x2b0] sm:$0xff] }
 0x2d5   :  { %5742 = vmatpush1.bf16.msra.mxu0 %v12175_v40  ;;  %5914 = vmatpush1.bf16.msra.mxu1 %v12177_v41  ;;  %v162_v40 = vld [vmem:[#allocation2 + $0x38] sm:$0xff] }
 0x2d6   :  { %5743 = vmatprep.subr.bf16.mxu0 %v12192_v42  ;;  %5915 = vmatprep.subr.bf16.mxu1 %v12194_v43  ;;  %v170_v41 = vld [vmem:[#allocation2 + $0x78] sm:$0xff]  ;;  %v12273_v42 = vcombine.low %v928_v29, %v936_v31  ;;  %v11508_v43 = vcombine.high %v161_v36, %v169_v37  ;;  %v11558_v29 = vcombine.high %v210_v18, %v218_v19  ;;  %v225_v31 = vld [vmem:[#allocation2 + $0x230] sm:$0xff] }
 0x2d7   :  { %v11510_v45 = vcombine.high %v162_v40, %v170_v41 }
 0x2d9   :  { %5744 = vmatpush1.bf16.msra.mxu0 %v12191_v50  ;;  %5916 = vmatpush1.bf16.msra.mxu1 %v12193_v51  ;;  %v186_v50 = vld [vmem:[#allocation2 + $0xf8] sm:$0xff]  ;;  %v11507_v51 = vcombine.low %v161_v36, %v169_v37 }
 0x2da   :  { %5745 = vmatprep.subr.bf16.mxu0 %v12208_v52  ;;  %5917 = vmatprep.subr.bf16.mxu1 %v12210_v53  ;;  %v11509_v52 = vcombine.low %v162_v40, %v170_v41  ;;  %v11524_v53 = vcombine.high %v177_v46, %v185_v47  ;;  %v11526_v54 = vcombine.high %v178_v48, %v186_v50  ;;  %v234_v36 = vld [vmem:[#allocation2 + $0x278] sm:$0xff] }
 0x2db   :  { %v11525_v2 = vcombine.low %v178_v48, %v186_v50 }
 0x2dd   :  { %5746 = vmatpush1.bf16.msra.mxu0 %v12207_v61  ;;  %5918 = vmatpush1.bf16.msra.mxu1 %v12209_v62  ;;  %v202_v61 = vld [vmem:[#allocation2 + $0x178] sm:$0xff]  ;;  %v961_v62 = vsub.s32 4, %v14663_v57 }
 0x2de   :  { %5747 = vmatprep.subr.bf16.mxu0 %v12224_v63  ;;  %5919 = vmatprep.subr.bf16.mxu1 %v12226_v0  ;;  %v11523_v63 = vcombine.low %v177_v46, %v185_v47  ;;  %v969_v0 = vsub.s32 6, %v14663_v57 }
 0x2e1   :  { %5748 = vmatpush1.bf16.msra.mxu0 %v12223_v8  ;;  %5920 = vmatpush1.bf16.msra.mxu1 %v12225_v9  ;;  %v11542_v8 = vcombine.high %v194_v60, %v202_v61  ;;  %v209_v9 = vld [vmem:[#allocation2 + $0x1b0] sm:$0xff] }
 0x2e2   :  { %5749 = vmatprep.subr.bf16.mxu0 %v12240_v12  ;;  %5921 = vmatprep.subr.bf16.mxu1 %v12242_v13  ;;  %v217_v12 = vld [vmem:[#allocation2 + $0x1f0] sm:$0xff]  ;;  %v14218_v13 = vld [vmem:[#allocation4] sm:$0xff] }
 0x2e3   :  { %v962_v17 = vrot.slane %v14218_v13, %v961_v62  ;;  %v11556_v27 = vcombine.high %v209_v9, %v217_v12 }
 0x2e5   :  { %5750 = vmatpush1.bf16.msra.mxu0 %v12239_v22  ;;  %5922 = vmatpush1.bf16.msra.mxu1 %v12241_v23  ;;  %v970_v22 = vrot.slane %v14218_v13, %v969_v0  ;;  %v966_v23 = vrot.slane %v14218_v13, %v965_v1 }
 0x2e6   :  { %5751 = vmatprep.subr.bf16.mxu0 %v12256_v24  ;;  %5923 = vmatprep.subr.bf16.mxu1 %v12258_v26  ;;  %v11541_v24 = vcombine.low %v194_v60, %v202_v61  ;;  %v974_v26 = vrot.slane %v14218_v13, %v973_v5  ;;  %v249_v60 = vld [vmem:[#allocation2 + $0x2f0] sm:$0xff] }
 0x2e9   :  { %5752 = vmatpush1.bf16.msra.mxu0 %v12255_v32  ;;  %5924 = vmatpush1.bf16.msra.mxu1 %v12257_v33 }
 0x2ea   :  { %5764 = vmatprep.subr.bf16.mxu0 %v12272_v34  ;;  %5936 = vmatprep.subr.bf16.mxu1 %v12274_v35  ;;  %v226_v35 = vld [vmem:[#allocation2 + $0x238] sm:$0xff] }
 0x2eb   :  { %v11574_v55 = vcombine.high %v226_v35, %v234_v36 }
 0x2ec   :  { %5754 = vmatmul.mubr.bf16.vlgmr.msra.gmra.mrb[8].mxu0 %v14631_v44  ;;  %5926 = vmatmul.mubr.bf16.vlgmr.msra.gmra.mrb[8].mxu1 %v14631_v44 }
 0x2ed   :  { %5765 = vmatpush1.bf16.msra.mxu0 %v12271_v38  ;;  %5937 = vmatpush1.bf16.msra.mxu1 %v12273_v42  ;;  %v11555_v42 = vcombine.low %v209_v9, %v217_v12  ;;  %v250_v9 = vld [vmem:[#allocation2 + $0x2f8] sm:$0xff] }
 0x2ee   :  { %5796 = vmatprep.mubr.bf16.mxu0 %v14418_v49  ;;  %5968 = vmatprep.mubr.bf16.mxu1 %v14418_v49 }
 0x2ef   :  { %5979 = vmatprep.subr.bf16.mxu0 %v11508_v43  ;;  %6151 = vmatprep.subr.bf16.mxu1 %v11510_v45  ;;  %v11557_v43 = vcombine.low %v210_v18, %v218_v19 }
 0x2f8   :  { %12283 = vmatmul.mubr.msk.bf16.vlgmr.msra.gmra.mrb[8].mxu0 %vm4943_vm0, %v14643_v56  ;;  %12284 = vmatmul.mubr.msk.bf16.vlgmr.msra.gmra.mrb[8].mxu1 %vm4943_vm0, %v14643_v56 }
 0x2f9   :  { %5980 = vmatpush1.bf16.msra.mxu0 %v11507_v51  ;;  %6152 = vmatpush1.bf16.msra.mxu1 %v11509_v52 }
 0x2fa   :  { %5981 = vmatprep.subr.bf16.mxu0 %v11524_v53  ;;  %6153 = vmatprep.subr.bf16.mxu1 %v11526_v54 }
 0x2fb   :  { %6011 = vmatprep.mubr.bf16.mxu0 %v14581_v58  ;;  %6183 = vmatprep.mubr.bf16.mxu1 %v14581_v58  ;;  %v233_v58 = vld [vmem:[#allocation2 + $0x270] sm:$0xff] }
 0x2fc   :  { %v11572_v50 = vcombine.high %v225_v31, %v233_v58  ;;  %v11571_v54 = vcombine.low %v225_v31, %v233_v58  ;;  %v258_v58 = vld [vmem:[#allocation2 + $0x338] sm:$0xff] }
 0x2fd   :  { %5982 = vmatpush1.bf16.msra.mxu0 %v11523_v63  ;;  %6154 = vmatpush1.bf16.msra.mxu1 %v11525_v2 }
 0x2fe   :  { %5983 = vmatprep.subr.bf16.mxu0 %v11540_v4  ;;  %6155 = vmatprep.subr.bf16.mxu1 %v11542_v8  ;;  %v11573_v4 = vcombine.low %v226_v35, %v234_v36  ;;  %v242_v8 = vld [vmem:[#allocation2 + $0x2b8] sm:$0xff] }
 0x2ff   :  { %v5454_v28 = vpop.f32.mrb[4].mxu0  ;;  %v5626_v33 = vpop.f32.mrb[4].mxu1 }
 0x300   :  { %v13012_v32 = vadd.f32 %v5454_v28, %v962_v17  ;;  %v5456_v34 = vpop.f32.mrb[5].mxu0  ;;  %v13016_v37 = vadd.f32 %v5626_v33, %v970_v22  ;;  %v5628_v40 = vpop.f32.mrb[5].mxu1  ;;  %v257_v28 = vld [vmem:[#allocation2 + $0x330] sm:$0xff]  ;;  %v11587_v33 = vcombine.low %v241_v59, %v249_v60 }
 0x301   :  { %5984 = vmatpush1.bf16.msra.mxu0 %v11539_v21  ;;  %v13013_v38 = vadd.f32 %v5456_v34, %v966_v23  ;;  %v5458_v41 = vpop.f32.mrb[6].mxu0  ;;  %6156 = vmatpush1.bf16.msra.mxu1 %v11541_v24  ;;  %v13017_v45 = vadd.f32 %v5628_v40, %v974_v26  ;;  %v5630_v47 = vpop.f32.mrb[6].mxu1  ;;  %v11589_v34 = vcombine.low %v242_v8, %v250_v9  ;;  %v274_v40 = vld [vmem:[#allocation2 + $0x3b8] sm:$0xff] }
 0x302   :  { %v13014_v46 = vadd.f32 %v5458_v41, %v962_v17  ;;  %v5460_v48 = vpop.f32.mrb[7].mxu0  ;;  %5985 = vmatprep.subr.bf16.mxu0 %v11556_v27  ;;  %v13018_v51 = vadd.f32 %v5630_v47, %v970_v22  ;;  %v5632_v53 = vpop.f32.mrb[7].mxu1  ;;  %6157 = vmatprep.subr.bf16.mxu1 %v11558_v29  ;;  %v6327_v61 = vmax.f32 %v13012_v32, 0.0  ;;  %v6329_v12 = vmax.f32 %v13016_v37, 0.0  ;;  %v265_v29 = vld [vmem:[#allocation2 + $0x370] sm:$0xff]  ;;  %v266_v32 = vld [vmem:[#allocation2 + $0x378] sm:$0xff] }
 0x303   :  { %v13015_v52 = vadd.f32 %v5460_v48, %v966_v23  ;;  %v13019_v2 = vadd.f32 %v5632_v53, %v974_v26  ;;  %v6328_v13 = vmax.f32 %v13013_v38, 0.0  ;;  %v6330_v19 = vmax.f32 %v13017_v45, 0.0  ;;  %v273_v37 = vld [vmem:[#allocation2 + $0x3b0] sm:$0xff]  ;;  %v282_v41 = vld [vmem:[#allocation2 + $0x3f8] sm:$0xff] }
 0x304   :  { %v6343_v63 = vmax.f32 %v13014_v46, 0.0  ;;  %v6345_v17 = vmax.f32 %v13018_v51, 0.0  ;;  %v11588_v23 = vcombine.high %v241_v59, %v249_v60  ;;  %v11590_v26 = vcombine.high %v242_v8, %v250_v9  ;;  %v281_v38 = vld [vmem:[#allocation2 + $0x3f0] sm:$0xff]  ;;  %v298_v51 = vld [vmem:[#allocation2 + $0x478] sm:$0xff] }
 0x305   :  { %v6344_v18 = vmax.f32 %v13015_v52, 0.0  ;;  %5986 = vmatpush1.bf16.msra.mxu0 %v11555_v42  ;;  %v6346_v22 = vmax.f32 %v13019_v2, 0.0  ;;  %6158 = vmatpush1.bf16.msra.mxu1 %v11557_v43  ;;  %v11604_v35 = vcombine.high %v257_v28, %v265_v29  ;;  %v11606_v36 = vcombine.high %v258_v58, %v266_v32  ;;  %v289_v47 = vld [vmem:[#allocation2 + $0x430] sm:$0xff] }
 0x306   :  { %v14725_v21 = vpack.c.bf16 %v6343_v63, %v6327_v61  ;;  %5987 = vmatprep.subr.bf16.mxu0 %v11572_v50  ;;  %v14727_v24 = vpack.c.bf16 %v6345_v17, %v6329_v12  ;;  %6159 = vmatprep.subr.bf16.mxu1 %v11574_v55  ;;  %v11603_v42 = vcombine.low %v257_v28, %v265_v29  ;;  %v297_v48 = vld [vmem:[#allocation2 + $0x470] sm:$0xff]  ;;  %v290_v50 = vld [vmem:[#allocation2 + $0x438] sm:$0xff] }
 0x307   :  { %v14729_v27 = vpack.c.bf16 %v6344_v18, %v6328_v13  ;;  %v14731_v31 = vpack.c.bf16 %v6346_v22, %v6330_v19  ;;  %v11605_v43 = vcombine.low %v258_v58, %v266_v32  ;;  %v11620_v45 = vcombine.high %v273_v37, %v281_v38  ;;  %v305_v59 = vld [vmem:[#allocation2 + $0x4b0] sm:$0xff]  ;;  %v306_v61 = vld [vmem:[#allocation2 + $0x4b8] sm:$0xff] }
 0x308   :  { %v11622_v46 = vcombine.high %v274_v40, %v282_v41  ;;  %v11619_v52 = vcombine.low %v273_v37, %v281_v38  ;;  %v11621_v53 = vcombine.low %v274_v40, %v282_v41  ;;  %v11638_v55 = vcombine.high %v290_v50, %v298_v51  ;;  %v313_v60 = vld [vmem:[#allocation2 + $0x4f0] sm:$0xff]  ;;  %v314_v63 = vld [vmem:[#allocation2 + $0x4f8] sm:$0xff] }
 0x309   :  { %5988 = vmatpush1.bf16.msra.mxu0 %v11571_v54  ;;  %6160 = vmatpush1.bf16.msra.mxu1 %v11573_v4  ;;  %v11636_v54 = vcombine.high %v289_v47, %v297_v48  ;;  %v11635_v2 = vcombine.low %v289_v47, %v297_v48  ;;  %v11637_v4 = vcombine.low %v290_v50, %v298_v51  ;;  %v321_v12 = vld [vmem:[#allocation2 + $0x530] sm:$0xff]  ;;  %v322_v17 = vld [vmem:[#allocation2 + $0x538] sm:$0xff] }
 0x30a   :  { %5989 = vmatprep.subr.bf16.mxu0 %v11588_v23  ;;  %6161 = vmatprep.subr.bf16.mxu1 %v11590_v26  ;;  %v11652_v8 = vcombine.high %v305_v59, %v313_v60  ;;  %v11654_v9 = vcombine.high %v306_v61, %v314_v63  ;;  %v329_v13 = vld [vmem:[#allocation2 + $0x570] sm:$0xff]  ;;  %v330_v18 = vld [vmem:[#allocation2 + $0x578] sm:$0xff]  ;;  %v11651_v19 = vcombine.low %v305_v59, %v313_v60 }
 0x30b   :  { %v11653_v22 = vcombine.low %v306_v61, %v314_v63  ;;  %v11668_v23 = vcombine.high %v321_v12, %v329_v13  ;;  %v11670_v26 = vcombine.high %v322_v17, %v330_v18  ;;  %v337_v28 = vld [vmem:[#allocation2 + $0x5b0] sm:$0xff]  ;;  %v338_v58 = vld [vmem:[#allocation2 + $0x5b8] sm:$0xff] }
 0x30c   :  { %v345_v29 = vld [vmem:[#allocation2 + $0x5f0] sm:$0xff]  ;;  %v346_v32 = vld [vmem:[#allocation2 + $0x5f8] sm:$0xff] }
 0x30d   :  { %5990 = vmatpush1.bf16.msra.mxu0 %v11587_v33  ;;  %6162 = vmatpush1.bf16.msra.mxu1 %v11589_v34  ;;  %v11667_v33 = vcombine.low %v321_v12, %v329_v13  ;;  %v11669_v34 = vcombine.low %v322_v17, %v330_v18  ;;  %v353_v37 = vld [vmem:[#allocation2 + $0x630] sm:$0xff]  ;;  %v354_v40 = vld [vmem:[#allocation2 + $0x638] sm:$0xff] }
 0x30e   :  { %5991 = vmatprep.subr.bf16.mxu0 %v11604_v35  ;;  %6163 = vmatprep.subr.bf16.mxu1 %v11606_v36  ;;  %v11684_v35 = vcombine.high %v337_v28, %v345_v29  ;;  %v11686_v36 = vcombine.high %v338_v58, %v346_v32  ;;  %v361_v38 = vld [vmem:[#allocation2 + $0x670] sm:$0xff]  ;;  %v362_v41 = vld [vmem:[#allocation2 + $0x678] sm:$0xff] }
 0x30f   :  { %v369_v47 = vld [vmem:[#allocation2 + $0x6b0] sm:$0xff]  ;;  %v370_v50 = vld [vmem:[#allocation2 + $0x6b8] sm:$0xff] }
 0x310   :  { %v377_v48 = vld [vmem:[#allocation2 + $0x6f0] sm:$0xff]  ;;  %v378_v51 = vld [vmem:[#allocation2 + $0x6f8] sm:$0xff] }
 0x311   :  { %5992 = vmatpush1.bf16.msra.mxu0 %v11603_v42  ;;  %6164 = vmatpush1.bf16.msra.mxu1 %v11605_v43  ;;  %v11683_v42 = vcombine.low %v337_v28, %v345_v29  ;;  %v11685_v43 = vcombine.low %v338_v58, %v346_v32  ;;  %v385_v59 = vld [vmem:[#allocation2 + $0x730] sm:$0xff]  ;;  %v386_v61 = vld [vmem:[#allocation2 + $0x738] sm:$0xff] }
 0x312   :  { %5993 = vmatprep.subr.bf16.mxu0 %v11620_v45  ;;  %6165 = vmatprep.subr.bf16.mxu1 %v11622_v46  ;;  %v11700_v45 = vcombine.high %v353_v37, %v361_v38  ;;  %v11702_v46 = vcombine.high %v354_v40, %v362_v41  ;;  %v393_v60 = vld [vmem:[#allocation2 + $0x770] sm:$0xff]  ;;  %v394_v63 = vld [vmem:[#allocation2 + $0x778] sm:$0xff] }
 0x313   :  { %v401_v12 = vld [vmem:[#allocation2 + $0x7b0] sm:$0xff]  ;;  %v402_v17 = vld [vmem:[#allocation2 + $0x7b8] sm:$0xff] }
 0x314   :  { %v409_v13 = vld [vmem:[#allocation2 + $0x7f0] sm:$0xff]  ;;  %v410_v18 = vld [vmem:[#allocation2 + $0x7f8] sm:$0xff] }
 0x315   :  { %5994 = vmatpush1.bf16.msra.mxu0 %v11619_v52  ;;  %6166 = vmatpush1.bf16.msra.mxu1 %v11621_v53  ;;  %v11699_v52 = vcombine.low %v353_v37, %v361_v38  ;;  %v11701_v53 = vcombine.low %v354_v40, %v362_v41  ;;  %v417_v28 = vld [vmem:[#allocation2 + $0x830] sm:$0xff]  ;;  %v418_v58 = vld [vmem:[#allocation2 + $0x838] sm:$0xff] }
 0x316   :  { %5995 = vmatprep.subr.bf16.mxu0 %v11636_v54  ;;  %6167 = vmatprep.subr.bf16.mxu1 %v11638_v55  ;;  %v11716_v54 = vcombine.high %v369_v47, %v377_v48  ;;  %v11718_v55 = vcombine.high %v370_v50, %v378_v51  ;;  %v425_v29 = vld [vmem:[#allocation2 + $0x870] sm:$0xff]  ;;  %v426_v32 = vld [vmem:[#allocation2 + $0x878] sm:$0xff] }
 0x317   :  { %v433_v37 = vld [vmem:[#allocation2 + $0x8b0] sm:$0xff]  ;;  %v434_v40 = vld [vmem:[#allocation2 + $0x8b8] sm:$0xff] }
 0x318   :  { %v441_v38 = vld [vmem:[#allocation2 + $0x8f0] sm:$0xff]  ;;  %v442_v41 = vld [vmem:[#allocation2 + $0x8f8] sm:$0xff] }
 0x319   :  { %5996 = vmatpush1.bf16.msra.mxu0 %v11635_v2  ;;  %6168 = vmatpush1.bf16.msra.mxu1 %v11637_v4  ;;  %v11715_v2 = vcombine.low %v369_v47, %v377_v48  ;;  %v11717_v4 = vcombine.low %v370_v50, %v378_v51  ;;  %v449_v47 = vld [vmem:[#allocation2 + $0x930] sm:$0xff]  ;;  %v450_v50 = vld [vmem:[#allocation2 + $0x938] sm:$0xff] }
 0x31a   :  { %5997 = vmatprep.subr.bf16.mxu0 %v11652_v8  ;;  %6169 = vmatprep.subr.bf16.mxu1 %v11654_v9  ;;  %v11732_v8 = vcombine.high %v385_v59, %v393_v60  ;;  %v11734_v9 = vcombine.high %v386_v61, %v394_v63  ;;  %v457_v48 = vld [vmem:[#allocation2 + $0x970] sm:$0xff]  ;;  %v458_v51 = vld [vmem:[#allocation2 + $0x978] sm:$0xff] }
 0x31d   :  { %5998 = vmatpush1.bf16.msra.mxu0 %v11651_v19  ;;  %6170 = vmatpush1.bf16.msra.mxu1 %v11653_v22  ;;  %v11731_v19 = vcombine.low %v385_v59, %v393_v60  ;;  %v11733_v22 = vcombine.low %v386_v61, %v394_v63  ;;  %v465_v59 = vld [vmem:[#allocation2 + $0x9b0] sm:$0xff]  ;;  %v466_v61 = vld [vmem:[#allocation2 + $0x9b8] sm:$0xff] }
 0x31e   :  { %5999 = vmatprep.subr.bf16.mxu0 %v11668_v23  ;;  %6171 = vmatprep.subr.bf16.mxu1 %v11670_v26  ;;  %v11748_v23 = vcombine.high %v401_v12, %v409_v13  ;;  %v11750_v26 = vcombine.high %v402_v17, %v410_v18  ;;  %v473_v60 = vld [vmem:[#allocation2 + $0x9f0] sm:$0xff]  ;;  %v474_v63 = vld [vmem:[#allocation2 + $0x9f8] sm:$0xff] }
 0x321   :  { %6000 = vmatpush1.bf16.msra.mxu0 %v11667_v33  ;;  %6172 = vmatpush1.bf16.msra.mxu1 %v11669_v34  ;;  %v11747_v33 = vcombine.low %v401_v12, %v409_v13  ;;  %v11749_v34 = vcombine.low %v402_v17, %v410_v18  ;;  %v489_v12 = vld [vmem:[#allocation2 + $0xa70] sm:$0xff]  ;;  %v482_v13 = vld [vmem:[#allocation2 + $0xa38] sm:$0xff]  ;;  %v11811_v18 = vcombine.low %v465_v59, %v473_v60 }
 0x322   :  { %6001 = vmatprep.subr.bf16.mxu0 %v11684_v35  ;;  %6173 = vmatprep.subr.bf16.mxu1 %v11686_v36  ;;  %v11764_v35 = vcombine.high %v417_v28, %v425_v29  ;;  %v11766_v36 = vcombine.high %v418_v58, %v426_v32  ;;  %v490_v17 = vld [vmem:[#allocation2 + $0xa78] sm:$0xff] }
 0x325   :  { %6002 = vmatpush1.bf16.msra.mxu0 %v11683_v42  ;;  %6174 = vmatpush1.bf16.msra.mxu1 %v11685_v43  ;;  %v11763_v42 = vcombine.low %v417_v28, %v425_v29  ;;  %v11765_v43 = vcombine.low %v418_v58, %v426_v32  ;;  %v498_v28 = vld [vmem:[#allocation2 + $0xab8] sm:$0xff]  ;;  %v11829_v32 = vcombine.low %v482_v13, %v490_v17 }
 0x326   :  { %6003 = vmatprep.subr.bf16.mxu0 %v11700_v45  ;;  %6175 = vmatprep.subr.bf16.mxu1 %v11702_v46  ;;  %v11780_v45 = vcombine.high %v433_v37, %v441_v38  ;;  %v11782_v46 = vcombine.high %v434_v40, %v442_v41  ;;  %v506_v29 = vld [vmem:[#allocation2 + $0xaf8] sm:$0xff] }
 0x329   :  { %6004 = vmatpush1.bf16.msra.mxu0 %v11699_v52  ;;  %6176 = vmatpush1.bf16.msra.mxu1 %v11701_v53  ;;  %v11779_v52 = vcombine.low %v433_v37, %v441_v38  ;;  %v11781_v53 = vcombine.low %v434_v40, %v442_v41  ;;  %v514_v37 = vld [vmem:[#allocation2 + $0xb38] sm:$0xff]  ;;  %v11845_v41 = vcombine.low %v498_v28, %v506_v29 }
 0x32a   :  { %6005 = vmatprep.subr.bf16.mxu0 %v11716_v54  ;;  %6177 = vmatprep.subr.bf16.mxu1 %v11718_v55  ;;  %v11796_v54 = vcombine.high %v449_v47, %v457_v48  ;;  %v11798_v55 = vcombine.high %v450_v50, %v458_v51  ;;  %v522_v38 = vld [vmem:[#allocation2 + $0xb78] sm:$0xff] }
 0x32d   :  { %6006 = vmatpush1.bf16.msra.mxu0 %v11715_v2  ;;  %6178 = vmatpush1.bf16.msra.mxu1 %v11717_v4  ;;  %v11795_v2 = vcombine.low %v449_v47, %v457_v48  ;;  %v11812_v4 = vcombine.high %v465_v59, %v473_v60  ;;  %v530_v47 = vld [vmem:[#allocation2 + $0xbb8] sm:$0xff] }
 0x32e   :  { %6007 = vmatprep.subr.bf16.mxu0 %v11732_v8  ;;  %6179 = vmatprep.subr.bf16.mxu1 %v11734_v9  ;;  %v11814_v8 = vcombine.high %v466_v61, %v474_v63  ;;  %v481_v9 = vld [vmem:[#allocation2 + $0xa30] sm:$0xff]  ;;  %v538_v48 = vld [vmem:[#allocation2 + $0xbf8] sm:$0xff] }
 0x32f   :  { %v11827_v58 = vcombine.low %v481_v9, %v489_v12  ;;  %v546_v59 = vld [vmem:[#allocation2 + $0xc38] sm:$0xff] }
 0x330   :  { %v554_v60 = vld [vmem:[#allocation2 + $0xc78] sm:$0xff] }
 0x331   :  { %6008 = vmatpush1.bf16.msra.mxu0 %v11731_v19  ;;  %6180 = vmatpush1.bf16.msra.mxu1 %v11733_v22  ;;  %v11813_v19 = vcombine.low %v466_v61, %v474_v63  ;;  %v11828_v22 = vcombine.high %v481_v9, %v489_v12  ;;  %v11877_v63 = vcombine.low %v530_v47, %v538_v48  ;;  %v562_v9 = vld [vmem:[#allocation2 + $0xcb8] sm:$0xff] }
 0x332   :  { %6009 = vmatprep.subr.bf16.mxu0 %v11748_v23  ;;  %6181 = vmatprep.subr.bf16.mxu1 %v11750_v26  ;;  %v497_v23 = vld [vmem:[#allocation2 + $0xab0] sm:$0xff]  ;;  %v570_v12 = vld [vmem:[#allocation2 + $0xcf8] sm:$0xff] }
 0x333   :  { %v505_v26 = vld [vmem:[#allocation2 + $0xaf0] sm:$0xff] }
 0x334   :  { %v11843_v40 = vcombine.low %v497_v23, %v505_v26 }
 0x335   :  { %6010 = vmatpush1.bf16.msra.mxu0 %v11747_v33  ;;  %6182 = vmatpush1.bf16.msra.mxu1 %v11749_v34  ;;  %v11844_v33 = vcombine.high %v497_v23, %v505_v26  ;;  %v11846_v34 = vcombine.high %v498_v28, %v506_v29  ;;  %v578_v23 = vld [vmem:[#allocation2 + $0xd38] sm:$0xff]  ;;  %v11909_v29 = vcombine.low %v562_v9, %v570_v12 }
 0x336   :  { %6022 = vmatprep.subr.bf16.mxu0 %v11764_v35  ;;  %6194 = vmatprep.subr.bf16.mxu1 %v11766_v36  ;;  %v513_v35 = vld [vmem:[#allocation2 + $0xb30] sm:$0xff]  ;;  %v586_v26 = vld [vmem:[#allocation2 + $0xd78] sm:$0xff] }
 0x337   :  { %v521_v36 = vld [vmem:[#allocation2 + $0xb70] sm:$0xff] }
 0x338   :  { %6012 = vmatmul.mubr.bf16.vlgmr.msra.gmra.mrb[12].mxu0 %v14591_v15  ;;  %6184 = vmatmul.mubr.bf16.vlgmr.msra.gmra.mrb[12].mxu1 %v14591_v15  ;;  %v11797_v15 = vcombine.low %v450_v50, %v458_v51  ;;  %v11859_v50 = vcombine.low %v513_v35, %v521_v36  ;;  %v11861_v51 = vcombine.low %v514_v37, %v522_v38 }
 0x339   :  { %6023 = vmatpush1.bf16.msra.mxu0 %v11763_v42  ;;  %6195 = vmatpush1.bf16.msra.mxu1 %v11765_v43  ;;  %v11860_v42 = vcombine.high %v513_v35, %v521_v36  ;;  %v11862_v43 = vcombine.high %v514_v37, %v522_v38  ;;  %v594_v35 = vld [vmem:[#allocation2 + $0xdb8] sm:$0xff]  ;;  %v11925_v38 = vcombine.low %v578_v23, %v586_v26 }
 0x33a   :  { %6024 = vmatprep.subr.bf16.mxu0 %v11780_v45  ;;  %6196 = vmatprep.subr.bf16.mxu1 %v11782_v46  ;;  %v529_v45 = vld [vmem:[#allocation2 + $0xbb0] sm:$0xff]  ;;  %v602_v36 = vld [vmem:[#allocation2 + $0xdf8] sm:$0xff] }
 0x33b   :  { %6054 = vmatprep.mubr.bf16.mxu0 %v14599_v25  ;;  %6226 = vmatprep.mubr.bf16.mxu1 %v14599_v25  ;;  %v11830_v25 = vcombine.high %v482_v13, %v490_v17  ;;  %v537_v46 = vld [vmem:[#allocation2 + $0xbf0] sm:$0xff]  ;;  %v11893_v17 = vcombine.low %v546_v59, %v554_v60 }
 0x33c   :  { %v11875_v61 = vcombine.low %v529_v45, %v537_v46 }
 0x33d   :  { %6025 = vmatpush1.bf16.msra.mxu0 %v11779_v52  ;;  %6197 = vmatpush1.bf16.msra.mxu1 %v11781_v53  ;;  %v11876_v52 = vcombine.high %v529_v45, %v537_v46  ;;  %v11878_v53 = vcombine.high %v530_v47, %v538_v48  ;;  %v610_v45 = vld [vmem:[#allocation2 + $0xe38] sm:$0xff]  ;;  %v11941_v48 = vcombine.low %v594_v35, %v602_v36 }
 0x33e   :  { %6026 = vmatprep.subr.bf16.mxu0 %v11796_v54  ;;  %6198 = vmatprep.subr.bf16.mxu1 %v11798_v55  ;;  %v545_v54 = vld [vmem:[#allocation2 + $0xc30] sm:$0xff]  ;;  %v618_v46 = vld [vmem:[#allocation2 + $0xe78] sm:$0xff] }
 0x33f   :  { %v553_v55 = vld [vmem:[#allocation2 + $0xc70] sm:$0xff] }
 0x340   :  { %v11891_v13 = vcombine.low %v545_v54, %v553_v55 }
 0x341   :  { %6027 = vmatpush1.bf16.msra.mxu0 %v11795_v2  ;;  %6199 = vmatpush1.bf16.msra.mxu1 %v11797_v15  ;;  %v11892_v2 = vcombine.high %v545_v54, %v553_v55  ;;  %v11894_v15 = vcombine.high %v546_v59, %v554_v60  ;;  %v626_v54 = vld [vmem:[#allocation2 + $0xeb8] sm:$0xff]  ;;  %v11957_v60 = vcombine.low %v610_v45, %v618_v46 }
 0x342   :  { %6028 = vmatprep.subr.bf16.mxu0 %v11812_v4  ;;  %6200 = vmatprep.subr.bf16.mxu1 %v11814_v8  ;;  %v561_v4 = vld [vmem:[#allocation2 + $0xcb0] sm:$0xff]  ;;  %v634_v55 = vld [vmem:[#allocation2 + $0xef8] sm:$0xff] }
 0x343   :  { %v569_v8 = vld [vmem:[#allocation2 + $0xcf0] sm:$0xff] }
 0x344   :  { %v11907_v28 = vcombine.low %v561_v4, %v569_v8 }
 0x345   :  { %6029 = vmatpush1.bf16.msra.mxu0 %v11811_v18  ;;  %6201 = vmatpush1.bf16.msra.mxu1 %v11813_v19  ;;  %v11908_v18 = vcombine.high %v561_v4, %v569_v8  ;;  %v11910_v19 = vcombine.high %v562_v9, %v570_v12  ;;  %v642_v4 = vld [vmem:[#allocation2 + $0xf38] sm:$0xff]  ;;  %v11973_v12 = vcombine.low %v626_v54, %v634_v55 }
 0x346   :  { %6030 = vmatprep.subr.bf16.mxu0 %v11828_v22  ;;  %6202 = vmatprep.subr.bf16.mxu1 %v11830_v25  ;;  %v577_v22 = vld [vmem:[#allocation2 + $0xd30] sm:$0xff]  ;;  %v650_v8 = vld [vmem:[#allocation2 + $0xf78] sm:$0xff] }
 0x347   :  { %v585_v25 = vld [vmem:[#allocation2 + $0xd70] sm:$0xff] }
 0x348   :  { %v11923_v37 = vcombine.low %v577_v22, %v585_v25 }
 0x349   :  { %6031 = vmatpush1.bf16.msra.mxu0 %v11827_v58  ;;  %6203 = vmatpush1.bf16.msra.mxu1 %v11829_v32  ;;  %v11924_v58 = vcombine.high %v577_v22, %v585_v25  ;;  %v11926_v32 = vcombine.high %v578_v23, %v586_v26  ;;  %v658_v22 = vld [vmem:[#allocation2 + $0xfb8] sm:$0xff]  ;;  %v11989_v26 = vcombine.low %v642_v4, %v650_v8 }
 0x34a   :  { %6032 = vmatprep.subr.bf16.mxu0 %v11844_v33  ;;  %6204 = vmatprep.subr.bf16.mxu1 %v11846_v34  ;;  %v593_v33 = vld [vmem:[#allocation2 + $0xdb0] sm:$0xff]  ;;  %v666_v25 = vld [vmem:[#allocation2 + $0xff8] sm:$0xff] }
 0x34b   :  { %v601_v34 = vld [vmem:[#allocation2 + $0xdf0] sm:$0xff] }
 0x34c   :  { %v11939_v47 = vcombine.low %v593_v33, %v601_v34 }
 0x34d   :  { %6033 = vmatpush1.bf16.msra.mxu0 %v11843_v40  ;;  %6205 = vmatpush1.bf16.msra.mxu1 %v11845_v41  ;;  %v11940_v40 = vcombine.high %v593_v33, %v601_v34  ;;  %v11942_v41 = vcombine.high %v594_v35, %v602_v36  ;;  %v674_v33 = vld [vmem:[#allocation2 + $0x1038] sm:$0xff]  ;;  %v12005_v36 = vcombine.low %v658_v22, %v666_v25 }
 0x34e   :  { %6034 = vmatprep.subr.bf16.mxu0 %v11860_v42  ;;  %6206 = vmatprep.subr.bf16.mxu1 %v11862_v43  ;;  %v609_v42 = vld [vmem:[#allocation2 + $0xe30] sm:$0xff]  ;;  %v682_v34 = vld [vmem:[#allocation2 + $0x1078] sm:$0xff] }
 0x34f   :  { %v617_v43 = vld [vmem:[#allocation2 + $0xe70] sm:$0xff] }
 0x350   :  { %v11955_v59 = vcombine.low %v609_v42, %v617_v43 }
 0x351   :  { %6035 = vmatpush1.bf16.msra.mxu0 %v11859_v50  ;;  %6207 = vmatpush1.bf16.msra.mxu1 %v11861_v51  ;;  %v11956_v50 = vcombine.high %v609_v42, %v617_v43  ;;  %v11958_v51 = vcombine.high %v610_v45, %v618_v46  ;;  %v690_v42 = vld [vmem:[#allocation2 + $0x10b8] sm:$0xff]  ;;  %v12021_v46 = vcombine.low %v674_v33, %v682_v34 }
 0x352   :  { %6036 = vmatprep.subr.bf16.mxu0 %v11876_v52  ;;  %6208 = vmatprep.subr.bf16.mxu1 %v11878_v53  ;;  %v625_v52 = vld [vmem:[#allocation2 + $0xeb0] sm:$0xff]  ;;  %v698_v43 = vld [vmem:[#allocation2 + $0x10f8] sm:$0xff] }
 0x353   :  { %v633_v53 = vld [vmem:[#allocation2 + $0xef0] sm:$0xff] }
 0x354   :  { %v11971_v9 = vcombine.low %v625_v52, %v633_v53 }
 0x355   :  { %6037 = vmatpush1.bf16.msra.mxu0 %v11875_v61  ;;  %6209 = vmatpush1.bf16.msra.mxu1 %v11877_v63  ;;  %v11972_v61 = vcombine.high %v625_v52, %v633_v53  ;;  %v11974_v63 = vcombine.high %v626_v54, %v634_v55  ;;  %v706_v52 = vld [vmem:[#allocation2 + $0x1138] sm:$0xff]  ;;  %v12037_v55 = vcombine.low %v690_v42, %v698_v43 }
 0x356   :  { %6038 = vmatprep.subr.bf16.mxu0 %v11892_v2  ;;  %6210 = vmatprep.subr.bf16.mxu1 %v11894_v15  ;;  %v641_v2 = vld [vmem:[#allocation2 + $0xf30] sm:$0xff]  ;;  %v714_v53 = vld [vmem:[#allocation2 + $0x1178] sm:$0xff] }
 0x357   :  { %v649_v15 = vld [vmem:[#allocation2 + $0xf70] sm:$0xff] }
 0x358   :  { %v11987_v23 = vcombine.low %v641_v2, %v649_v15 }
 0x359   :  { %6039 = vmatpush1.bf16.msra.mxu0 %v11891_v13  ;;  %6211 = vmatpush1.bf16.msra.mxu1 %v11893_v17  ;;  %v11988_v13 = vcombine.high %v641_v2, %v649_v15  ;;  %v11990_v17 = vcombine.high %v642_v4, %v650_v8  ;;  %v722_v2 = vld [vmem:[#allocation2 + $0x11b8] sm:$0xff] }
 0x35a   :  { %6040 = vmatprep.subr.bf16.mxu0 %v11908_v18  ;;  %6212 = vmatprep.subr.bf16.mxu1 %v11910_v19  ;;  %v657_v18 = vld [vmem:[#allocation2 + $0xfb0] sm:$0xff]  ;;  %v730_v15 = vld [vmem:[#allocation2 + $0x11f8] sm:$0xff] }
 0x35b   :  { %v665_v19 = vld [vmem:[#allocation2 + $0xff0] sm:$0xff] }
 0x35c   :  { %v12003_v35 = vcombine.low %v657_v18, %v665_v19 }
 0x35d   :  { %6041 = vmatpush1.bf16.msra.mxu0 %v11907_v28  ;;  %6213 = vmatpush1.bf16.msra.mxu1 %v11909_v29  ;;  %v12004_v28 = vcombine.high %v657_v18, %v665_v19  ;;  %v12006_v29 = vcombine.high %v658_v22, %v666_v25  ;;  %v746_v18 = vld [vmem:[#allocation2 + $0x1278] sm:$0xff]  ;;  %v12069_v22 = vcombine.low %v722_v2, %v730_v15 }
 0x35e   :  { %6042 = vmatprep.subr.bf16.mxu0 %v11924_v58  ;;  %6214 = vmatprep.subr.bf16.mxu1 %v11926_v32  ;;  %v673_v58 = vld [vmem:[#allocation2 + $0x1030] sm:$0xff] }
 0x35f   :  { %v681_v32 = vld [vmem:[#allocation2 + $0x1070] sm:$0xff] }
 0x360   :  { %v12019_v45 = vcombine.low %v673_v58, %v681_v32 }
 0x361   :  { %6043 = vmatpush1.bf16.msra.mxu0 %v11923_v37  ;;  %6215 = vmatpush1.bf16.msra.mxu1 %v11925_v38  ;;  %v12020_v37 = vcombine.high %v673_v58, %v681_v32  ;;  %v12022_v38 = vcombine.high %v674_v33, %v682_v34 }
 0x362   :  { %6044 = vmatprep.subr.bf16.mxu0 %v11940_v40  ;;  %6216 = vmatprep.subr.bf16.mxu1 %v11942_v41  ;;  %v689_v40 = vld [vmem:[#allocation2 + $0x10b0] sm:$0xff] }
 0x363   :  { %v697_v41 = vld [vmem:[#allocation2 + $0x10f0] sm:$0xff] }
 0x364   :  { %v12035_v54 = vcombine.low %v689_v40, %v697_v41 }
 0x365   :  { %6045 = vmatpush1.bf16.msra.mxu0 %v11939_v47  ;;  %6217 = vmatpush1.bf16.msra.mxu1 %v11941_v48  ;;  %v12036_v47 = vcombine.high %v689_v40, %v697_v41  ;;  %v12038_v48 = vcombine.high %v690_v42, %v698_v43 }
 0x366   :  { %6046 = vmatprep.subr.bf16.mxu0 %v11956_v50  ;;  %6218 = vmatprep.subr.bf16.mxu1 %v11958_v51  ;;  %v705_v50 = vld [vmem:[#allocation2 + $0x1130] sm:$0xff] }
 0x367   :  { %v713_v51 = vld [vmem:[#allocation2 + $0x1170] sm:$0xff] }
 0x368   :  { %v12051_v4 = vcombine.low %v705_v50, %v713_v51 }
 0x369   :  { %6047 = vmatpush1.bf16.msra.mxu0 %v11955_v59  ;;  %6219 = vmatpush1.bf16.msra.mxu1 %v11957_v60  ;;  %v12052_v59 = vcombine.high %v705_v50, %v713_v51  ;;  %v12054_v60 = vcombine.high %v706_v52, %v714_v53 }
 0x36a   :  { %6048 = vmatprep.subr.bf16.mxu0 %v11972_v61  ;;  %6220 = vmatprep.subr.bf16.mxu1 %v11974_v63  ;;  %v721_v61 = vld [vmem:[#allocation2 + $0x11b0] sm:$0xff] }
 0x36b   :  { %v729_v63 = vld [vmem:[#allocation2 + $0x11f0] sm:$0xff] }
 0x36c   :  { %v12068_v8 = vcombine.high %v721_v61, %v729_v63  ;;  %v12067_v19 = vcombine.low %v721_v61, %v729_v63 }
 0x36d   :  { %6049 = vmatpush1.bf16.msra.mxu0 %v11971_v9  ;;  %6221 = vmatpush1.bf16.msra.mxu1 %v11973_v12  ;;  %v12070_v9 = vcombine.high %v722_v2, %v730_v15  ;;  %v737_v12 = vld [vmem:[#allocation2 + $0x1230] sm:$0xff] }
 0x36e   :  { %6050 = vmatprep.subr.bf16.mxu0 %v11988_v13  ;;  %6222 = vmatprep.subr.bf16.mxu1 %v11990_v17  ;;  %v745_v13 = vld [vmem:[#allocation2 + $0x1270] sm:$0xff]  ;;  %v738_v17 = vld [vmem:[#allocation2 + $0x1238] sm:$0xff] }
 0x36f   :  { %v12084_v25 = vcombine.high %v737_v12, %v745_v13  ;;  %v12083_v58 = vcombine.low %v737_v12, %v745_v13  ;;  %v12085_v32 = vcombine.low %v738_v17, %v746_v18 }
 0x371   :  { %6051 = vmatpush1.bf16.msra.mxu0 %v11987_v23  ;;  %6223 = vmatpush1.bf16.msra.mxu1 %v11989_v26  ;;  %v753_v23 = vld [vmem:[#allocation2 + $0x12b0] sm:$0xff] }
 0x372   :  { %6052 = vmatprep.subr.bf16.mxu0 %v12004_v28  ;;  %6224 = vmatprep.subr.bf16.mxu1 %v12006_v29  ;;  %v761_v26 = vld [vmem:[#allocation2 + $0x12f0] sm:$0xff]  ;;  %v754_v28 = vld [vmem:[#allocation2 + $0x12b8] sm:$0xff] }
 0x373   :  { %v762_v29 = vld [vmem:[#allocation2 + $0x12f8] sm:$0xff]  ;;  %v12100_v33 = vcombine.high %v753_v23, %v761_v26  ;;  %v12099_v40 = vcombine.low %v753_v23, %v761_v26 }
 0x374   :  { %v12102_v34 = vcombine.high %v754_v28, %v762_v29  ;;  %v12101_v41 = vcombine.low %v754_v28, %v762_v29 }
 0x375   :  { %6053 = vmatpush1.bf16.msra.mxu0 %v12003_v35  ;;  %6225 = vmatpush1.bf16.msra.mxu1 %v12005_v36  ;;  %v769_v35 = vld [vmem:[#allocation2 + $0x1330] sm:$0xff] }
 0x376   :  { %6065 = vmatprep.subr.bf16.mxu0 %v12020_v37  ;;  %6237 = vmatprep.subr.bf16.mxu1 %v12022_v38  ;;  %v777_v36 = vld [vmem:[#allocation2 + $0x1370] sm:$0xff]  ;;  %v770_v37 = vld [vmem:[#allocation2 + $0x1338] sm:$0xff] }
 0x377   :  { %v778_v38 = vld [vmem:[#allocation2 + $0x1378] sm:$0xff]  ;;  %v12116_v42 = vcombine.high %v769_v35, %v777_v36  ;;  %v12115_v50 = vcombine.low %v769_v35, %v777_v36 }
 0x378   :  { %6055 = vmatmul.mubr.bf16.vlgmr.msra.gmra.mrb[12].mxu0 %v14617_v30  ;;  %6227 = vmatmul.mubr.bf16.vlgmr.msra.gmra.mrb[12].mxu1 %v14617_v30  ;;  %v12053_v30 = vcombine.low %v706_v52, %v714_v53  ;;  %v12118_v43 = vcombine.high %v770_v37, %v778_v38  ;;  %v12117_v51 = vcombine.low %v770_v37, %v778_v38 }
 0x379   :  { %6066 = vmatpush1.bf16.msra.mxu0 %v12019_v45  ;;  %6238 = vmatpush1.bf16.msra.mxu1 %v12021_v46  ;;  %v785_v45 = vld [vmem:[#allocation2 + $0x13b0] sm:$0xff] }
 0x37a   :  { %6067 = vmatprep.subr.bf16.mxu0 %v12036_v47  ;;  %6239 = vmatprep.subr.bf16.mxu1 %v12038_v48  ;;  %v793_v46 = vld [vmem:[#allocation2 + $0x13f0] sm:$0xff]  ;;  %v786_v47 = vld [vmem:[#allocation2 + $0x13b8] sm:$0xff] }
 0x37b   :  { %6097 = vmatprep.mubr.bf16.mxu0 %v14619_v39  ;;  %6269 = vmatprep.mubr.bf16.mxu1 %v14619_v39  ;;  %v12086_v39 = vcombine.high %v738_v17, %v746_v18  ;;  %v794_v48 = vld [vmem:[#allocation2 + $0x13f8] sm:$0xff]  ;;  %v12132_v52 = vcombine.high %v785_v45, %v793_v46  ;;  %v12131_v61 = vcombine.low %v785_v45, %v793_v46 }
 0x37c   :  { %v12134_v53 = vcombine.high %v786_v47, %v794_v48  ;;  %v12133_v63 = vcombine.low %v786_v47, %v794_v48 }
 0x37d   :  { %6068 = vmatpush1.bf16.msra.mxu0 %v12035_v54  ;;  %6240 = vmatpush1.bf16.msra.mxu1 %v12037_v55  ;;  %v801_v54 = vld [vmem:[#allocation2 + $0x1430] sm:$0xff] }
 0x37e   :  { %6069 = vmatprep.subr.bf16.mxu0 %v12052_v59  ;;  %6241 = vmatprep.subr.bf16.mxu1 %v12054_v60  ;;  %v809_v55 = vld [vmem:[#allocation2 + $0x1470] sm:$0xff]  ;;  %v802_v59 = vld [vmem:[#allocation2 + $0x1438] sm:$0xff] }
 0x37f   :  { %v810_v60 = vld [vmem:[#allocation2 + $0x1478] sm:$0xff]  ;;  %v12148_v2 = vcombine.high %v801_v54, %v809_v55  ;;  %v12147_v12 = vcombine.low %v801_v54, %v809_v55 }
 0x380   :  { %v12150_v15 = vcombine.high %v802_v59, %v810_v60  ;;  %v12149_v13 = vcombine.low %v802_v59, %v810_v60 }
 0x381   :  { %6070 = vmatpush1.bf16.msra.mxu0 %v12051_v4  ;;  %6242 = vmatpush1.bf16.msra.mxu1 %v12053_v30  ;;  %v817_v4 = vld [vmem:[#allocation2 + $0x14b0] sm:$0xff] }
 0x382   :  { %6071 = vmatprep.subr.bf16.mxu0 %v12068_v8  ;;  %6243 = vmatprep.subr.bf16.mxu1 %v12070_v9  ;;  %v825_v30 = vld [vmem:[#allocation2 + $0x14f0] sm:$0xff]  ;;  %v818_v8 = vld [vmem:[#allocation2 + $0x14b8] sm:$0xff] }
 0x383   :  { %v826_v9 = vld [vmem:[#allocation2 + $0x14f8] sm:$0xff]  ;;  %v12164_v17 = vcombine.high %v817_v4, %v825_v30  ;;  %v12163_v23 = vcombine.low %v817_v4, %v825_v30 }
 0x384   :  { %v12166_v18 = vcombine.high %v818_v8, %v826_v9  ;;  %v12165_v26 = vcombine.low %v818_v8, %v826_v9 }
 0x385   :  { %6072 = vmatpush1.bf16.msra.mxu0 %v12067_v19  ;;  %6244 = vmatpush1.bf16.msra.mxu1 %v12069_v22  ;;  %v833_v19 = vld [vmem:[#allocation2 + $0x1530] sm:$0xff] }
 0x386   :  { %6073 = vmatprep.subr.bf16.mxu0 %v12084_v25  ;;  %6245 = vmatprep.subr.bf16.mxu1 %v12086_v39  ;;  %v841_v22 = vld [vmem:[#allocation2 + $0x1570] sm:$0xff]  ;;  %v834_v25 = vld [vmem:[#allocation2 + $0x1538] sm:$0xff] }
 0x387   :  { %v842_v39 = vld [vmem:[#allocation2 + $0x1578] sm:$0xff]  ;;  %v12180_v28 = vcombine.high %v833_v19, %v841_v22  ;;  %v12179_v35 = vcombine.low %v833_v19, %v841_v22 }
 0x388   :  { %v12182_v29 = vcombine.high %v834_v25, %v842_v39  ;;  %v12181_v36 = vcombine.low %v834_v25, %v842_v39 }
 0x389   :  { %6074 = vmatpush1.bf16.msra.mxu0 %v12083_v58  ;;  %6246 = vmatpush1.bf16.msra.mxu1 %v12085_v32  ;;  %v849_v58 = vld [vmem:[#allocation2 + $0x15b0] sm:$0xff] }
 0x38a   :  { %6075 = vmatprep.subr.bf16.mxu0 %v12100_v33  ;;  %6247 = vmatprep.subr.bf16.mxu1 %v12102_v34  ;;  %v857_v32 = vld [vmem:[#allocation2 + $0x15f0] sm:$0xff]  ;;  %v850_v33 = vld [vmem:[#allocation2 + $0x15b8] sm:$0xff] }
 0x38b   :  { %v858_v34 = vld [vmem:[#allocation2 + $0x15f8] sm:$0xff]  ;;  %v12196_v37 = vcombine.high %v849_v58, %v857_v32  ;;  %v12195_v45 = vcombine.low %v849_v58, %v857_v32 }
 0x38c   :  { %v12198_v38 = vcombine.high %v850_v33, %v858_v34  ;;  %v12197_v46 = vcombine.low %v850_v33, %v858_v34 }
 0x38d   :  { %6076 = vmatpush1.bf16.msra.mxu0 %v12099_v40  ;;  %6248 = vmatpush1.bf16.msra.mxu1 %v12101_v41  ;;  %v865_v40 = vld [vmem:[#allocation2 + $0x1630] sm:$0xff] }
 0x38e   :  { %6077 = vmatprep.subr.bf16.mxu0 %v12116_v42  ;;  %6249 = vmatprep.subr.bf16.mxu1 %v12118_v43  ;;  %v873_v41 = vld [vmem:[#allocation2 + $0x1670] sm:$0xff]  ;;  %v866_v42 = vld [vmem:[#allocation2 + $0x1638] sm:$0xff] }
 0x38f   :  { %v874_v43 = vld [vmem:[#allocation2 + $0x1678] sm:$0xff]  ;;  %v12212_v47 = vcombine.high %v865_v40, %v873_v41  ;;  %v12211_v54 = vcombine.low %v865_v40, %v873_v41  ;;  %v13226_v40 = vld [vmem:[#allocation6] ss:$16 sps:$4 sm:$0xff]  }
 0x390   :  { %v12214_v48 = vcombine.high %v866_v42, %v874_v43  ;;  %v12213_v55 = vcombine.low %v866_v42, %v874_v43  ;;  %v13229_v41 = vld [vmem:[#allocation6 + $0x8] ss:$16 sps:$4 sm:$0xff]   ;;  %v13234_v42 = vld [vmem:[#allocation6 + $0x24] ss:$16 sps:$4 sm:$0xff]   ;;  %v13237_v43 = vld [vmem:[#allocation6 + $0x2c] ss:$16 sps:$4 sm:$0xff]  }
 0x391   :  { %6078 = vmatpush1.bf16.msra.mxu0 %v12115_v50  ;;  %6250 = vmatpush1.bf16.msra.mxu1 %v12117_v51  ;;  %v881_v50 = vld [vmem:[#allocation2 + $0x16b0] sm:$0xff] }
 0x392   :  { %6079 = vmatprep.subr.bf16.mxu0 %v12132_v52  ;;  %6251 = vmatprep.subr.bf16.mxu1 %v12134_v53  ;;  %v889_v51 = vld [vmem:[#allocation2 + $0x16f0] sm:$0xff]  ;;  %v882_v52 = vld [vmem:[#allocation2 + $0x16b8] sm:$0xff] }
 0x393   :  { %v890_v53 = vld [vmem:[#allocation2 + $0x16f8] sm:$0xff]  ;;  %v12228_v59 = vcombine.high %v881_v50, %v889_v51  ;;  %v12227_v4 = vcombine.low %v881_v50, %v889_v51  ;;  %v13238_v50 = vld [vmem:[#allocation6 + $0x40] ss:$16 sps:$4 sm:$0xff]  }
 0x394   :  { %v12230_v60 = vcombine.high %v882_v52, %v890_v53  ;;  %v12229_v30 = vcombine.low %v882_v52, %v890_v53  ;;  %v13241_v52 = vld [vmem:[#allocation6 + $0x48] ss:$16 sps:$4 sm:$0xff]   ;;  %v13246_v53 = vld [vmem:[#allocation6 + $0x64] ss:$16 sps:$4 sm:$0xff]  }
 0x395   :  { %6080 = vmatpush1.bf16.msra.mxu0 %v12131_v61  ;;  %6252 = vmatpush1.bf16.msra.mxu1 %v12133_v63  ;;  %v897_v61 = vld [vmem:[#allocation2 + $0x1730] sm:$0xff] }
 0x396   :  { %6081 = vmatprep.subr.bf16.mxu0 %v12148_v2  ;;  %6253 = vmatprep.subr.bf16.mxu1 %v12150_v15  ;;  %v905_v63 = vld [vmem:[#allocation2 + $0x1770] sm:$0xff]  ;;  %v898_v2 = vld [vmem:[#allocation2 + $0x1738] sm:$0xff] }
 0x397   :  { %v906_v15 = vld [vmem:[#allocation2 + $0x1778] sm:$0xff]  ;;  %v12244_v8 = vcombine.high %v897_v61, %v905_v63  ;;  %v12243_v19 = vcombine.low %v897_v61, %v905_v63 }
 0x398   :  { %v12246_v9 = vcombine.high %v898_v2, %v906_v15  ;;  %v12245_v22 = vcombine.low %v898_v2, %v906_v15 }
 0x399   :  { %6082 = vmatpush1.bf16.msra.mxu0 %v12147_v12  ;;  %6254 = vmatpush1.bf16.msra.mxu1 %v12149_v13  ;;  %v913_v12 = vld [vmem:[#allocation2 + $0x17b0] sm:$0xff] }
 0x39a   :  { %6083 = vmatprep.subr.bf16.mxu0 %v12164_v17  ;;  %6255 = vmatprep.subr.bf16.mxu1 %v12166_v18  ;;  %v921_v13 = vld [vmem:[#allocation2 + $0x17f0] sm:$0xff]  ;;  %v914_v17 = vld [vmem:[#allocation2 + $0x17b8] sm:$0xff] }
 0x39b   :  { %v922_v18 = vld [vmem:[#allocation2 + $0x17f8] sm:$0xff]  ;;  %v12260_v25 = vcombine.high %v913_v12, %v921_v13  ;;  %v12259_v58 = vcombine.low %v913_v12, %v921_v13 }
 0x39c   :  { %v12262_v39 = vcombine.high %v914_v17, %v922_v18  ;;  %v12261_v32 = vcombine.low %v914_v17, %v922_v18  ;;  %v13247_v17 = vld [vmem:[#allocation6 + $0x68] ss:$16 sps:$4 sm:$0xff]   ;;  %v13252_v18 = vld [vmem:[#allocation6 + $0x84] ss:$16 sps:$4 sm:$0xff]  }
 0x39d   :  { %6084 = vmatpush1.bf16.msra.mxu0 %v12163_v23  ;;  %6256 = vmatpush1.bf16.msra.mxu1 %v12165_v26  ;;  %v929_v23 = vld [vmem:[#allocation2 + $0x1830] sm:$0xff] }
 0x39e   :  { %6085 = vmatprep.subr.bf16.mxu0 %v12180_v28  ;;  %6257 = vmatprep.subr.bf16.mxu1 %v12182_v29  ;;  %v937_v26 = vld [vmem:[#allocation2 + $0x1870] sm:$0xff]  ;;  %v930_v28 = vld [vmem:[#allocation2 + $0x1838] sm:$0xff] }
 0x39f   :  { %v938_v29 = vld [vmem:[#allocation2 + $0x1878] sm:$0xff]  ;;  %v12276_v33 = vcombine.high %v929_v23, %v937_v26 }
 0x3a0   :  { %v12278_v34 = vcombine.high %v930_v28, %v938_v29 }
 0x3a1   :  { %6086 = vmatpush1.bf16.msra.mxu0 %v12179_v35  ;;  %6258 = vmatpush1.bf16.msra.mxu1 %v12181_v36  ;;  %v12275_v35 = vcombine.low %v929_v23, %v937_v26  ;;  %v12277_v36 = vcombine.low %v930_v28, %v938_v29 }
 0x3a2   :  { %6087 = vmatprep.subr.bf16.mxu0 %v12196_v37  ;;  %6259 = vmatprep.subr.bf16.mxu1 %v12198_v38  ;;  %v13228_v37 = vld [vmem:[#allocation6 + $0x4] ss:$16 sps:$4 sm:$0xff]   ;;  %v13231_v38 = vld [vmem:[#allocation6 + $0xc] ss:$16 sps:$4 sm:$0xff]  }
 0x3a5   :  { %6088 = vmatpush1.bf16.msra.mxu0 %v12195_v45  ;;  %6260 = vmatpush1.bf16.msra.mxu1 %v12197_v46  ;;  %v14749_v45 = vld [vmem:[#allocation4 + $0x8] sm:$0xff]  ;;  %v13240_v46 = vld [vmem:[#allocation6 + $0x44] ss:$16 sps:$4 sm:$0xff]  }
 0x3a6   :  { %6089 = vmatprep.subr.bf16.mxu0 %v12212_v47  ;;  %6261 = vmatprep.subr.bf16.mxu1 %v12214_v48  ;;  %v13243_v47 = vld [vmem:[#allocation6 + $0x4c] ss:$16 sps:$4 sm:$0xff]   ;;  %v978_v48 = vrot.slane %v14749_v45, %v14666_v3  ;;  %v982_v51 = vrot.slane %v14749_v45, %v14672_v7 }
 0x3a9   :  { %6090 = vmatpush1.bf16.msra.mxu0 %v12211_v54  ;;  %6262 = vmatpush1.bf16.msra.mxu1 %v12213_v55  ;;  %v13249_v55 = vld [vmem:[#allocation6 + $0x6c] ss:$16 sps:$4 sm:$0xff]  }
 0x3aa   :  { %6091 = vmatprep.subr.bf16.mxu0 %v12228_v59  ;;  %6263 = vmatprep.subr.bf16.mxu1 %v12230_v60 }
 0x3ad   :  { %6092 = vmatpush1.bf16.msra.mxu0 %v12227_v4  ;;  %6264 = vmatpush1.bf16.msra.mxu1 %v12229_v30  ;;  %v13244_v30 = vld [vmem:[#allocation6 + $0x60] ss:$16 sps:$4 sm:$0xff]  }
 0x3ae   :  { %6093 = vmatprep.subr.bf16.mxu0 %v12244_v8  ;;  %6265 = vmatprep.subr.bf16.mxu1 %v12246_v9 }
 0x3b1   :  { %6094 = vmatpush1.bf16.msra.mxu0 %v12243_v19  ;;  %6266 = vmatpush1.bf16.msra.mxu1 %v12245_v22 }
 0x3b2   :  { %6095 = vmatprep.subr.bf16.mxu0 %v12260_v25  ;;  %6267 = vmatprep.subr.bf16.mxu1 %v12262_v39  ;;  %v13255_v39 = vld [vmem:[#allocation6 + $0x8c] ss:$16 sps:$4 sm:$0xff]  }
 0x3b5   :  { %6096 = vmatpush1.bf16.msra.mxu0 %v12259_v58  ;;  %6268 = vmatpush1.bf16.msra.mxu1 %v12261_v32 }
 0x3b6   :  { %6108 = vmatprep.subr.bf16.mxu0 %v12276_v33  ;;  %6280 = vmatprep.subr.bf16.mxu1 %v12278_v34  ;;  %v13250_v34 = vld [vmem:[#allocation6 + $0x80] ss:$16 sps:$4 sm:$0xff]  }
 0x3b8   :  { %6098 = vmatmul.mubr.bf16.vlgmr.msra.gmra.mrb[12].mxu0 %v14631_v44  ;;  %6270 = vmatmul.mubr.bf16.vlgmr.msra.gmra.mrb[12].mxu1 %v14631_v44  ;;  %v13232_v44 = vld [vmem:[#allocation6 + $0x20] ss:$16 sps:$4 sm:$0xff]  }
 0x3b9   :  { %6109 = vmatpush1.bf16.msra.mxu0 %v12275_v35  ;;  %6281 = vmatpush1.bf16.msra.mxu1 %v12277_v36 }
 0x3ba   :  { %6140 = vmatprep.mubr.bf16.mxu0 %v14418_v49  ;;  %6312 = vmatprep.mubr.bf16.mxu1 %v14418_v49  ;;  %v13235_v49 = vld [vmem:[#allocation6 + $0x28] ss:$16 sps:$4 sm:$0xff]  }
 0x3bb   :  { %9465 = vmatprep.subr.bf16.mxu0 %v13228_v37  ;;  %9809 = vmatprep.subr.bf16.mxu1 %v13231_v38  ;;  %v13253_v38 = vld [vmem:[#allocation6 + $0x88] ss:$16 sps:$4 sm:$0xff]  }
 0x3c4   :  { %12285 = vmatmul.mubr.msk.bf16.vlgmr.msra.gmra.mrb[12].mxu0 %vm4943_vm0, %v14643_v56  ;;  %12286 = vmatmul.mubr.msk.bf16.vlgmr.msra.gmra.mrb[12].mxu1 %vm4943_vm0, %v14643_v56  ;;  %v986_v56 = vrot.slane %v14749_v45, %v14669_v6 }
 0x3c5   :  { %9466 = vmatpush1.bf16.msra.mxu0 %v13226_v40  ;;  %9810 = vmatpush1.bf16.msra.mxu1 %v13229_v41  ;;  %v13258_v40 = vld [vmem:[#allocation6 + $0xa4] ss:$16 sps:$4 sm:$0xff]  }
 0x3c6   :  { %9497 = vmatprep.mubr.bf16.mxu0 %v14691_v16  ;;  %9841 = vmatprep.mubr.bf16.mxu1 %v14691_v16  ;;  %v990_v16 = vrot.slane %v14749_v45, %v14679_v11 }
 0x3c7   :  { %9467 = vmatprep.subr.bf16.mxu0 %v13234_v42  ;;  %9811 = vmatprep.subr.bf16.mxu1 %v13237_v43  ;;  %v13261_v43 = vld [vmem:[#allocation6 + $0xac] ss:$16 sps:$4 sm:$0xff]  }
 0x3c9   :  { %9468 = vmatpush1.bf16.msra.mxu0 %v13232_v44  ;;  %9812 = vmatpush1.bf16.msra.mxu1 %v13235_v49  ;;  %v13256_v49 = vld [vmem:[#allocation6 + $0xa0] ss:$16 sps:$4 sm:$0xff]  }
 0x3ca   :  { %9469 = vmatprep.subr.bf16.mxu0 %v13240_v46  ;;  %9813 = vmatprep.subr.bf16.mxu1 %v13243_v47  ;;  %v13259_v46 = vld [vmem:[#allocation6 + $0xa8] ss:$16 sps:$4 sm:$0xff]   ;;  %v13264_v47 = vld [vmem:[#allocation6 + $0xc4] ss:$16 sps:$4 sm:$0xff]  }
 0x3cb   :  { %v5798_v54 = vpop.f32.mrb[8].mxu0  ;;  %v5970_v60 = vpop.f32.mrb[8].mxu1 }
 0x3cc   :  { %v13020_v59 = vadd.f32 %v5798_v54, %v978_v48  ;;  %v5800_v61 = vpop.f32.mrb[9].mxu0  ;;  %v13024_v63 = vadd.f32 %v5970_v60, %v986_v56  ;;  %v5972_v15 = vpop.f32.mrb[9].mxu1  ;;  %v13276_v54 = vld [vmem:[#allocation6 + $0x104] ss:$16 sps:$4 sm:$0xff]   ;;  %v13277_v60 = vld [vmem:[#allocation6 + $0x108] ss:$16 sps:$4 sm:$0xff]  }
 0x3cd   :  { %9470 = vmatpush1.bf16.msra.mxu0 %v13238_v50  ;;  %v13021_v2 = vadd.f32 %v5800_v61, %v982_v51  ;;  %v5802_v4 = vpop.f32.mrb[10].mxu0  ;;  %9814 = vmatpush1.bf16.msra.mxu1 %v13241_v52  ;;  %v13025_v8 = vadd.f32 %v5972_v15, %v990_v16  ;;  %v5974_v12 = vpop.f32.mrb[10].mxu1  ;;  %v13262_v50 = vld [vmem:[#allocation6 + $0xc0] ss:$16 sps:$4 sm:$0xff]   ;;  %v13273_v52 = vld [vmem:[#allocation6 + $0xec] ss:$16 sps:$4 sm:$0xff]  }
 0x3ce   :  { %v13022_v9 = vadd.f32 %v5802_v4, %v978_v48  ;;  %v5804_v13 = vpop.f32.mrb[11].mxu0  ;;  %9471 = vmatprep.subr.bf16.mxu0 %v13246_v53  ;;  %v13026_v19 = vadd.f32 %v5974_v12, %v986_v56  ;;  %v5976_v25 = vpop.f32.mrb[11].mxu1  ;;  %9815 = vmatprep.subr.bf16.mxu1 %v13249_v55  ;;  %v6331_v23 = vmax.f32 %v13020_v59, 0.0  ;;  %v6333_v29 = vmax.f32 %v13024_v63, 0.0  ;;  %v13267_v48 = vld [vmem:[#allocation6 + $0xcc] ss:$16 sps:$4 sm:$0xff]  }
 0x3cf   :  { %v13023_v22 = vadd.f32 %v5804_v13, %v982_v51  ;;  %v13027_v28 = vadd.f32 %v5976_v25, %v990_v16  ;;  %v6332_v58 = vmax.f32 %v13021_v2, 0.0  ;;  %v6334_v35 = vmax.f32 %v13025_v8, 0.0  ;;  %v13265_v56 = vld [vmem:[#allocation6 + $0xc8] ss:$16 sps:$4 sm:$0xff]   ;;  %v13270_v51 = vld [vmem:[#allocation6 + $0xe4] ss:$16 sps:$4 sm:$0xff]  }
 0x3d0   :  { %v6347_v26 = vmax.f32 %v13022_v9, 0.0  ;;  %v6349_v32 = vmax.f32 %v13026_v19, 0.0  ;;  %v13268_v16 = vld [vmem:[#allocation6 + $0xe0] ss:$16 sps:$4 sm:$0xff]   ;;  %v13271_v53 = vld [vmem:[#allocation6 + $0xe8] ss:$16 sps:$4 sm:$0xff]  }
 0x3d1   :  { %v6348_v33 = vmax.f32 %v13023_v22, 0.0  ;;  %9472 = vmatpush1.bf16.msra.mxu0 %v13244_v30  ;;  %v6350_v37 = vmax.f32 %v13027_v28, 0.0  ;;  %9816 = vmatpush1.bf16.msra.mxu1 %v13247_v17  ;;  %v13279_v55 = vld [vmem:[#allocation6 + $0x10c] ss:$16 sps:$4 sm:$0xff]   ;;  %v13274_v59 = vld [vmem:[#allocation6 + $0x100] ss:$16 sps:$4 sm:$0xff]  }
 0x3d2   :  { %v14761_v36 = vpack.c.bf16 %v6347_v26, %v6331_v23  ;;  %9473 = vmatprep.subr.bf16.mxu0 %v13252_v18  ;;  %v14763_v41 = vpack.c.bf16 %v6349_v32, %v6333_v29  ;;  %9817 = vmatprep.subr.bf16.mxu1 %v13255_v39  ;;  %v13282_v61 = vld [vmem:[#allocation6 + $0x124] ss:$16 sps:$4 sm:$0xff]   ;;  %v13285_v63 = vld [vmem:[#allocation6 + $0x12c] ss:$16 sps:$4 sm:$0xff]   ;;  %v13280_v2 = vld [vmem:[#allocation6 + $0x120] ss:$16 sps:$4 sm:$0xff]  }
 0x3d3   :  { %v14765_v42 = vpack.c.bf16 %v6348_v33, %v6332_v58  ;;  %v14767_v44 = vpack.c.bf16 %v6350_v37, %v6334_v35  ;;  %v13283_v15 = vld [vmem:[#allocation6 + $0x128] ss:$16 sps:$4 sm:$0xff]   ;;  %v13288_v4 = vld [vmem:[#allocation6 + $0x144] ss:$16 sps:$4 sm:$0xff]   ;;  %v13291_v30 = vld [vmem:[#allocation6 + $0x14c] ss:$16 sps:$4 sm:$0xff]  }
 0x3d4   :  { %v13286_v8 = vld [vmem:[#allocation6 + $0x140] ss:$16 sps:$4 sm:$0xff]   ;;  %v13289_v9 = vld [vmem:[#allocation6 + $0x148] ss:$16 sps:$4 sm:$0xff]   ;;  %v13294_v12 = vld [vmem:[#allocation6 + $0x164] ss:$16 sps:$4 sm:$0xff]  }
 0x3d5   :  { %9474 = vmatpush1.bf16.msra.mxu0 %v13250_v34  ;;  %9818 = vmatpush1.bf16.msra.mxu1 %v13253_v38  ;;  %v13297_v13 = vld [vmem:[#allocation6 + $0x16c] ss:$16 sps:$4 sm:$0xff]   ;;  %v13292_v17 = vld [vmem:[#allocation6 + $0x160] ss:$16 sps:$4 sm:$0xff]   ;;  %v13295_v18 = vld [vmem:[#allocation6 + $0x168] ss:$16 sps:$4 sm:$0xff]  }
 0x3d6   :  { %9475 = vmatprep.subr.bf16.mxu0 %v13258_v40  ;;  %9819 = vmatprep.subr.bf16.mxu1 %v13261_v43  ;;  %v13300_v19 = vld [vmem:[#allocation6 + $0x184] ss:$16 sps:$4 sm:$0xff]   ;;  %v13303_v22 = vld [vmem:[#allocation6 + $0x18c] ss:$16 sps:$4 sm:$0xff]   ;;  %v13298_v25 = vld [vmem:[#allocation6 + $0x180] ss:$16 sps:$4 sm:$0xff]  }
 0x3d7   :  { %v13301_v39 = vld [vmem:[#allocation6 + $0x188] ss:$16 sps:$4 sm:$0xff]   ;;  %v13306_v23 = vld [vmem:[#allocation6 + $0x1a4] ss:$16 sps:$4 sm:$0xff]   ;;  %v13309_v26 = vld [vmem:[#allocation6 + $0x1ac] ss:$16 sps:$4 sm:$0xff]  }
 0x3d8   :  { %v13304_v28 = vld [vmem:[#allocation6 + $0x1a0] ss:$16 sps:$4 sm:$0xff]   ;;  %v13307_v29 = vld [vmem:[#allocation6 + $0x1a8] ss:$16 sps:$4 sm:$0xff]   ;;  %v13312_v58 = vld [vmem:[#allocation6 + $0x1c4] ss:$16 sps:$4 sm:$0xff]  }
 0x3d9   :  { %9476 = vmatpush1.bf16.msra.mxu0 %v13256_v49  ;;  %9820 = vmatpush1.bf16.msra.mxu1 %v13259_v46  ;;  %v13315_v32 = vld [vmem:[#allocation6 + $0x1cc] ss:$16 sps:$4 sm:$0xff]   ;;  %v13310_v33 = vld [vmem:[#allocation6 + $0x1c0] ss:$16 sps:$4 sm:$0xff]   ;;  %v13313_v34 = vld [vmem:[#allocation6 + $0x1c8] ss:$16 sps:$4 sm:$0xff]  }
 0x3da   :  { %9477 = vmatprep.subr.bf16.mxu0 %v13264_v47  ;;  %9821 = vmatprep.subr.bf16.mxu1 %v13267_v48  ;;  %v13318_v35 = vld [vmem:[#allocation6 + $0x1e4] ss:$16 sps:$4 sm:$0xff]   ;;  %v13321_v37 = vld [vmem:[#allocation6 + $0x1ec] ss:$16 sps:$4 sm:$0xff]   ;;  %v13316_v38 = vld [vmem:[#allocation6 + $0x1e0] ss:$16 sps:$4 sm:$0xff]  }
 0x3db   :  { %v13319_v40 = vld [vmem:[#allocation6 + $0x1e8] ss:$16 sps:$4 sm:$0xff]   ;;  %v13324_v43 = vld [vmem:[#allocation6 + $0x204] ss:$16 sps:$4 sm:$0xff]   ;;  %v13327_v49 = vld [vmem:[#allocation6 + $0x20c] ss:$16 sps:$4 sm:$0xff]  }
 0x3dc   :  { %v13322_v46 = vld [vmem:[#allocation6 + $0x200] ss:$16 sps:$4 sm:$0xff]   ;;  %v13325_v47 = vld [vmem:[#allocation6 + $0x208] ss:$16 sps:$4 sm:$0xff]   ;;  %v13330_v48 = vld [vmem:[#allocation6 + $0x224] ss:$16 sps:$4 sm:$0xff]  }
 0x3dd   :  { %9478 = vmatpush1.bf16.msra.mxu0 %v13262_v50  ;;  %9822 = vmatpush1.bf16.msra.mxu1 %v13265_v56  ;;  %v13333_v50 = vld [vmem:[#allocation6 + $0x22c] ss:$16 sps:$4 sm:$0xff]   ;;  %v13328_v56 = vld [vmem:[#allocation6 + $0x220] ss:$16 sps:$4 sm:$0xff]  }
 0x3de   :  { %9479 = vmatprep.subr.bf16.mxu0 %v13270_v51  ;;  %9823 = vmatprep.subr.bf16.mxu1 %v13273_v52  ;;  %v13331_v51 = vld [vmem:[#allocation6 + $0x228] ss:$16 sps:$4 sm:$0xff]   ;;  %v13336_v52 = vld [vmem:[#allocation6 + $0x244] ss:$16 sps:$4 sm:$0xff]  }
 0x3e1   :  { %9480 = vmatpush1.bf16.msra.mxu0 %v13268_v16  ;;  %9824 = vmatpush1.bf16.msra.mxu1 %v13271_v53  ;;  %v13339_v16 = vld [vmem:[#allocation6 + $0x24c] ss:$16 sps:$4 sm:$0xff]   ;;  %v13334_v53 = vld [vmem:[#allocation6 + $0x240] ss:$16 sps:$4 sm:$0xff]  }
 0x3e2   :  { %9481 = vmatprep.subr.bf16.mxu0 %v13276_v54  ;;  %9825 = vmatprep.subr.bf16.mxu1 %v13279_v55  ;;  %v13337_v54 = vld [vmem:[#allocation6 + $0x248] ss:$16 sps:$4 sm:$0xff]   ;;  %v13342_v55 = vld [vmem:[#allocation6 + $0x264] ss:$16 sps:$4 sm:$0xff]  }
 0x3e5   :  { %9482 = vmatpush1.bf16.msra.mxu0 %v13274_v59  ;;  %9826 = vmatpush1.bf16.msra.mxu1 %v13277_v60  ;;  %v13340_v59 = vld [vmem:[#allocation6 + $0x260] ss:$16 sps:$4 sm:$0xff]   ;;  %v13343_v60 = vld [vmem:[#allocation6 + $0x268] ss:$16 sps:$4 sm:$0xff]  }
 0x3e6   :  { %9483 = vmatprep.subr.bf16.mxu0 %v13282_v61  ;;  %9827 = vmatprep.subr.bf16.mxu1 %v13285_v63  ;;  %v13348_v61 = vld [vmem:[#allocation6 + $0x284] ss:$16 sps:$4 sm:$0xff]   ;;  %v13351_v63 = vld [vmem:[#allocation6 + $0x28c] ss:$16 sps:$4 sm:$0xff]  }
 0x3e9   :  { %9484 = vmatpush1.bf16.msra.mxu0 %v13280_v2  ;;  %9828 = vmatpush1.bf16.msra.mxu1 %v13283_v15  ;;  %v13349_v2 = vld [vmem:[#allocation6 + $0x288] ss:$16 sps:$4 sm:$0xff]   ;;  %v13354_v15 = vld [vmem:[#allocation6 + $0x2a4] ss:$16 sps:$4 sm:$0xff]  }
 0x3ea   :  { %9485 = vmatprep.subr.bf16.mxu0 %v13288_v4  ;;  %9829 = vmatprep.subr.bf16.mxu1 %v13291_v30  ;;  %v13357_v4 = vld [vmem:[#allocation6 + $0x2ac] ss:$16 sps:$4 sm:$0xff]   ;;  %v13352_v30 = vld [vmem:[#allocation6 + $0x2a0] ss:$16 sps:$4 sm:$0xff]  }
 0x3ed   :  { %9486 = vmatpush1.bf16.msra.mxu0 %v13286_v8  ;;  %9830 = vmatpush1.bf16.msra.mxu1 %v13289_v9  ;;  %v13355_v8 = vld [vmem:[#allocation6 + $0x2a8] ss:$16 sps:$4 sm:$0xff]   ;;  %v13360_v9 = vld [vmem:[#allocation6 + $0x2c4] ss:$16 sps:$4 sm:$0xff]  }
 0x3ee   :  { %9487 = vmatprep.subr.bf16.mxu0 %v13294_v12  ;;  %9831 = vmatprep.subr.bf16.mxu1 %v13297_v13  ;;  %v13363_v12 = vld [vmem:[#allocation6 + $0x2cc] ss:$16 sps:$4 sm:$0xff]   ;;  %v13358_v13 = vld [vmem:[#allocation6 + $0x2c0] ss:$16 sps:$4 sm:$0xff]  }
 0x3f1   :  { %9488 = vmatpush1.bf16.msra.mxu0 %v13292_v17  ;;  %9832 = vmatpush1.bf16.msra.mxu1 %v13295_v18  ;;  %v13361_v17 = vld [vmem:[#allocation6 + $0x2c8] ss:$16 sps:$4 sm:$0xff]   ;;  %v13366_v18 = vld [vmem:[#allocation6 + $0x2e4] ss:$16 sps:$4 sm:$0xff]  }
 0x3f2   :  { %9489 = vmatprep.subr.bf16.mxu0 %v13300_v19  ;;  %9833 = vmatprep.subr.bf16.mxu1 %v13303_v22  ;;  %v13369_v19 = vld [vmem:[#allocation6 + $0x2ec] ss:$16 sps:$4 sm:$0xff]   ;;  %v13364_v22 = vld [vmem:[#allocation6 + $0x2e0] ss:$16 sps:$4 sm:$0xff]  }
 0x3f5   :  { %9490 = vmatpush1.bf16.msra.mxu0 %v13298_v25  ;;  %9834 = vmatpush1.bf16.msra.mxu1 %v13301_v39  ;;  %v13367_v25 = vld [vmem:[#allocation6 + $0x2e8] ss:$16 sps:$4 sm:$0xff]   ;;  %v13372_v39 = vld [vmem:[#allocation6 + $0x304] ss:$16 sps:$4 sm:$0xff]  }
 0x3f6   :  { %9491 = vmatprep.subr.bf16.mxu0 %v13306_v23  ;;  %9835 = vmatprep.subr.bf16.mxu1 %v13309_v26  ;;  %v13375_v23 = vld [vmem:[#allocation6 + $0x30c] ss:$16 sps:$4 sm:$0xff]   ;;  %v13370_v26 = vld [vmem:[#allocation6 + $0x300] ss:$16 sps:$4 sm:$0xff]  }
 0x3f9   :  { %9492 = vmatpush1.bf16.msra.mxu0 %v13304_v28  ;;  %9836 = vmatpush1.bf16.msra.mxu1 %v13307_v29  ;;  %v13373_v28 = vld [vmem:[#allocation6 + $0x308] ss:$16 sps:$4 sm:$0xff]   ;;  %v13378_v29 = vld [vmem:[#allocation6 + $0x324] ss:$16 sps:$4 sm:$0xff]  }
 0x3fa   :  { %9493 = vmatprep.subr.bf16.mxu0 %v13312_v58  ;;  %9837 = vmatprep.subr.bf16.mxu1 %v13315_v32  ;;  %v13381_v58 = vld [vmem:[#allocation6 + $0x32c] ss:$16 sps:$4 sm:$0xff]   ;;  %v13376_v32 = vld [vmem:[#allocation6 + $0x320] ss:$16 sps:$4 sm:$0xff]  }
 0x3fd   :  { %9494 = vmatpush1.bf16.msra.mxu0 %v13310_v33  ;;  %9838 = vmatpush1.bf16.msra.mxu1 %v13313_v34  ;;  %v13379_v33 = vld [vmem:[#allocation6 + $0x328] ss:$16 sps:$4 sm:$0xff]   ;;  %v13384_v34 = vld [vmem:[#allocation6 + $0x344] ss:$16 sps:$4 sm:$0xff]  }
 0x3fe   :  { %9495 = vmatprep.subr.bf16.mxu0 %v13318_v35  ;;  %9839 = vmatprep.subr.bf16.mxu1 %v13321_v37  ;;  %v13387_v35 = vld [vmem:[#allocation6 + $0x34c] ss:$16 sps:$4 sm:$0xff]   ;;  %v13382_v37 = vld [vmem:[#allocation6 + $0x340] ss:$16 sps:$4 sm:$0xff]  }
 0x401   :  { %9496 = vmatpush1.bf16.msra.mxu0 %v13316_v38  ;;  %9840 = vmatpush1.bf16.msra.mxu1 %v13319_v40  ;;  %v13385_v38 = vld [vmem:[#allocation6 + $0x348] ss:$16 sps:$4 sm:$0xff]   ;;  %v13390_v40 = vld [vmem:[#allocation6 + $0x364] ss:$16 sps:$4 sm:$0xff]  }
 0x402   :  { %9508 = vmatprep.subr.bf16.mxu0 %v13324_v43  ;;  %9852 = vmatprep.subr.bf16.mxu1 %v13327_v49  ;;  %v13393_v43 = vld [vmem:[#allocation6 + $0x36c] ss:$16 sps:$4 sm:$0xff]   ;;  %v13388_v49 = vld [vmem:[#allocation6 + $0x360] ss:$16 sps:$4 sm:$0xff]  }
 0x404   :  { %9498 = vmatmul.mubr.bf16.vlgmr.msra.gmra.mrb[16].mxu0 %v14687_v10  ;;  %9842 = vmatmul.mubr.bf16.vlgmr.msra.gmra.mrb[16].mxu1 %v14687_v10  ;;  %v13345_v10 = vld [vmem:[#allocation6 + $0x26c] ss:$16 sps:$4 sm:$0xff]  }
 0x405   :  { %9509 = vmatpush1.bf16.msra.mxu0 %v13322_v46  ;;  %9540 = vmatprep.mubr.bf16.mxu0 %v14693_v20  ;;  %v13391_v46 = vld [vmem:[#allocation6 + $0x368] ss:$16 sps:$4 sm:$0xff]  }
 0x406   :  { %9853 = vmatpush1.bf16.msra.mxu1 %v13325_v47  ;;  %9884 = vmatprep.mubr.bf16.mxu1 %v14693_v20  ;;  %v13346_v20 = vld [vmem:[#allocation6 + $0x280] ss:$16 sps:$4 sm:$0xff]   ;;  %v13396_v47 = vld [vmem:[#allocation6 + $0x384] ss:$16 sps:$4 sm:$0xff]  }
 0x407   :  { %9510 = vmatprep.subr.bf16.mxu0 %v13330_v48  ;;  %9854 = vmatprep.subr.bf16.mxu1 %v13333_v50  ;;  %v13399_v48 = vld [vmem:[#allocation6 + $0x38c] ss:$16 sps:$4 sm:$0xff]   ;;  %v13394_v50 = vld [vmem:[#allocation6 + $0x380] ss:$16 sps:$4 sm:$0xff]  }
 0x409   :  { %9511 = vmatpush1.bf16.msra.mxu0 %v13328_v56  ;;  %v13397_v56 = vld [vmem:[#allocation6 + $0x388] ss:$16 sps:$4 sm:$0xff]  }
 0x40a   :  { %9855 = vmatpush1.bf16.msra.mxu1 %v13331_v51  ;;  %9512 = vmatprep.subr.bf16.mxu0 %v13336_v52  ;;  %v13402_v51 = vld [vmem:[#allocation6 + $0x3a4] ss:$16 sps:$4 sm:$0xff]   ;;  %v13405_v52 = vld [vmem:[#allocation6 + $0x3ac] ss:$16 sps:$4 sm:$0xff]  }
 0x40b   :  { %9856 = vmatprep.subr.bf16.mxu1 %v13339_v16  ;;  %v13400_v16 = vld [vmem:[#allocation6 + $0x3a0] ss:$16 sps:$4 sm:$0xff]  }
 0x40d   :  { %9513 = vmatpush1.bf16.msra.mxu0 %v13334_v53  ;;  %v13403_v53 = vld [vmem:[#allocation6 + $0x3a8] ss:$16 sps:$4 sm:$0xff]  }
 0x40e   :  { %9857 = vmatpush1.bf16.msra.mxu1 %v13337_v54  ;;  %9514 = vmatprep.subr.bf16.mxu0 %v13342_v55  ;;  %v13408_v54 = vld [vmem:[#allocation6 + $0x3c4] ss:$16 sps:$4 sm:$0xff]   ;;  %v13411_v55 = vld [vmem:[#allocation6 + $0x3cc] ss:$16 sps:$4 sm:$0xff]  }
 0x40f   :  { %9858 = vmatprep.subr.bf16.mxu1 %v13345_v10  ;;  %v13406_v10 = vld [vmem:[#allocation6 + $0x3c0] ss:$16 sps:$4 sm:$0xff]  }
 0x411   :  { %9515 = vmatpush1.bf16.msra.mxu0 %v13340_v59  ;;  %v13409_v59 = vld [vmem:[#allocation6 + $0x3c8] ss:$16 sps:$4 sm:$0xff]  }
 0x412   :  { %9859 = vmatpush1.bf16.msra.mxu1 %v13343_v60  ;;  %9516 = vmatprep.subr.bf16.mxu0 %v13348_v61  ;;  %v13414_v60 = vld [vmem:[#allocation6 + $0x3e4] ss:$16 sps:$4 sm:$0xff]   ;;  %v13417_v61 = vld [vmem:[#allocation6 + $0x3ec] ss:$16 sps:$4 sm:$0xff]  }
 0x413   :  { %9860 = vmatprep.subr.bf16.mxu1 %v13351_v63  ;;  %v13412_v63 = vld [vmem:[#allocation6 + $0x3e0] ss:$16 sps:$4 sm:$0xff]  }
 0x415   :  { %9517 = vmatpush1.bf16.msra.mxu0 %v13346_v20  ;;  %v13415_v20 = vld [vmem:[#allocation6 + $0x3e8] ss:$16 sps:$4 sm:$0xff]  }
 0x416   :  { %9861 = vmatpush1.bf16.msra.mxu1 %v13349_v2  ;;  %9518 = vmatprep.subr.bf16.mxu0 %v13354_v15  ;;  %v13420_v2 = vld [vmem:[#allocation6 + $0x404] ss:$16 sps:$4 sm:$0xff]   ;;  %v13423_v15 = vld [vmem:[#allocation6 + $0x40c] ss:$16 sps:$4 sm:$0xff]  }
 0x417   :  { %9862 = vmatprep.subr.bf16.mxu1 %v13357_v4  ;;  %v13418_v4 = vld [vmem:[#allocation6 + $0x400] ss:$16 sps:$4 sm:$0xff]  }
 0x419   :  { %9519 = vmatpush1.bf16.msra.mxu0 %v13352_v30  ;;  %v13421_v30 = vld [vmem:[#allocation6 + $0x408] ss:$16 sps:$4 sm:$0xff]  }
 0x41a   :  { %9863 = vmatpush1.bf16.msra.mxu1 %v13355_v8  ;;  %9520 = vmatprep.subr.bf16.mxu0 %v13360_v9  ;;  %v13426_v8 = vld [vmem:[#allocation6 + $0x424] ss:$16 sps:$4 sm:$0xff]   ;;  %v13429_v9 = vld [vmem:[#allocation6 + $0x42c] ss:$16 sps:$4 sm:$0xff]  }
 0x41b   :  { %9864 = vmatprep.subr.bf16.mxu1 %v13363_v12  ;;  %v13424_v12 = vld [vmem:[#allocation6 + $0x420] ss:$16 sps:$4 sm:$0xff]  }
 0x41d   :  { %9521 = vmatpush1.bf16.msra.mxu0 %v13358_v13  ;;  %v13427_v13 = vld [vmem:[#allocation6 + $0x428] ss:$16 sps:$4 sm:$0xff]  }
 0x41e   :  { %9865 = vmatpush1.bf16.msra.mxu1 %v13361_v17  ;;  %9522 = vmatprep.subr.bf16.mxu0 %v13366_v18  ;;  %v13432_v17 = vld [vmem:[#allocation6 + $0x444] ss:$16 sps:$4 sm:$0xff]   ;;  %v13435_v18 = vld [vmem:[#allocation6 + $0x44c] ss:$16 sps:$4 sm:$0xff]  }
 0x41f   :  { %9866 = vmatprep.subr.bf16.mxu1 %v13369_v19  ;;  %v13430_v19 = vld [vmem:[#allocation6 + $0x440] ss:$16 sps:$4 sm:$0xff]  }
 0x421   :  { %9523 = vmatpush1.bf16.msra.mxu0 %v13364_v22  ;;  %v13433_v22 = vld [vmem:[#allocation6 + $0x448] ss:$16 sps:$4 sm:$0xff]  }
 0x422   :  { %9867 = vmatpush1.bf16.msra.mxu1 %v13367_v25  ;;  %9524 = vmatprep.subr.bf16.mxu0 %v13372_v39  ;;  %v13438_v25 = vld [vmem:[#allocation6 + $0x464] ss:$16 sps:$4 sm:$0xff]   ;;  %v13436_v39 = vld [vmem:[#allocation6 + $0x460] ss:$16 sps:$4 sm:$0xff]  }
 0x423   :  { %9868 = vmatprep.subr.bf16.mxu1 %v13375_v23  ;;  %v13439_v23 = vld [vmem:[#allocation6 + $0x468] ss:$16 sps:$4 sm:$0xff]  }
 0x425   :  { %9525 = vmatpush1.bf16.msra.mxu0 %v13370_v26  ;;  %v13444_v26 = vld [vmem:[#allocation6 + $0x484] ss:$16 sps:$4 sm:$0xff]  }
 0x426   :  { %9869 = vmatpush1.bf16.msra.mxu1 %v13373_v28  ;;  %9526 = vmatprep.subr.bf16.mxu0 %v13378_v29  ;;  %v13447_v28 = vld [vmem:[#allocation6 + $0x48c] ss:$16 sps:$4 sm:$0xff]   ;;  %v13445_v29 = vld [vmem:[#allocation6 + $0x488] ss:$16 sps:$4 sm:$0xff]  }
 0x427   :  { %9870 = vmatprep.subr.bf16.mxu1 %v13381_v58  ;;  %v13450_v58 = vld [vmem:[#allocation6 + $0x4a4] ss:$16 sps:$4 sm:$0xff]  }
 0x429   :  { %9527 = vmatpush1.bf16.msra.mxu0 %v13376_v32  ;;  %v13453_v32 = vld [vmem:[#allocation6 + $0x4ac] ss:$16 sps:$4 sm:$0xff]  }
 0x42a   :  { %9871 = vmatpush1.bf16.msra.mxu1 %v13379_v33  ;;  %9528 = vmatprep.subr.bf16.mxu0 %v13384_v34  ;;  %v13448_v33 = vld [vmem:[#allocation6 + $0x4a0] ss:$16 sps:$4 sm:$0xff]   ;;  %v13451_v34 = vld [vmem:[#allocation6 + $0x4a8] ss:$16 sps:$4 sm:$0xff]  }
 0x42b   :  { %9872 = vmatprep.subr.bf16.mxu1 %v13387_v35  ;;  %v13456_v35 = vld [vmem:[#allocation6 + $0x4c4] ss:$16 sps:$4 sm:$0xff]  }
 0x42d   :  { %9529 = vmatpush1.bf16.msra.mxu0 %v13382_v37  ;;  %v13459_v37 = vld [vmem:[#allocation6 + $0x4cc] ss:$16 sps:$4 sm:$0xff]  }
 0x42e   :  { %9873 = vmatpush1.bf16.msra.mxu1 %v13385_v38  ;;  %9530 = vmatprep.subr.bf16.mxu0 %v13390_v40  ;;  %v13454_v38 = vld [vmem:[#allocation6 + $0x4c0] ss:$16 sps:$4 sm:$0xff]   ;;  %v13457_v40 = vld [vmem:[#allocation6 + $0x4c8] ss:$16 sps:$4 sm:$0xff]  }
 0x42f   :  { %9874 = vmatprep.subr.bf16.mxu1 %v13393_v43  ;;  %v13462_v43 = vld [vmem:[#allocation6 + $0x4e4] ss:$16 sps:$4 sm:$0xff]  }
 0x431   :  { %9531 = vmatpush1.bf16.msra.mxu0 %v13388_v49  ;;  %v13465_v49 = vld [vmem:[#allocation6 + $0x4ec] ss:$16 sps:$4 sm:$0xff]  }
 0x432   :  { %9875 = vmatpush1.bf16.msra.mxu1 %v13391_v46  ;;  %9532 = vmatprep.subr.bf16.mxu0 %v13396_v47  ;;  %v13460_v46 = vld [vmem:[#allocation6 + $0x4e0] ss:$16 sps:$4 sm:$0xff]   ;;  %v13463_v47 = vld [vmem:[#allocation6 + $0x4e8] ss:$16 sps:$4 sm:$0xff]  }
 0x433   :  { %9876 = vmatprep.subr.bf16.mxu1 %v13399_v48  ;;  %v13468_v48 = vld [vmem:[#allocation6 + $0x504] ss:$16 sps:$4 sm:$0xff]  }
 0x435   :  { %9533 = vmatpush1.bf16.msra.mxu0 %v13394_v50  ;;  %v13471_v50 = vld [vmem:[#allocation6 + $0x50c] ss:$16 sps:$4 sm:$0xff]  }
 0x436   :  { %9877 = vmatpush1.bf16.msra.mxu1 %v13397_v56  ;;  %9534 = vmatprep.subr.bf16.mxu0 %v13402_v51  ;;  %v13466_v56 = vld [vmem:[#allocation6 + $0x500] ss:$16 sps:$4 sm:$0xff]   ;;  %v13469_v51 = vld [vmem:[#allocation6 + $0x508] ss:$16 sps:$4 sm:$0xff]  }
 0x437   :  { %9878 = vmatprep.subr.bf16.mxu1 %v13405_v52  ;;  %v13474_v52 = vld [vmem:[#allocation6 + $0x524] ss:$16 sps:$4 sm:$0xff]  }
 0x439   :  { %9535 = vmatpush1.bf16.msra.mxu0 %v13400_v16  ;;  %v13477_v16 = vld [vmem:[#allocation6 + $0x52c] ss:$16 sps:$4 sm:$0xff]  }
 0x43a   :  { %9879 = vmatpush1.bf16.msra.mxu1 %v13403_v53  ;;  %9536 = vmatprep.subr.bf16.mxu0 %v13408_v54  ;;  %v13472_v53 = vld [vmem:[#allocation6 + $0x520] ss:$16 sps:$4 sm:$0xff]   ;;  %v13475_v54 = vld [vmem:[#allocation6 + $0x528] ss:$16 sps:$4 sm:$0xff]  }
 0x43b   :  { %9880 = vmatprep.subr.bf16.mxu1 %v13411_v55  ;;  %v13480_v55 = vld [vmem:[#allocation6 + $0x544] ss:$16 sps:$4 sm:$0xff]  }
 0x43d   :  { %9537 = vmatpush1.bf16.msra.mxu0 %v13406_v10  ;;  %v13483_v10 = vld [vmem:[#allocation6 + $0x54c] ss:$16 sps:$4 sm:$0xff]  }
 0x43e   :  { %9881 = vmatpush1.bf16.msra.mxu1 %v13409_v59  ;;  %9538 = vmatprep.subr.bf16.mxu0 %v13414_v60  ;;  %v13478_v59 = vld [vmem:[#allocation6 + $0x540] ss:$16 sps:$4 sm:$0xff]   ;;  %v13481_v60 = vld [vmem:[#allocation6 + $0x548] ss:$16 sps:$4 sm:$0xff]  }
 0x43f   :  { %9882 = vmatprep.subr.bf16.mxu1 %v13417_v61  ;;  %v13486_v61 = vld [vmem:[#allocation6 + $0x564] ss:$16 sps:$4 sm:$0xff]  }
 0x441   :  { %9539 = vmatpush1.bf16.msra.mxu0 %v13412_v63  ;;  %v13489_v63 = vld [vmem:[#allocation6 + $0x56c] ss:$16 sps:$4 sm:$0xff]  }
 0x442   :  { %9883 = vmatpush1.bf16.msra.mxu1 %v13415_v20  ;;  %9551 = vmatprep.subr.bf16.mxu0 %v13420_v2  ;;  %v13484_v20 = vld [vmem:[#allocation6 + $0x560] ss:$16 sps:$4 sm:$0xff]   ;;  %v13487_v2 = vld [vmem:[#allocation6 + $0x568] ss:$16 sps:$4 sm:$0xff]  }
 0x443   :  { %9895 = vmatprep.subr.bf16.mxu1 %v13423_v15  ;;  %v13492_v15 = vld [vmem:[#allocation6 + $0x584] ss:$16 sps:$4 sm:$0xff]  }
 0x444   :  { %9541 = vmatmul.mubr.bf16.vlgmr.msra.gmra.mrb[16].mxu0 %v14689_v14 }
 0x445   :  { %9885 = vmatmul.mubr.bf16.vlgmr.msra.gmra.mrb[16].mxu1 %v14689_v14  ;;  %9552 = vmatpush1.bf16.msra.mxu0 %v13418_v4  ;;  %v13441_v14 = vld [vmem:[#allocation6 + $0x46c] ss:$16 sps:$4 sm:$0xff]  }
 0x446   :  { %9583 = vmatprep.mubr.bf16.mxu0 %v14729_v27  ;;  %9896 = vmatpush1.bf16.msra.mxu1 %v13421_v30  ;;  %v13495_v4 = vld [vmem:[#allocation6 + $0x58c] ss:$16 sps:$4 sm:$0xff]   ;;  %v13490_v30 = vld [vmem:[#allocation6 + $0x580] ss:$16 sps:$4 sm:$0xff]  }
 0x447   :  { %9927 = vmatprep.mubr.bf16.mxu1 %v14729_v27  ;;  %9553 = vmatprep.subr.bf16.mxu0 %v13426_v8  ;;  %v13442_v27 = vld [vmem:[#allocation6 + $0x480] ss:$16 sps:$4 sm:$0xff]   ;;  %v13493_v8 = vld [vmem:[#allocation6 + $0x588] ss:$16 sps:$4 sm:$0xff]  }
 0x448   :  { %9897 = vmatprep.subr.bf16.mxu1 %v13429_v9  ;;  %v13498_v9 = vld [vmem:[#allocation6 + $0x5a4] ss:$16 sps:$4 sm:$0xff]  }
 0x449   :  { %9554 = vmatpush1.bf16.msra.mxu0 %v13424_v12  ;;  %v13501_v12 = vld [vmem:[#allocation6 + $0x5ac] ss:$16 sps:$4 sm:$0xff]  }
 0x44a   :  { %9898 = vmatpush1.bf16.msra.mxu1 %v13427_v13  ;;  %9555 = vmatprep.subr.bf16.mxu0 %v13432_v17  ;;  %v13496_v13 = vld [vmem:[#allocation6 + $0x5a0] ss:$16 sps:$4 sm:$0xff]   ;;  %v13499_v17 = vld [vmem:[#allocation6 + $0x5a8] ss:$16 sps:$4 sm:$0xff]  }
 0x44b   :  { %9899 = vmatprep.subr.bf16.mxu1 %v13435_v18  ;;  %v13504_v18 = vld [vmem:[#allocation6 + $0x5c4] ss:$16 sps:$4 sm:$0xff]  }
 0x44d   :  { %9556 = vmatpush1.bf16.msra.mxu0 %v13430_v19  ;;  %v13507_v19 = vld [vmem:[#allocation6 + $0x5cc] ss:$16 sps:$4 sm:$0xff]  }
 0x44e   :  { %9900 = vmatpush1.bf16.msra.mxu1 %v13433_v22  ;;  %9557 = vmatprep.subr.bf16.mxu0 %v13438_v25  ;;  %v13502_v22 = vld [vmem:[#allocation6 + $0x5c0] ss:$16 sps:$4 sm:$0xff]   ;;  %v13505_v25 = vld [vmem:[#allocation6 + $0x5c8] ss:$16 sps:$4 sm:$0xff]  }
 0x44f   :  { %9901 = vmatprep.subr.bf16.mxu1 %v13441_v14  ;;  %v13510_v14 = vld [vmem:[#allocation6 + $0x5e4] ss:$16 sps:$4 sm:$0xff]  }
 0x451   :  { %9558 = vmatpush1.bf16.msra.mxu0 %v13436_v39  ;;  %v13513_v39 = vld [vmem:[#allocation6 + $0x5ec] ss:$16 sps:$4 sm:$0xff]  }
 0x452   :  { %9902 = vmatpush1.bf16.msra.mxu1 %v13439_v23  ;;  %9559 = vmatprep.subr.bf16.mxu0 %v13444_v26  ;;  %v13508_v23 = vld [vmem:[#allocation6 + $0x5e0] ss:$16 sps:$4 sm:$0xff]   ;;  %v13511_v26 = vld [vmem:[#allocation6 + $0x5e8] ss:$16 sps:$4 sm:$0xff]  }
 0x453   :  { %9903 = vmatprep.subr.bf16.mxu1 %v13447_v28  ;;  %v13516_v28 = vld [vmem:[#allocation6 + $0x604] ss:$16 sps:$4 sm:$0xff]  }
 0x455   :  { %9560 = vmatpush1.bf16.msra.mxu0 %v13442_v27  ;;  %v13519_v27 = vld [vmem:[#allocation6 + $0x60c] ss:$16 sps:$4 sm:$0xff]  }
 0x456   :  { %9904 = vmatpush1.bf16.msra.mxu1 %v13445_v29  ;;  %9561 = vmatprep.subr.bf16.mxu0 %v13450_v58  ;;  %v13514_v29 = vld [vmem:[#allocation6 + $0x600] ss:$16 sps:$4 sm:$0xff]   ;;  %v13517_v58 = vld [vmem:[#allocation6 + $0x608] ss:$16 sps:$4 sm:$0xff]  }
 0x457   :  { %9905 = vmatprep.subr.bf16.mxu1 %v13453_v32  ;;  %v13522_v32 = vld [vmem:[#allocation6 + $0x624] ss:$16 sps:$4 sm:$0xff]  }
 0x459   :  { %9562 = vmatpush1.bf16.msra.mxu0 %v13448_v33  ;;  %v13525_v33 = vld [vmem:[#allocation6 + $0x62c] ss:$16 sps:$4 sm:$0xff]  }
 0x45a   :  { %9906 = vmatpush1.bf16.msra.mxu1 %v13451_v34  ;;  %9563 = vmatprep.subr.bf16.mxu0 %v13456_v35  ;;  %v13520_v34 = vld [vmem:[#allocation6 + $0x620] ss:$16 sps:$4 sm:$0xff]   ;;  %v13523_v35 = vld [vmem:[#allocation6 + $0x628] ss:$16 sps:$4 sm:$0xff]  }
 0x45b   :  { %9907 = vmatprep.subr.bf16.mxu1 %v13459_v37  ;;  %v13528_v37 = vld [vmem:[#allocation6 + $0x644] ss:$16 sps:$4 sm:$0xff]  }
 0x45d   :  { %9564 = vmatpush1.bf16.msra.mxu0 %v13454_v38  ;;  %v13531_v38 = vld [vmem:[#allocation6 + $0x64c] ss:$16 sps:$4 sm:$0xff]  }
 0x45e   :  { %9908 = vmatpush1.bf16.msra.mxu1 %v13457_v40  ;;  %9565 = vmatprep.subr.bf16.mxu0 %v13462_v43  ;;  %v13526_v40 = vld [vmem:[#allocation6 + $0x640] ss:$16 sps:$4 sm:$0xff]   ;;  %v13529_v43 = vld [vmem:[#allocation6 + $0x648] ss:$16 sps:$4 sm:$0xff]  }
 0x45f   :  { %9909 = vmatprep.subr.bf16.mxu1 %v13465_v49  ;;  %v13534_v49 = vld [vmem:[#allocation6 + $0x664] ss:$16 sps:$4 sm:$0xff]  }
 0x461   :  { %9566 = vmatpush1.bf16.msra.mxu0 %v13460_v46  ;;  %v13532_v46 = vld [vmem:[#allocation6 + $0x660] ss:$16 sps:$4 sm:$0xff]  }
 0x462   :  { %9910 = vmatpush1.bf16.msra.mxu1 %v13463_v47  ;;  %9567 = vmatprep.subr.bf16.mxu0 %v13468_v48  ;;  %v13535_v47 = vld [vmem:[#allocation6 + $0x668] ss:$16 sps:$4 sm:$0xff]   ;;  %v13540_v48 = vld [vmem:[#allocation6 + $0x684] ss:$16 sps:$4 sm:$0xff]  }
 0x463   :  { %9911 = vmatprep.subr.bf16.mxu1 %v13471_v50  ;;  %v13543_v50 = vld [vmem:[#allocation6 + $0x68c] ss:$16 sps:$4 sm:$0xff]  }
 0x465   :  { %9568 = vmatpush1.bf16.msra.mxu0 %v13466_v56  ;;  %v13541_v56 = vld [vmem:[#allocation6 + $0x688] ss:$16 sps:$4 sm:$0xff]  }
 0x466   :  { %9912 = vmatpush1.bf16.msra.mxu1 %v13469_v51  ;;  %9569 = vmatprep.subr.bf16.mxu0 %v13474_v52  ;;  %v13546_v51 = vld [vmem:[#allocation6 + $0x6a4] ss:$16 sps:$4 sm:$0xff]   ;;  %v13549_v52 = vld [vmem:[#allocation6 + $0x6ac] ss:$16 sps:$4 sm:$0xff]  }
 0x467   :  { %9913 = vmatprep.subr.bf16.mxu1 %v13477_v16  ;;  %v994_v16 = vrot.slane %v14749_v45, %v961_v62  ;;  %v13555_v62 = vld [vmem:[#allocation6 + $0x6cc] ss:$16 sps:$4 sm:$0xff]  }
 0x469   :  { %9570 = vmatpush1.bf16.msra.mxu0 %v13472_v53  ;;  %v1002_v53 = vrot.slane %v14749_v45, %v969_v0 }
 0x46a   :  { %9914 = vmatpush1.bf16.msra.mxu1 %v13475_v54  ;;  %9571 = vmatprep.subr.bf16.mxu0 %v13480_v55  ;;  %v13544_v54 = vld [vmem:[#allocation6 + $0x6a0] ss:$16 sps:$4 sm:$0xff]   ;;  %v998_v55 = vrot.slane %v14749_v45, %v965_v1 }
 0x46b   :  { %9915 = vmatprep.subr.bf16.mxu1 %v13483_v10  ;;  %v13547_v10 = vld [vmem:[#allocation6 + $0x6a8] ss:$16 sps:$4 sm:$0xff]   ;;  %v13550_v1 = vld [vmem:[#allocation6 + $0x6c0] ss:$16 sps:$4 sm:$0xff]  }
 0x46d   :  { %9572 = vmatpush1.bf16.msra.mxu0 %v13478_v59  ;;  %v1006_v59 = vrot.slane %v14749_v45, %v973_v5  ;;  %v13553_v5 = vld [vmem:[#allocation6 + $0x6c8] ss:$16 sps:$4 sm:$0xff]   ;;  %v13558_v45 = vld [vmem:[#allocation6 + $0x6e4] ss:$16 sps:$4 sm:$0xff]  }
 0x46e   :  { %9916 = vmatpush1.bf16.msra.mxu1 %v13481_v60  ;;  %9573 = vmatprep.subr.bf16.mxu0 %v13486_v61  ;;  %v13552_v60 = vld [vmem:[#allocation6 + $0x6c4] ss:$16 sps:$4 sm:$0xff]  }
 0x46f   :  { %9917 = vmatprep.subr.bf16.mxu1 %v13489_v63 }
 0x471   :  { %9574 = vmatpush1.bf16.msra.mxu0 %v13484_v20 }
 0x472   :  { %9918 = vmatpush1.bf16.msra.mxu1 %v13487_v2  ;;  %9575 = vmatprep.subr.bf16.mxu0 %v13492_v15 }
 0x473   :  { %9919 = vmatprep.subr.bf16.mxu1 %v13495_v4 }
 0x475   :  { %9576 = vmatpush1.bf16.msra.mxu0 %v13490_v30 }
 0x476   :  { %9920 = vmatpush1.bf16.msra.mxu1 %v13493_v8  ;;  %9577 = vmatprep.subr.bf16.mxu0 %v13498_v9 }
 0x477   :  { %9921 = vmatprep.subr.bf16.mxu1 %v13501_v12 }
 0x479   :  { %9578 = vmatpush1.bf16.msra.mxu0 %v13496_v13 }
 0x47a   :  { %9922 = vmatpush1.bf16.msra.mxu1 %v13499_v17  ;;  %9579 = vmatprep.subr.bf16.mxu0 %v13504_v18 }
 0x47b   :  { %9923 = vmatprep.subr.bf16.mxu1 %v13507_v19  ;;  %v13561_v19 = vld [vmem:[#allocation6 + $0x6ec] ss:$16 sps:$4 sm:$0xff]  }
 0x47d   :  { %9580 = vmatpush1.bf16.msra.mxu0 %v13502_v22 }
 0x47e   :  { %9924 = vmatpush1.bf16.msra.mxu1 %v13505_v25  ;;  %9581 = vmatprep.subr.bf16.mxu0 %v13510_v14 }
 0x47f   :  { %9925 = vmatprep.subr.bf16.mxu1 %v13513_v39 }
 0x481   :  { %9582 = vmatpush1.bf16.msra.mxu0 %v13508_v23 }
 0x482   :  { %9926 = vmatpush1.bf16.msra.mxu1 %v13511_v26  ;;  %9594 = vmatprep.subr.bf16.mxu0 %v13516_v28 }
 0x483   :  { %9938 = vmatprep.subr.bf16.mxu1 %v13519_v27  ;;  %v13556_v27 = vld [vmem:[#allocation6 + $0x6e0] ss:$16 sps:$4 sm:$0xff]  }
 0x484   :  { %9584 = vmatmul.mubr.bf16.vlgmr.msra.gmra.mrb[16].mxu0 %v14725_v21 }
 0x485   :  { %9928 = vmatmul.mubr.bf16.vlgmr.msra.gmra.mrb[16].mxu1 %v14725_v21  ;;  %9595 = vmatpush1.bf16.msra.mxu0 %v13514_v29  ;;  %v13537_v21 = vld [vmem:[#allocation6 + $0x66c] ss:$16 sps:$4 sm:$0xff]  }
 0x486   :  { %9626 = vmatprep.mubr.bf16.mxu0 %v14731_v31  ;;  %9939 = vmatpush1.bf16.msra.mxu1 %v13517_v58 }
 0x487   :  { %9970 = vmatprep.mubr.bf16.mxu1 %v14731_v31  ;;  %9596 = vmatprep.subr.bf16.mxu0 %v13522_v32  ;;  %v13538_v31 = vld [vmem:[#allocation6 + $0x680] ss:$16 sps:$4 sm:$0xff]  }
 0x488   :  { %9940 = vmatprep.subr.bf16.mxu1 %v13525_v33  ;;  %v13559_v33 = vld [vmem:[#allocation6 + $0x6e8] ss:$16 sps:$4 sm:$0xff]  }
 0x489   :  { %9597 = vmatpush1.bf16.msra.mxu0 %v13520_v34  ;;  %v13564_v34 = vld [vmem:[#allocation6 + $0x704] ss:$16 sps:$4 sm:$0xff]  }
 0x48a   :  { %9941 = vmatpush1.bf16.msra.mxu1 %v13523_v35  ;;  %9598 = vmatprep.subr.bf16.mxu0 %v13528_v37 }
 0x48b   :  { %9942 = vmatprep.subr.bf16.mxu1 %v13531_v38  ;;  %v13567_v38 = vld [vmem:[#allocation6 + $0x70c] ss:$16 sps:$4 sm:$0xff]  }
 0x48d   :  { %9599 = vmatpush1.bf16.msra.mxu0 %v13526_v40 }
 0x48e   :  { %9943 = vmatpush1.bf16.msra.mxu1 %v13529_v43  ;;  %9600 = vmatprep.subr.bf16.mxu0 %v13534_v49  ;;  %v13562_v43 = vld [vmem:[#allocation6 + $0x700] ss:$16 sps:$4 sm:$0xff]   ;;  %v13565_v49 = vld [vmem:[#allocation6 + $0x708] ss:$16 sps:$4 sm:$0xff]  }
 0x48f   :  { %9944 = vmatprep.subr.bf16.mxu1 %v13537_v21  ;;  %v13570_v21 = vld [vmem:[#allocation6 + $0x724] ss:$16 sps:$4 sm:$0xff]  }
 0x491   :  { %9601 = vmatpush1.bf16.msra.mxu0 %v13532_v46  ;;  %v13573_v46 = vld [vmem:[#allocation6 + $0x72c] ss:$16 sps:$4 sm:$0xff]  }
 0x492   :  { %9945 = vmatpush1.bf16.msra.mxu1 %v13535_v47  ;;  %9602 = vmatprep.subr.bf16.mxu0 %v13540_v48  ;;  %v13568_v47 = vld [vmem:[#allocation6 + $0x720] ss:$16 sps:$4 sm:$0xff]   ;;  %v13571_v48 = vld [vmem:[#allocation6 + $0x728] ss:$16 sps:$4 sm:$0xff]  }
 0x493   :  { %9946 = vmatprep.subr.bf16.mxu1 %v13543_v50  ;;  %v13576_v50 = vld [vmem:[#allocation6 + $0x744] ss:$16 sps:$4 sm:$0xff]  }
 0x495   :  { %9603 = vmatpush1.bf16.msra.mxu0 %v13538_v31  ;;  %v13579_v31 = vld [vmem:[#allocation6 + $0x74c] ss:$16 sps:$4 sm:$0xff]  }
 0x496   :  { %9947 = vmatpush1.bf16.msra.mxu1 %v13541_v56  ;;  %9604 = vmatprep.subr.bf16.mxu0 %v13546_v51  ;;  %v13574_v56 = vld [vmem:[#allocation6 + $0x740] ss:$16 sps:$4 sm:$0xff]   ;;  %v13577_v51 = vld [vmem:[#allocation6 + $0x748] ss:$16 sps:$4 sm:$0xff]  }
 0x497   :  { %v6142_v61 = vpop.f32.mrb[12].mxu0  ;;  %9948 = vmatprep.subr.bf16.mxu1 %v13549_v52  ;;  %v6314_v20 = vpop.f32.mrb[12].mxu1  ;;  %v13582_v52 = vld [vmem:[#allocation6 + $0x764] ss:$16 sps:$4 sm:$0xff]  }
 0x498   :  { %v13028_v63 = vadd.f32 %v6142_v61, %v994_v16  ;;  %v6144_v2 = vpop.f32.mrb[13].mxu0  ;;  %v13032_v0 = vadd.f32 %v6314_v20, %v1002_v53  ;;  %v6316_v4 = vpop.f32.mrb[13].mxu1  ;;  %v13594_v61 = vld [vmem:[#allocation6 + $0x7a4] ss:$16 sps:$4 sm:$0xff]   ;;  %v13595_v20 = vld [vmem:[#allocation6 + $0x7a8] ss:$16 sps:$4 sm:$0xff]  }
 0x499   :  { %v13029_v15 = vadd.f32 %v6144_v2, %v998_v55  ;;  %9605 = vmatpush1.bf16.msra.mxu0 %v13544_v54  ;;  %v6146_v30 = vpop.f32.mrb[14].mxu0  ;;  %v13033_v8 = vadd.f32 %v6316_v4, %v1006_v59  ;;  %v6318_v12 = vpop.f32.mrb[14].mxu1  ;;  %v13583_v54 = vld [vmem:[#allocation6 + $0x768] ss:$16 sps:$4 sm:$0xff]   ;;  %v13600_v2 = vld [vmem:[#allocation6 + $0x7c4] ss:$16 sps:$4 sm:$0xff]  }
 0x49a   :  { %9949 = vmatpush1.bf16.msra.mxu1 %v13547_v10  ;;  %v13030_v9 = vadd.f32 %v6146_v30, %v994_v16  ;;  %v6148_v57 = vpop.f32.mrb[15].mxu0  ;;  %9606 = vmatprep.subr.bf16.mxu0 %v13552_v60  ;;  %v13034_v13 = vadd.f32 %v6318_v12, %v1002_v53  ;;  %v6320_v18 = vpop.f32.mrb[15].mxu1  ;;  %v6335_v22 = vmax.f32 %v13028_v63, 0.0  ;;  %v6337_v39 = vmax.f32 %v13032_v0, 0.0  ;;  %v13585_v16 = vld [vmem:[#allocation6 + $0x76c] ss:$16 sps:$4 sm:$0xff]  }
 0x49b   :  { %v13031_v17 = vadd.f32 %v6148_v57, %v998_v55  ;;  %9950 = vmatprep.subr.bf16.mxu1 %v13555_v62  ;;  %v13035_v14 = vadd.f32 %v6320_v18, %v1006_v59  ;;  %v6336_v23 = vmax.f32 %v13029_v15, 0.0  ;;  %v6338_v29 = vmax.f32 %v13033_v8, 0.0  ;;  %v13580_v53 = vld [vmem:[#allocation6 + $0x760] ss:$16 sps:$4 sm:$0xff]   ;;  %v13588_v55 = vld [vmem:[#allocation6 + $0x784] ss:$16 sps:$4 sm:$0xff]  }
 0x49c   :  { %v6351_v25 = vmax.f32 %v13030_v9, 0.0  ;;  %v6353_v26 = vmax.f32 %v13034_v13, 0.0  ;;  %v13591_v10 = vld [vmem:[#allocation6 + $0x78c] ss:$16 sps:$4 sm:$0xff]   ;;  %v13586_v59 = vld [vmem:[#allocation6 + $0x780] ss:$16 sps:$4 sm:$0xff]  }
 0x49d   :  { %v6352_v28 = vmax.f32 %v13031_v17, 0.0  ;;  %9607 = vmatpush1.bf16.msra.mxu0 %v13550_v1  ;;  %v6354_v32 = vmax.f32 %v13035_v14, 0.0  ;;  %v13589_v60 = vld [vmem:[#allocation6 + $0x788] ss:$16 sps:$4 sm:$0xff]   ;;  %v13597_v62 = vld [vmem:[#allocation6 + $0x7ac] ss:$16 sps:$4 sm:$0xff]  }
 0x49e   :  { %v14793_v58 = vpack.c.bf16 %v6351_v25, %v6335_v22  ;;  %9951 = vmatpush1.bf16.msra.mxu1 %v13553_v5  ;;  %9608 = vmatprep.subr.bf16.mxu0 %v13558_v45  ;;  %v14795_v35 = vpack.c.bf16 %v6353_v26, %v6337_v39  ;;  %v13592_v63 = vld [vmem:[#allocation6 + $0x7a0] ss:$16 sps:$4 sm:$0xff]   ;;  %v13603_v0 = vld [vmem:[#allocation6 + $0x7cc] ss:$16 sps:$4 sm:$0xff]   ;;  %v13601_v4 = vld [vmem:[#allocation6 + $0x7c8] ss:$16 sps:$4 sm:$0xff]  }
 0x49f   :  { %v14797_v37 = vpack.c.bf16 %v6352_v28, %v6336_v23  ;;  %9952 = vmatprep.subr.bf16.mxu1 %v13561_v19  ;;  %v14799_v40 = vpack.c.bf16 %v6354_v32, %v6338_v29  ;;  %v13598_v15 = vld [vmem:[#allocation6 + $0x7c0] ss:$16 sps:$4 sm:$0xff]   ;;  %v13606_v30 = vld [vmem:[#allocation6 + $0x7e4] ss:$16 sps:$4 sm:$0xff]   ;;  %v13609_v1 = vld [vmem:[#allocation6 + $0x7ec] ss:$16 sps:$4 sm:$0xff]  }
 0x4a0   :  { %v13604_v8 = vld [vmem:[#allocation6 + $0x7e0] ss:$16 sps:$4 sm:$0xff]   ;;  %v13607_v9 = vld [vmem:[#allocation6 + $0x7e8] ss:$16 sps:$4 sm:$0xff]   ;;  %v13612_v12 = vld [vmem:[#allocation6 + $0x804] ss:$16 sps:$4 sm:$0xff]  }
 0x4a1   :  { %9609 = vmatpush1.bf16.msra.mxu0 %v13556_v27  ;;  %v13615_v57 = vld [vmem:[#allocation6 + $0x80c] ss:$16 sps:$4 sm:$0xff]   ;;  %v13610_v5 = vld [vmem:[#allocation6 + $0x800] ss:$16 sps:$4 sm:$0xff]   ;;  %v13613_v45 = vld [vmem:[#allocation6 + $0x808] ss:$16 sps:$4 sm:$0xff]  }
 0x4a2   :  { %9953 = vmatpush1.bf16.msra.mxu1 %v13559_v33  ;;  %9610 = vmatprep.subr.bf16.mxu0 %v13564_v34  ;;  %v13618_v13 = vld [vmem:[#allocation6 + $0x824] ss:$16 sps:$4 sm:$0xff]   ;;  %v13621_v17 = vld [vmem:[#allocation6 + $0x82c] ss:$16 sps:$4 sm:$0xff]   ;;  %v13616_v18 = vld [vmem:[#allocation6 + $0x820] ss:$16 sps:$4 sm:$0xff]  }
 0x4a3   :  { %9954 = vmatprep.subr.bf16.mxu1 %v13567_v38  ;;  %v13619_v19 = vld [vmem:[#allocation6 + $0x828] ss:$16 sps:$4 sm:$0xff]   ;;  %v13624_v22 = vld [vmem:[#allocation6 + $0x844] ss:$16 sps:$4 sm:$0xff]   ;;  %v13627_v25 = vld [vmem:[#allocation6 + $0x84c] ss:$16 sps:$4 sm:$0xff]  }
 0x4a4   :  { %v13622_v14 = vld [vmem:[#allocation6 + $0x840] ss:$16 sps:$4 sm:$0xff]   ;;  %v13625_v39 = vld [vmem:[#allocation6 + $0x848] ss:$16 sps:$4 sm:$0xff]   ;;  %v13630_v23 = vld [vmem:[#allocation6 + $0x864] ss:$16 sps:$4 sm:$0xff]  }
 0x4a5   :  { %9611 = vmatpush1.bf16.msra.mxu0 %v13562_v43  ;;  %v13628_v26 = vld [vmem:[#allocation6 + $0x860] ss:$16 sps:$4 sm:$0xff]   ;;  %v13631_v28 = vld [vmem:[#allocation6 + $0x868] ss:$16 sps:$4 sm:$0xff]   ;;  %v13636_v27 = vld [vmem:[#allocation6 + $0x884] ss:$16 sps:$4 sm:$0xff]  }
 0x4a6   :  { %9955 = vmatpush1.bf16.msra.mxu1 %v13565_v49  ;;  %9612 = vmatprep.subr.bf16.mxu0 %v13570_v21  ;;  %v13639_v29 = vld [vmem:[#allocation6 + $0x88c] ss:$16 sps:$4 sm:$0xff]   ;;  %v13637_v32 = vld [vmem:[#allocation6 + $0x888] ss:$16 sps:$4 sm:$0xff]   ;;  %v13642_v33 = vld [vmem:[#allocation6 + $0x8a4] ss:$16 sps:$4 sm:$0xff]  }
 0x4a7   :  { %9956 = vmatprep.subr.bf16.mxu1 %v13573_v46  ;;  %v13645_v34 = vld [vmem:[#allocation6 + $0x8ac] ss:$16 sps:$4 sm:$0xff]   ;;  %v13640_v38 = vld [vmem:[#allocation6 + $0x8a0] ss:$16 sps:$4 sm:$0xff]   ;;  %v13643_v43 = vld [vmem:[#allocation6 + $0x8a8] ss:$16 sps:$4 sm:$0xff]  }
 0x4a8   :  { %v13648_v49 = vld [vmem:[#allocation6 + $0x8c4] ss:$16 sps:$4 sm:$0xff]   ;;  %v13651_v21 = vld [vmem:[#allocation6 + $0x8cc] ss:$16 sps:$4 sm:$0xff]   ;;  %v13646_v46 = vld [vmem:[#allocation6 + $0x8c0] ss:$16 sps:$4 sm:$0xff]  }
 0x4a9   :  { %9613 = vmatpush1.bf16.msra.mxu0 %v13568_v47  ;;  %v13649_v47 = vld [vmem:[#allocation6 + $0x8c8] ss:$16 sps:$4 sm:$0xff]  }
 0x4aa   :  { %9957 = vmatpush1.bf16.msra.mxu1 %v13571_v48  ;;  %9614 = vmatprep.subr.bf16.mxu0 %v13576_v50  ;;  %v13654_v48 = vld [vmem:[#allocation6 + $0x8e4] ss:$16 sps:$4 sm:$0xff]   ;;  %v13657_v50 = vld [vmem:[#allocation6 + $0x8ec] ss:$16 sps:$4 sm:$0xff]  }
 0x4ab   :  { %9958 = vmatprep.subr.bf16.mxu1 %v13579_v31  ;;  %v13652_v31 = vld [vmem:[#allocation6 + $0x8e0] ss:$16 sps:$4 sm:$0xff]  }
 0x4ad   :  { %9615 = vmatpush1.bf16.msra.mxu0 %v13574_v56  ;;  %v13655_v56 = vld [vmem:[#allocation6 + $0x8e8] ss:$16 sps:$4 sm:$0xff]  }
 0x4ae   :  { %9959 = vmatpush1.bf16.msra.mxu1 %v13577_v51  ;;  %9616 = vmatprep.subr.bf16.mxu0 %v13582_v52  ;;  %v13660_v51 = vld [vmem:[#allocation6 + $0x904] ss:$16 sps:$4 sm:$0xff]   ;;  %v13663_v52 = vld [vmem:[#allocation6 + $0x90c] ss:$16 sps:$4 sm:$0xff]  }
 0x4af   :  { %9960 = vmatprep.subr.bf16.mxu1 %v13585_v16  ;;  %v13658_v16 = vld [vmem:[#allocation6 + $0x900] ss:$16 sps:$4 sm:$0xff]  }
 0x4b1   :  { %9617 = vmatpush1.bf16.msra.mxu0 %v13580_v53  ;;  %v13661_v53 = vld [vmem:[#allocation6 + $0x908] ss:$16 sps:$4 sm:$0xff]  }
 0x4b2   :  { %9961 = vmatpush1.bf16.msra.mxu1 %v13583_v54  ;;  %9618 = vmatprep.subr.bf16.mxu0 %v13588_v55  ;;  %v13666_v54 = vld [vmem:[#allocation6 + $0x924] ss:$16 sps:$4 sm:$0xff]   ;;  %v13669_v55 = vld [vmem:[#allocation6 + $0x92c] ss:$16 sps:$4 sm:$0xff]  }
 0x4b3   :  { %9962 = vmatprep.subr.bf16.mxu1 %v13591_v10  ;;  %v13664_v10 = vld [vmem:[#allocation6 + $0x920] ss:$16 sps:$4 sm:$0xff]  }
 0x4b5   :  { %9619 = vmatpush1.bf16.msra.mxu0 %v13586_v59  ;;  %v13667_v59 = vld [vmem:[#allocation6 + $0x928] ss:$16 sps:$4 sm:$0xff]  }
 0x4b6   :  { %9963 = vmatpush1.bf16.msra.mxu1 %v13589_v60  ;;  %9620 = vmatprep.subr.bf16.mxu0 %v13594_v61  ;;  %v13672_v60 = vld [vmem:[#allocation6 + $0x944] ss:$16 sps:$4 sm:$0xff]   ;;  %v13675_v61 = vld [vmem:[#allocation6 + $0x94c] ss:$16 sps:$4 sm:$0xff]  }
 0x4b7   :  { %9964 = vmatprep.subr.bf16.mxu1 %v13597_v62  ;;  %v13670_v62 = vld [vmem:[#allocation6 + $0x940] ss:$16 sps:$4 sm:$0xff]  }
 0x4b9   :  { %9621 = vmatpush1.bf16.msra.mxu0 %v13592_v63  ;;  %v13673_v63 = vld [vmem:[#allocation6 + $0x948] ss:$16 sps:$4 sm:$0xff]  }
 0x4ba   :  { %9965 = vmatpush1.bf16.msra.mxu1 %v13595_v20  ;;  %9622 = vmatprep.subr.bf16.mxu0 %v13600_v2  ;;  %v13678_v20 = vld [vmem:[#allocation6 + $0x964] ss:$16 sps:$4 sm:$0xff]   ;;  %v13681_v2 = vld [vmem:[#allocation6 + $0x96c] ss:$16 sps:$4 sm:$0xff]  }
 0x4bb   :  { %9966 = vmatprep.subr.bf16.mxu1 %v13603_v0  ;;  %v13676_v0 = vld [vmem:[#allocation6 + $0x960] ss:$16 sps:$4 sm:$0xff]  }
 0x4bd   :  { %9623 = vmatpush1.bf16.msra.mxu0 %v13598_v15  ;;  %v13679_v15 = vld [vmem:[#allocation6 + $0x968] ss:$16 sps:$4 sm:$0xff]  }
 0x4be   :  { %9967 = vmatpush1.bf16.msra.mxu1 %v13601_v4  ;;  %9624 = vmatprep.subr.bf16.mxu0 %v13606_v30  ;;  %v13684_v4 = vld [vmem:[#allocation6 + $0x984] ss:$16 sps:$4 sm:$0xff]   ;;  %v13687_v30 = vld [vmem:[#allocation6 + $0x98c] ss:$16 sps:$4 sm:$0xff]  }
 0x4bf   :  { %9968 = vmatprep.subr.bf16.mxu1 %v13609_v1  ;;  %v13682_v1 = vld [vmem:[#allocation6 + $0x980] ss:$16 sps:$4 sm:$0xff]  }
 0x4c1   :  { %9625 = vmatpush1.bf16.msra.mxu0 %v13604_v8  ;;  %v13685_v8 = vld [vmem:[#allocation6 + $0x988] ss:$16 sps:$4 sm:$0xff]  }
 0x4c2   :  { %9969 = vmatpush1.bf16.msra.mxu1 %v13607_v9  ;;  %9637 = vmatprep.subr.bf16.mxu0 %v13612_v12  ;;  %v13690_v9 = vld [vmem:[#allocation6 + $0x9a4] ss:$16 sps:$4 sm:$0xff]   ;;  %v13693_v12 = vld [vmem:[#allocation6 + $0x9ac] ss:$16 sps:$4 sm:$0xff]  }
 0x4c3   :  { %9981 = vmatprep.subr.bf16.mxu1 %v13615_v57  ;;  %v13688_v57 = vld [vmem:[#allocation6 + $0x9a0] ss:$16 sps:$4 sm:$0xff]  }
 0x4c4   :  { %9627 = vmatmul.mubr.bf16.vlgmr.msra.gmra.mrb[16].mxu0 %v14727_v24 }
 0x4c5   :  { %9971 = vmatmul.mubr.bf16.vlgmr.msra.gmra.mrb[16].mxu1 %v14727_v24  ;;  %9638 = vmatpush1.bf16.msra.mxu0 %v13610_v5  ;;  %v13633_v24 = vld [vmem:[#allocation6 + $0x86c] ss:$16 sps:$4 sm:$0xff]   ;;  %v13691_v5 = vld [vmem:[#allocation6 + $0x9a8] ss:$16 sps:$4 sm:$0xff]  }
 0x4c6   :  { %9669 = vmatprep.mubr.bf16.mxu0 %v14765_v42  ;;  %9982 = vmatpush1.bf16.msra.mxu1 %v13613_v45  ;;  %v13696_v45 = vld [vmem:[#allocation6 + $0x9c4] ss:$16 sps:$4 sm:$0xff]  }
 0x4c7   :  { %10013 = vmatprep.mubr.bf16.mxu1 %v14765_v42  ;;  %9639 = vmatprep.subr.bf16.mxu0 %v13618_v13  ;;  %v13634_v42 = vld [vmem:[#allocation6 + $0x880] ss:$16 sps:$4 sm:$0xff]   ;;  %v13699_v13 = vld [vmem:[#allocation6 + $0x9cc] ss:$16 sps:$4 sm:$0xff]  }
 0x4c8   :  { %9983 = vmatprep.subr.bf16.mxu1 %v13621_v17  ;;  %v13694_v17 = vld [vmem:[#allocation6 + $0x9c0] ss:$16 sps:$4 sm:$0xff]  }
 0x4c9   :  { %9640 = vmatpush1.bf16.msra.mxu0 %v13616_v18  ;;  %v13697_v18 = vld [vmem:[#allocation6 + $0x9c8] ss:$16 sps:$4 sm:$0xff]  }
 0x4ca   :  { %9984 = vmatpush1.bf16.msra.mxu1 %v13619_v19  ;;  %9641 = vmatprep.subr.bf16.mxu0 %v13624_v22  ;;  %v13702_v19 = vld [vmem:[#allocation6 + $0x9e4] ss:$16 sps:$4 sm:$0xff]   ;;  %v13705_v22 = vld [vmem:[#allocation6 + $0x9ec] ss:$16 sps:$4 sm:$0xff]  }
 0x4cb   :  { %9985 = vmatprep.subr.bf16.mxu1 %v13627_v25  ;;  %v13700_v25 = vld [vmem:[#allocation6 + $0x9e0] ss:$16 sps:$4 sm:$0xff]  }
 0x4cd   :  { %9642 = vmatpush1.bf16.msra.mxu0 %v13622_v14  ;;  %v13703_v14 = vld [vmem:[#allocation6 + $0x9e8] ss:$16 sps:$4 sm:$0xff]  }
 0x4ce   :  { %9986 = vmatpush1.bf16.msra.mxu1 %v13625_v39  ;;  %9643 = vmatprep.subr.bf16.mxu0 %v13630_v23  ;;  %v13708_v39 = vld [vmem:[#allocation6 + $0xa04] ss:$16 sps:$4 sm:$0xff]   ;;  %v13711_v23 = vld [vmem:[#allocation6 + $0xa0c] ss:$16 sps:$4 sm:$0xff]  }
 0x4cf   :  { %9987 = vmatprep.subr.bf16.mxu1 %v13633_v24  ;;  %v13706_v24 = vld [vmem:[#allocation6 + $0xa00] ss:$16 sps:$4 sm:$0xff]  }
 0x4d1   :  { %9644 = vmatpush1.bf16.msra.mxu0 %v13628_v26  ;;  %v13709_v26 = vld [vmem:[#allocation6 + $0xa08] ss:$16 sps:$4 sm:$0xff]  }
 0x4d2   :  { %9988 = vmatpush1.bf16.msra.mxu1 %v13631_v28  ;;  %9645 = vmatprep.subr.bf16.mxu0 %v13636_v27  ;;  %v13714_v28 = vld [vmem:[#allocation6 + $0xa24] ss:$16 sps:$4 sm:$0xff]   ;;  %v13717_v27 = vld [vmem:[#allocation6 + $0xa2c] ss:$16 sps:$4 sm:$0xff]  }
 0x4d3   :  { %9989 = vmatprep.subr.bf16.mxu1 %v13639_v29  ;;  %v13712_v29 = vld [vmem:[#allocation6 + $0xa20] ss:$16 sps:$4 sm:$0xff]  }
 0x4d5   :  { %9646 = vmatpush1.bf16.msra.mxu0 %v13634_v42  ;;  %v13715_v42 = vld [vmem:[#allocation6 + $0xa28] ss:$16 sps:$4 sm:$0xff]  }
 0x4d6   :  { %9990 = vmatpush1.bf16.msra.mxu1 %v13637_v32  ;;  %9647 = vmatprep.subr.bf16.mxu0 %v13642_v33  ;;  %v13720_v32 = vld [vmem:[#allocation6 + $0xa44] ss:$16 sps:$4 sm:$0xff]   ;;  %v13723_v33 = vld [vmem:[#allocation6 + $0xa4c] ss:$16 sps:$4 sm:$0xff]  }
 0x4d7   :  { %9991 = vmatprep.subr.bf16.mxu1 %v13645_v34  ;;  %v13718_v34 = vld [vmem:[#allocation6 + $0xa40] ss:$16 sps:$4 sm:$0xff]  }
 0x4d9   :  { %9648 = vmatpush1.bf16.msra.mxu0 %v13640_v38  ;;  %v13721_v38 = vld [vmem:[#allocation6 + $0xa48] ss:$16 sps:$4 sm:$0xff]  }
 0x4da   :  { %9992 = vmatpush1.bf16.msra.mxu1 %v13643_v43  ;;  %9649 = vmatprep.subr.bf16.mxu0 %v13648_v49  ;;  %v13726_v43 = vld [vmem:[#allocation6 + $0xa64] ss:$16 sps:$4 sm:$0xff]   ;;  %v13724_v49 = vld [vmem:[#allocation6 + $0xa60] ss:$16 sps:$4 sm:$0xff]  }
 0x4db   :  { %9993 = vmatprep.subr.bf16.mxu1 %v13651_v21  ;;  %v13727_v21 = vld [vmem:[#allocation6 + $0xa68] ss:$16 sps:$4 sm:$0xff]  }
 0x4dd   :  { %9650 = vmatpush1.bf16.msra.mxu0 %v13646_v46  ;;  %v13732_v46 = vld [vmem:[#allocation6 + $0xa84] ss:$16 sps:$4 sm:$0xff]  }
 0x4de   :  { %9994 = vmatpush1.bf16.msra.mxu1 %v13649_v47  ;;  %9651 = vmatprep.subr.bf16.mxu0 %v13654_v48  ;;  %v13735_v47 = vld [vmem:[#allocation6 + $0xa8c] ss:$16 sps:$4 sm:$0xff]   ;;  %v13733_v48 = vld [vmem:[#allocation6 + $0xa88] ss:$16 sps:$4 sm:$0xff]  }
 0x4df   :  { %9995 = vmatprep.subr.bf16.mxu1 %v13657_v50  ;;  %v13738_v50 = vld [vmem:[#allocation6 + $0xaa4] ss:$16 sps:$4 sm:$0xff]  }
 0x4e1   :  { %9652 = vmatpush1.bf16.msra.mxu0 %v13652_v31  ;;  %v13741_v31 = vld [vmem:[#allocation6 + $0xaac] ss:$16 sps:$4 sm:$0xff]  }
 0x4e2   :  { %9996 = vmatpush1.bf16.msra.mxu1 %v13655_v56  ;;  %9653 = vmatprep.subr.bf16.mxu0 %v13660_v51  ;;  %v13736_v56 = vld [vmem:[#allocation6 + $0xaa0] ss:$16 sps:$4 sm:$0xff]   ;;  %v13739_v51 = vld [vmem:[#allocation6 + $0xaa8] ss:$16 sps:$4 sm:$0xff]  }
 0x4e3   :  { %9997 = vmatprep.subr.bf16.mxu1 %v13663_v52  ;;  %v13744_v52 = vld [vmem:[#allocation6 + $0xac4] ss:$16 sps:$4 sm:$0xff]  }
 0x4e5   :  { %9654 = vmatpush1.bf16.msra.mxu0 %v13658_v16  ;;  %v13747_v16 = vld [vmem:[#allocation6 + $0xacc] ss:$16 sps:$4 sm:$0xff]  }
 0x4e6   :  { %9998 = vmatpush1.bf16.msra.mxu1 %v13661_v53  ;;  %9655 = vmatprep.subr.bf16.mxu0 %v13666_v54  ;;  %v13742_v53 = vld [vmem:[#allocation6 + $0xac0] ss:$16 sps:$4 sm:$0xff]   ;;  %v13745_v54 = vld [vmem:[#allocation6 + $0xac8] ss:$16 sps:$4 sm:$0xff]  }
 0x4e7   :  { %9999 = vmatprep.subr.bf16.mxu1 %v13669_v55  ;;  %v13750_v55 = vld [vmem:[#allocation6 + $0xae4] ss:$16 sps:$4 sm:$0xff]  }
 0x4e9   :  { %9656 = vmatpush1.bf16.msra.mxu0 %v13664_v10  ;;  %v13753_v10 = vld [vmem:[#allocation6 + $0xaec] ss:$16 sps:$4 sm:$0xff]  }
 0x4ea   :  { %10000 = vmatpush1.bf16.msra.mxu1 %v13667_v59  ;;  %9657 = vmatprep.subr.bf16.mxu0 %v13672_v60  ;;  %v13748_v59 = vld [vmem:[#allocation6 + $0xae0] ss:$16 sps:$4 sm:$0xff]   ;;  %v13751_v60 = vld [vmem:[#allocation6 + $0xae8] ss:$16 sps:$4 sm:$0xff]  }
 0x4eb   :  { %10001 = vmatprep.subr.bf16.mxu1 %v13675_v61  ;;  %v13756_v61 = vld [vmem:[#allocation6 + $0xb04] ss:$16 sps:$4 sm:$0xff]  }
 0x4ed   :  { %9658 = vmatpush1.bf16.msra.mxu0 %v13670_v62  ;;  %v13759_v62 = vld [vmem:[#allocation6 + $0xb0c] ss:$16 sps:$4 sm:$0xff]  }
 0x4ee   :  { %10002 = vmatpush1.bf16.msra.mxu1 %v13673_v63  ;;  %9659 = vmatprep.subr.bf16.mxu0 %v13678_v20  ;;  %v13754_v63 = vld [vmem:[#allocation6 + $0xb00] ss:$16 sps:$4 sm:$0xff]   ;;  %v13757_v20 = vld [vmem:[#allocation6 + $0xb08] ss:$16 sps:$4 sm:$0xff]  }
 0x4ef   :  { %10003 = vmatprep.subr.bf16.mxu1 %v13681_v2  ;;  %v13762_v2 = vld [vmem:[#allocation6 + $0xb24] ss:$16 sps:$4 sm:$0xff]  }
 0x4f1   :  { %9660 = vmatpush1.bf16.msra.mxu0 %v13676_v0  ;;  %v13765_v0 = vld [vmem:[#allocation6 + $0xb2c] ss:$16 sps:$4 sm:$0xff]  }
 0x4f2   :  { %10004 = vmatpush1.bf16.msra.mxu1 %v13679_v15  ;;  %9661 = vmatprep.subr.bf16.mxu0 %v13684_v4  ;;  %v13760_v15 = vld [vmem:[#allocation6 + $0xb20] ss:$16 sps:$4 sm:$0xff]   ;;  %v13763_v4 = vld [vmem:[#allocation6 + $0xb28] ss:$16 sps:$4 sm:$0xff]  }
 0x4f3   :  { %10005 = vmatprep.subr.bf16.mxu1 %v13687_v30  ;;  %v13768_v30 = vld [vmem:[#allocation6 + $0xb44] ss:$16 sps:$4 sm:$0xff]  }
 0x4f5   :  { %9662 = vmatpush1.bf16.msra.mxu0 %v13682_v1  ;;  %v13771_v1 = vld [vmem:[#allocation6 + $0xb4c] ss:$16 sps:$4 sm:$0xff]  }
 0x4f6   :  { %10006 = vmatpush1.bf16.msra.mxu1 %v13685_v8  ;;  %9663 = vmatprep.subr.bf16.mxu0 %v13690_v9  ;;  %v13766_v8 = vld [vmem:[#allocation6 + $0xb40] ss:$16 sps:$4 sm:$0xff]   ;;  %v13769_v9 = vld [vmem:[#allocation6 + $0xb48] ss:$16 sps:$4 sm:$0xff]  }
 0x4f7   :  { %10007 = vmatprep.subr.bf16.mxu1 %v13693_v12  ;;  %v13774_v12 = vld [vmem:[#allocation6 + $0xb64] ss:$16 sps:$4 sm:$0xff]  }
 0x4f9   :  { %9664 = vmatpush1.bf16.msra.mxu0 %v13688_v57  ;;  %v13777_v57 = vld [vmem:[#allocation6 + $0xb6c] ss:$16 sps:$4 sm:$0xff]  }
 0x4fa   :  { %10008 = vmatpush1.bf16.msra.mxu1 %v13691_v5  ;;  %9665 = vmatprep.subr.bf16.mxu0 %v13696_v45  ;;  %v13772_v5 = vld [vmem:[#allocation6 + $0xb60] ss:$16 sps:$4 sm:$0xff]   ;;  %v13775_v45 = vld [vmem:[#allocation6 + $0xb68] ss:$16 sps:$4 sm:$0xff]  }
 0x4fb   :  { %10009 = vmatprep.subr.bf16.mxu1 %v13699_v13  ;;  %v13780_v13 = vld [vmem:[#allocation6 + $0xb84] ss:$16 sps:$4 sm:$0xff]  }
 0x4fd   :  { %9666 = vmatpush1.bf16.msra.mxu0 %v13694_v17  ;;  %v13783_v17 = vld [vmem:[#allocation6 + $0xb8c] ss:$16 sps:$4 sm:$0xff]  }
 0x4fe   :  { %10010 = vmatpush1.bf16.msra.mxu1 %v13697_v18  ;;  %9667 = vmatprep.subr.bf16.mxu0 %v13702_v19  ;;  %v13778_v18 = vld [vmem:[#allocation6 + $0xb80] ss:$16 sps:$4 sm:$0xff]   ;;  %v13781_v19 = vld [vmem:[#allocation6 + $0xb88] ss:$16 sps:$4 sm:$0xff]  }
 0x4ff   :  { %10011 = vmatprep.subr.bf16.mxu1 %v13705_v22  ;;  %v13786_v22 = vld [vmem:[#allocation6 + $0xba4] ss:$16 sps:$4 sm:$0xff]  }
 0x501   :  { %9668 = vmatpush1.bf16.msra.mxu0 %v13700_v25  ;;  %v13789_v25 = vld [vmem:[#allocation6 + $0xbac] ss:$16 sps:$4 sm:$0xff]  }
 0x502   :  { %10012 = vmatpush1.bf16.msra.mxu1 %v13703_v14  ;;  %9680 = vmatprep.subr.bf16.mxu0 %v13708_v39  ;;  %v13784_v14 = vld [vmem:[#allocation6 + $0xba0] ss:$16 sps:$4 sm:$0xff]   ;;  %v13787_v39 = vld [vmem:[#allocation6 + $0xba8] ss:$16 sps:$4 sm:$0xff]  }
 0x503   :  { %10024 = vmatprep.subr.bf16.mxu1 %v13711_v23  ;;  %v13792_v23 = vld [vmem:[#allocation6 + $0xbc4] ss:$16 sps:$4 sm:$0xff]  }
 0x504   :  { %9670 = vmatmul.mubr.bf16.vlgmr.msra.gmra.mrb[16].mxu0 %v14761_v36 }
 0x505   :  { %10014 = vmatmul.mubr.bf16.vlgmr.msra.gmra.mrb[16].mxu1 %v14761_v36  ;;  %9681 = vmatpush1.bf16.msra.mxu0 %v13706_v24  ;;  %v13729_v36 = vld [vmem:[#allocation6 + $0xa6c] ss:$16 sps:$4 sm:$0xff]  }
 0x506   :  { %9712 = vmatprep.mubr.bf16.mxu0 %v14767_v44  ;;  %10025 = vmatpush1.bf16.msra.mxu1 %v13709_v26  ;;  %v13795_v24 = vld [vmem:[#allocation6 + $0xbcc] ss:$16 sps:$4 sm:$0xff]   ;;  %v13790_v26 = vld [vmem:[#allocation6 + $0xbc0] ss:$16 sps:$4 sm:$0xff]  }
 0x507   :  { %10056 = vmatprep.mubr.bf16.mxu1 %v14767_v44  ;;  %9682 = vmatprep.subr.bf16.mxu0 %v13714_v28  ;;  %v13730_v44 = vld [vmem:[#allocation6 + $0xa80] ss:$16 sps:$4 sm:$0xff]   ;;  %v13793_v28 = vld [vmem:[#allocation6 + $0xbc8] ss:$16 sps:$4 sm:$0xff]  }
 0x508   :  { %10026 = vmatprep.subr.bf16.mxu1 %v13717_v27  ;;  %v13798_v27 = vld [vmem:[#allocation6 + $0xbe4] ss:$16 sps:$4 sm:$0xff]  }
 0x509   :  { %9683 = vmatpush1.bf16.msra.mxu0 %v13712_v29  ;;  %v13801_v29 = vld [vmem:[#allocation6 + $0xbec] ss:$16 sps:$4 sm:$0xff]  }
 0x50a   :  { %10027 = vmatpush1.bf16.msra.mxu1 %v13715_v42  ;;  %9684 = vmatprep.subr.bf16.mxu0 %v13720_v32  ;;  %v13796_v42 = vld [vmem:[#allocation6 + $0xbe0] ss:$16 sps:$4 sm:$0xff]   ;;  %v13799_v32 = vld [vmem:[#allocation6 + $0xbe8] ss:$16 sps:$4 sm:$0xff]  }
 0x50b   :  { %10028 = vmatprep.subr.bf16.mxu1 %v13723_v33  ;;  %v13804_v33 = vld [vmem:[#allocation6 + $0xc04] ss:$16 sps:$4 sm:$0xff]  }
 0x50d   :  { %9685 = vmatpush1.bf16.msra.mxu0 %v13718_v34  ;;  %v13807_v34 = vld [vmem:[#allocation6 + $0xc0c] ss:$16 sps:$4 sm:$0xff]  }
 0x50e   :  { %10029 = vmatpush1.bf16.msra.mxu1 %v13721_v38  ;;  %9686 = vmatprep.subr.bf16.mxu0 %v13726_v43  ;;  %v13802_v38 = vld [vmem:[#allocation6 + $0xc00] ss:$16 sps:$4 sm:$0xff]   ;;  %v13805_v43 = vld [vmem:[#allocation6 + $0xc08] ss:$16 sps:$4 sm:$0xff]  }
 0x50f   :  { %10030 = vmatprep.subr.bf16.mxu1 %v13729_v36  ;;  %v13810_v36 = vld [vmem:[#allocation6 + $0xc24] ss:$16 sps:$4 sm:$0xff]  }
 0x511   :  { %9687 = vmatpush1.bf16.msra.mxu0 %v13724_v49  ;;  %v13813_v49 = vld [vmem:[#allocation6 + $0xc2c] ss:$16 sps:$4 sm:$0xff]  }
 0x512   :  { %10031 = vmatpush1.bf16.msra.mxu1 %v13727_v21  ;;  %9688 = vmatprep.subr.bf16.mxu0 %v13732_v46  ;;  %v13808_v21 = vld [vmem:[#allocation6 + $0xc20] ss:$16 sps:$4 sm:$0xff]   ;;  %v13811_v46 = vld [vmem:[#allocation6 + $0xc28] ss:$16 sps:$4 sm:$0xff]  }
 0x513   :  { %10032 = vmatprep.subr.bf16.mxu1 %v13735_v47  ;;  %v13816_v47 = vld [vmem:[#allocation6 + $0xc44] ss:$16 sps:$4 sm:$0xff]  }
 0x515   :  { %9689 = vmatpush1.bf16.msra.mxu0 %v13730_v44  ;;  %v13819_v44 = vld [vmem:[#allocation6 + $0xc4c] ss:$16 sps:$4 sm:$0xff]  }
 0x516   :  { %10033 = vmatpush1.bf16.msra.mxu1 %v13733_v48  ;;  %9690 = vmatprep.subr.bf16.mxu0 %v13738_v50  ;;  %v13814_v48 = vld [vmem:[#allocation6 + $0xc40] ss:$16 sps:$4 sm:$0xff]   ;;  %v13817_v50 = vld [vmem:[#allocation6 + $0xc48] ss:$16 sps:$4 sm:$0xff]  }
 0x517   :  { %10034 = vmatprep.subr.bf16.mxu1 %v13741_v31  ;;  %v13822_v31 = vld [vmem:[#allocation6 + $0xc64] ss:$16 sps:$4 sm:$0xff]  }
 0x519   :  { %9691 = vmatpush1.bf16.msra.mxu0 %v13736_v56  ;;  %v13820_v56 = vld [vmem:[#allocation6 + $0xc60] ss:$16 sps:$4 sm:$0xff]  }
 0x51a   :  { %10035 = vmatpush1.bf16.msra.mxu1 %v13739_v51  ;;  %9692 = vmatprep.subr.bf16.mxu0 %v13744_v52  ;;  %v13823_v51 = vld [vmem:[#allocation6 + $0xc68] ss:$16 sps:$4 sm:$0xff]   ;;  %v13828_v52 = vld [vmem:[#allocation6 + $0xc84] ss:$16 sps:$4 sm:$0xff]  }
 0x51b   :  { %10036 = vmatprep.subr.bf16.mxu1 %v13747_v16  ;;  %v13831_v16 = vld [vmem:[#allocation6 + $0xc8c] ss:$16 sps:$4 sm:$0xff]  }
 0x51d   :  { %9693 = vmatpush1.bf16.msra.mxu0 %v13742_v53  ;;  %v13829_v53 = vld [vmem:[#allocation6 + $0xc88] ss:$16 sps:$4 sm:$0xff]  }
 0x51e   :  { %10037 = vmatpush1.bf16.msra.mxu1 %v13745_v54  ;;  %9694 = vmatprep.subr.bf16.mxu0 %v13750_v55  ;;  %v13834_v54 = vld [vmem:[#allocation6 + $0xca4] ss:$16 sps:$4 sm:$0xff]   ;;  %v13837_v55 = vld [vmem:[#allocation6 + $0xcac] ss:$16 sps:$4 sm:$0xff]  }
 0x51f   :  { %10038 = vmatprep.subr.bf16.mxu1 %v13753_v10  ;;  %v13832_v10 = vld [vmem:[#allocation6 + $0xca0] ss:$16 sps:$4 sm:$0xff]  }
 0x521   :  { %9695 = vmatpush1.bf16.msra.mxu0 %v13748_v59  ;;  %v13835_v59 = vld [vmem:[#allocation6 + $0xca8] ss:$16 sps:$4 sm:$0xff]  }
 0x522   :  { %10039 = vmatpush1.bf16.msra.mxu1 %v13751_v60  ;;  %9696 = vmatprep.subr.bf16.mxu0 %v13756_v61  ;;  %v13840_v60 = vld [vmem:[#allocation6 + $0xcc4] ss:$16 sps:$4 sm:$0xff]   ;;  %v13843_v61 = vld [vmem:[#allocation6 + $0xccc] ss:$16 sps:$4 sm:$0xff]  }
 0x523   :  { %10040 = vmatprep.subr.bf16.mxu1 %v13759_v62  ;;  %v13838_v62 = vld [vmem:[#allocation6 + $0xcc0] ss:$16 sps:$4 sm:$0xff]  }
 0x525   :  { %9697 = vmatpush1.bf16.msra.mxu0 %v13754_v63  ;;  %v13841_v63 = vld [vmem:[#allocation6 + $0xcc8] ss:$16 sps:$4 sm:$0xff]  }
 0x526   :  { %10041 = vmatpush1.bf16.msra.mxu1 %v13757_v20  ;;  %9698 = vmatprep.subr.bf16.mxu0 %v13762_v2  ;;  %v13846_v20 = vld [vmem:[#allocation6 + $0xce4] ss:$16 sps:$4 sm:$0xff]   ;;  %v13849_v2 = vld [vmem:[#allocation6 + $0xcec] ss:$16 sps:$4 sm:$0xff]  }
 0x527   :  { %10042 = vmatprep.subr.bf16.mxu1 %v13765_v0  ;;  %v13844_v0 = vld [vmem:[#allocation6 + $0xce0] ss:$16 sps:$4 sm:$0xff]  }
 0x529   :  { %9699 = vmatpush1.bf16.msra.mxu0 %v13760_v15  ;;  %v13847_v15 = vld [vmem:[#allocation6 + $0xce8] ss:$16 sps:$4 sm:$0xff]  }
 0x52a   :  { %10043 = vmatpush1.bf16.msra.mxu1 %v13763_v4  ;;  %9700 = vmatprep.subr.bf16.mxu0 %v13768_v30  ;;  %v13852_v4 = vld [vmem:[#allocation6 + $0xd04] ss:$16 sps:$4 sm:$0xff]   ;;  %v13855_v30 = vld [vmem:[#allocation6 + $0xd0c] ss:$16 sps:$4 sm:$0xff]  }
 0x52b   :  { %10044 = vmatprep.subr.bf16.mxu1 %v13771_v1  ;;  %v13850_v1 = vld [vmem:[#allocation6 + $0xd00] ss:$16 sps:$4 sm:$0xff]  }
 0x52d   :  { %9701 = vmatpush1.bf16.msra.mxu0 %v13766_v8  ;;  %v13853_v8 = vld [vmem:[#allocation6 + $0xd08] ss:$16 sps:$4 sm:$0xff]  }
 0x52e   :  { %10045 = vmatpush1.bf16.msra.mxu1 %v13769_v9  ;;  %9702 = vmatprep.subr.bf16.mxu0 %v13774_v12  ;;  %v13858_v9 = vld [vmem:[#allocation6 + $0xd24] ss:$16 sps:$4 sm:$0xff]   ;;  %v13861_v12 = vld [vmem:[#allocation6 + $0xd2c] ss:$16 sps:$4 sm:$0xff]  }
 0x52f   :  { %10046 = vmatprep.subr.bf16.mxu1 %v13777_v57  ;;  %v13856_v57 = vld [vmem:[#allocation6 + $0xd20] ss:$16 sps:$4 sm:$0xff]  }
 0x531   :  { %9703 = vmatpush1.bf16.msra.mxu0 %v13772_v5  ;;  %v13859_v5 = vld [vmem:[#allocation6 + $0xd28] ss:$16 sps:$4 sm:$0xff]  }
 0x532   :  { %10047 = vmatpush1.bf16.msra.mxu1 %v13775_v45  ;;  %9704 = vmatprep.subr.bf16.mxu0 %v13780_v13  ;;  %v13864_v45 = vld [vmem:[#allocation6 + $0xd44] ss:$16 sps:$4 sm:$0xff]   ;;  %v13867_v13 = vld [vmem:[#allocation6 + $0xd4c] ss:$16 sps:$4 sm:$0xff]  }
 0x533   :  { %10048 = vmatprep.subr.bf16.mxu1 %v13783_v17  ;;  %v13862_v17 = vld [vmem:[#allocation6 + $0xd40] ss:$16 sps:$4 sm:$0xff]  }
 0x535   :  { %9705 = vmatpush1.bf16.msra.mxu0 %v13778_v18  ;;  %v13865_v18 = vld [vmem:[#allocation6 + $0xd48] ss:$16 sps:$4 sm:$0xff]  }
 0x536   :  { %10049 = vmatpush1.bf16.msra.mxu1 %v13781_v19  ;;  %9706 = vmatprep.subr.bf16.mxu0 %v13786_v22  ;;  %v13870_v19 = vld [vmem:[#allocation6 + $0xd64] ss:$16 sps:$4 sm:$0xff]   ;;  %v13873_v22 = vld [vmem:[#allocation6 + $0xd6c] ss:$16 sps:$4 sm:$0xff]  }
 0x537   :  { %10050 = vmatprep.subr.bf16.mxu1 %v13789_v25  ;;  %v13868_v25 = vld [vmem:[#allocation6 + $0xd60] ss:$16 sps:$4 sm:$0xff]  }
 0x539   :  { %9707 = vmatpush1.bf16.msra.mxu0 %v13784_v14  ;;  %v13871_v14 = vld [vmem:[#allocation6 + $0xd68] ss:$16 sps:$4 sm:$0xff]  }
 0x53a   :  { %10051 = vmatpush1.bf16.msra.mxu1 %v13787_v39  ;;  %9708 = vmatprep.subr.bf16.mxu0 %v13792_v23  ;;  %v13876_v39 = vld [vmem:[#allocation6 + $0xd84] ss:$16 sps:$4 sm:$0xff]   ;;  %v13879_v23 = vld [vmem:[#allocation6 + $0xd8c] ss:$16 sps:$4 sm:$0xff]  }
 0x53b   :  { %10052 = vmatprep.subr.bf16.mxu1 %v13795_v24  ;;  %v13874_v24 = vld [vmem:[#allocation6 + $0xd80] ss:$16 sps:$4 sm:$0xff]  }
 0x53d   :  { %9709 = vmatpush1.bf16.msra.mxu0 %v13790_v26  ;;  %v13877_v26 = vld [vmem:[#allocation6 + $0xd88] ss:$16 sps:$4 sm:$0xff]  }
 0x53e   :  { %10053 = vmatpush1.bf16.msra.mxu1 %v13793_v28  ;;  %9710 = vmatprep.subr.bf16.mxu0 %v13798_v27  ;;  %v13882_v28 = vld [vmem:[#allocation6 + $0xda4] ss:$16 sps:$4 sm:$0xff]   ;;  %v13885_v27 = vld [vmem:[#allocation6 + $0xdac] ss:$16 sps:$4 sm:$0xff]  }
 0x53f   :  { %10054 = vmatprep.subr.bf16.mxu1 %v13801_v29  ;;  %v13880_v29 = vld [vmem:[#allocation6 + $0xda0] ss:$16 sps:$4 sm:$0xff]  }
 0x541   :  { %9711 = vmatpush1.bf16.msra.mxu0 %v13796_v42  ;;  %v13883_v42 = vld [vmem:[#allocation6 + $0xda8] ss:$16 sps:$4 sm:$0xff]  }
 0x542   :  { %10055 = vmatpush1.bf16.msra.mxu1 %v13799_v32  ;;  %9723 = vmatprep.subr.bf16.mxu0 %v13804_v33  ;;  %v13888_v32 = vld [vmem:[#allocation6 + $0xdc4] ss:$16 sps:$4 sm:$0xff]   ;;  %v13891_v33 = vld [vmem:[#allocation6 + $0xdcc] ss:$16 sps:$4 sm:$0xff]  }
 0x543   :  { %10067 = vmatprep.subr.bf16.mxu1 %v13807_v34  ;;  %v13886_v34 = vld [vmem:[#allocation6 + $0xdc0] ss:$16 sps:$4 sm:$0xff]  }
 0x544   :  { %9713 = vmatmul.mubr.bf16.vlgmr.msra.gmra.mrb[16].mxu0 %v14763_v41 }
 0x545   :  { %10057 = vmatmul.mubr.bf16.vlgmr.msra.gmra.mrb[16].mxu1 %v14763_v41  ;;  %9724 = vmatpush1.bf16.msra.mxu0 %v13802_v38  ;;  %v13825_v41 = vld [vmem:[#allocation6 + $0xc6c] ss:$16 sps:$4 sm:$0xff]   ;;  %v13889_v38 = vld [vmem:[#allocation6 + $0xdc8] ss:$16 sps:$4 sm:$0xff]  }
 0x546   :  { %9755 = vmatprep.mubr.bf16.mxu0 %v14797_v37  ;;  %10068 = vmatpush1.bf16.msra.mxu1 %v13805_v43  ;;  %v13894_v43 = vld [vmem:[#allocation6 + $0xde4] ss:$16 sps:$4 sm:$0xff]  }
 0x547   :  { %10099 = vmatprep.mubr.bf16.mxu1 %v14797_v37  ;;  %9725 = vmatprep.subr.bf16.mxu0 %v13810_v36  ;;  %v13826_v37 = vld [vmem:[#allocation6 + $0xc80] ss:$16 sps:$4 sm:$0xff]   ;;  %v13897_v36 = vld [vmem:[#allocation6 + $0xdec] ss:$16 sps:$4 sm:$0xff]  }
 0x548   :  { %10069 = vmatprep.subr.bf16.mxu1 %v13813_v49  ;;  %v13892_v49 = vld [vmem:[#allocation6 + $0xde0] ss:$16 sps:$4 sm:$0xff]  }
 0x549   :  { %9726 = vmatpush1.bf16.msra.mxu0 %v13808_v21  ;;  %v13895_v21 = vld [vmem:[#allocation6 + $0xde8] ss:$16 sps:$4 sm:$0xff]  }
 0x54a   :  { %10070 = vmatpush1.bf16.msra.mxu1 %v13811_v46  ;;  %9727 = vmatprep.subr.bf16.mxu0 %v13816_v47  ;;  %v13900_v46 = vld [vmem:[#allocation6 + $0xe04] ss:$16 sps:$4 sm:$0xff]   ;;  %v13903_v47 = vld [vmem:[#allocation6 + $0xe0c] ss:$16 sps:$4 sm:$0xff]  }
 0x54b   :  { %10071 = vmatprep.subr.bf16.mxu1 %v13819_v44  ;;  %v13898_v44 = vld [vmem:[#allocation6 + $0xe00] ss:$16 sps:$4 sm:$0xff]  }
 0x54d   :  { %9728 = vmatpush1.bf16.msra.mxu0 %v13814_v48  ;;  %v13901_v48 = vld [vmem:[#allocation6 + $0xe08] ss:$16 sps:$4 sm:$0xff]  }
 0x54e   :  { %10072 = vmatpush1.bf16.msra.mxu1 %v13817_v50  ;;  %9729 = vmatprep.subr.bf16.mxu0 %v13822_v31  ;;  %v13906_v50 = vld [vmem:[#allocation6 + $0xe24] ss:$16 sps:$4 sm:$0xff]   ;;  %v13909_v31 = vld [vmem:[#allocation6 + $0xe2c] ss:$16 sps:$4 sm:$0xff]  }
 0x54f   :  { %10073 = vmatprep.subr.bf16.mxu1 %v13825_v41  ;;  %v13904_v41 = vld [vmem:[#allocation6 + $0xe20] ss:$16 sps:$4 sm:$0xff]  }
 0x551   :  { %9730 = vmatpush1.bf16.msra.mxu0 %v13820_v56  ;;  %v13907_v56 = vld [vmem:[#allocation6 + $0xe28] ss:$16 sps:$4 sm:$0xff]  }
 0x552   :  { %10074 = vmatpush1.bf16.msra.mxu1 %v13823_v51  ;;  %9731 = vmatprep.subr.bf16.mxu0 %v13828_v52  ;;  %v13912_v51 = vld [vmem:[#allocation6 + $0xe44] ss:$16 sps:$4 sm:$0xff]   ;;  %v13915_v52 = vld [vmem:[#allocation6 + $0xe4c] ss:$16 sps:$4 sm:$0xff]  }
 0x553   :  { %10075 = vmatprep.subr.bf16.mxu1 %v13831_v16  ;;  %v13910_v16 = vld [vmem:[#allocation6 + $0xe40] ss:$16 sps:$4 sm:$0xff]  }
 0x555   :  { %9732 = vmatpush1.bf16.msra.mxu0 %v13826_v37  ;;  %v13913_v37 = vld [vmem:[#allocation6 + $0xe48] ss:$16 sps:$4 sm:$0xff]  }
 0x556   :  { %10076 = vmatpush1.bf16.msra.mxu1 %v13829_v53  ;;  %9733 = vmatprep.subr.bf16.mxu0 %v13834_v54  ;;  %v13918_v53 = vld [vmem:[#allocation6 + $0xe64] ss:$16 sps:$4 sm:$0xff]   ;;  %v13916_v54 = vld [vmem:[#allocation6 + $0xe60] ss:$16 sps:$4 sm:$0xff]  }
 0x557   :  { %10077 = vmatprep.subr.bf16.mxu1 %v13837_v55  ;;  %v13919_v55 = vld [vmem:[#allocation6 + $0xe68] ss:$16 sps:$4 sm:$0xff]  }
 0x559   :  { %9734 = vmatpush1.bf16.msra.mxu0 %v13832_v10  ;;  %v13924_v10 = vld [vmem:[#allocation6 + $0xe84] ss:$16 sps:$4 sm:$0xff]  }
 0x55a   :  { %10078 = vmatpush1.bf16.msra.mxu1 %v13835_v59  ;;  %9735 = vmatprep.subr.bf16.mxu0 %v13840_v60  ;;  %v13927_v59 = vld [vmem:[#allocation6 + $0xe8c] ss:$16 sps:$4 sm:$0xff]   ;;  %v13925_v60 = vld [vmem:[#allocation6 + $0xe88] ss:$16 sps:$4 sm:$0xff]  }
 0x55b   :  { %10079 = vmatprep.subr.bf16.mxu1 %v13843_v61  ;;  %v13930_v61 = vld [vmem:[#allocation6 + $0xea4] ss:$16 sps:$4 sm:$0xff]  }
 0x55d   :  { %9736 = vmatpush1.bf16.msra.mxu0 %v13838_v62  ;;  %v13933_v62 = vld [vmem:[#allocation6 + $0xeac] ss:$16 sps:$4 sm:$0xff]  }
 0x55e   :  { %10080 = vmatpush1.bf16.msra.mxu1 %v13841_v63  ;;  %9737 = vmatprep.subr.bf16.mxu0 %v13846_v20  ;;  %v13928_v63 = vld [vmem:[#allocation6 + $0xea0] ss:$16 sps:$4 sm:$0xff]   ;;  %v13931_v20 = vld [vmem:[#allocation6 + $0xea8] ss:$16 sps:$4 sm:$0xff]  }
 0x55f   :  { %10081 = vmatprep.subr.bf16.mxu1 %v13849_v2  ;;  %v13936_v2 = vld [vmem:[#allocation6 + $0xec4] ss:$16 sps:$4 sm:$0xff]  }
 0x561   :  { %9738 = vmatpush1.bf16.msra.mxu0 %v13844_v0  ;;  %v13939_v0 = vld [vmem:[#allocation6 + $0xecc] ss:$16 sps:$4 sm:$0xff]  }
 0x562   :  { %10082 = vmatpush1.bf16.msra.mxu1 %v13847_v15  ;;  %9739 = vmatprep.subr.bf16.mxu0 %v13852_v4  ;;  %v13934_v15 = vld [vmem:[#allocation6 + $0xec0] ss:$16 sps:$4 sm:$0xff]   ;;  %v13937_v4 = vld [vmem:[#allocation6 + $0xec8] ss:$16 sps:$4 sm:$0xff]  }
 0x563   :  { %10083 = vmatprep.subr.bf16.mxu1 %v13855_v30  ;;  %v13942_v30 = vld [vmem:[#allocation6 + $0xee4] ss:$16 sps:$4 sm:$0xff]  }
 0x565   :  { %9740 = vmatpush1.bf16.msra.mxu0 %v13850_v1  ;;  %v13945_v1 = vld [vmem:[#allocation6 + $0xeec] ss:$16 sps:$4 sm:$0xff]  }
 0x566   :  { %10084 = vmatpush1.bf16.msra.mxu1 %v13853_v8  ;;  %9741 = vmatprep.subr.bf16.mxu0 %v13858_v9  ;;  %v13940_v8 = vld [vmem:[#allocation6 + $0xee0] ss:$16 sps:$4 sm:$0xff]   ;;  %v13943_v9 = vld [vmem:[#allocation6 + $0xee8] ss:$16 sps:$4 sm:$0xff]  }
 0x567   :  { %10085 = vmatprep.subr.bf16.mxu1 %v13861_v12  ;;  %v13948_v12 = vld [vmem:[#allocation6 + $0xf04] ss:$16 sps:$4 sm:$0xff]  }
 0x569   :  { %9742 = vmatpush1.bf16.msra.mxu0 %v13856_v57  ;;  %v13951_v57 = vld [vmem:[#allocation6 + $0xf0c] ss:$16 sps:$4 sm:$0xff]  }
 0x56a   :  { %10086 = vmatpush1.bf16.msra.mxu1 %v13859_v5  ;;  %9743 = vmatprep.subr.bf16.mxu0 %v13864_v45  ;;  %v13946_v5 = vld [vmem:[#allocation6 + $0xf00] ss:$16 sps:$4 sm:$0xff]   ;;  %v13949_v45 = vld [vmem:[#allocation6 + $0xf08] ss:$16 sps:$4 sm:$0xff]  }
 0x56b   :  { %10087 = vmatprep.subr.bf16.mxu1 %v13867_v13  ;;  %v13954_v13 = vld [vmem:[#allocation6 + $0xf24] ss:$16 sps:$4 sm:$0xff]  }
 0x56d   :  { %9744 = vmatpush1.bf16.msra.mxu0 %v13862_v17  ;;  %v13957_v17 = vld [vmem:[#allocation6 + $0xf2c] ss:$16 sps:$4 sm:$0xff]  }
 0x56e   :  { %10088 = vmatpush1.bf16.msra.mxu1 %v13865_v18  ;;  %9745 = vmatprep.subr.bf16.mxu0 %v13870_v19  ;;  %v13952_v18 = vld [vmem:[#allocation6 + $0xf20] ss:$16 sps:$4 sm:$0xff]   ;;  %v13955_v19 = vld [vmem:[#allocation6 + $0xf28] ss:$16 sps:$4 sm:$0xff]  }
 0x56f   :  { %10089 = vmatprep.subr.bf16.mxu1 %v13873_v22  ;;  %v13960_v22 = vld [vmem:[#allocation6 + $0xf44] ss:$16 sps:$4 sm:$0xff]  }
 0x571   :  { %9746 = vmatpush1.bf16.msra.mxu0 %v13868_v25  ;;  %v13963_v25 = vld [vmem:[#allocation6 + $0xf4c] ss:$16 sps:$4 sm:$0xff]  }
 0x572   :  { %10090 = vmatpush1.bf16.msra.mxu1 %v13871_v14  ;;  %9747 = vmatprep.subr.bf16.mxu0 %v13876_v39  ;;  %v13958_v14 = vld [vmem:[#allocation6 + $0xf40] ss:$16 sps:$4 sm:$0xff]   ;;  %v13961_v39 = vld [vmem:[#allocation6 + $0xf48] ss:$16 sps:$4 sm:$0xff]  }
 0x573   :  { %10091 = vmatprep.subr.bf16.mxu1 %v13879_v23  ;;  %v13966_v23 = vld [vmem:[#allocation6 + $0xf64] ss:$16 sps:$4 sm:$0xff]  }
 0x575   :  { %9748 = vmatpush1.bf16.msra.mxu0 %v13874_v24  ;;  %v13969_v24 = vld [vmem:[#allocation6 + $0xf6c] ss:$16 sps:$4 sm:$0xff]  }
 0x576   :  { %10092 = vmatpush1.bf16.msra.mxu1 %v13877_v26  ;;  %9749 = vmatprep.subr.bf16.mxu0 %v13882_v28  ;;  %v13964_v26 = vld [vmem:[#allocation6 + $0xf60] ss:$16 sps:$4 sm:$0xff]   ;;  %v13967_v28 = vld [vmem:[#allocation6 + $0xf68] ss:$16 sps:$4 sm:$0xff]  }
 0x577   :  { %10093 = vmatprep.subr.bf16.mxu1 %v13885_v27  ;;  %v13972_v27 = vld [vmem:[#allocation6 + $0xf84] ss:$16 sps:$4 sm:$0xff]  }
 0x579   :  { %9750 = vmatpush1.bf16.msra.mxu0 %v13880_v29  ;;  %v13975_v29 = vld [vmem:[#allocation6 + $0xf8c] ss:$16 sps:$4 sm:$0xff]  }
 0x57a   :  { %10094 = vmatpush1.bf16.msra.mxu1 %v13883_v42  ;;  %9751 = vmatprep.subr.bf16.mxu0 %v13888_v32  ;;  %v13970_v42 = vld [vmem:[#allocation6 + $0xf80] ss:$16 sps:$4 sm:$0xff]   ;;  %v13973_v32 = vld [vmem:[#allocation6 + $0xf88] ss:$16 sps:$4 sm:$0xff]  }
 0x57b   :  { %10095 = vmatprep.subr.bf16.mxu1 %v13891_v33  ;;  %v13978_v33 = vld [vmem:[#allocation6 + $0xfa4] ss:$16 sps:$4 sm:$0xff]  }
 0x57d   :  { %9752 = vmatpush1.bf16.msra.mxu0 %v13886_v34  ;;  %v13981_v34 = vld [vmem:[#allocation6 + $0xfac] ss:$16 sps:$4 sm:$0xff]  }
 0x57e   :  { %10096 = vmatpush1.bf16.msra.mxu1 %v13889_v38  ;;  %9753 = vmatprep.subr.bf16.mxu0 %v13894_v43  ;;  %v13976_v38 = vld [vmem:[#allocation6 + $0xfa0] ss:$16 sps:$4 sm:$0xff]   ;;  %v13979_v43 = vld [vmem:[#allocation6 + $0xfa8] ss:$16 sps:$4 sm:$0xff]  }
 0x57f   :  { %10097 = vmatprep.subr.bf16.mxu1 %v13897_v36  ;;  %v13984_v36 = vld [vmem:[#allocation6 + $0xfc4] ss:$16 sps:$4 sm:$0xff]  }
 0x581   :  { %9754 = vmatpush1.bf16.msra.mxu0 %v13892_v49  ;;  %v13987_v49 = vld [vmem:[#allocation6 + $0xfcc] ss:$16 sps:$4 sm:$0xff]  }
 0x582   :  { %10098 = vmatpush1.bf16.msra.mxu1 %v13895_v21  ;;  %9766 = vmatprep.subr.bf16.mxu0 %v13900_v46  ;;  %v13982_v21 = vld [vmem:[#allocation6 + $0xfc0] ss:$16 sps:$4 sm:$0xff]   ;;  %v13985_v46 = vld [vmem:[#allocation6 + $0xfc8] ss:$16 sps:$4 sm:$0xff]  }
 0x583   :  { %10110 = vmatprep.subr.bf16.mxu1 %v13903_v47  ;;  %v13990_v47 = vld [vmem:[#allocation6 + $0xfe4] ss:$16 sps:$4 sm:$0xff]  }
 0x584   :  { %9756 = vmatmul.mubr.bf16.vlgmr.msra.gmra.mrb[16].mxu0 %v14793_v58 }
 0x585   :  { %10100 = vmatmul.mubr.bf16.vlgmr.msra.gmra.mrb[16].mxu1 %v14793_v58  ;;  %9767 = vmatpush1.bf16.msra.mxu0 %v13898_v44  ;;  %v13921_v58 = vld [vmem:[#allocation6 + $0xe6c] ss:$16 sps:$4 sm:$0xff]  }
 0x586   :  { %9798 = vmatprep.mubr.bf16.mxu0 %v14799_v40  ;;  %10111 = vmatpush1.bf16.msra.mxu1 %v13901_v48  ;;  %v13993_v44 = vld [vmem:[#allocation6 + $0xfec] ss:$16 sps:$4 sm:$0xff]   ;;  %v13988_v48 = vld [vmem:[#allocation6 + $0xfe0] ss:$16 sps:$4 sm:$0xff]  }
 0x587   :  { %10142 = vmatprep.mubr.bf16.mxu1 %v14799_v40  ;;  %9768 = vmatprep.subr.bf16.mxu0 %v13906_v50  ;;  %v13922_v40 = vld [vmem:[#allocation6 + $0xe80] ss:$16 sps:$4 sm:$0xff]   ;;  %v13991_v50 = vld [vmem:[#allocation6 + $0xfe8] ss:$16 sps:$4 sm:$0xff]  }
 0x588   :  { %10112 = vmatprep.subr.bf16.mxu1 %v13909_v31  ;;  %v13996_v31 = vld [vmem:[#allocation9 + $0x4] ss:$16 sps:$4 sm:$0xff]  }
 0x589   :  { %9769 = vmatpush1.bf16.msra.mxu0 %v13904_v41  ;;  %v13999_v41 = vld [vmem:[#allocation9 + $0xc] ss:$16 sps:$4 sm:$0xff]  }
 0x58a   :  { %10113 = vmatpush1.bf16.msra.mxu1 %v13907_v56  ;;  %9770 = vmatprep.subr.bf16.mxu0 %v13912_v51  ;;  %v13994_v56 = vld [vmem:[#allocation9] ss:$16 sps:$4 sm:$0xff]   ;;  %v13997_v51 = vld [vmem:[#allocation9 + $0x8] ss:$16 sps:$4 sm:$0xff]  }
 0x58b   :  { %10114 = vmatprep.subr.bf16.mxu1 %v13915_v52  ;;  %v14002_v52 = vld [vmem:[#allocation9 + $0x24] ss:$16 sps:$4 sm:$0xff]  }
 0x58d   :  { %9771 = vmatpush1.bf16.msra.mxu0 %v13910_v16  ;;  %v14005_v16 = vld [vmem:[#allocation9 + $0x2c] ss:$16 sps:$4 sm:$0xff]  }
 0x58e   :  { %10115 = vmatpush1.bf16.msra.mxu1 %v13913_v37  ;;  %9772 = vmatprep.subr.bf16.mxu0 %v13918_v53  ;;  %v14000_v37 = vld [vmem:[#allocation9 + $0x20] ss:$16 sps:$4 sm:$0xff]   ;;  %v14003_v53 = vld [vmem:[#allocation9 + $0x28] ss:$16 sps:$4 sm:$0xff]  }
 0x58f   :  { %10116 = vmatprep.subr.bf16.mxu1 %v13921_v58  ;;  %v14008_v58 = vld [vmem:[#allocation9 + $0x44] ss:$16 sps:$4 sm:$0xff]  }
 0x591   :  { %9773 = vmatpush1.bf16.msra.mxu0 %v13916_v54  ;;  %v14011_v54 = vld [vmem:[#allocation9 + $0x4c] ss:$16 sps:$4 sm:$0xff]  }
 0x592   :  { %10117 = vmatpush1.bf16.msra.mxu1 %v13919_v55  ;;  %9774 = vmatprep.subr.bf16.mxu0 %v13924_v10  ;;  %v14006_v55 = vld [vmem:[#allocation9 + $0x40] ss:$16 sps:$4 sm:$0xff]   ;;  %v14009_v10 = vld [vmem:[#allocation9 + $0x48] ss:$16 sps:$4 sm:$0xff]  }
 0x593   :  { %10118 = vmatprep.subr.bf16.mxu1 %v13927_v59  ;;  %v14014_v59 = vld [vmem:[#allocation9 + $0x64] ss:$16 sps:$4 sm:$0xff]  }
 0x595   :  { %9775 = vmatpush1.bf16.msra.mxu0 %v13922_v40  ;;  %v14017_v40 = vld [vmem:[#allocation9 + $0x6c] ss:$16 sps:$4 sm:$0xff]  }
 0x596   :  { %10119 = vmatpush1.bf16.msra.mxu1 %v13925_v60  ;;  %9776 = vmatprep.subr.bf16.mxu0 %v13930_v61  ;;  %v14012_v60 = vld [vmem:[#allocation9 + $0x60] ss:$16 sps:$4 sm:$0xff]   ;;  %v14020_v61 = vld [vmem:[#allocation9 + $0x84] ss:$16 sps:$4 sm:$0xff]  }
 0x597   :  { %10120 = vmatprep.subr.bf16.mxu1 %v13933_v62  ;;  %v14023_v62 = vld [vmem:[#allocation9 + $0x8c] ss:$16 sps:$4 sm:$0xff]  }
 0x599   :  { %9777 = vmatpush1.bf16.msra.mxu0 %v13928_v63  ;;  %v14018_v63 = vld [vmem:[#allocation9 + $0x80] ss:$16 sps:$4 sm:$0xff]  }
 0x59a   :  { %10121 = vmatpush1.bf16.msra.mxu1 %v13931_v20  ;;  %9778 = vmatprep.subr.bf16.mxu0 %v13936_v2  ;;  %v14021_v20 = vld [vmem:[#allocation9 + $0x88] ss:$16 sps:$4 sm:$0xff]   ;;  %v14026_v2 = vld [vmem:[#allocation9 + $0xa4] ss:$16 sps:$4 sm:$0xff]  }
 0x59b   :  { %10122 = vmatprep.subr.bf16.mxu1 %v13939_v0  ;;  %v14029_v0 = vld [vmem:[#allocation9 + $0xac] ss:$16 sps:$4 sm:$0xff]  }
 0x59d   :  { %9779 = vmatpush1.bf16.msra.mxu0 %v13934_v15  ;;  %v14024_v15 = vld [vmem:[#allocation9 + $0xa0] ss:$16 sps:$4 sm:$0xff]  }
 0x59e   :  { %10123 = vmatpush1.bf16.msra.mxu1 %v13937_v4  ;;  %9780 = vmatprep.subr.bf16.mxu0 %v13942_v30  ;;  %v14027_v4 = vld [vmem:[#allocation9 + $0xa8] ss:$16 sps:$4 sm:$0xff]   ;;  %v14032_v30 = vld [vmem:[#allocation9 + $0xc4] ss:$16 sps:$4 sm:$0xff]  }
 0x59f   :  { %10124 = vmatprep.subr.bf16.mxu1 %v13945_v1  ;;  %v14035_v1 = vld [vmem:[#allocation9 + $0xcc] ss:$16 sps:$4 sm:$0xff]  }
 0x5a1   :  { %9781 = vmatpush1.bf16.msra.mxu0 %v13940_v8  ;;  %v14030_v8 = vld [vmem:[#allocation9 + $0xc0] ss:$16 sps:$4 sm:$0xff]  }
 0x5a2   :  { %10125 = vmatpush1.bf16.msra.mxu1 %v13943_v9  ;;  %9782 = vmatprep.subr.bf16.mxu0 %v13948_v12  ;;  %v14033_v9 = vld [vmem:[#allocation9 + $0xc8] ss:$16 sps:$4 sm:$0xff]   ;;  %v14038_v12 = vld [vmem:[#allocation9 + $0xe4] ss:$16 sps:$4 sm:$0xff]  }
 0x5a3   :  { %10126 = vmatprep.subr.bf16.mxu1 %v13951_v57  ;;  %v14041_v57 = vld [vmem:[#allocation9 + $0xec] ss:$16 sps:$4 sm:$0xff]  }
 0x5a5   :  { %9783 = vmatpush1.bf16.msra.mxu0 %v13946_v5  ;;  %v14036_v5 = vld [vmem:[#allocation9 + $0xe0] ss:$16 sps:$4 sm:$0xff]  }
 0x5a6   :  { %10127 = vmatpush1.bf16.msra.mxu1 %v13949_v45  ;;  %9784 = vmatprep.subr.bf16.mxu0 %v13954_v13  ;;  %v14039_v45 = vld [vmem:[#allocation9 + $0xe8] ss:$16 sps:$4 sm:$0xff]   ;;  %v14044_v13 = vld [vmem:[#allocation9 + $0x104] ss:$16 sps:$4 sm:$0xff]  }
 0x5a7   :  { %10128 = vmatprep.subr.bf16.mxu1 %v13957_v17  ;;  %v14047_v17 = vld [vmem:[#allocation9 + $0x10c] ss:$16 sps:$4 sm:$0xff]  }
 0x5a9   :  { %9785 = vmatpush1.bf16.msra.mxu0 %v13952_v18  ;;  %v14042_v18 = vld [vmem:[#allocation9 + $0x100] ss:$16 sps:$4 sm:$0xff]  }
 0x5aa   :  { %10129 = vmatpush1.bf16.msra.mxu1 %v13955_v19  ;;  %9786 = vmatprep.subr.bf16.mxu0 %v13960_v22  ;;  %v14045_v19 = vld [vmem:[#allocation9 + $0x108] ss:$16 sps:$4 sm:$0xff]   ;;  %v14050_v22 = vld [vmem:[#allocation9 + $0x124] ss:$16 sps:$4 sm:$0xff]  }
 0x5ab   :  { %10130 = vmatprep.subr.bf16.mxu1 %v13963_v25  ;;  %v14053_v25 = vld [vmem:[#allocation9 + $0x12c] ss:$16 sps:$4 sm:$0xff]  }
 0x5ad   :  { %9787 = vmatpush1.bf16.msra.mxu0 %v13958_v14  ;;  %v14048_v14 = vld [vmem:[#allocation9 + $0x120] ss:$16 sps:$4 sm:$0xff]  }
 0x5ae   :  { %10131 = vmatpush1.bf16.msra.mxu1 %v13961_v39  ;;  %9788 = vmatprep.subr.bf16.mxu0 %v13966_v23  ;;  %v14051_v39 = vld [vmem:[#allocation9 + $0x128] ss:$16 sps:$4 sm:$0xff]   ;;  %v14056_v23 = vld [vmem:[#allocation9 + $0x144] ss:$16 sps:$4 sm:$0xff]  }
 0x5af   :  { %10132 = vmatprep.subr.bf16.mxu1 %v13969_v24  ;;  %v14059_v24 = vld [vmem:[#allocation9 + $0x14c] ss:$16 sps:$4 sm:$0xff]  }
 0x5b1   :  { %9789 = vmatpush1.bf16.msra.mxu0 %v13964_v26  ;;  %v14054_v26 = vld [vmem:[#allocation9 + $0x140] ss:$16 sps:$4 sm:$0xff]  }
 0x5b2   :  { %10133 = vmatpush1.bf16.msra.mxu1 %v13967_v28  ;;  %9790 = vmatprep.subr.bf16.mxu0 %v13972_v27  ;;  %v14057_v28 = vld [vmem:[#allocation9 + $0x148] ss:$16 sps:$4 sm:$0xff]   ;;  %v14062_v27 = vld [vmem:[#allocation9 + $0x164] ss:$16 sps:$4 sm:$0xff]  }
 0x5b3   :  { %10134 = vmatprep.subr.bf16.mxu1 %v13975_v29  ;;  %v14065_v29 = vld [vmem:[#allocation9 + $0x16c] ss:$16 sps:$4 sm:$0xff]  }
 0x5b5   :  { %9791 = vmatpush1.bf16.msra.mxu0 %v13970_v42  ;;  %v14060_v42 = vld [vmem:[#allocation9 + $0x160] ss:$16 sps:$4 sm:$0xff]  }
 0x5b6   :  { %10135 = vmatpush1.bf16.msra.mxu1 %v13973_v32  ;;  %9792 = vmatprep.subr.bf16.mxu0 %v13978_v33  ;;  %v14063_v32 = vld [vmem:[#allocation9 + $0x168] ss:$16 sps:$4 sm:$0xff]   ;;  %v14068_v33 = vld [vmem:[#allocation9 + $0x184] ss:$16 sps:$4 sm:$0xff]  }
 0x5b7   :  { %10136 = vmatprep.subr.bf16.mxu1 %v13981_v34  ;;  %v14071_v34 = vld [vmem:[#allocation9 + $0x18c] ss:$16 sps:$4 sm:$0xff]  }
 0x5b9   :  { %9793 = vmatpush1.bf16.msra.mxu0 %v13976_v38  ;;  %v14066_v38 = vld [vmem:[#allocation9 + $0x180] ss:$16 sps:$4 sm:$0xff]  }
 0x5ba   :  { %10137 = vmatpush1.bf16.msra.mxu1 %v13979_v43  ;;  %9794 = vmatprep.subr.bf16.mxu0 %v13984_v36  ;;  %v14069_v43 = vld [vmem:[#allocation9 + $0x188] ss:$16 sps:$4 sm:$0xff]   ;;  %v14074_v36 = vld [vmem:[#allocation9 + $0x1a4] ss:$16 sps:$4 sm:$0xff]  }
 0x5bb   :  { %10138 = vmatprep.subr.bf16.mxu1 %v13987_v49  ;;  %v14077_v49 = vld [vmem:[#allocation9 + $0x1ac] ss:$16 sps:$4 sm:$0xff]  }
 0x5bd   :  { %9795 = vmatpush1.bf16.msra.mxu0 %v13982_v21  ;;  %v14072_v21 = vld [vmem:[#allocation9 + $0x1a0] ss:$16 sps:$4 sm:$0xff]  }
 0x5be   :  { %10139 = vmatpush1.bf16.msra.mxu1 %v13985_v46  ;;  %9796 = vmatprep.subr.bf16.mxu0 %v13990_v47  ;;  %v14075_v46 = vld [vmem:[#allocation9 + $0x1a8] ss:$16 sps:$4 sm:$0xff]   ;;  %v14080_v47 = vld [vmem:[#allocation9 + $0x1c4] ss:$16 sps:$4 sm:$0xff]  }
 0x5bf   :  { %10140 = vmatprep.subr.bf16.mxu1 %v13993_v44  ;;  %v14083_v44 = vld [vmem:[#allocation9 + $0x1cc] ss:$16 sps:$4 sm:$0xff]  }
 0x5c1   :  { %9797 = vmatpush1.bf16.msra.mxu0 %v13988_v48  ;;  %v14078_v48 = vld [vmem:[#allocation9 + $0x1c0] ss:$16 sps:$4 sm:$0xff]  }
 0x5c2   :  { %10141 = vmatpush1.bf16.msra.mxu1 %v13991_v50  ;;  %10955 = vmatprep.subr.bf16.mxu0 %v13996_v31  ;;  %v14081_v50 = vld [vmem:[#allocation9 + $0x1c8] ss:$16 sps:$4 sm:$0xff]   ;;  %v14086_v31 = vld [vmem:[#allocation9 + $0x1e4] ss:$16 sps:$4 sm:$0xff]  }
 0x5c3   :  { %11041 = vmatprep.subr.bf16.mxu1 %v13999_v41  ;;  %v14089_v41 = vld [vmem:[#allocation9 + $0x1ec] ss:$16 sps:$4 sm:$0xff]  }
 0x5c4   :  { %9799 = vmatmul.mubr.bf16.vlgmr.msra.gmra.mrb[16].mxu0 %v14795_v35 }
 0x5c5   :  { %10143 = vmatmul.mubr.bf16.vlgmr.msra.gmra.mrb[16].mxu1 %v14795_v35  ;;  %10956 = vmatpush1.bf16.msra.mxu0 %v13994_v56  ;;  %v14015_v35 = vld [vmem:[#allocation9 + $0x68] ss:$16 sps:$4 sm:$0xff]   ;;  %v14084_v56 = vld [vmem:[#allocation9 + $0x1e0] ss:$16 sps:$4 sm:$0xff]  }
 0x5c6   :  { %11042 = vmatpush1.bf16.msra.mxu1 %v13997_v51  ;;  %10957 = vmatprep.subr.bf16.mxu0 %v14002_v52  ;;  %v14087_v51 = vld [vmem:[#allocation9 + $0x1e8] ss:$16 sps:$4 sm:$0xff]   ;;  %v14092_v52 = vld [vmem:[#allocation9 + $0x204] ss:$16 sps:$4 sm:$0xff]  }
 0x5c7   :  { %11043 = vmatprep.subr.bf16.mxu1 %v14005_v16  ;;  %v14095_v16 = vld [vmem:[#allocation9 + $0x20c] ss:$16 sps:$4 sm:$0xff]  }
 0x5c9   :  { %10958 = vmatpush1.bf16.msra.mxu0 %v14000_v37  ;;  %v6883_v37 = vld [vmem:[#allocation7] sm:$0xf] }
 0x5ca   :  { %11044 = vmatpush1.bf16.msra.mxu1 %v14003_v53  ;;  %10959 = vmatprep.subr.bf16.mxu0 %v14008_v58  ;;  %v6888_v53 = vrot.slane %v6883_v37, %v14666_v3  ;;  %v6896_v58 = vrot.slane %v6883_v37, %v14669_v6 }
 0x5cb   :  { %11045 = vmatprep.subr.bf16.mxu1 %v14011_v54  ;;  %v6892_v54 = vrot.slane %v6883_v37, %v14672_v7 }
 0x5cd   :  { %10960 = vmatpush1.bf16.msra.mxu0 %v14006_v55  ;;  %v6900_v55 = vrot.slane %v6883_v37, %v14679_v11  ;;  %v14137_v37 = vld [vmem:[#allocation9 + $0x2ec] ss:$16 sps:$4 sm:$0xff]  }
 0x5ce   :  { %11046 = vmatpush1.bf16.msra.mxu1 %v14009_v10  ;;  %10961 = vmatprep.subr.bf16.mxu0 %v14014_v59 }
 0x5cf   :  { %11047 = vmatprep.subr.bf16.mxu1 %v14017_v40 }
 0x5d1   :  { %10962 = vmatpush1.bf16.msra.mxu0 %v14012_v60 }
 0x5d2   :  { %11048 = vmatpush1.bf16.msra.mxu1 %v14015_v35  ;;  %10963 = vmatprep.subr.bf16.mxu0 %v14020_v61 }
 0x5d3   :  { %11049 = vmatprep.subr.bf16.mxu1 %v14023_v62 }
 0x5d5   :  { %10964 = vmatpush1.bf16.msra.mxu0 %v14018_v63 }
 0x5d6   :  { %11050 = vmatpush1.bf16.msra.mxu1 %v14021_v20  ;;  %10965 = vmatprep.subr.bf16.mxu0 %v14026_v2 }
 0x5d7   :  { %11051 = vmatprep.subr.bf16.mxu1 %v14029_v0 }
 0x5d9   :  { %10966 = vmatpush1.bf16.msra.mxu0 %v14024_v15 }
 0x5da   :  { %11052 = vmatpush1.bf16.msra.mxu1 %v14027_v4  ;;  %10967 = vmatprep.subr.bf16.mxu0 %v14032_v30 }
 0x5db   :  { %11053 = vmatprep.subr.bf16.mxu1 %v14035_v1 }
 0x5dd   :  { %10968 = vmatpush1.bf16.msra.mxu0 %v14030_v8 }
 0x5de   :  { %11054 = vmatpush1.bf16.msra.mxu1 %v14033_v9  ;;  %10969 = vmatprep.subr.bf16.mxu0 %v14038_v12 }
 0x5df   :  { %11055 = vmatprep.subr.bf16.mxu1 %v14041_v57 }
 0x5e1   :  { %10970 = vmatpush1.bf16.msra.mxu0 %v14036_v5 }
 0x5e2   :  { %11056 = vmatpush1.bf16.msra.mxu1 %v14039_v45  ;;  %10971 = vmatprep.subr.bf16.mxu0 %v14044_v13 }
 0x5e3   :  { %11057 = vmatprep.subr.bf16.mxu1 %v14047_v17 }
 0x5e5   :  { %10972 = vmatpush1.bf16.msra.mxu0 %v14042_v18 }
 0x5e6   :  { %11058 = vmatpush1.bf16.msra.mxu1 %v14045_v19  ;;  %10973 = vmatprep.subr.bf16.mxu0 %v14050_v22 }
 0x5e7   :  { %11059 = vmatprep.subr.bf16.mxu1 %v14053_v25 }
 0x5e9   :  { %10974 = vmatpush1.bf16.msra.mxu0 %v14048_v14  ;;  %v14090_v14 = vld [vmem:[#allocation9 + $0x200] ss:$16 sps:$4 sm:$0xff]  }
 0x5ea   :  { %11060 = vmatpush1.bf16.msra.mxu1 %v14051_v39  ;;  %10975 = vmatprep.subr.bf16.mxu0 %v14056_v23  ;;  %v14093_v39 = vld [vmem:[#allocation9 + $0x208] ss:$16 sps:$4 sm:$0xff]  }
 0x5eb   :  { %11061 = vmatprep.subr.bf16.mxu1 %v14059_v24  ;;  %v14098_v24 = vld [vmem:[#allocation9 + $0x224] ss:$16 sps:$4 sm:$0xff]  }
 0x5ed   :  { %10976 = vmatpush1.bf16.msra.mxu0 %v14054_v26  ;;  %v14101_v26 = vld [vmem:[#allocation9 + $0x22c] ss:$16 sps:$4 sm:$0xff]  }
 0x5ee   :  { %11062 = vmatpush1.bf16.msra.mxu1 %v14057_v28  ;;  %10977 = vmatprep.subr.bf16.mxu0 %v14062_v27  ;;  %v14096_v28 = vld [vmem:[#allocation9 + $0x220] ss:$16 sps:$4 sm:$0xff]   ;;  %v14099_v27 = vld [vmem:[#allocation9 + $0x228] ss:$16 sps:$4 sm:$0xff]  }
 0x5ef   :  { %11063 = vmatprep.subr.bf16.mxu1 %v14065_v29  ;;  %v14104_v29 = vld [vmem:[#allocation9 + $0x244] ss:$16 sps:$4 sm:$0xff]  }
 0x5f1   :  { %10978 = vmatpush1.bf16.msra.mxu0 %v14060_v42  ;;  %v14107_v42 = vld [vmem:[#allocation9 + $0x24c] ss:$16 sps:$4 sm:$0xff]  }
 0x5f2   :  { %11064 = vmatpush1.bf16.msra.mxu1 %v14063_v32  ;;  %10979 = vmatprep.subr.bf16.mxu0 %v14068_v33  ;;  %v14102_v32 = vld [vmem:[#allocation9 + $0x240] ss:$16 sps:$4 sm:$0xff]   ;;  %v14105_v33 = vld [vmem:[#allocation9 + $0x248] ss:$16 sps:$4 sm:$0xff]  }
 0x5f3   :  { %11065 = vmatprep.subr.bf16.mxu1 %v14071_v34  ;;  %v14110_v34 = vld [vmem:[#allocation9 + $0x264] ss:$16 sps:$4 sm:$0xff]  }
 0x5f5   :  { %10980 = vmatpush1.bf16.msra.mxu0 %v14066_v38  ;;  %v14113_v38 = vld [vmem:[#allocation9 + $0x26c] ss:$16 sps:$4 sm:$0xff]  }
 0x5f6   :  { %11066 = vmatpush1.bf16.msra.mxu1 %v14069_v43  ;;  %10981 = vmatprep.subr.bf16.mxu0 %v14074_v36  ;;  %v14108_v43 = vld [vmem:[#allocation9 + $0x260] ss:$16 sps:$4 sm:$0xff]   ;;  %v14111_v36 = vld [vmem:[#allocation9 + $0x268] ss:$16 sps:$4 sm:$0xff]  }
 0x5f7   :  { %11067 = vmatprep.subr.bf16.mxu1 %v14077_v49  ;;  %v14116_v49 = vld [vmem:[#allocation9 + $0x284] ss:$16 sps:$4 sm:$0xff]  }
 0x5f9   :  { %10982 = vmatpush1.bf16.msra.mxu0 %v14072_v21  ;;  %v14119_v21 = vld [vmem:[#allocation9 + $0x28c] ss:$16 sps:$4 sm:$0xff]  }
 0x5fa   :  { %11068 = vmatpush1.bf16.msra.mxu1 %v14075_v46  ;;  %10983 = vmatprep.subr.bf16.mxu0 %v14080_v47  ;;  %v14114_v46 = vld [vmem:[#allocation9 + $0x280] ss:$16 sps:$4 sm:$0xff]   ;;  %v14117_v47 = vld [vmem:[#allocation9 + $0x288] ss:$16 sps:$4 sm:$0xff]  }
 0x5fb   :  { %11069 = vmatprep.subr.bf16.mxu1 %v14083_v44  ;;  %v14122_v44 = vld [vmem:[#allocation9 + $0x2a4] ss:$16 sps:$4 sm:$0xff]  }
 0x5fd   :  { %10984 = vmatpush1.bf16.msra.mxu0 %v14078_v48  ;;  %v14125_v48 = vld [vmem:[#allocation9 + $0x2ac] ss:$16 sps:$4 sm:$0xff]  }
 0x5fe   :  { %11070 = vmatpush1.bf16.msra.mxu1 %v14081_v50  ;;  %10985 = vmatprep.subr.bf16.mxu0 %v14086_v31  ;;  %v14120_v50 = vld [vmem:[#allocation9 + $0x2a0] ss:$16 sps:$4 sm:$0xff]   ;;  %v14123_v31 = vld [vmem:[#allocation9 + $0x2a8] ss:$16 sps:$4 sm:$0xff]  }
 0x5ff   :  { %11071 = vmatprep.subr.bf16.mxu1 %v14089_v41  ;;  %v14128_v41 = vld [vmem:[#allocation9 + $0x2c4] ss:$16 sps:$4 sm:$0xff]  }
 0x601   :  { %10986 = vmatpush1.bf16.msra.mxu0 %v14084_v56  ;;  %v14131_v56 = vld [vmem:[#allocation9 + $0x2cc] ss:$16 sps:$4 sm:$0xff]  }
 0x602   :  { %11072 = vmatpush1.bf16.msra.mxu1 %v14087_v51  ;;  %10998 = vmatprep.subr.bf16.mxu0 %v14092_v52  ;;  %v14126_v51 = vld [vmem:[#allocation9 + $0x2c0] ss:$16 sps:$4 sm:$0xff]   ;;  %v14129_v52 = vld [vmem:[#allocation9 + $0x2c8] ss:$16 sps:$4 sm:$0xff]  }
 0x603   :  { %11084 = vmatprep.subr.bf16.mxu1 %v14095_v16  ;;  %v14134_v16 = vld [vmem:[#allocation9 + $0x2e4] ss:$16 sps:$4 sm:$0xff]  }
 0x697   :  { %v9800_v10 = vpop.f32.mrb[16].mxu0 }
 0x698   :  { %v13036_v59 = vadd.f32 %v9800_v10, %v6888_v53  ;;  %v10144_v40 = vpop.f32.mrb[16].mxu1  ;;  %v9802_v60 = vpop.f32.mrb[17].mxu0  ;;  %v14138_v10 = vld [vmem:[#allocation9 + $0x300] ss:$16 sps:$4 sm:$0xff]  }
 0x699   :  { %v13040_v35 = vadd.f32 %v10144_v40, %v6896_v58  ;;  %v13037_v61 = vadd.f32 %v9802_v60, %v6892_v54  ;;  %v10146_v62 = vpop.f32.mrb[17].mxu1  ;;  %v9804_v63 = vpop.f32.mrb[18].mxu0  ;;  %v14146_v40 = vld [vmem:[#allocation9 + $0x324] ss:$16 sps:$4 sm:$0xff]   ;;  %v14149_v60 = vld [vmem:[#allocation9 + $0x32c] ss:$16 sps:$4 sm:$0xff]  }
 0x69a   :  { %v13041_v20 = vadd.f32 %v10146_v62, %v6900_v55  ;;  %v13038_v2 = vadd.f32 %v9804_v63, %v6888_v53  ;;  %v10148_v0 = vpop.f32.mrb[18].mxu1  ;;  %v9806_v15 = vpop.f32.mrb[19].mxu0  ;;  %v10153_v8 = vmax.f32 %v13036_v59, 0.0  ;;  %v14132_v53 = vld [vmem:[#allocation9 + $0x2e0] ss:$16 sps:$4 sm:$0xff]  }
 0x69b   :  { %v13042_v4 = vadd.f32 %v10148_v0, %v6896_v58  ;;  %v13039_v30 = vadd.f32 %v9806_v15, %v6892_v54  ;;  %v10150_v1 = vpop.f32.mrb[19].mxu1  ;;  %v10155_v57 = vmax.f32 %v13040_v35, 0.0  ;;  %v10154_v5 = vmax.f32 %v13037_v61, 0.0  ;;  %v14135_v58 = vld [vmem:[#allocation9 + $0x2e8] ss:$16 sps:$4 sm:$0xff]  }
 0x69c   :  { %v10157_v9 = vmax.f32 %v13038_v2, 0.0  ;;  %v13043_v12 = vadd.f32 %v10150_v1, %v6900_v55  ;;  %v10156_v17 = vmax.f32 %v13041_v20, 0.0  ;;  %v14140_v54 = vld [vmem:[#allocation9 + $0x304] ss:$16 sps:$4 sm:$0xff]   ;;  %v14143_v55 = vld [vmem:[#allocation9 + $0x30c] ss:$16 sps:$4 sm:$0xff]  }
 0x69d   :  { %v10159_v45 = vmax.f32 %v13042_v4, 0.0  ;;  %v10158_v13 = vmax.f32 %v13039_v30, 0.0  ;;  %v14141_v59 = vld [vmem:[#allocation9 + $0x308] ss:$16 sps:$4 sm:$0xff]   ;;  %v14144_v35 = vld [vmem:[#allocation9 + $0x320] ss:$16 sps:$4 sm:$0xff]  }
 0x69e   :  { %v10161_v18 = vpack.c.bf16 %v10157_v9, %v10153_v8  ;;  %v10160_v19 = vmax.f32 %v13043_v12, 0.0  ;;  %v14147_v61 = vld [vmem:[#allocation9 + $0x328] ss:$16 sps:$4 sm:$0xff]   ;;  %v14152_v62 = vld [vmem:[#allocation9 + $0x344] ss:$16 sps:$4 sm:$0xff]  }
 0x69f   :  { %v14823_v22 = vpack.c.bf16 %v10159_v45, %v10155_v57  ;;  %v10162_v25 = vpack.c.bf16 %v10158_v13, %v10154_v5  ;;  %v14155_v63 = vld [vmem:[#allocation9 + $0x34c] ss:$16 sps:$4 sm:$0xff]   ;;  %v14150_v20 = vld [vmem:[#allocation9 + $0x340] ss:$16 sps:$4 sm:$0xff]   ;;  %v14153_v2 = vld [vmem:[#allocation9 + $0x348] ss:$16 sps:$4 sm:$0xff]  }
 0x6a0   :  { %v10164_v23 = vpack.c.bf16 %v10160_v19, %v10156_v17  ;;  %v14158_v0 = vld [vmem:[#allocation9 + $0x364] ss:$16 sps:$4 sm:$0xff]   ;;  %v14161_v15 = vld [vmem:[#allocation9 + $0x36c] ss:$16 sps:$4 sm:$0xff]   ;;  %v14156_v4 = vld [vmem:[#allocation9 + $0x360] ss:$16 sps:$4 sm:$0xff]  }
 0x6a1   :  { %10987 = vmatprep.mubr.bf16.mxu0 %v10162_v25  ;;  %11073 = vmatprep.mubr.bf16.mxu1 %v10162_v25  ;;  %v14159_v30 = vld [vmem:[#allocation9 + $0x368] ss:$16 sps:$4 sm:$0xff]   ;;  %v14164_v1 = vld [vmem:[#allocation9 + $0x384] ss:$16 sps:$4 sm:$0xff]   ;;  %v14167_v8 = vld [vmem:[#allocation9 + $0x38c] ss:$16 sps:$4 sm:$0xff]  }
 0x6a2   :  { %10988 = vmatmul.mubr.bf16.vlgmr.msra.gmra.mrb[20].mxu0 %v10161_v18  ;;  %11074 = vmatmul.mubr.bf16.vlgmr.msra.gmra.mrb[20].mxu1 %v10161_v18  ;;  %v14162_v9 = vld [vmem:[#allocation9 + $0x380] ss:$16 sps:$4 sm:$0xff]   ;;  %v14165_v12 = vld [vmem:[#allocation9 + $0x388] ss:$16 sps:$4 sm:$0xff]   ;;  %v14170_v57 = vld [vmem:[#allocation9 + $0x3a4] ss:$16 sps:$4 sm:$0xff]  }
 0x6a3   :  { %10999 = vmatpush1.bf16.msra.mxu0 %v14090_v14  ;;  %11085 = vmatpush1.bf16.msra.mxu1 %v14093_v39  ;;  %v14173_v5 = vld [vmem:[#allocation9 + $0x3ac] ss:$16 sps:$4 sm:$0xff]   ;;  %v14168_v45 = vld [vmem:[#allocation9 + $0x3a0] ss:$16 sps:$4 sm:$0xff]   ;;  %v14171_v13 = vld [vmem:[#allocation9 + $0x3a8] ss:$16 sps:$4 sm:$0xff]  }
 0x6a4   :  { %11030 = vmatprep.mubr.bf16.mxu0 %v10164_v23  ;;  %11116 = vmatprep.mubr.bf16.mxu1 %v10164_v23  ;;  %v14176_v17 = vld [vmem:[#allocation9 + $0x3c4] ss:$16 sps:$4 sm:$0xff]   ;;  %v14179_v18 = vld [vmem:[#allocation9 + $0x3cc] ss:$16 sps:$4 sm:$0xff]   ;;  %v14174_v19 = vld [vmem:[#allocation9 + $0x3c0] ss:$16 sps:$4 sm:$0xff]  }
 0x6a5   :  { %11000 = vmatprep.subr.bf16.mxu0 %v14098_v24  ;;  %11086 = vmatprep.subr.bf16.mxu1 %v14101_v26  ;;  %v14177_v25 = vld [vmem:[#allocation9 + $0x3c8] ss:$16 sps:$4 sm:$0xff]   ;;  %v14182_v14 = vld [vmem:[#allocation9 + $0x3e4] ss:$16 sps:$4 sm:$0xff]   ;;  %v14185_v39 = vld [vmem:[#allocation9 + $0x3ec] ss:$16 sps:$4 sm:$0xff]  }
 0x6a6   :  { %v14180_v23 = vld [vmem:[#allocation9 + $0x3e0] ss:$16 sps:$4 sm:$0xff]   ;;  %v14183_v24 = vld [vmem:[#allocation9 + $0x3e8] ss:$16 sps:$4 sm:$0xff]  }
 0x6a7   :  { %11001 = vmatpush1.bf16.msra.mxu0 %v14096_v28  ;;  %11087 = vmatpush1.bf16.msra.mxu1 %v14099_v27  ;;  %v14186_v26 = vld [vmem:[#allocation12 + $0x40] sm:$0xff]  }
 0x6a8   :  { %11002 = vmatprep.subr.bf16.mxu0 %v14104_v29  ;;  %11088 = vmatprep.subr.bf16.mxu1 %v14107_v42  ;;  %v14187_v28 = vld [vmem:[#allocation12 + $0xc0] sm:$0xff]   ;;  %v14190_v42 = vld [vmem:[#allocation12 + $0x48] sm:$0xff]  }
 0x6a9   :  { %v14188_v27 = vld [vmem:[#allocation12] sm:$0xff]  }
 0x6aa   :  { %v14189_v29 = vld [vmem:[#allocation12 + $0x80] sm:$0xff]  }
 0x6ab   :  { %11003 = vmatpush1.bf16.msra.mxu0 %v14102_v32  ;;  %11089 = vmatpush1.bf16.msra.mxu1 %v14105_v33  ;;  %v14191_v32 = vld [vmem:[#allocation12 + $0xc8] sm:$0xff]  }
 0x6ac   :  { %11004 = vmatprep.subr.bf16.mxu0 %v14110_v34  ;;  %11090 = vmatprep.subr.bf16.mxu1 %v14113_v38  ;;  %v14192_v33 = vld [vmem:[#allocation12 + $0x8] sm:$0xff]   ;;  %v14194_v38 = vld [vmem:[#allocation12 + $0x50] sm:$0xff]  }
 0x6ad   :  { %v14193_v34 = vld [vmem:[#allocation12 + $0x88] sm:$0xff]  }
 0x6af   :  { %11005 = vmatpush1.bf16.msra.mxu0 %v14108_v43  ;;  %11091 = vmatpush1.bf16.msra.mxu1 %v14111_v36  ;;  %v14195_v43 = vld [vmem:[#allocation12 + $0xd0] sm:$0xff]  }
 0x6b0   :  { %11006 = vmatprep.subr.bf16.mxu0 %v14116_v49  ;;  %11092 = vmatprep.subr.bf16.mxu1 %v14119_v21  ;;  %v14196_v36 = vld [vmem:[#allocation12 + $0x10] sm:$0xff]   ;;  %v14198_v21 = vld [vmem:[#allocation12 + $0x58] sm:$0xff]  }
 0x6b1   :  { %v14197_v49 = vld [vmem:[#allocation12 + $0x90] sm:$0xff]  }
 0x6b3   :  { %11007 = vmatpush1.bf16.msra.mxu0 %v14114_v46  ;;  %11093 = vmatpush1.bf16.msra.mxu1 %v14117_v47  ;;  %v14199_v46 = vld [vmem:[#allocation12 + $0xd8] sm:$0xff]  }
 0x6b4   :  { %11008 = vmatprep.subr.bf16.mxu0 %v14122_v44  ;;  %11094 = vmatprep.subr.bf16.mxu1 %v14125_v48  ;;  %v14200_v47 = vld [vmem:[#allocation12 + $0x18] sm:$0xff]   ;;  %v14202_v44 = vld [vmem:[#allocation12 + $0x60] sm:$0xff]  }
 0x6b5   :  { %v14203_v48 = vld [vmem:[#allocation12 + $0xe0] sm:$0xff]  }
 0x6b7   :  { %11009 = vmatpush1.bf16.msra.mxu0 %v14120_v50  ;;  %11095 = vmatpush1.bf16.msra.mxu1 %v14123_v31  ;;  %v14204_v50 = vld [vmem:[#allocation12 + $0x20] sm:$0xff]  }
 0x6b8   :  { %11010 = vmatprep.subr.bf16.mxu0 %v14128_v41  ;;  %11096 = vmatprep.subr.bf16.mxu1 %v14131_v56  ;;  %v14205_v31 = vld [vmem:[#allocation12 + $0xa0] sm:$0xff]   ;;  %v14206_v41 = vld [vmem:[#allocation12 + $0x68] sm:$0xff]  }
 0x6b9   :  { %v14207_v56 = vld [vmem:[#allocation12 + $0xe8] sm:$0xff]  }
 0x6bb   :  { %11011 = vmatpush1.bf16.msra.mxu0 %v14126_v51  ;;  %11097 = vmatpush1.bf16.msra.mxu1 %v14129_v52  ;;  %v14208_v51 = vld [vmem:[#allocation12 + $0x28] sm:$0xff]  }
 0x6bc   :  { %11012 = vmatprep.subr.bf16.mxu0 %v14134_v16  ;;  %11098 = vmatprep.subr.bf16.mxu1 %v14137_v37  ;;  %v14209_v52 = vld [vmem:[#allocation12 + $0xa8] sm:$0xff]   ;;  %v14210_v16 = vld [vmem:[#allocation12 + $0x70] sm:$0xff]  }
 0x6bd   :  { %v14211_v37 = vld [vmem:[#allocation12 + $0xf0] sm:$0xff]  }
 0x6bf   :  { %11013 = vmatpush1.bf16.msra.mxu0 %v14132_v53  ;;  %11099 = vmatpush1.bf16.msra.mxu1 %v14135_v58  ;;  %v14212_v53 = vld [vmem:[#allocation12 + $0x30] sm:$0xff]  }
 0x6c0   :  { %11014 = vmatprep.subr.bf16.mxu0 %v14140_v54  ;;  %11100 = vmatprep.subr.bf16.mxu1 %v14143_v55  ;;  %v14213_v58 = vld [vmem:[#allocation12 + $0xb0] sm:$0xff]   ;;  %v14214_v54 = vld [vmem:[#allocation12 + $0x78] sm:$0xff]  }
 0x6c1   :  { %v14215_v55 = vld [vmem:[#allocation12 + $0xf8] sm:$0xff]  }
 0x6c3   :  { %11015 = vmatpush1.bf16.msra.mxu0 %v14138_v10  ;;  %11101 = vmatpush1.bf16.msra.mxu1 %v14141_v59  ;;  %v14216_v10 = vld [vmem:[#allocation12 + $0x38] sm:$0xff]  }
 0x6c4   :  { %11016 = vmatprep.subr.bf16.mxu0 %v14146_v40  ;;  %11102 = vmatprep.subr.bf16.mxu1 %v14149_v60  ;;  %v14217_v59 = vld [vmem:[#allocation12 + $0xb8] sm:$0xff]  }
 0x6c5   :  { %v10293_v40 = vld [vmem:[#allocation10] sm:$0xf] }
 0x6c6   :  { %v10298_v60 = vrot.slane %v10293_v40, %v14666_v3 }
 0x6c7   :  { %11017 = vmatpush1.bf16.msra.mxu0 %v14144_v35  ;;  %11103 = vmatpush1.bf16.msra.mxu1 %v14147_v61  ;;  %v10306_v35 = vrot.slane %v10293_v40, %v14669_v6  ;;  %v10302_v61 = vrot.slane %v10293_v40, %v14672_v7 }
 0x6c8   :  { %11018 = vmatprep.subr.bf16.mxu0 %v14152_v62  ;;  %11104 = vmatprep.subr.bf16.mxu1 %v14155_v63  ;;  %v10310_v62 = vrot.slane %v10293_v40, %v14679_v11 }
 0x6cb   :  { %11019 = vmatpush1.bf16.msra.mxu0 %v14150_v20  ;;  %11105 = vmatpush1.bf16.msra.mxu1 %v14153_v2 }
 0x6cc   :  { %11020 = vmatprep.subr.bf16.mxu0 %v14158_v0  ;;  %11106 = vmatprep.subr.bf16.mxu1 %v14161_v15 }
 0x6cf   :  { %11021 = vmatpush1.bf16.msra.mxu0 %v14156_v4  ;;  %11107 = vmatpush1.bf16.msra.mxu1 %v14159_v30 }
 0x6d0   :  { %11022 = vmatprep.subr.bf16.mxu0 %v14164_v1  ;;  %11108 = vmatprep.subr.bf16.mxu1 %v14167_v8 }
 0x6d3   :  { %11023 = vmatpush1.bf16.msra.mxu0 %v14162_v9  ;;  %11109 = vmatpush1.bf16.msra.mxu1 %v14165_v12 }
 0x6d4   :  { %11024 = vmatprep.subr.bf16.mxu0 %v14170_v57  ;;  %11110 = vmatprep.subr.bf16.mxu1 %v14173_v5 }
 0x6d7   :  { %11025 = vmatpush1.bf16.msra.mxu0 %v14168_v45  ;;  %11111 = vmatpush1.bf16.msra.mxu1 %v14171_v13 }
 0x6d8   :  { %11026 = vmatprep.subr.bf16.mxu0 %v14176_v17  ;;  %11112 = vmatprep.subr.bf16.mxu1 %v14179_v18 }
 0x6db   :  { %11027 = vmatpush1.bf16.msra.mxu0 %v14174_v19  ;;  %11113 = vmatpush1.bf16.msra.mxu1 %v14177_v25 }
 0x6dc   :  { %11028 = vmatprep.subr.bf16.mxu0 %v14182_v14  ;;  %11114 = vmatprep.subr.bf16.mxu1 %v14185_v39 }
 0x6df   :  { %11029 = vmatpush1.bf16.msra.mxu0 %v14180_v23  ;;  %11115 = vmatpush1.bf16.msra.mxu1 %v14183_v24 }
 0x6e0   :  { %12960 = vmatprep.subr.bf16.mxu0 %v14186_v26  ;;  %12982 = vmatprep.subr.bf16.mxu1 %v14187_v28 }
 0x6e2   :  { %11031 = vmatmul.mubr.bf16.vlgmr.msra.gmra.mrb[20].mxu0 %v14823_v22  ;;  %11117 = vmatmul.mubr.bf16.vlgmr.msra.gmra.mrb[20].mxu1 %v14823_v22  ;;  %v14201_v22 = vld [vmem:[#allocation12 + $0x98] sm:$0xff]  }
 0x6e3   :  { %12961 = vmatpush3.bf16.msra.mxu0 %v14188_v27  ;;  %12983 = vmatpush3.bf16.msra.mxu1 %v14189_v29  ;;  %v12927_v29 = vld [vmem:[#allocation13] ss:$0 sm:$0xff] }
 0x6e4   :  { %12962 = vmatprep.subr.bf16.mxu0 %v14190_v42  ;;  %12984 = vmatprep.subr.bf16.mxu1 %v14191_v32 }
 0x6e7   :  { %12963 = vmatpush3.bf16.msra.mxu0 %v14192_v33  ;;  %12985 = vmatpush3.bf16.msra.mxu1 %v14193_v34 }
 0x6e8   :  { %12964 = vmatprep.subr.bf16.mxu0 %v14194_v38  ;;  %12986 = vmatprep.subr.bf16.mxu1 %v14195_v43 }
 0x6eb   :  { %12965 = vmatpush3.bf16.msra.mxu0 %v14196_v36  ;;  %12987 = vmatpush3.bf16.msra.mxu1 %v14197_v49 }
 0x6ec   :  { %12966 = vmatprep.subr.bf16.mxu0 %v14198_v21  ;;  %12988 = vmatprep.subr.bf16.mxu1 %v14199_v46 }
 0x6ef   :  { %12967 = vmatpush3.bf16.msra.mxu0 %v14200_v47  ;;  %12989 = vmatpush3.bf16.msra.mxu1 %v14201_v22 }
 0x6f0   :  { %12968 = vmatprep.subr.bf16.mxu0 %v14202_v44  ;;  %12990 = vmatprep.subr.bf16.mxu1 %v14203_v48 }
 0x6f3   :  { %12969 = vmatpush3.bf16.msra.mxu0 %v14204_v50  ;;  %12991 = vmatpush3.bf16.msra.mxu1 %v14205_v31 }
 0x6f4   :  { %12970 = vmatprep.subr.bf16.mxu0 %v14206_v41  ;;  %12992 = vmatprep.subr.bf16.mxu1 %v14207_v56 }
 0x6f7   :  { %12971 = vmatpush3.bf16.msra.mxu0 %v14208_v51  ;;  %12993 = vmatpush3.bf16.msra.mxu1 %v14209_v52 }
 0x6f8   :  { %12972 = vmatprep.subr.bf16.mxu0 %v14210_v16  ;;  %12994 = vmatprep.subr.bf16.mxu1 %v14211_v37 }
 0x6fb   :  { %12973 = vmatpush3.bf16.msra.mxu0 %v14212_v53  ;;  %12995 = vmatpush3.bf16.msra.mxu1 %v14213_v58 }
 0x6fc   :  { %12974 = vmatprep.subr.bf16.mxu0 %v14214_v54  ;;  %12996 = vmatprep.subr.bf16.mxu1 %v14215_v55 }
 0x6ff   :  { %12975 = vmatpush3.bf16.msra.mxu0 %v14216_v10  ;;  %12997 = vmatpush3.bf16.msra.mxu1 %v14217_v59 }
 0x7b5   :  { %v11032_v63 = vpop.f32.mrb[20].mxu0  ;;  %v11118_v20 = vpop.f32.mrb[20].mxu1 }
 0x7b6   :  { %v13044_v2 = vadd.f32 %v11032_v63, %v10298_v60  ;;  %v13048_v0 = vadd.f32 %v11118_v20, %v10306_v35  ;;  %v11034_v15 = vpop.f32.mrb[21].mxu0  ;;  %v11120_v4 = vpop.f32.mrb[21].mxu1 }
 0x7b7   :  { %v13045_v30 = vadd.f32 %v11034_v15, %v10302_v61  ;;  %v13049_v1 = vadd.f32 %v11120_v4, %v10310_v62  ;;  %v11036_v8 = vpop.f32.mrb[22].mxu0  ;;  %v11122_v9 = vpop.f32.mrb[22].mxu1 }
 0x7b8   :  { %v13046_v12 = vadd.f32 %v11036_v8, %v10298_v60  ;;  %v13050_v57 = vadd.f32 %v11122_v9, %v10306_v35  ;;  %v11038_v5 = vpop.f32.mrb[23].mxu0  ;;  %v11124_v3 = vpop.f32.mrb[23].mxu1  ;;  %v11127_v13 = vmax.f32 %v13044_v2, 0.0  ;;  %v11129_v7 = vmax.f32 %v13048_v0, 0.0 }
 0x7b9   :  { %v13047_v45 = vadd.f32 %v11038_v5, %v10302_v61  ;;  %v13051_v6 = vadd.f32 %v11124_v3, %v10310_v62  ;;  %v11128_v18 = vmax.f32 %v13045_v30, 0.0  ;;  %v11130_v19 = vmax.f32 %v13049_v1, 0.0 }
 0x7ba   :  { %v11131_v17 = vmax.f32 %v13046_v12, 0.0  ;;  %v11133_v11 = vmax.f32 %v13050_v57, 0.0 }
 0x7bb   :  { %v11132_v25 = vmax.f32 %v13047_v45, 0.0  ;;  %v11134_v14 = vmax.f32 %v13051_v6, 0.0 }
 0x7bc   :  { %v11135_v39 = vpack.c.bf16 %v11131_v17, %v11127_v13  ;;  %v11137_v23 = vpack.c.bf16 %v11133_v11, %v11129_v7 }
 0x7bd   :  { %v11136_v24 = vpack.c.bf16 %v11132_v25, %v11128_v18  ;;  %v11138_v26 = vpack.c.bf16 %v11134_v14, %v11130_v19 }
 0x7bf   :  { %11434 = vmatprep.mubr.bf16.mxu0 %v11136_v24  ;;  %11475 = vmatprep.mubr.bf16.mxu1 %v11138_v26 }
 0x7c0   :  { %11435 = vmatmul.mubr.bf16.vlgmr.msra.gmra.mrb[24].mxu0 %v11135_v39  ;;  %11476 = vmatmul.mubr.bf16.vlgmr.msra.gmra.mrb[24].mxu1 %v11137_v23 }
 0x893   :  { %v12976_v28 = vpop.f32.mrb[24].mxu0  ;;  %v12998_v27 = vpop.f32.mrb[24].mxu1 }
 0x894   :  { %v12977_v42 = vpop.f32.mrb[25].mxu0  ;;  %v12999_v32 = vpop.f32.mrb[25].mxu1 }
 0x895   :  { %v12978_v33 = vadd.f32 %v12977_v42, %v12976_v28  ;;  %v13000_v34 = vadd.f32 %v12999_v32, %v12998_v27  ;;  %v12979_v38 = vpop.f32.mrb[26].mxu0  ;;  %v13001_v43 = vpop.f32.mrb[26].mxu1 }
 0x896   :  { %v12980_v36 = vpop.f32.mrb[27].mxu0  ;;  %v13002_v49 = vpop.f32.mrb[27].mxu1 }
 0x897   :  { %v11437_v21 = vadd.f32 %v12978_v33, %v12927_v29  ;;  %v12981_v46 = vadd.f32 %v12980_v36, %v12979_v38  ;;  %v13003_v47 = vadd.f32 %v13002_v49, %v13001_v43 }
 0x899   :  { %v11478_v22 = vadd.f32 %v13000_v34, %v11437_v21  ;;  %v11440_v44 = vadd.f32 %v12981_v46, %v12927_v29 }
 0x89b   :  { %11484 = vst [vmem:[%s14846_s9] sm:$0xff] %v11478_v22  ;;  %v11481_v48 = vadd.f32 %v13003_v47, %v11440_v44 }
 0x89d   :  { %11485 = vst [vmem:[%s14846_s9 + $0x8] sm:$0xff] %v11481_v48 }
 0x89e   :  { %11490 = vsyncpa [#allocation3], 1 }
 0x89f   :  { %11491 = vsyncpa [#allocation5], 1 }
 0x8a0   :  { %11492 = vsyncpa [#allocation8], 1 }
 0x8a1   :  { %11493 = vsyncpa [#allocation11], 1 }
 0x8a2   :  { %11494 = vsyncpa [#allocation14], 1 }

</bundles_post_ra>
